<compile_context>
chip_gen: v6e
topology: v6e:2x2x1
jax: 0.10.0
libtpu: 0.0.40
codegen_flags: <defaults>
</compile_context>

<pallas_src>
import jax
import jax.numpy as jnp
from jax.experimental import pallas as pl
from jax.experimental.pallas import tpu as pltpu

H = W = 14
HW = H * W
CIN = 512
CMID = 512
COUT = 1024
GROUPS = 32
CPG = CIN // GROUPS          # 16 channels per group
NCHUNK = 4                   # 512 channels -> 4 chunks of 128 lanes
K9 = 9 * 128                 # packed contraction length (9 taps x 128 channels)
EPS = 1e-5


def fused_kernel(p_ref, w1_ref, g1_ref, b1_ref, w2_ref, g2_ref, b2_ref,
                 out_ref, yn_scr):
    """One grid step = one 128-channel chunk of the grouped conv.

    Stage 2 (1x1 conv) + BN2 run only on the last step, as one K=512 bf16 matmul.
    """
    c = pl.program_id(0)

    # ---- grouped 3x3 conv for this chunk: single K=1152 bf16 matmul, f32 acc ------
    y = jnp.dot(p_ref[0], w1_ref[0], preferred_element_type=jnp.float32)  # (HW, 128)

    # ---- BatchNorm2d #1 (training-mode batch stats, biased var) + ReLU, f32 -------
    m1 = jnp.sum(y, axis=0, keepdims=True) * (1.0 / HW)
    v1 = jnp.sum(y * y, axis=0, keepdims=True) * (1.0 / HW) - m1 * m1
    yn = (y - m1) * jax.lax.rsqrt(v1 + EPS) * g1_ref[...] + b1_ref[...]
    yn = jnp.maximum(yn, 0.0)

    # ---- stash this chunk's activation tile (bf16) into the resident scratch ------
    yn_scr[c] = yn.astype(jnp.bfloat16)

    # ---- last chunk: one (HW,512)x(512,1024) matmul, BatchNorm2d #2, write out ----
    @pl.when(c == NCHUNK - 1)
    def _():
        yn_all = jnp.concatenate(
            [yn_scr[0], yn_scr[1], yn_scr[2], yn_scr[3]], axis=-1)   # (HW, 512) bf16
        z = jnp.dot(yn_all, w2_ref[...],
                    preferred_element_type=jnp.float32)              # (HW, 1024) f32
        m2 = jnp.sum(z, axis=0, keepdims=True) * (1.0 / HW)
        v2 = jnp.sum(z * z, axis=0, keepdims=True) * (1.0 / HW) - m2 * m2
        out_ref[...] = (z - m2) * jax.lax.rsqrt(v2 + EPS) * g2_ref[...] \
            + b2_ref[...]


@jax.jit
def run_module(x, w1, g1, b1, w2, g2, b2):
    """x: (1, 512, 14, 14) NCHW. Returns (1, 1024, 14, 14) NCHW."""
    # --- glue: NCHW -> HWC (bf16), pad, im2col patches -----------------------------
    xhwc = jnp.transpose(x[0], (1, 2, 0)).astype(jnp.bfloat16)       # (14, 14, 512)
    xpad = jnp.pad(xhwc, ((1, 1), (1, 1), (0, 0)))                   # (16, 16, 512)
    patches = jnp.stack(
        [xpad[kh:kh + H, kw:kw + W, :].reshape(HW, CIN)
         for kh in range(3) for kw in range(3)], axis=0)             # (9, HW, 512) bf16
    # pack the 9 taps along the contraction axis, per 128-lane chunk -> (4, HW, 1152)
    pk = patches.reshape(9, HW, NCHUNK, 128)
    pk = jnp.transpose(pk, (2, 1, 0, 3)).reshape(NCHUNK, HW, K9)     # bf16

    # --- glue: grouped weights -> per-chunk block-diagonal, taps packed along K ----
    # w1: (512, 16, 3, 3) OIHW grouped -> (tap, chunk, group-in-chunk, ci, co), bf16
    w1k = jnp.transpose(
        w1.reshape(NCHUNK, 8, CPG, CPG, 3, 3),      # (chunk, gl, co, ci, kh, kw)
        (4, 5, 0, 1, 3, 2)).reshape(9, NCHUNK, 8, CPG, CPG).astype(jnp.bfloat16)
    # single placement op: broadcast each 16x16 group block across column-groups,
    # then mask to the block-diagonal.
    w1e = jnp.broadcast_to(
        w1k[:, :, :, :, None, :],
        (9, NCHUNK, 8, CPG, 8, CPG)).reshape(9, NCHUNK, 128, 128)
    blk = (jnp.arange(128)[:, None] // CPG) == (jnp.arange(128)[None, :] // CPG)
    dense1 = jnp.where(blk[None, None], w1e, jnp.bfloat16(0))        # (9, 4, 128, 128)
    # -> (NCHUNK, 9*128, 128), rows ordered tap-major to match the packed patches
    w1p = jnp.transpose(dense1, (1, 0, 2, 3)).reshape(NCHUNK, K9, 128)

    # w2: (1024, 512, 1, 1) -> (512, 1024) bf16, kept resident in VMEM
    w2m = jnp.transpose(w2[:, :, 0, 0], (1, 0)).astype(jnp.bfloat16)

    out = pl.pallas_call(
        fused_kernel,
        out_shape=jax.ShapeDtypeStruct((HW, COUT), jnp.float32),
        grid=(NCHUNK,),
        in_specs=[
            pl.BlockSpec((1, HW, K9), lambda c: (c, 0, 0)),     # packed patches (streamed)
            pl.BlockSpec((1, K9, 128), lambda c: (c, 0, 0)),    # packed conv1 weights
            pl.BlockSpec((1, 128), lambda c: (0, c)),           # gamma1 chunk
            pl.BlockSpec((1, 128), lambda c: (0, c)),           # beta1 chunk
            pl.BlockSpec((CMID, COUT), lambda c: (0, 0)),       # w2, resident
            pl.BlockSpec((1, COUT), lambda c: (0, 0)),          # gamma2
            pl.BlockSpec((1, COUT), lambda c: (0, 0)),          # beta2
        ],
        out_specs=pl.BlockSpec((HW, COUT), lambda c: (0, 0)),
        scratch_shapes=[pltpu.VMEM((NCHUNK, HW, 128), jnp.bfloat16)],
        compiler_params=pltpu.CompilerParams(
            dimension_semantics=("arbitrary",),
            vmem_limit_bytes=12 * 1024 * 1024),
    )(pk, w1p,
      g1.reshape(1, CMID), b1.reshape(1, CMID),
      w2m,
      g2.reshape(1, COUT), b2.reshape(1, COUT))

    # --- glue: (HW, 1024) -> NCHW ----------------------------------------------------
    return jnp.transpose(out.reshape(H, W, COUT), (2, 0, 1))[None]


def reference(x, w1, g1, b1, w2, g2, b2):
    """Pure-JAX reference matching the PyTorch module (training-mode BN)."""
    y = jax.lax.conv_general_dilated(
        x, w1, (1, 1), ((1, 1), (1, 1)),
        dimension_numbers=("NCHW", "OIHW", "NCHW"),
        feature_group_count=GROUPS, precision=jax.lax.Precision.HIGHEST)
    m = y.mean(axis=(0, 2, 3), keepdims=True)
    v = jnp.square(y - m).mean(axis=(0, 2, 3), keepdims=True)
    y = (y - m) / jnp.sqrt(v + EPS) * g1.reshape(1, -1, 1, 1) \
        + b1.reshape(1, -1, 1, 1)
    y = jnp.maximum(y, 0.0)
    z = jax.lax.conv_general_dilated(
        y, w2, (1, 1), ((0, 0), (0, 0)),
        dimension_numbers=("NCHW", "OIHW", "NCHW"),
        precision=jax.lax.Precision.HIGHEST)
    m2 = z.mean(axis=(0, 2, 3), keepdims=True)
    v2 = jnp.square(z - m2).mean(axis=(0, 2, 3), keepdims=True)
    return (z - m2) / jnp.sqrt(v2 + EPS) * g2.reshape(1, -1, 1, 1) \
        + b2.reshape(1, -1, 1, 1)


if __name__ == "__main__":
    key = jax.random.PRNGKey(0)
    kx, k1, k2, kg1, kb1, kg2, kb2 = jax.random.split(key, 7)

    x113 = jax.random.normal(kx, (1, CIN, H, W), jnp.float32)
    # Conv2d(512, 512, 3x3, groups=32, bias=False) weight: (512, 16, 3, 3)
    w1 = jax.random.normal(k1, (CMID, CPG, 3, 3), jnp.float32) * 0.05
    # BatchNorm2d(512) affine params
    g1 = 1.0 + 0.1 * jax.random.normal(kg1, (CMID,), jnp.float32)
    b1 = 0.1 * jax.random.normal(kb1, (CMID,), jnp.float32)
    # Conv2d(512, 1024, 1x1, bias=False) weight: (1024, 512, 1, 1)
    w2 = jax.random.normal(k2, (COUT, CMID, 1, 1), jnp.float32) * 0.03
    # BatchNorm2d(1024) affine params
    g2 = 1.0 + 0.1 * jax.random.normal(kg2, (COUT,), jnp.float32)
    b2 = 0.1 * jax.random.normal(kb2, (COUT,), jnp.float32)

    out = jax.block_until_ready(run_module(x113, w1, g1, b1, w2, g2, b2))
    ref = jax.block_until_ready(reference(x113, w1, g1, b1, w2, g2, b2))

    assert out.shape == (1, COUT, H, W), out.shape
    max_err = float(jnp.max(jnp.abs(out - ref)))
    assert max_err < 5e-2, f"max abs error too large: {max_err}"
    print("KERNEL_OK")
</pallas_src>

<mosaic_0001>
module attributes {stable_mosaic.version = 11 : i64} {
  func.func @fused_kernel(%arg0: i32, %arg1: memref<1x196x1152xbf16, #tpu.memory_space<vmem>>, %arg2: memref<1x1152x128xbf16, #tpu.memory_space<vmem>>, %arg3: memref<1x128xf32, #tpu.memory_space<vmem>>, %arg4: memref<1x128xf32, #tpu.memory_space<vmem>>, %arg5: memref<512x1024xbf16, #tpu.memory_space<vmem>>, %arg6: memref<1x1024xf32, #tpu.memory_space<vmem>>, %arg7: memref<1x1024xf32, #tpu.memory_space<vmem>>, %arg8: memref<196x1024xf32, #tpu.memory_space<vmem>>, %arg9: memref<4x196x128xbf16, #tpu.memory_space<vmem>>) attributes {dimension_semantics = [#tpu.dimension_semantics<arbitrary>], iteration_bounds = array<i64: 4>, scalar_prefetch = 0 : i64, scratch_operands = 1 : i64, tpu.core_type = #tpu.core_type<tc>, window_params = [{transform_indices = @transform_0, window_bounds = array<i64: 1, 196, 1152>}, {transform_indices = @transform_1, window_bounds = array<i64: 1, 1152, 128>}, {transform_indices = @transform_2, window_bounds = array<i64: 1, 128>}, {transform_indices = @transform_3, window_bounds = array<i64: 1, 128>}, {pipeline_mode = #tpu.pipeline_mode<synchronous>, transform_indices = @transform_4, window_bounds = array<i64: 512, 1024>}, {pipeline_mode = #tpu.pipeline_mode<synchronous>, transform_indices = @transform_5, window_bounds = array<i64: 1, 1024>}, {pipeline_mode = #tpu.pipeline_mode<synchronous>, transform_indices = @transform_6, window_bounds = array<i64: 1, 1024>}, {pipeline_mode = #tpu.pipeline_mode<synchronous>, transform_indices = @transform_7, window_bounds = array<i64: 196, 1024>}]} {
    %c0 = arith.constant 0 : index
    %c0_0 = arith.constant 0 : index
    %c0_1 = arith.constant 0 : index
    %0 = vector.load %arg1[%c0, %c0_0, %c0_1] : memref<1x196x1152xbf16, #tpu.memory_space<vmem>>, vector<1x196x1152xbf16>
    %1 = vector.shape_cast %0 : vector<1x196x1152xbf16> to vector<196x1152xbf16>
    %c0_2 = arith.constant 0 : index
    %c0_3 = arith.constant 0 : index
    %c0_4 = arith.constant 0 : index
    %2 = vector.load %arg2[%c0_2, %c0_3, %c0_4] : memref<1x1152x128xbf16, #tpu.memory_space<vmem>>, vector<1x1152x128xbf16>
    %3 = vector.shape_cast %2 : vector<1x1152x128xbf16> to vector<1152x128xbf16>
    %cst = arith.constant dense<0.000000e+00> : vector<196x128xf32>
    %4 = tpu.matmul %1, %3, %cst {dimension_numbers = #tpu.dot_dimension_numbers<[1], [0], [0], [1], [0, 0, 1, 1], [], []>} : vector<196x1152xbf16>, vector<1152x128xbf16>, vector<196x128xf32> -> vector<196x128xf32>
    %cst_5 = arith.constant dense<0.000000e+00> : vector<128xf32>
    %5 = vector.multi_reduction <add>, %4, %cst_5 [0] : vector<196x128xf32> to vector<128xf32>
    %6 = vector.shape_cast %5 : vector<128xf32> to vector<1x128xf32>
    %cst_6 = arith.constant 0.00510204071 : f32
    %7 = vector.broadcast %cst_6 : f32 to vector<1x128xf32>
    %8 = arith.mulf %6, %7 : vector<1x128xf32>
    %9 = arith.mulf %4, %4 : vector<196x128xf32>
    %cst_7 = arith.constant dense<0.000000e+00> : vector<128xf32>
    %10 = vector.multi_reduction <add>, %9, %cst_7 [0] : vector<196x128xf32> to vector<128xf32>
    %11 = vector.shape_cast %10 : vector<128xf32> to vector<1x128xf32>
    %cst_8 = arith.constant 0.00510204071 : f32
    %12 = vector.broadcast %cst_8 : f32 to vector<1x128xf32>
    %13 = arith.mulf %11, %12 : vector<1x128xf32>
    %14 = arith.mulf %8, %8 : vector<1x128xf32>
    %15 = arith.subf %13, %14 : vector<1x128xf32>
    %16 = vector.broadcast %8 : vector<1x128xf32> to vector<196x128xf32>
    %17 = arith.subf %4, %16 : vector<196x128xf32>
    %cst_9 = arith.constant 9.99999974E-6 : f32
    %18 = vector.broadcast %cst_9 : f32 to vector<1x128xf32>
    %19 = arith.addf %15, %18 : vector<1x128xf32>
    %20 = math.rsqrt %19 : vector<1x128xf32>
    %21 = vector.broadcast %20 : vector<1x128xf32> to vector<196x128xf32>
    %22 = arith.mulf %17, %21 : vector<196x128xf32>
    %c0_10 = arith.constant 0 : index
    %c0_11 = arith.constant 0 : index
    %23 = vector.load %arg3[%c0_10, %c0_11] : memref<1x128xf32, #tpu.memory_space<vmem>>, vector<1x128xf32>
    %24 = vector.broadcast %23 : vector<1x128xf32> to vector<196x128xf32>
    %25 = arith.mulf %22, %24 : vector<196x128xf32>
    %c0_12 = arith.constant 0 : index
    %c0_13 = arith.constant 0 : index
    %26 = vector.load %arg4[%c0_12, %c0_13] : memref<1x128xf32, #tpu.memory_space<vmem>>, vector<1x128xf32>
    %27 = vector.broadcast %26 : vector<1x128xf32> to vector<196x128xf32>
    %28 = arith.addf %25, %27 : vector<196x128xf32>
    %cst_14 = arith.constant 0.000000e+00 : f32
    %29 = vector.broadcast %cst_14 : f32 to vector<196x128xf32>
    %30 = arith.maximumf %28, %29 : vector<196x128xf32>
    %31 = arith.truncf %30 : vector<196x128xf32> to vector<196x128xbf16>
    %32 = arith.index_cast %arg0 : i32 to index
    %c0_15 = arith.constant 0 : index
    %c0_16 = arith.constant 0 : index
    %33 = vector.load %arg9[%32, %c0_15, %c0_16] : memref<4x196x128xbf16, #tpu.memory_space<vmem>>, vector<1x196x128xbf16>
    %34 = vector.shape_cast %33 : vector<1x196x128xbf16> to vector<196x128xbf16>
    %35 = vector.shape_cast %31 : vector<196x128xbf16> to vector<1x196x128xbf16>
    tpu.vector_store %arg9[%32, %c0_15, %c0_16], %35 {strides = array<i32>} : memref<4x196x128xbf16, #tpu.memory_space<vmem>>, vector<1x196x128xbf16>,
    %c3_i32 = arith.constant 3 : i32
    %36 = arith.cmpi eq, %arg0, %c3_i32 : i32
    %37 = arith.extui %36 : i1 to i32
    %c0_i32 = arith.constant 0 : i32
    %38 = arith.cmpi ne, %37, %c0_i32 : i32
    scf.if %38 {
      %c0_17 = arith.constant 0 : index
      %c0_18 = arith.constant 0 : index
      %c0_19 = arith.constant 0 : index
      %39 = vector.load %arg9[%c0_17, %c0_18, %c0_19] : memref<4x196x128xbf16, #tpu.memory_space<vmem>>, vector<1x196x128xbf16>
      %40 = vector.shape_cast %39 : vector<1x196x128xbf16> to vector<196x128xbf16>
      %c1 = arith.constant 1 : index
      %c0_20 = arith.constant 0 : index
      %c0_21 = arith.constant 0 : index
      %41 = vector.load %arg9[%c1, %c0_20, %c0_21] : memref<4x196x128xbf16, #tpu.memory_space<vmem>>, vector<1x196x128xbf16>
      %42 = vector.shape_cast %41 : vector<1x196x128xbf16> to vector<196x128xbf16>
      %c2 = arith.constant 2 : index
      %c0_22 = arith.constant 0 : index
      %c0_23 = arith.constant 0 : index
      %43 = vector.load %arg9[%c2, %c0_22, %c0_23] : memref<4x196x128xbf16, #tpu.memory_space<vmem>>, vector<1x196x128xbf16>
      %44 = vector.shape_cast %43 : vector<1x196x128xbf16> to vector<196x128xbf16>
      %c3 = arith.constant 3 : index
      %c0_24 = arith.constant 0 : index
      %c0_25 = arith.constant 0 : index
      %45 = vector.load %arg9[%c3, %c0_24, %c0_25] : memref<4x196x128xbf16, #tpu.memory_space<vmem>>, vector<1x196x128xbf16>
      %46 = vector.shape_cast %45 : vector<1x196x128xbf16> to vector<196x128xbf16>
      %47 = tpu.concatenate %40, %42, %44, %46 in 1 : vector<196x128xbf16>, vector<196x128xbf16>, vector<196x128xbf16>, vector<196x128xbf16> -> vector<196x512xbf16>
      %c0_26 = arith.constant 0 : index
      %c0_27 = arith.constant 0 : index
      %48 = vector.load %arg5[%c0_26, %c0_27] : memref<512x1024xbf16, #tpu.memory_space<vmem>>, vector<512x1024xbf16>
      %cst_28 = arith.constant dense<0.000000e+00> : vector<196x1024xf32>
      %49 = tpu.matmul %47, %48, %cst_28 {dimension_numbers = #tpu.dot_dimension_numbers<[1], [0], [0], [1], [0, 0, 1, 1], [], []>} : vector<196x512xbf16>, vector<512x1024xbf16>, vector<196x1024xf32> -> vector<196x1024xf32>
      %cst_29 = arith.constant dense<0.000000e+00> : vector<1024xf32>
      %50 = vector.multi_reduction <add>, %49, %cst_29 [0] : vector<196x1024xf32> to vector<1024xf32>
      %51 = vector.shape_cast %50 : vector<1024xf32> to vector<1x1024xf32>
      %cst_30 = arith.constant 0.00510204071 : f32
      %52 = vector.broadcast %cst_30 : f32 to vector<1x1024xf32>
      %53 = arith.mulf %51, %52 : vector<1x1024xf32>
      %54 = arith.mulf %49, %49 : vector<196x1024xf32>
      %cst_31 = arith.constant dense<0.000000e+00> : vector<1024xf32>
      %55 = vector.multi_reduction <add>, %54, %cst_31 [0] : vector<196x1024xf32> to vector<1024xf32>
      %56 = vector.shape_cast %55 : vector<1024xf32> to vector<1x1024xf32>
      %cst_32 = arith.constant 0.00510204071 : f32
      %57 = vector.broadcast %cst_32 : f32 to vector<1x1024xf32>
      %58 = arith.mulf %56, %57 : vector<1x1024xf32>
      %59 = arith.mulf %53, %53 : vector<1x1024xf32>
      %60 = arith.subf %58, %59 : vector<1x1024xf32>
      %61 = vector.broadcast %53 : vector<1x1024xf32> to vector<196x1024xf32>
      %62 = arith.subf %49, %61 : vector<196x1024xf32>
      %cst_33 = arith.constant 9.99999974E-6 : f32
      %63 = vector.broadcast %cst_33 : f32 to vector<1x1024xf32>
      %64 = arith.addf %60, %63 : vector<1x1024xf32>
      %65 = math.rsqrt %64 : vector<1x1024xf32>
      %66 = vector.broadcast %65 : vector<1x1024xf32> to vector<196x1024xf32>
      %67 = arith.mulf %62, %66 : vector<196x1024xf32>
      %c0_34 = arith.constant 0 : index
      %c0_35 = arith.constant 0 : index
      %68 = vector.load %arg6[%c0_34, %c0_35] : memref<1x1024xf32, #tpu.memory_space<vmem>>, vector<1x1024xf32>
      %69 = vector.broadcast %68 : vector<1x1024xf32> to vector<196x1024xf32>
      %70 = arith.mulf %67, %69 : vector<196x1024xf32>
      %c0_36 = arith.constant 0 : index
      %c0_37 = arith.constant 0 : index
      %71 = vector.load %arg7[%c0_36, %c0_37] : memref<1x1024xf32, #tpu.memory_space<vmem>>, vector<1x1024xf32>
      %72 = vector.broadcast %71 : vector<1x1024xf32> to vector<196x1024xf32>
      %73 = arith.addf %70, %72 : vector<196x1024xf32>
      %c0_38 = arith.constant 0 : index
      %c0_39 = arith.constant 0 : index
      %74 = vector.load %arg8[%c0_38, %c0_39] : memref<196x1024xf32, #tpu.memory_space<vmem>>, vector<196x1024xf32>
      tpu.vector_store %arg8[%c0_38, %c0_39], %73 {strides = array<i32>} : memref<196x1024xf32, #tpu.memory_space<vmem>>, vector<196x1024xf32>,
    } else {
    }
    return
  }
  func.func @transform_0(%arg0: i32) -> (i32, i32, i32) {
    %c0_i32 = arith.constant 0 : i32
    %c0_i32_0 = arith.constant 0 : i32
    %c0_i32_1 = arith.constant 0 : i32
    return %arg0, %c0_i32, %c0_i32_0 : i32, i32, i32
  }
  func.func @transform_1(%arg0: i32) -> (i32, i32, i32) {
    %c0_i32 = arith.constant 0 : i32
    %c0_i32_0 = arith.constant 0 : i32
    %c0_i32_1 = arith.constant 0 : i32
    return %arg0, %c0_i32, %c0_i32_0 : i32, i32, i32
  }
  func.func @transform_2(%arg0: i32) -> (i32, i32) {
    %c0_i32 = arith.constant 0 : i32
    %c0_i32_0 = arith.constant 0 : i32
    return %c0_i32, %arg0 : i32, i32
  }
  func.func @transform_3(%arg0: i32) -> (i32, i32) {
    %c0_i32 = arith.constant 0 : i32
    %c0_i32_0 = arith.constant 0 : i32
    return %c0_i32, %arg0 : i32, i32
  }
  func.func @transform_4(%arg0: i32) -> (i32, i32) {
    %c0_i32 = arith.constant 0 : i32
    %c0_i32_0 = arith.constant 0 : i32
    %c0_i32_1 = arith.constant 0 : i32
    return %c0_i32, %c0_i32_0 : i32, i32
  }
  func.func @transform_5(%arg0: i32) -> (i32, i32) {
    %c0_i32 = arith.constant 0 : i32
    %c0_i32_0 = arith.constant 0 : i32
    %c0_i32_1 = arith.constant 0 : i32
    return %c0_i32, %c0_i32_0 : i32, i32
  }
  func.func @transform_6(%arg0: i32) -> (i32, i32) {
    %c0_i32 = arith.constant 0 : i32
    %c0_i32_0 = arith.constant 0 : i32
    %c0_i32_1 = arith.constant 0 : i32
    return %c0_i32, %c0_i32_0 : i32, i32
  }
  func.func @transform_7(%arg0: i32) -> (i32, i32) {
    %c0_i32 = arith.constant 0 : i32
    %c0_i32_0 = arith.constant 0 : i32
    %c0_i32_1 = arith.constant 0 : i32
    return %c0_i32, %c0_i32_0 : i32, i32
  }
}

</mosaic_0001>

<bundles_post_ra>
// kernel: run_module.1
= control target key start
LH: loop header
LB: loop body
LE: loop exit
PB: predicated region body
PF: predicated region fallthrough
CT: control target
= control target key end

     0   :  { %s9354_s24 = smov 0   ;;  %s15319_s0 = inlined_call_operand.vmem [shape: bf16[4,196,1152], index: 0, kind: input, shape index: {}]   ;;  %s15320_s1 = inlined_call_operand.vmem [shape: bf16[4,1152,128], index: 1, kind: input, shape index: {}]   ;;  %s15321_s2 = inlined_call_operand.vmem [shape: f32[1,512], index: 2, kind: input, shape index: {}]   ;;  %s15322_s3 = inlined_call_operand.vmem [shape: f32[1,512], index: 3, kind: input, shape index: {}]   ;;  %s15323_s4 = inlined_call_operand.vmem [shape: bf16[512,1024], index: 4, kind: input, shape index: {}]   ;;  %s15324_s5 = inlined_call_operand.vmem [shape: f32[1,1024], index: 5, kind: input, shape index: {}]   ;;  %s15325_s6 = inlined_call_operand.vmem [shape: f32[1,1024], index: 6, kind: input, shape index: {}]   ;;  %s15326_s7 = inlined_call_operand.vmem [shape: f32[196,1024], index: 7, kind: output, shape index: {}]  }
   0x1 LB: > { %s9360_s25 = sadd.s32 4294967295, %s9310_s24   ;;  %p7766_p0 = scmp.ge.s32.totalorder %s9310_s24, 1  ;;  %s9310_s24 = sphi %s9354_s24, %s17_s24  }
   0x2   : > { %p258_p1 = scmp.lt.s32.totalorder %s9310_s24, 5 }
   0x4   : > { %p259_p2 = pnand %p7766_p0, %p258_p1 }
   0x5   : > { %p296_p3 = scmp.lt.s32.totalorder (!%p259_p2), %s9360_s25, 3  ;;  %s8322_s18 = smul.u32 (!%p259_p2), 100, %s9360_s25 }
   0x6   : > { %262 = sbr.rel (%p259_p2) target bundleno = 1412 (0x584), region = 48  ;;  %p7986_p4 = scmp.ne.s32.totalorder (!%p259_p2), %s9360_s25, 3 }
   0x7   : > { %s2614_s19 = scalar_lea.vmem (!%p259_p2), [#allocation2], %s8322_s18 }
   0xb   : > { %s9366_s26 = scalar_select %p296_p3, %s9360_s25, 3  ;;  %vm9313_vm0 = vmmov 0   ;;  %vm2301_vm1 = vcmask 1043456  }
   0xd   : > { %s8876_s27 = smul.u32 576, %s9366_s26  ;;  %s308_s14 = scalar_lea.vmem %s15321_s2, %s9366_s26 }
   0xe   : > { %s8875_s8 = smul.u32 900, %s9366_s26  ;;  %s311_s17 = scalar_lea.vmem %s15322_s3, %s9366_s26 }
   0xf   : > { %s9372_s30 = scalar_lea.vmem %s15320_s1, %s8876_s27 }
  0x10   : > { %v8887_v0 = vld [vmem:[%s9372_s30 + $0x78] sm:$0xff]   ;;  %v8889_v2 = vld [vmem:[%s9372_s30 + $0x70] sm:$0xff]   ;;  %v8891_v4 = vld [vmem:[%s9372_s30 + $0x68] sm:$0xff]   ;;  %s9387_s11 = scalar_lea.vmem %s15319_s0, %s8875_s8 }
  0x11   : > { %v8888_v1 = vld [vmem:[%s9372_s30 + $0x38] sm:$0xff]   ;;  %8394 = vmatprep.subr.bf16.mxu0 %v8887_v0  ;;  %8859 = vmatprep.subr.bf16.mxu1 %v8887_v0  ;;  %v8890_v3 = vld [vmem:[%s9372_s30 + $0x30] sm:$0xff]   ;;  %v8892_v5 = vld [vmem:[%s9372_s30 + $0x28] sm:$0xff]  }
  0x12   : > { %8395 = vmatpush3.bf16.msra.mxu0 %v8888_v1  ;;  %8867 = vmatpush3.bf16.msra.mxu1 %v8888_v1  ;;  %v8893_v6 = vld [vmem:[%s9372_s30 + $0x60] sm:$0xff]   ;;  %v8895_v8 = vld [vmem:[%s9372_s30 + $0x58] sm:$0xff]   ;;  %v8897_v10 = vld [vmem:[%s9372_s30 + $0x50] sm:$0xff]  }
  0x13   : > { %8396 = vmatprep.subr.bf16.mxu0 %v8889_v2  ;;  %8860 = vmatprep.subr.bf16.mxu1 %v8889_v2  ;;  %v8894_v7 = vld [vmem:[%s9372_s30 + $0x20] sm:$0xff]   ;;  %v8896_v9 = vld [vmem:[%s9372_s30 + $0x18] sm:$0xff]   ;;  %v8898_v13 = vld [vmem:[%s9372_s30 + $0x10] sm:$0xff]  }
  0x14   : > { %v8905_v11 = vld [vmem:[%s9387_s11 + $0x4] ss:$36 sps:$4 sm:$0xff]   ;;  %v8908_v12 = vld [vmem:[%s9387_s11 + $0x1fc] ss:$36 sps:$4 sm:$0xff]   ;;  %v8913_v24 = vld [vmem:[%s9387_s11 + $0x4c] ss:$36 sps:$4 sm:$0xff]  }
  0x15   : > { %v8899_v14 = vld [vmem:[%s9372_s30 + $0x48] sm:$0xff]   ;;  %1630 = vmatprep.mubr.bf16.mxu0 %v8905_v11  ;;  %1686 = vmatprep.mubr.bf16.mxu1 %v8908_v12  ;;  %v8901_v16 = vld [vmem:[%s9372_s30 + $0x40] sm:$0xff]   ;;  %v8909_v18 = vld [vmem:[%s9372_s30 + $0x178] sm:$0xff]   ;;  %v9312_v11 = vmov 0.0  }
  0x16   : > { %8397 = vmatpush3.bf16.msra.mxu0 %v8890_v3  ;;  %8868 = vmatpush3.bf16.msra.mxu1 %v8890_v3  ;;  %v8900_v15 = vld [vmem:[%s9372_s30 + $0x8] sm:$0xff]   ;;  %v8902_v17 = vld [vmem:[%s9372_s30] sm:$0xff]   ;;  %v8906_v20 = vld [vmem:[%s9387_s11 + $0x1f8] ss:$36 sps:$4 sm:$0xff]  }
  0x17   : > { %8398 = vmatprep.subr.bf16.mxu0 %v8891_v4  ;;  %8861 = vmatprep.subr.bf16.mxu1 %v8891_v4  ;;  %v8903_v19 = vld [vmem:[%s9387_s11] ss:$36 sps:$4 sm:$0xff]   ;;  %v8911_v21 = vld [vmem:[%s9372_s30 + $0xf8] sm:$0xff]   ;;  %v8917_v26 = vld [vmem:[%s9372_s30 + $0x170] sm:$0xff]  }
  0x18   : > { %v8910_v22 = vld [vmem:[%s9372_s30 + $0x138] sm:$0xff]   ;;  %v8915_v25 = vld [vmem:[%s9387_s11 + $0x244] ss:$36 sps:$4 sm:$0xff]   ;;  %v8920_v27 = vld [vmem:[%s9372_s30 + $0xf0] sm:$0xff]  }
  0x19   : > { %v8912_v23 = vld [vmem:[%s9372_s30 + $0xb8] sm:$0xff]   ;;  %v8921_v28 = vld [vmem:[%s9372_s30 + $0x130] sm:$0xff]   ;;  %v8923_v30 = vld [vmem:[%s9372_s30 + $0xe8] sm:$0xff]  }
  0x1a   : > { %8399 = vmatpush3.bf16.msra.mxu0 %v8892_v5  ;;  %8869 = vmatpush3.bf16.msra.mxu1 %v8892_v5  ;;  %v8922_v29 = vld [vmem:[%s9372_s30 + $0xb0] sm:$0xff]   ;;  %v8918_v31 = vld [vmem:[%s9387_s11 + $0x48] ss:$36 sps:$4 sm:$0xff]   ;;  %v8919_v32 = vld [vmem:[%s9387_s11 + $0x240] ss:$36 sps:$4 sm:$0xff]  }
  0x1b   : > { %8400 = vmatprep.subr.bf16.mxu0 %v8893_v6  ;;  %8862 = vmatprep.subr.bf16.mxu1 %v8893_v6  ;;  %v8924_v33 = vld [vmem:[%s9372_s30 + $0x168] sm:$0xff]   ;;  %v8925_v34 = vld [vmem:[%s9387_s11 + $0x94] ss:$36 sps:$4 sm:$0xff]   ;;  %v8933_v38 = vld [vmem:[%s9372_s30 + $0xe0] sm:$0xff]  }
  0x1c   : > { %v8927_v35 = vld [vmem:[%s9387_s11 + $0x28c] ss:$36 sps:$4 sm:$0xff]   ;;  %v8935_v39 = vld [vmem:[%s9372_s30 + $0x160] sm:$0xff]   ;;  %v8943_v44 = vld [vmem:[%s9372_s30 + $0xd8] sm:$0xff]  }
  0x1d   : > { %v8929_v36 = vld [vmem:[%s9372_s30 + $0xa8] sm:$0xff]   ;;  %v8934_v40 = vld [vmem:[%s9372_s30 + $0xa0] sm:$0xff]   ;;  %v8931_v42 = vld [vmem:[%s9387_s11 + $0x90] ss:$36 sps:$4 sm:$0xff]  }
  0x1e   : > { %8401 = vmatpush3.bf16.msra.mxu0 %v8894_v7  ;;  %8870 = vmatpush3.bf16.msra.mxu1 %v8894_v7  ;;  %v8930_v37 = vld [vmem:[%s9372_s30 + $0x128] sm:$0xff]   ;;  %v8936_v41 = vld [vmem:[%s9372_s30 + $0x120] sm:$0xff]   ;;  %v8945_v45 = vld [vmem:[%s9372_s30 + $0x158] sm:$0xff]  }
  0x1f   : > { %8402 = vmatprep.subr.bf16.mxu0 %v8895_v8  ;;  %8863 = vmatprep.subr.bf16.mxu1 %v8895_v8  ;;  %v8932_v43 = vld [vmem:[%s9387_s11 + $0x288] ss:$36 sps:$4 sm:$0xff]   ;;  %v8937_v46 = vld [vmem:[%s9387_s11 + $0xdc] ss:$36 sps:$4 sm:$0xff]   ;;  %v8939_v47 = vld [vmem:[%s9387_s11 + $0x2d4] ss:$36 sps:$4 sm:$0xff]  }
  0x20   : > { %v8944_v48 = vld [vmem:[%s9372_s30 + $0x98] sm:$0xff]   ;;  %v8953_v50 = vld [vmem:[%s9372_s30 + $0xd0] sm:$0xff]   ;;  %v8957_v56 = vld [vmem:[%s9372_s30 + $0xc8] sm:$0xff]  }
  0x21   : > { %v8946_v49 = vld [vmem:[%s9372_s30 + $0x118] sm:$0xff]   ;;  %v8954_v51 = vld [vmem:[%s9372_s30 + $0x90] sm:$0xff]   ;;  %v8947_v57 = vld [vmem:[%s9387_s11 + $0x124] ss:$36 sps:$4 sm:$0xff]  }
  0x22   : > { %8403 = vmatpush3.bf16.msra.mxu0 %v8896_v9  ;;  %8871 = vmatpush3.bf16.msra.mxu1 %v8896_v9  ;;  %v8941_v52 = vld [vmem:[%s9387_s11 + $0xd8] ss:$36 sps:$4 sm:$0xff]   ;;  %v8942_v53 = vld [vmem:[%s9387_s11 + $0x2d0] ss:$36 sps:$4 sm:$0xff]   ;;  %v8961_v59 = vld [vmem:[%s9372_s30 + $0x88] sm:$0xff]  }
  0x23   : > { %8404 = vmatprep.subr.bf16.mxu0 %v8897_v10  ;;  %8864 = vmatprep.subr.bf16.mxu1 %v8897_v10  ;;  %v8955_v54 = vld [vmem:[%s9372_s30 + $0x150] sm:$0xff]   ;;  %v8949_v58 = vld [vmem:[%s9387_s11 + $0x31c] ss:$36 sps:$4 sm:$0xff]   ;;  %v8964_v60 = vld [vmem:[%s9372_s30 + $0x148] sm:$0xff]  }
  0x24   : > { %v8956_v55 = vld [vmem:[%s9372_s30 + $0x110] sm:$0xff]   ;;  %v433_v61 = vld [vmem:[%s9387_s11 + $0x360] sm:$0x33]  ;;  %v8965_v62 = vld [vmem:[%s9372_s30 + $0x108] sm:$0xff]  }
  0x25   : > { %v8966_v63 = vld [vmem:[%s9372_s30 + $0xc0] sm:$0xff]   ;;  %v8952_v2 = vld [vmem:[%s9387_s11 + $0x318] ss:$36 sps:$4 sm:$0xff]   ;;  %v8958_v3 = vld [vmem:[%s9387_s11 + $0x16c] ss:$36 sps:$4 sm:$0xff]   ;;  %v7878_v4 = vcombine.high %v433_v61, %v433_v61  ;;  %v7877_v9 = vcombine.low %v433_v61, %v433_v61 }
  0x26   : > { %8405 = vmatpush3.bf16.msra.mxu0 %v8898_v13  ;;  %8872 = vmatpush3.bf16.msra.mxu1 %v8898_v13  ;;  %v8967_v0 = vld [vmem:[%s9372_s30 + $0x80] sm:$0xff]   ;;  %v8976_v7 = vld [vmem:[%s9372_s30 + $0x1f8] sm:$0xff]   ;;  %v8962_v8 = vld [vmem:[%s9387_s11 + $0x168] ss:$36 sps:$4 sm:$0xff]  }
  0x27   : > { %8406 = vmatprep.subr.bf16.mxu0 %v8899_v14  ;;  %8865 = vmatprep.subr.bf16.mxu1 %v8899_v14  ;;  %v8951_v1 = vld [vmem:[%s9387_s11 + $0x120] ss:$36 sps:$4 sm:$0xff]   ;;  %v8968_v10 = vld [vmem:[%s9387_s11 + $0x1b4] ss:$36 sps:$4 sm:$0xff]   ;;  %v8972_v12 = vld [vmem:[%s9387_s11 + $0xc] ss:$36 sps:$4 sm:$0xff]  }
  0x28   : > { %v8974_v5 = vld [vmem:[%s9372_s30 + $0x140] sm:$0xff]   ;;  %v8970_v13 = vld [vmem:[%s9387_s11 + $0x8] ss:$36 sps:$4 sm:$0xff]   ;;  %v8973_v14 = vld [vmem:[%s9387_s11 + $0x1b0] ss:$36 sps:$4 sm:$0xff]  }
  0x29   : > { %v8975_v6 = vld [vmem:[%s9372_s30 + $0x100] sm:$0xff]   ;;  %v9022_v61 = vld [vmem:[%s9387_s11 + $0x178] ss:$36 sps:$4 sm:$0xff]  }
  0x2a   : > { %8407 = vmatpush3.bf16.msra.mxu0 %v8900_v15  ;;  %8873 = vmatpush3.bf16.msra.mxu1 %v8900_v15  ;;  %v8977_v15 = vld [vmem:[%s9372_s30 + $0x1b8] sm:$0xff]  }
  0x2b   : > { %8408 = vmatprep.subr.bf16.mxu0 %v8901_v16  ;;  %8866 = vmatprep.subr.bf16.mxu1 %v8901_v16  ;;  %v8978_v16 = vld [vmem:[%s9387_s11 + $0x54] ss:$36 sps:$4 sm:$0xff]  }
  0x2e   : > { %8409 = vmatpush3.bf16.msra.mxu0 %v8902_v17  ;;  %8874 = vmatpush3.bf16.msra.mxu1 %v8902_v17  ;;  %v8982_v17 = vld [vmem:[%s9387_s11 + $0x14] ss:$36 sps:$4 sm:$0xff]  }
  0x2f   : > { %8582 = vmatprep.subr.bf16.mxu0 %v8909_v18  ;;  %8488 = vmatprep.subr.bf16.mxu1 %v8911_v21  ;;  %v8989_v18 = vld [vmem:[%s9372_s30 + $0x1f0] sm:$0xff]  }
  0x30   : > { %v8980_v21 = vld [vmem:[%s9387_s11 + $0x10] ss:$36 sps:$4 sm:$0xff]  }
  0x31   : > { %1631 = vmatmul.mubr.bf16.vlgmr.msra.gmra.mxu0 %v8903_v19  ;;  %1687 = vmatmul.mubr.bf16.vlgmr.msra.gmra.mxu1 %v8906_v20  ;;  %v8992_v19 = vld [vmem:[%s9372_s30 + $0x1b0] sm:$0xff]   ;;  %v9000_v20 = vld [vmem:[%s9372_s30 + $0x1e8] sm:$0xff]  }
  0x32   : > { %8583 = vmatpush3.bf16.msra.mxu0 %v8910_v22  ;;  %8489 = vmatpush3.bf16.msra.mxu1 %v8912_v23  ;;  %v8983_v22 = vld [vmem:[%s9387_s11 + $0x50] ss:$36 sps:$4 sm:$0xff]   ;;  %v8984_v23 = vld [vmem:[%s9372_s30 + $0x238] sm:$0xff]  }
  0x33   : > { %1638 = vmatprep.mubr.bf16.mxu0 %v8913_v24  ;;  %1694 = vmatprep.mubr.bf16.mxu1 %v8915_v25  ;;  %v8985_v24 = vld [vmem:[%s9387_s11 + $0x9c] ss:$36 sps:$4 sm:$0xff]  }
  0x34   : > { %8584 = vmatprep.subr.bf16.mxu0 %v8917_v26  ;;  %8490 = vmatprep.subr.bf16.mxu1 %v8920_v27  ;;  %v8987_v25 = vld [vmem:[%s9387_s11 + $0x5c] ss:$36 sps:$4 sm:$0xff]   ;;  %v9001_v26 = vld [vmem:[%s9372_s30 + $0x1a8] sm:$0xff]  }
  0x35   : > { %v9015_v27 = vld [vmem:[%s9372_s30 + $0x1e0] sm:$0xff]  }
  0x36   : > { %8585 = vmatpush3.bf16.msra.mxu0 %v8921_v28  ;;  %8491 = vmatpush3.bf16.msra.mxu1 %v8922_v29  ;;  %v8993_v28 = vld [vmem:[%s9372_s30 + $0x230] sm:$0xff]   ;;  %v8990_v29 = vld [vmem:[%s9387_s11 + $0x98] ss:$36 sps:$4 sm:$0xff]  }
  0x37   : > { %8492 = vmatprep.subr.bf16.mxu1 %v8923_v30  ;;  %8586 = vmatprep.subr.bf16.mxu0 %v8924_v33  ;;  %v8991_v30 = vld [vmem:[%s9387_s11 + $0x58] ss:$36 sps:$4 sm:$0xff]   ;;  %v8996_v33 = vld [vmem:[%s9387_s11 + $0xa4] ss:$36 sps:$4 sm:$0xff]  }
  0x39   : > { %1639 = vmatmul.mubr.bf16.gmra.mxu0 %v8918_v31  ;;  %1695 = vmatmul.mubr.bf16.gmra.mxu1 %v8919_v32  ;;  %v8994_v31 = vld [vmem:[%s9387_s11 + $0xe4] ss:$36 sps:$4 sm:$0xff]  }
  0x3a   : > { %1646 = vmatprep.mubr.bf16.mxu0 %v8925_v34  ;;  %1702 = vmatprep.mubr.bf16.mxu1 %v8927_v35  ;;  %v9016_v32 = vld [vmem:[%s9372_s30 + $0x1a0] sm:$0xff]   ;;  %v9008_v34 = vld [vmem:[%s9372_s30 + $0x228] sm:$0xff]   ;;  %v9024_v35 = vld [vmem:[%s9372_s30 + $0x1d8] sm:$0xff]  }
  0x3b   : > { %8493 = vmatpush3.bf16.msra.mxu1 %v8929_v36  ;;  %8587 = vmatpush3.bf16.msra.mxu0 %v8930_v37  ;;  %v9029_v36 = vld [vmem:[%s9372_s30 + $0x198] sm:$0xff]   ;;  %v8998_v37 = vld [vmem:[%s9387_s11 + $0xe0] ss:$36 sps:$4 sm:$0xff]  }
  0x3c   : > { %8494 = vmatprep.subr.bf16.mxu1 %v8933_v38  ;;  %8588 = vmatprep.subr.bf16.mxu0 %v8935_v39  ;;  %v9023_v38 = vld [vmem:[%s9372_s30 + $0x220] sm:$0xff]  }
  0x3d   : > { %v8999_v39 = vld [vmem:[%s9387_s11 + $0xa0] ss:$36 sps:$4 sm:$0xff]  }
  0x3f   : > { %8495 = vmatpush3.bf16.msra.mxu1 %v8934_v40  ;;  %8589 = vmatpush3.bf16.msra.mxu0 %v8936_v41  ;;  %v9002_v40 = vld [vmem:[%s9387_s11 + $0x12c] ss:$36 sps:$4 sm:$0xff]  }
  0x40   : > { %8496 = vmatprep.subr.bf16.mxu1 %v8943_v44  ;;  %8590 = vmatprep.subr.bf16.mxu0 %v8945_v45  ;;  %v9004_v41 = vld [vmem:[%s9387_s11 + $0xec] ss:$36 sps:$4 sm:$0xff]   ;;  %v9032_v44 = vld [vmem:[%s9372_s30 + $0x218] sm:$0xff]  }
  0x41   : > { %1647 = vmatmul.mubr.bf16.gmra.mxu0 %v8931_v42  ;;  %1703 = vmatmul.mubr.bf16.gmra.mxu1 %v8932_v43  ;;  %v9039_v42 = vld [vmem:[%s9372_s30 + $0x1d0] sm:$0xff]   ;;  %v9006_v45 = vld [vmem:[%s9387_s11 + $0x128] ss:$36 sps:$4 sm:$0xff]  }
  0x42   : > { %1654 = vmatprep.mubr.bf16.mxu0 %v8937_v46  ;;  %1710 = vmatprep.mubr.bf16.mxu1 %v8939_v47  ;;  %v9040_v43 = vld [vmem:[%s9372_s30 + $0x190] sm:$0xff]   ;;  %v9007_v47 = vld [vmem:[%s9387_s11 + $0xe8] ss:$36 sps:$4 sm:$0xff]  }
  0x43   : > { %8497 = vmatpush3.bf16.msra.mxu1 %v8944_v48  ;;  %8591 = vmatpush3.bf16.msra.mxu0 %v8946_v49  ;;  %v9047_v46 = vld [vmem:[%s9372_s30 + $0x210] sm:$0xff]  }
  0x44   : > { %8498 = vmatprep.subr.bf16.mxu1 %v8953_v50  ;;  %8592 = vmatprep.subr.bf16.mxu0 %v8955_v54  ;;  %v9009_v48 = vld [vmem:[%s9387_s11 + $0x174] ss:$36 sps:$4 sm:$0xff]   ;;  %v9054_v50 = vld [vmem:[%s9372_s30 + $0x1c8] sm:$0xff]   ;;  %v9063_v54 = vld [vmem:[%s9372_s30 + $0x1c0] sm:$0xff]  }
  0x45   : > { %v9011_v49 = vld [vmem:[%s9387_s11 + $0x134] ss:$36 sps:$4 sm:$0xff]  }
  0x47   : > { %8499 = vmatpush3.bf16.msra.mxu1 %v8954_v51  ;;  %8593 = vmatpush3.bf16.msra.mxu0 %v8956_v55  ;;  %v9055_v51 = vld [vmem:[%s9372_s30 + $0x188] sm:$0xff]   ;;  %v9064_v55 = vld [vmem:[%s9372_s30 + $0x180] sm:$0xff]  }
  0x48   : > { %8500 = vmatprep.subr.bf16.mxu1 %v8957_v56  ;;  %8594 = vmatprep.subr.bf16.mxu0 %v8964_v60  ;;  %v9014_v56 = vld [vmem:[%s9387_s11 + $0x130] ss:$36 sps:$4 sm:$0xff]   ;;  %v9021_v60 = vld [vmem:[%s9387_s11 + $0x1b8] ss:$36 sps:$4 sm:$0xff]  }
  0x49   : > { %1655 = vmatmul.mubr.bf16.gmra.mxu0 %v8941_v52  ;;  %1711 = vmatmul.mubr.bf16.gmra.mxu1 %v8942_v53  ;;  %v9060_v52 = vld [vmem:[%s9372_s30 + $0x208] sm:$0xff]   ;;  %v9013_v53 = vld [vmem:[%s9387_s11 + $0x170] ss:$36 sps:$4 sm:$0xff]  }
  0x4a   : > { %1662 = vmatprep.mubr.bf16.mxu0 %v8947_v57  ;;  %1718 = vmatprep.mubr.bf16.mxu1 %v8949_v58  ;;  %v9017_v57 = vld [vmem:[%s9387_s11 + $0x1bc] ss:$36 sps:$4 sm:$0xff]  }
  0x4b   : > { %8501 = vmatpush3.bf16.msra.mxu1 %v8961_v59  ;;  %8595 = vmatpush3.bf16.msra.mxu0 %v8965_v62  ;;  %v9019_v58 = vld [vmem:[%s9387_s11 + $0x17c] ss:$36 sps:$4 sm:$0xff]   ;;  %v9025_v62 = vld [vmem:[%s9387_s11 + $0x204] ss:$36 sps:$4 sm:$0xff]  }
  0x4c   : > { %8502 = vmatprep.subr.bf16.mxu1 %v8966_v63  ;;  %8596 = vmatprep.subr.bf16.mxu0 %v8974_v5  ;;  %v9070_v59 = vld [vmem:[%s9372_s30 + $0x200] sm:$0xff]   ;;  %v9038_v5 = vld [vmem:[%s9387_s11 + $0x208] ss:$36 sps:$4 sm:$0xff]  }
  0x4d   : > { %v9027_v63 = vld [vmem:[%s9387_s11 + $0x1c4] ss:$36 sps:$4 sm:$0xff]  }
  0x4f   : > { %8503 = vmatpush3.bf16.msra.mxu1 %v8967_v0  ;;  %8597 = vmatpush3.bf16.msra.mxu0 %v8975_v6  ;;  %v9030_v0 = vld [vmem:[%s9387_s11 + $0x200] ss:$36 sps:$4 sm:$0xff]   ;;  %v9041_v6 = vld [vmem:[%s9387_s11 + $0x294] ss:$36 sps:$4 sm:$0xff]  }
  0x50   : > { %8676 = vmatprep.subr.bf16.mxu1 %v8976_v7  ;;  %8791 = vmatprep.subr.bf16.mxu0 %v9312_v11  ;;  %v9043_v7 = vld [vmem:[%s9387_s11 + $0x254] ss:$36 sps:$4 sm:$0xff]  }
  0x51   : > { %1663 = vmatmul.mubr.bf16.gmra.mxu0 %v8951_v1  ;;  %1719 = vmatmul.mubr.bf16.gmra.mxu1 %v8952_v2  ;;  %v9031_v1 = vld [vmem:[%s9387_s11 + $0x1c0] ss:$36 sps:$4 sm:$0xff]   ;;  %v9033_v2 = vld [vmem:[%s9387_s11 + $0x24c] ss:$36 sps:$4 sm:$0xff]  }
  0x52   : > { %1670 = vmatprep.mubr.bf16.mxu0 %v8958_v3  ;;  %1726 = vmatprep.mubr.bf16.mxu1 %v7878_v4  ;;  %v9035_v3 = vld [vmem:[%s9387_s11 + $0x20c] ss:$36 sps:$4 sm:$0xff]  }
  0x53   : > { %v9037_v4 = vld [vmem:[%s9387_s11 + $0x248] ss:$36 sps:$4 sm:$0xff]  }
  0x59   : > { %1671 = vmatmul.mubr.bf16.gmra.mxu0 %v8962_v8  ;;  %1727 = vmatmul.mubr.bf16.gmra.mxu1 %v7877_v9  ;;  %v9045_v8 = vld [vmem:[%s9387_s11 + $0x290] ss:$36 sps:$4 sm:$0xff]  }
  0x5a   : > { %1678 = vmatprep.mubr.bf16.mxu0 %v8968_v10  ;;  %1766 = vmatprep.mubr.bf16.mxu1 %v8972_v12  ;;  %v9046_v9 = vld [vmem:[%s9387_s11 + $0x250] ss:$36 sps:$4 sm:$0xff]   ;;  %v9048_v10 = vld [vmem:[%s9387_s11 + $0x2dc] ss:$36 sps:$4 sm:$0xff]  }
  0x5b   : > { %v9050_v12 = vld [vmem:[%s9387_s11 + $0x29c] ss:$36 sps:$4 sm:$0xff]  }
  0x61   : > { %1679 = vmatmul.mubr.bf16.gmra.mxu0 %v8973_v14  ;;  %1767 = vmatmul.mubr.bf16.vlgmr.msra.gmra.mxu1 %v8970_v13  ;;  %v9052_v13 = vld [vmem:[%s9387_s11 + $0x2d8] ss:$36 sps:$4 sm:$0xff]  }
  0x62   : > { %8677 = vmatpush3.bf16.msra.mxu1 %v8977_v15  ;;  %1774 = vmatprep.mubr.bf16.mxu1 %v8978_v16  ;;  %v9053_v14 = vld [vmem:[%s9387_s11 + $0x298] ss:$36 sps:$4 sm:$0xff]   ;;  %v9056_v15 = vld [vmem:[%s9387_s11 + $0x324] ss:$36 sps:$4 sm:$0xff]  }
  0x63   : > { %1902 = vmatprep.mubr.bf16.mxu0 %v8982_v17  ;;  %8678 = vmatprep.subr.bf16.mxu1 %v8989_v18  ;;  %v9058_v16 = vld [vmem:[%s9387_s11 + $0x2e4] ss:$36 sps:$4 sm:$0xff]  }
  0x64   : > { %v434_v17 = vld [vmem:[%s9387_s11 + $0x368] sm:$0x33]  ;;  %v9061_v18 = vld [vmem:[%s9387_s11 + $0x320] ss:$36 sps:$4 sm:$0xff]  }
  0x66   : > { %8679 = vmatpush3.bf16.msra.mxu1 %v8992_v19  ;;  %v9062_v19 = vld [vmem:[%s9387_s11 + $0x2e0] ss:$36 sps:$4 sm:$0xff]  }
  0x67   : > { %8680 = vmatprep.subr.bf16.mxu1 %v9000_v20  ;;  %v7880_v20 = vcombine.high %v434_v17, %v434_v17 }
  0x69   : > { %1775 = vmatmul.mubr.bf16.gmra.mxu1 %v8983_v22  ;;  %1903 = vmatmul.mubr.bf16.vlgmr.msra.gmra.mxu0 %v8980_v21  ;;  %v9066_v21 = vld [vmem:[%s9387_s11 + $0x32c] ss:$36 sps:$4 sm:$0xff]  }
  0x6a   : > { %8792 = vmatpush3.bf16.msra.mxu0 %v8984_v23  ;;  %1782 = vmatprep.mubr.bf16.mxu1 %v8985_v24  ;;  %v435_v22 = vld [vmem:[%s9387_s11 + $0x370] sm:$0x33]  ;;  %v7879_v23 = vcombine.low %v434_v17, %v434_v17  ;;  %v9069_v24 = vld [vmem:[%s9387_s11 + $0x328] ss:$36 sps:$4 sm:$0xff]  }
  0x6b   : > { %1910 = vmatprep.mubr.bf16.mxu0 %v8987_v25  ;;  %8793 = vmatprep.subr.bf16.mxu0 %v9312_v11  ;;  %v7882_v25 = vcombine.high %v435_v22, %v435_v22 }
  0x6c   : > { %8681 = vmatpush3.bf16.msra.mxu1 %v9001_v26  ;;  %v9074_v26 = vld [vmem:[%s9387_s11 + $0x1c] ss:$36 sps:$4 sm:$0xff]  }
  0x6d   : > { %8682 = vmatprep.subr.bf16.mxu1 %v9015_v27  ;;  %v9072_v27 = vld [vmem:[%s9387_s11 + $0x18] ss:$36 sps:$4 sm:$0xff]  }
  0x6e   : > { %8794 = vmatpush3.bf16.msra.mxu0 %v8993_v28  ;;  %v7881_v28 = vcombine.low %v435_v22, %v435_v22  ;;  %v9110_v22 = vld [vmem:[%s9387_s11 + $0x2a4] ss:$36 sps:$4 sm:$0xff]  }
  0x6f   : > { %8795 = vmatprep.subr.bf16.mxu0 %v9312_v11 }
  0x70   : > { %8683 = vmatpush3.bf16.msra.mxu1 %v9016_v32  ;;  %v9080_v32 = vld [vmem:[%s9387_s11 + $0xac] ss:$36 sps:$4 sm:$0xff]  }
  0x71   : > { %1783 = vmatmul.mubr.bf16.gmra.mxu1 %v8990_v29  ;;  %1911 = vmatmul.mubr.bf16.gmra.mxu0 %v8991_v30  ;;  %v9076_v29 = vld [vmem:[%s9387_s11 + $0x64] ss:$36 sps:$4 sm:$0xff]  }
  0x72   : > { %1790 = vmatprep.mubr.bf16.mxu1 %v8994_v31  ;;  %1918 = vmatprep.mubr.bf16.mxu0 %v8996_v33  ;;  %v9078_v30 = vld [vmem:[%s9387_s11 + $0x60] ss:$36 sps:$4 sm:$0xff]   ;;  %v9082_v33 = vld [vmem:[%s9387_s11 + $0xa8] ss:$36 sps:$4 sm:$0xff]  }
  0x73   : > { %8796 = vmatpush3.bf16.msra.mxu0 %v9008_v34  ;;  %8684 = vmatprep.subr.bf16.mxu1 %v9024_v35  ;;  %v9079_v31 = vld [vmem:[%s9387_s11 + $0x20] ss:$36 sps:$4 sm:$0xff]   ;;  %v9083_v34 = vld [vmem:[%s9387_s11 + $0x68] ss:$36 sps:$4 sm:$0xff]   ;;  %v9084_v35 = vld [vmem:[%s9387_s11 + $0xf4] ss:$36 sps:$4 sm:$0xff]  }
  0x74   : > { %8797 = vmatprep.subr.bf16.mxu0 %v9312_v11  ;;  %8685 = vmatpush3.bf16.msra.mxu1 %v9029_v36  ;;  %v9086_v36 = vld [vmem:[%s9387_s11 + $0xf0] ss:$36 sps:$4 sm:$0xff]  }
  0x75   : > { %8686 = vmatprep.subr.bf16.mxu1 %v9039_v42  ;;  %v9094_v42 = vld [vmem:[%s9387_s11 + $0x180] ss:$36 sps:$4 sm:$0xff]  }
  0x77   : > { %8798 = vmatpush3.bf16.msra.mxu0 %v9023_v38  ;;  %v9088_v38 = vld [vmem:[%s9387_s11 + $0x13c] ss:$36 sps:$4 sm:$0xff]  }
  0x78   : > { %8799 = vmatprep.subr.bf16.mxu0 %v9312_v11  ;;  %8687 = vmatpush3.bf16.msra.mxu1 %v9040_v43  ;;  %v9095_v43 = vld [vmem:[%s9387_s11 + $0x140] ss:$36 sps:$4 sm:$0xff]  }
  0x79   : > { %1791 = vmatmul.mubr.bf16.gmra.mxu1 %v8998_v37  ;;  %1919 = vmatmul.mubr.bf16.gmra.mxu0 %v8999_v39  ;;  %v9087_v37 = vld [vmem:[%s9387_s11 + $0xb0] ss:$36 sps:$4 sm:$0xff]   ;;  %v9090_v39 = vld [vmem:[%s9387_s11 + $0x138] ss:$36 sps:$4 sm:$0xff]  }
  0x7a   : > { %1798 = vmatprep.mubr.bf16.mxu1 %v9002_v40  ;;  %1926 = vmatprep.mubr.bf16.mxu0 %v9004_v41  ;;  %v9091_v40 = vld [vmem:[%s9387_s11 + $0xf8] ss:$36 sps:$4 sm:$0xff]   ;;  %v9092_v41 = vld [vmem:[%s9387_s11 + $0x184] ss:$36 sps:$4 sm:$0xff]  }
  0x7b   : > { %8800 = vmatpush3.bf16.msra.mxu0 %v9032_v44  ;;  %8688 = vmatprep.subr.bf16.mxu1 %v9054_v50  ;;  %v9096_v44 = vld [vmem:[%s9387_s11 + $0x1cc] ss:$36 sps:$4 sm:$0xff]  }
  0x7c   : > { %8801 = vmatprep.subr.bf16.mxu0 %v9312_v11  ;;  %8689 = vmatpush3.bf16.msra.mxu1 %v9055_v51 }
  0x7d   : > { %8690 = vmatprep.subr.bf16.mxu1 %v9063_v54  ;;  %v9099_v54 = vld [vmem:[%s9387_s11 + $0x188] ss:$36 sps:$4 sm:$0xff]  }
  0x7f   : > { %8802 = vmatpush3.bf16.msra.mxu0 %v9047_v46 }
  0x80   : > { %8803 = vmatprep.subr.bf16.mxu0 %v9312_v11  ;;  %8691 = vmatpush3.bf16.msra.mxu1 %v9064_v55  ;;  %v9100_v55 = vld [vmem:[%s9387_s11 + $0x214] ss:$36 sps:$4 sm:$0xff]  }
  0x81   : > { %1799 = vmatmul.mubr.bf16.gmra.mxu1 %v9006_v45  ;;  %1927 = vmatmul.mubr.bf16.gmra.mxu0 %v9007_v47 }
  0x82   : > { %1806 = vmatprep.mubr.bf16.mxu1 %v9009_v48  ;;  %1934 = vmatprep.mubr.bf16.mxu0 %v9011_v49 }
  0x83   : > { %8804 = vmatpush3.bf16.msra.mxu0 %v9060_v52 }
  0x84   : > { %8805 = vmatprep.subr.bf16.mxu0 %v9312_v11 }
  0x87   : > { %8806 = vmatpush3.bf16.msra.mxu0 %v9070_v59 }
  0x89   : > { %1807 = vmatmul.mubr.bf16.gmra.mxu1 %v9013_v53  ;;  %1935 = vmatmul.mubr.bf16.gmra.mxu0 %v9014_v56  ;;  %v9098_v53 = vld [vmem:[%s9387_s11 + $0x1c8] ss:$36 sps:$4 sm:$0xff]  }
  0x8a   : > { %1814 = vmatprep.mubr.bf16.mxu1 %v9017_v57  ;;  %1942 = vmatprep.mubr.bf16.mxu0 %v9019_v58 }
  0x91   : > { %1815 = vmatmul.mubr.bf16.gmra.mxu1 %v9021_v60  ;;  %1943 = vmatmul.mubr.bf16.gmra.mxu0 %v9022_v61 }
  0x92   : > { %1822 = vmatprep.mubr.bf16.mxu1 %v9025_v62  ;;  %1950 = vmatprep.mubr.bf16.mxu0 %v9027_v63 }
  0x99   : > { %1823 = vmatmul.mubr.bf16.gmra.mxu1 %v9030_v0  ;;  %1951 = vmatmul.mubr.bf16.gmra.mxu0 %v9031_v1 }
  0x9a   : > { %1830 = vmatprep.mubr.bf16.mxu1 %v9033_v2  ;;  %1958 = vmatprep.mubr.bf16.mxu0 %v9035_v3 }
  0xa1   : > { %1831 = vmatmul.mubr.bf16.gmra.mxu1 %v9037_v4  ;;  %1959 = vmatmul.mubr.bf16.gmra.mxu0 %v9038_v5  ;;  %v9102_v4 = vld [vmem:[%s9387_s11 + $0x210] ss:$36 sps:$4 sm:$0xff]  }
  0xa2   : > { %1838 = vmatprep.mubr.bf16.mxu1 %v9041_v6  ;;  %1966 = vmatprep.mubr.bf16.mxu0 %v9043_v7  ;;  %v9103_v5 = vld [vmem:[%s9387_s11 + $0x1d0] ss:$36 sps:$4 sm:$0xff]   ;;  %v9104_v6 = vld [vmem:[%s9387_s11 + $0x25c] ss:$36 sps:$4 sm:$0xff]  }
  0xa9   : > { %1839 = vmatmul.mubr.bf16.gmra.mxu1 %v9045_v8  ;;  %1967 = vmatmul.mubr.bf16.gmra.mxu0 %v9046_v9 }
  0xaa   : > { %1846 = vmatprep.mubr.bf16.mxu1 %v9048_v10  ;;  %1974 = vmatprep.mubr.bf16.mxu0 %v9050_v12 }
  0xb1   : > { %1847 = vmatmul.mubr.bf16.gmra.mxu1 %v9052_v13  ;;  %1975 = vmatmul.mubr.bf16.gmra.mxu0 %v9053_v14 }
  0xb2   : > { %1854 = vmatprep.mubr.bf16.mxu1 %v9056_v15  ;;  %1982 = vmatprep.mubr.bf16.mxu0 %v9058_v16 }
  0xb9   : > { %1855 = vmatmul.mubr.bf16.gmra.mxu1 %v9061_v18  ;;  %1983 = vmatmul.mubr.bf16.gmra.mxu0 %v9062_v19 }
  0xba   : > { %1862 = vmatprep.mubr.bf16.mxu1 %v7880_v20  ;;  %1990 = vmatprep.mubr.bf16.mxu0 %v9066_v21  ;;  %v9106_v20 = vld [vmem:[%s9387_s11 + $0x258] ss:$36 sps:$4 sm:$0xff]  }
  0xbb   : > { %v9107_v21 = vld [vmem:[%s9387_s11 + $0x218] ss:$36 sps:$4 sm:$0xff]  }
  0xc1   : > { %1863 = vmatmul.mubr.bf16.gmra.mxu1 %v7879_v23  ;;  %1991 = vmatmul.mubr.bf16.gmra.mxu0 %v9069_v24 }
  0xc2   : > { %1998 = vmatprep.mubr.bf16.mxu0 %v7882_v25  ;;  %2038 = vmatprep.mubr.bf16.mxu1 %v9074_v26 }
  0xc9   : > { %1999 = vmatmul.mubr.bf16.gmra.mxu0 %v7881_v28  ;;  %2039 = vmatmul.mubr.bf16.vlgmr.msra.gmra.mxu1 %v9072_v27 }
  0xca   : > { %2046 = vmatprep.mubr.bf16.mxu1 %v9076_v29  ;;  %8807 = vmatprep.mubr.msk.bf16.mxu0 %vm9313_vm0, %v9312_v11 }
  0xd1   : > { %2047 = vmatmul.mubr.bf16.gmra.mxu1 %v9078_v30  ;;  %8808 = vmatmul.mubr.bf16.vlgmr.msra.gmra.mxu0 %v9079_v31 }
  0xd2   : > { %2054 = vmatprep.mubr.bf16.mxu1 %v9080_v32  ;;  %8811 = vmatprep.mubr.msk.bf16.mxu0 %vm9313_vm0, %v9312_v11 }
  0xd9   : > { %2055 = vmatmul.mubr.bf16.gmra.mxu1 %v9082_v33  ;;  %8812 = vmatmul.mubr.bf16.gmra.mxu0 %v9083_v34 }
  0xda   : > { %2062 = vmatprep.mubr.bf16.mxu1 %v9084_v35  ;;  %8815 = vmatprep.mubr.msk.bf16.mxu0 %vm9313_vm0, %v9312_v11  ;;  %v9108_v35 = vld [vmem:[%s9387_s11 + $0x2a0] ss:$36 sps:$4 sm:$0xff]  }
  0xe1   : > { %2063 = vmatmul.mubr.bf16.gmra.mxu1 %v9086_v36  ;;  %8816 = vmatmul.mubr.bf16.gmra.mxu0 %v9087_v37  ;;  %v9111_v36 = vld [vmem:[%s9387_s11 + $0x260] ss:$36 sps:$4 sm:$0xff]   ;;  %v9114_v37 = vld [vmem:[%s9387_s11 + $0x2ec] ss:$36 sps:$4 sm:$0xff]  }
  0xe2   : > { %2070 = vmatprep.mubr.bf16.mxu1 %v9088_v38  ;;  %8819 = vmatprep.mubr.msk.bf16.mxu0 %vm9313_vm0, %v9312_v11 }
  0xe9   : > { %2071 = vmatmul.mubr.bf16.gmra.mxu1 %v9090_v39  ;;  %8820 = vmatmul.mubr.bf16.gmra.mxu0 %v9091_v40 }
  0xea   : > { %2078 = vmatprep.mubr.bf16.mxu1 %v9092_v41  ;;  %8823 = vmatprep.mubr.msk.bf16.mxu0 %vm9313_vm0, %v9312_v11 }
  0xf1   : > { %v8410_v45 = vpop.f32.mrf.mxu0  ;;  %v8452_v46 = vpop.f32.mrf.mxu1  ;;  %2079 = vmatmul.mubr.bf16.gmra.mxu1 %v9094_v42  ;;  %8824 = vmatmul.mubr.bf16.gmra.mxu0 %v9095_v43 }
  0xf2   : > { %2086 = vmatprep.mubr.bf16.mxu1 %v9096_v44  ;;  %8827 = vmatprep.mubr.msk.bf16.mxu0 %vm9313_vm0, %v9312_v11 }
  0xf3   : > { %v8411_v47 = vpop.f32.mrf.mxu0  ;;  %v8453_v48 = vpop.f32.mrf.mxu1 }
  0xf4   : > { %v9565_v49 = vadd.f32 %v8411_v47, %v8410_v45  ;;  %v9567_v50 = vadd.f32 %v8453_v48, %v8452_v46 }
  0xf5   : > { %v8413_v51 = vpop.f32.mrf.mxu0  ;;  %v8455_v52 = vpop.f32.mrf.mxu1 }
  0xf7   : > { %v8414_v56 = vpop.f32.mrf.mxu0  ;;  %v8456_v57 = vpop.f32.mrf.mxu1 }
  0xf8   : > { %v9572_v58 = vadd.f32 %v8414_v56, %v8413_v51  ;;  %v9574_v59 = vadd.f32 %v8456_v57, %v8455_v52  ;;  %v9112_v52 = vld [vmem:[%s9387_s11 + $0x2e8] ss:$36 sps:$4 sm:$0xff]  }
  0xf9   : > { %v8416_v60 = vpop.f32.mrf.mxu0  ;;  %v8458_v61 = vpop.f32.mrf.mxu1  ;;  %2087 = vmatmul.mubr.bf16.gmra.mxu1 %v9098_v53  ;;  %8828 = vmatmul.mubr.bf16.gmra.mxu0 %v9099_v54  ;;  %v9115_v53 = vld [vmem:[%s9387_s11 + $0x2a8] ss:$36 sps:$4 sm:$0xff]   ;;  %v9118_v54 = vld [vmem:[%s9387_s11 + $0x334] ss:$36 sps:$4 sm:$0xff]  }
  0xfa   : > { %2094 = vmatprep.mubr.bf16.mxu1 %v9100_v55  ;;  %8831 = vmatprep.mubr.msk.bf16.mxu0 %vm9313_vm0, %v9312_v11 }
  0xfb   : > { %v8417_v62 = vpop.f32.mrf.mxu0  ;;  %v8459_v63 = vpop.f32.mrf.mxu1 }
  0xfc   : > { %v9578_v0 = vadd.f32 %v8417_v62, %v8416_v60  ;;  %v9580_v1 = vadd.f32 %v8459_v63, %v8458_v61 }
  0xfd   : > { %v8419_v2 = vpop.f32.mrf.mxu0  ;;  %v8461_v3 = vpop.f32.mrf.mxu1 }
  0xff   : > { %v8420_v7 = vpop.f32.mrf.mxu0  ;;  %v8462_v8 = vpop.f32.mrf.mxu1 }
 0x100   : > { %v9585_v9 = vadd.f32 %v8420_v7, %v8419_v2  ;;  %v9587_v10 = vadd.f32 %v8462_v8, %v8461_v3  ;;  %v436_v3 = vld [vmem:[%s9387_s11 + $0x378] sm:$0x33]  ;;  %v9116_v8 = vld [vmem:[%s9387_s11 + $0x330] ss:$36 sps:$4 sm:$0xff]  }
 0x101   : > { %v8422_v12 = vpop.f32.mrf.mxu0  ;;  %v8464_v13 = vpop.f32.mrf.mxu1  ;;  %2095 = vmatmul.mubr.bf16.gmra.mxu1 %v9102_v4  ;;  %8832 = vmatmul.mubr.bf16.gmra.mxu0 %v9103_v5 }
 0x102   : > { %2102 = vmatprep.mubr.bf16.mxu1 %v9104_v6  ;;  %8835 = vmatprep.mubr.msk.bf16.mxu0 %vm9313_vm0, %v9312_v11 }
 0x103   : > { %v8423_v14 = vpop.f32.mrf.mxu0  ;;  %v8465_v15 = vpop.f32.mrf.mxu1 }
 0x104   : > { %v9591_v16 = vadd.f32 %v8423_v14, %v8422_v12  ;;  %v9593_v17 = vadd.f32 %v8465_v15, %v8464_v13  ;;  %v9119_v12 = vld [vmem:[%s9387_s11 + $0x2f0] ss:$36 sps:$4 sm:$0xff]   ;;  %v7884_v13 = vcombine.high %v436_v3, %v436_v3 }
 0x105   : > { %v8425_v18 = vpop.f32.mrf.mxu0  ;;  %v8467_v19 = vpop.f32.mrf.mxu1 }
 0x107   : > { %v8426_v23 = vpop.f32.mrf.mxu0  ;;  %v8468_v24 = vpop.f32.mrf.mxu1 }
 0x108   : > { %v9598_v25 = vadd.f32 %v8426_v23, %v8425_v18  ;;  %v9600_v26 = vadd.f32 %v8468_v24, %v8467_v19 }
 0x109   : > { %v8428_v27 = vpop.f32.mrf.mxu0  ;;  %v8470_v28 = vpop.f32.mrf.mxu1  ;;  %2103 = vmatmul.mubr.bf16.gmra.mxu1 %v9106_v20  ;;  %8836 = vmatmul.mubr.bf16.gmra.mxu0 %v9107_v21 }
 0x10a   : > { %2110 = vmatprep.mubr.bf16.mxu1 %v9110_v22  ;;  %8839 = vmatprep.mubr.msk.bf16.mxu0 %vm9313_vm0, %v9312_v11 }
 0x10b   : > { %v8429_v29 = vpop.f32.mrf.mxu0  ;;  %v8471_v30 = vpop.f32.mrf.mxu1 }
 0x10c   : > { %v9604_v31 = vadd.f32 %v8429_v29, %v8428_v27  ;;  %v9606_v32 = vadd.f32 %v8471_v30, %v8470_v28  ;;  %v7883_v29 = vcombine.low %v436_v3, %v436_v3  ;;  %v9122_v30 = vld [vmem:[%s9387_s11 + $0x338] ss:$36 sps:$4 sm:$0xff]  }
 0x10d   : > { %v8431_v33 = vpop.f32.mrf.mxu0  ;;  %v8473_v34 = vpop.f32.mrf.mxu1 }
 0x10f   : > { %v8432_v38 = vpop.f32.mrf.mxu0  ;;  %v8474_v39 = vpop.f32.mrf.mxu1 }
 0x110   : > { %v9611_v40 = vadd.f32 %v8432_v38, %v8431_v33  ;;  %v9613_v41 = vadd.f32 %v8474_v39, %v8473_v34 }
 0x111   : > { %v8434_v42 = vpop.f32.mrf.mxu0  ;;  %v8476_v43 = vpop.f32.mrf.mxu1  ;;  %2111 = vmatmul.mubr.bf16.gmra.mxu1 %v9108_v35  ;;  %8840 = vmatmul.mubr.bf16.gmra.mxu0 %v9111_v36 }
 0x112   : > { %2118 = vmatprep.mubr.bf16.mxu1 %v9114_v37  ;;  %8843 = vmatprep.mubr.msk.bf16.mxu0 %vm9313_vm0, %v9312_v11 }
 0x113   : > { %v8435_v44 = vpop.f32.mrf.mxu0  ;;  %v8477_v45 = vpop.f32.mrf.mxu1 }
 0x114   : > { %v9617_v46 = vadd.f32 %v8435_v44, %v8434_v42  ;;  %v9619_v47 = vadd.f32 %v8477_v45, %v8476_v43 }
 0x115   : > { %v8437_v48 = vpop.f32.mrf.mxu0  ;;  %v8479_v51 = vpop.f32.mrf.mxu1 }
 0x117   : > { %v8438_v55 = vpop.f32.mrf.mxu0  ;;  %v8480_v56 = vpop.f32.mrf.mxu1 }
 0x118   : > { %v9624_v57 = vadd.f32 %v8438_v55, %v8437_v48  ;;  %v9626_v60 = vadd.f32 %v8480_v56, %v8479_v51 }
 0x119   : > { %v8440_v61 = vpop.f32.mrf.mxu0  ;;  %v8482_v62 = vpop.f32.mrf.mxu1  ;;  %2119 = vmatmul.mubr.bf16.gmra.mxu1 %v9112_v52  ;;  %8844 = vmatmul.mubr.bf16.gmra.mxu0 %v9115_v53  ;;  %v9123_v52 = vld [vmem:[%s9387_s11 + $0x380] ss:$0 sps:$4 sm:$0x33]  }
 0x11a   : > { %2126 = vmatprep.mubr.bf16.mxu1 %v9118_v54  ;;  %8847 = vmatprep.mubr.msk.bf16.mxu0 %vm9313_vm0, %v9312_v11 }
 0x11b   : > { %v8441_v63 = vpop.f32.mrf.mxu0  ;;  %v8483_v2 = vpop.f32.mrf.mxu1 }
 0x11c   : > { %v9631_v4 = vadd.f32 %v8441_v63, %v8440_v61  ;;  %v9633_v5 = vadd.f32 %v8483_v2, %v8482_v62 }
 0x11d   : > { %v8443_v6 = vpop.f32.mrf.mxu0  ;;  %v8485_v7 = vpop.f32.mrf.mxu1 }
 0x11f   : > { %v8444_v14 = vpop.f32.mrf.mxu0  ;;  %v8486_v15 = vpop.f32.mrf.mxu1 }
 0x120   : > { %v9637_v18 = vadd.f32 %v8444_v14, %v8443_v6 }
 0x121   : > { %v8446_v19 = vpop.f32.mrf.mxu0  ;;  %v8504_v20 = vpop.f32.mrf.mxu1  ;;  %2127 = vmatmul.mubr.bf16.gmra.mxu1 %v9116_v8  ;;  %8848 = vmatmul.mubr.bf16.gmra.mxu0 %v9119_v12 }
 0x122   : > { %2134 = vmatprep.mubr.bf16.mxu1 %v7884_v13  ;;  %8851 = vmatprep.mubr.msk.bf16.mxu0 %vm9313_vm0, %v9312_v11 }
 0x123   : > { %v8447_v21 = vpop.f32.mrf.mxu0  ;;  %v8505_v22 = vpop.f32.mrf.mxu1 }
 0x124   : > { %v9641_v23 = vadd.f32 %v8447_v21, %v8446_v19  ;;  %v8506_v24 = vadd.f32 %v8505_v22, %v8504_v20 }
 0x125   : > { %v8449_v27 = vpop.f32.mrf.mxu0  ;;  %v8507_v28 = vpop.f32.mrf.mxu1 }
 0x126   : > { %v1769_v33 = vadd.f32 %v8506_v24, %v9565_v49 }
 0x127   : > { %v8450_v34 = vpop.f32.mrf.mxu0  ;;  %v8508_v35 = vpop.f32.mrf.mxu1 }
 0x128   : > { %v9645_v36 = vadd.f32 %v8450_v34, %v8449_v27  ;;  %v8509_v37 = vadd.f32 %v8508_v35, %v8507_v28 }
 0x129   : > { %v8510_v38 = vpop.f32.mrf.mxu1  ;;  %v8598_v39 = vpop.f32.mrf.mxu0  ;;  %2135 = vmatmul.mubr.bf16.gmra.mxu1 %v7883_v29  ;;  %8852 = vmatmul.mubr.bf16.gmra.mxu0 %v9122_v30 }
 0x12a   : > { %v1772_v42 = vadd.f32 %v8509_v37, %v9572_v58  ;;  %8855 = vmatprep.mubr.msk.bf16.mxu0 %vm9313_vm0, %v9312_v11 }
 0x12b   : > { %v8511_v43 = vpop.f32.mrf.mxu1  ;;  %v8599_v44 = vpop.f32.mrf.mxu0 }
 0x12c   : > { %v8512_v45 = vadd.f32 %v8511_v43, %v8510_v38  ;;  %v8600_v48 = vadd.f32 %v8599_v44, %v8598_v39 }
 0x12d   : > { %v8513_v49 = vpop.f32.mrf.mxu1  ;;  %v8601_v51 = vpop.f32.mrf.mxu0 }
 0x12e   : > { %v1777_v53 = vadd.f32 %v8512_v45, %v9578_v0  ;;  %v9652_v54 = vadd.f32 %v8600_v48, %v1769_v33 }
 0x12f   : > { %v8514_v55 = vpop.f32.mrf.mxu1  ;;  %v8602_v56 = vpop.f32.mrf.mxu0 }
 0x130   : > { %v8515_v61 = vadd.f32 %v8514_v55, %v8513_v49  ;;  %v8603_v62 = vadd.f32 %v8602_v56, %v8601_v51 }
 0x131   : > { %v8516_v63 = vpop.f32.mrf.mxu1  ;;  %v8604_v58 = vpop.f32.mrf.mxu0  ;;  %8856 = vmatmul.mubr.bf16.gmra.mxu0 %v9123_v52 }
 0x132   : > { %v1780_v11 = vadd.f32 %v8515_v61, %v9585_v9  ;;  %v9655_v2 = vadd.f32 %v8603_v62, %v1772_v42 }
 0x133   : > { %v8517_v3 = vpop.f32.mrf.mxu1  ;;  %v8605_v6 = vpop.f32.mrf.mxu0 }
 0x134   : > { %v8518_v7 = vadd.f32 %v8517_v3, %v8516_v63  ;;  %v8606_v8 = vadd.f32 %v8605_v6, %v8604_v58 }
 0x135   : > { %v8519_v12 = vpop.f32.mrf.mxu1  ;;  %v8607_v13 = vpop.f32.mrf.mxu0 }
 0x136   : > { %v1785_v0 = vadd.f32 %v8518_v7, %v9591_v16  ;;  %v9658_v14 = vadd.f32 %v8606_v8, %v1777_v53 }
 0x137   : > { %v8520_v15 = vpop.f32.mrf.mxu1  ;;  %v8608_v19 = vpop.f32.mrf.mxu0 }
 0x138   : > { %v8521_v20 = vadd.f32 %v8520_v15, %v8519_v12  ;;  %v8609_v21 = vadd.f32 %v8608_v19, %v8607_v13 }
 0x139   : > { %v8522_v22 = vpop.f32.mrf.mxu1  ;;  %v8610_v24 = vpop.f32.mrf.mxu0 }
 0x13a   : > { %v1788_v9 = vadd.f32 %v8521_v20, %v9598_v25  ;;  %v9661_v27 = vadd.f32 %v8609_v21, %v1780_v11 }
 0x13b   : > { %v8523_v28 = vpop.f32.mrf.mxu1  ;;  %v8611_v29 = vpop.f32.mrf.mxu0 }
 0x13c   : > { %v8524_v30 = vadd.f32 %v8523_v28, %v8522_v22  ;;  %v8612_v33 = vadd.f32 %v8611_v29, %v8610_v24 }
 0x13d   : > { %v8525_v34 = vpop.f32.mrf.mxu1  ;;  %v8613_v35 = vpop.f32.mrf.mxu0 }
 0x13e   : > { %v1793_v16 = vadd.f32 %v8524_v30, %v9604_v31  ;;  %v9664_v37 = vadd.f32 %v8612_v33, %v1785_v0 }
 0x13f   : > { %v8526_v38 = vpop.f32.mrf.mxu1  ;;  %v8614_v39 = vpop.f32.mrf.mxu0 }
 0x140   : > { %v8527_v42 = vadd.f32 %v8526_v38, %v8525_v34  ;;  %v8615_v43 = vadd.f32 %v8614_v39, %v8613_v35 }
 0x141   : > { %v8528_v44 = vpop.f32.mrf.mxu1  ;;  %v8616_v45 = vpop.f32.mrf.mxu0 }
 0x142   : > { %v1796_v25 = vadd.f32 %v8527_v42, %v9611_v40  ;;  %v9667_v48 = vadd.f32 %v8615_v43, %v1788_v9 }
 0x143   : > { %v8529_v49 = vpop.f32.mrf.mxu1  ;;  %v8617_v51 = vpop.f32.mrf.mxu0 }
 0x144   : > { %v8530_v52 = vadd.f32 %v8529_v49, %v8528_v44  ;;  %v8618_v53 = vadd.f32 %v8617_v51, %v8616_v45 }
 0x145   : > { %v8531_v55 = vpop.f32.mrf.mxu1  ;;  %v8619_v56 = vpop.f32.mrf.mxu0 }
 0x146   : > { %v1801_v31 = vadd.f32 %v8530_v52, %v9617_v46  ;;  %v9670_v61 = vadd.f32 %v8618_v53, %v1793_v16 }
 0x147   : > { %v8532_v62 = vpop.f32.mrf.mxu1  ;;  %v8620_v63 = vpop.f32.mrf.mxu0 }
 0x148   : > { %v8533_v58 = vadd.f32 %v8532_v62, %v8531_v55  ;;  %v8621_v11 = vadd.f32 %v8620_v63, %v8619_v56 }
 0x149   : > { %v8534_v3 = vpop.f32.mrf.mxu1  ;;  %v8622_v6 = vpop.f32.mrf.mxu0 }
 0x14a   : > { %v1804_v40 = vadd.f32 %v8533_v58, %v9624_v57  ;;  %v9673_v7 = vadd.f32 %v8621_v11, %v1796_v25 }
 0x14b   : > { %v8535_v8 = vpop.f32.mrf.mxu1  ;;  %v8623_v12 = vpop.f32.mrf.mxu0 }
 0x14c   : > { %v8536_v13 = vadd.f32 %v8535_v8, %v8534_v3  ;;  %v8624_v0 = vadd.f32 %v8623_v12, %v8622_v6 }
 0x14d   : > { %v8537_v15 = vpop.f32.mrf.mxu1  ;;  %v8625_v19 = vpop.f32.mrf.mxu0 }
 0x14e   : > { %v1809_v46 = vadd.f32 %v8536_v13, %v9631_v4  ;;  %v9676_v20 = vadd.f32 %v8624_v0, %v1801_v31 }
 0x14f   : > { %v8538_v21 = vpop.f32.mrf.mxu1  ;;  %v8626_v22 = vpop.f32.mrf.mxu0 }
 0x150   : > { %v8539_v24 = vadd.f32 %v8538_v21, %v8537_v15  ;;  %v8627_v9 = vadd.f32 %v8626_v22, %v8625_v19 }
 0x151   : > { %v8540_v28 = vpop.f32.mrf.mxu1  ;;  %v8628_v29 = vpop.f32.mrf.mxu0 }
 0x152   : > { %v1812_v57 = vadd.f32 %v8539_v24, %v9637_v18  ;;  %v9679_v30 = vadd.f32 %v8627_v9, %v1804_v40 }
 0x153   : > { %v8541_v33 = vpop.f32.mrf.mxu1  ;;  %v8629_v34 = vpop.f32.mrf.mxu0 }
 0x154   : > { %v8542_v35 = vadd.f32 %v8541_v33, %v8540_v28  ;;  %v8630_v16 = vadd.f32 %v8629_v34, %v8628_v29 }
 0x155   : > { %v8543_v38 = vpop.f32.mrf.mxu1  ;;  %v8631_v39 = vpop.f32.mrf.mxu0 }
 0x156   : > { %v1817_v4 = vadd.f32 %v8542_v35, %v9641_v23  ;;  %v9682_v42 = vadd.f32 %v8630_v16, %v1809_v46 }
 0x157   : > { %v8544_v43 = vpop.f32.mrf.mxu1  ;;  %v8632_v44 = vpop.f32.mrf.mxu0 }
 0x158   : > { %v8545_v45 = vadd.f32 %v8544_v43, %v8543_v38  ;;  %v8633_v25 = vadd.f32 %v8632_v44, %v8631_v39 }
 0x159   : > { %v8546_v49 = vpop.f32.mrf.mxu1  ;;  %v8634_v51 = vpop.f32.mrf.mxu0 }
 0x15a   : > { %v1820_v18 = vadd.f32 %v8545_v45, %v9645_v36  ;;  %v9685_v52 = vadd.f32 %v8633_v25, %v1812_v57 }
 0x15b   : > { %v8547_v53 = vpop.f32.mrf.mxu1  ;;  %v8635_v55 = vpop.f32.mrf.mxu0 }
 0x15c   : > { %v8548_v56 = vadd.f32 %v8547_v53, %v8546_v49  ;;  %v8636_v31 = vadd.f32 %v8635_v55, %v8634_v51 }
 0x15d   : > { %v8549_v62 = vpop.f32.mrf.mxu1  ;;  %v8637_v63 = vpop.f32.mrf.mxu0 }
 0x15e   : > { %v1825_v23 = vadd.f32 %v8548_v56, %v9567_v50  ;;  %v9688_v58 = vadd.f32 %v8636_v31, %v1817_v4 }
 0x15f   : > { %v8550_v11 = vpop.f32.mrf.mxu1  ;;  %v8638_v3 = vpop.f32.mrf.mxu0 }
 0x160   : > { %v8551_v6 = vadd.f32 %v8550_v11, %v8549_v62  ;;  %v8639_v40 = vadd.f32 %v8638_v3, %v8637_v63 }
 0x161   : > { %v8552_v8 = vpop.f32.mrf.mxu1  ;;  %v8640_v12 = vpop.f32.mrf.mxu0 }
 0x162   : > { %v1828_v36 = vadd.f32 %v8551_v6, %v9574_v59  ;;  %v9691_v13 = vadd.f32 %v8639_v40, %v1820_v18 }
 0x163   : > { %v8553_v0 = vpop.f32.mrf.mxu1  ;;  %v8641_v15 = vpop.f32.mrf.mxu0 }
 0x164   : > { %v8554_v19 = vadd.f32 %v8553_v0, %v8552_v8  ;;  %v8642_v46 = vadd.f32 %v8641_v15, %v8640_v12 }
 0x165   : > { %v8555_v21 = vpop.f32.mrf.mxu1  ;;  %v8643_v22 = vpop.f32.mrf.mxu0 }
 0x166   : > { %v1833_v50 = vadd.f32 %v8554_v19, %v9580_v1  ;;  %v9694_v24 = vadd.f32 %v8642_v46, %v1825_v23 }
 0x167   : > { %v8556_v9 = vpop.f32.mrf.mxu1  ;;  %v8644_v28 = vpop.f32.mrf.mxu0 }
 0x168   : > { %v8557_v29 = vadd.f32 %v8556_v9, %v8555_v21  ;;  %v8645_v57 = vadd.f32 %v8644_v28, %v8643_v22 }
 0x169   : > { %v8558_v33 = vpop.f32.mrf.mxu1  ;;  %v8646_v34 = vpop.f32.mrf.mxu0 }
 0x16a   : > { %v1836_v59 = vadd.f32 %v8557_v29, %v9587_v10  ;;  %v9697_v35 = vadd.f32 %v8645_v57, %v1828_v36 }
 0x16b   : > { %v8559_v16 = vpop.f32.mrf.mxu1  ;;  %v8647_v38 = vpop.f32.mrf.mxu0 }
 0x16c   : > { %v8560_v39 = vadd.f32 %v8559_v16, %v8558_v33  ;;  %v8648_v4 = vadd.f32 %v8647_v38, %v8646_v34 }
 0x16d   : > { %v8561_v43 = vpop.f32.mrf.mxu1  ;;  %v8649_v44 = vpop.f32.mrf.mxu0 }
 0x16e   : > { %v1841_v1 = vadd.f32 %v8560_v39, %v9593_v17  ;;  %v9700_v45 = vadd.f32 %v8648_v4, %v1833_v50 }
 0x16f   : > { %v8562_v25 = vpop.f32.mrf.mxu1  ;;  %v8650_v49 = vpop.f32.mrf.mxu0 }
 0x170   : > { %v8563_v51 = vadd.f32 %v8562_v25, %v8561_v43  ;;  %v8651_v18 = vadd.f32 %v8650_v49, %v8649_v44 }
 0x171   : > { %v8564_v53 = vpop.f32.mrf.mxu1  ;;  %v8652_v55 = vpop.f32.mrf.mxu0 }
 0x172   : > { %v1844_v10 = vadd.f32 %v8563_v51, %v9600_v26  ;;  %v9703_v56 = vadd.f32 %v8651_v18, %v1836_v59 }
 0x173   : > { %v8565_v31 = vpop.f32.mrf.mxu1  ;;  %v8653_v62 = vpop.f32.mrf.mxu0 }
 0x174   : > { %v8566_v63 = vadd.f32 %v8565_v31, %v8564_v53  ;;  %v8654_v23 = vadd.f32 %v8653_v62, %v8652_v55 }
 0x175   : > { %v8567_v11 = vpop.f32.mrf.mxu1  ;;  %v8655_v3 = vpop.f32.mrf.mxu0 }
 0x176   : > { %v1849_v17 = vadd.f32 %v8566_v63, %v9606_v32  ;;  %v9706_v6 = vadd.f32 %v8654_v23, %v1841_v1 }
 0x177   : > { %v8568_v40 = vpop.f32.mrf.mxu1  ;;  %v8656_v8 = vpop.f32.mrf.mxu0 }
 0x178   : > { %v8569_v12 = vadd.f32 %v8568_v40, %v8567_v11  ;;  %v8657_v36 = vadd.f32 %v8656_v8, %v8655_v3 }
 0x179   : > { %v8570_v0 = vpop.f32.mrf.mxu1  ;;  %v8658_v15 = vpop.f32.mrf.mxu0 }
 0x17a   : > { %v1852_v26 = vadd.f32 %v8569_v12, %v9613_v41  ;;  %v9709_v19 = vadd.f32 %v8657_v36, %v1844_v10 }
 0x17b   : > { %v8571_v46 = vpop.f32.mrf.mxu1  ;;  %v8659_v21 = vpop.f32.mrf.mxu0 }
 0x17c   : > { %v8572_v22 = vadd.f32 %v8571_v46, %v8570_v0  ;;  %v8660_v50 = vadd.f32 %v8659_v21, %v8658_v15 }
 0x17d   : > { %v8573_v9 = vpop.f32.mrf.mxu1  ;;  %v8661_v28 = vpop.f32.mrf.mxu0 }
 0x17e   : > { %v1857_v32 = vadd.f32 %v8572_v22, %v9619_v47  ;;  %v9712_v29 = vadd.f32 %v8660_v50, %v1849_v17 }
 0x17f   : > { %v8574_v57 = vpop.f32.mrf.mxu1  ;;  %v8662_v33 = vpop.f32.mrf.mxu0 }
 0x180   : > { %v8575_v34 = vadd.f32 %v8574_v57, %v8573_v9  ;;  %v8663_v59 = vadd.f32 %v8662_v33, %v8661_v28 }
 0x181   : > { %v8576_v16 = vpop.f32.mrf.mxu1  ;;  %v8664_v38 = vpop.f32.mrf.mxu0 }
 0x182   : > { %v1860_v41 = vadd.f32 %v8575_v34, %v9626_v60  ;;  %v9715_v39 = vadd.f32 %v8663_v59, %v1852_v26 }
 0x183   : > { %v8577_v4 = vpop.f32.mrf.mxu1  ;;  %v8665_v43 = vpop.f32.mrf.mxu0 }
 0x184   : > { %v8578_v44 = vadd.f32 %v8577_v4, %v8576_v16  ;;  %v8666_v1 = vadd.f32 %v8665_v43, %v8664_v38 }
 0x185   : > { %v8579_v25 = vpop.f32.mrf.mxu1  ;;  %v8667_v49 = vpop.f32.mrf.mxu0 }
 0x186   : > { %v1865_v47 = vadd.f32 %v8578_v44, %v9633_v5  ;;  %v9718_v51 = vadd.f32 %v8666_v1, %v1857_v32 }
 0x187   : > { %v8580_v18 = vpop.f32.mrf.mxu1  ;;  %v8668_v53 = vpop.f32.mrf.mxu0 }
 0x188   : > { %v8669_v55 = vadd.f32 %v8668_v53, %v8667_v49 }
 0x189   : > { %v8670_v10 = vpop.f32.mrf.mxu0  ;;  %v8692_v31 = vpop.f32.mrf.mxu1 }
 0x18a   : > { %v9720_v62 = vadd.f32 %v8669_v55, %v1860_v41 }
 0x18b   : > { %v8671_v60 = vpop.f32.mrf.mxu0  ;;  %v8693_v63 = vpop.f32.mrf.mxu1 }
 0x18c   : > { %v8672_v23 = vadd.f32 %v8671_v60, %v8670_v10  ;;  %v8694_v11 = vadd.f32 %v8693_v63, %v8692_v31 }
 0x18d   : > { %v8673_v3 = vpop.f32.mrf.mxu0  ;;  %v8695_v17 = vpop.f32.mrf.mxu1 }
 0x18e   : > { %v9722_v40 = vadd.f32 %v8672_v23, %v1865_v47  ;;  %v2041_v8 = vadd.f32 %v8694_v11, %v9652_v54 }
 0x18f   : > { %v8674_v5 = vpop.f32.mrf.mxu0  ;;  %v8696_v12 = vpop.f32.mrf.mxu1 }
 0x190   : > { %v8697_v36 = vadd.f32 %v8696_v12, %v8695_v17 }
 0x191   : > { %v8698_v0 = vpop.f32.mrf.mxu1  ;;  %v2176_v15 = vpop.f32.mrf.mxu0 }
 0x192   : > { %v9725_v26 = vadd.f32 %v2176_v15, %v2041_v8  ;;  %v2044_v46 = vadd.f32 %v8697_v36, %v9655_v2 }
 0x193   : > { %v8699_v21 = vpop.f32.mrf.mxu1  ;;  %v8809_v22 = vpop.f32.mrf.mxu0 }
 0x194   : > { %v8700_v50 = vadd.f32 %v8699_v21, %v8698_v0 }
 0x195   : > { %v8701_v9 = vpop.f32.mrf.mxu1  ;;  %v2179_v28 = vpop.f32.mrf.mxu0 }
 0x196   : > { %v9728_v32 = vadd.f32 %v2179_v28, %v2044_v46  ;;  %v2049_v57 = vadd.f32 %v8700_v50, %v9658_v14 }
 0x197   : > { %v8702_v33 = vpop.f32.mrf.mxu1  ;;  %v8810_v54 = vpop.f32.mrf.mxu0 }
 0x198   : > { %v8703_v34 = vadd.f32 %v8702_v33, %v8701_v9  ;;  %v2278_v21 = vadd.f32 %v9728_v32, %v9725_v26 }
 0x199   : > { %v8704_v59 = vpop.f32.mrf.mxu1  ;;  %v2184_v16 = vpop.f32.mrf.mxu0 }
 0x19a   : > { %v9731_v38 = vadd.f32 %v2184_v16, %v2049_v57  ;;  %v2052_v41 = vadd.f32 %v8703_v34, %v9661_v27  ;;  %v2312_v27 = vmul.f32 %v9728_v32, %v9728_v32 }
 0x19b   : > { %v8705_v4 = vpop.f32.mrf.mxu1  ;;  %v8813_v2 = vpop.f32.mrf.mxu0 }
 0x19c   : > { %v8706_v43 = vadd.f32 %v8705_v4, %v8704_v59  ;;  %v2313_v5 = vmul.f32 %v9731_v38, %v9731_v38  ;;  %v2279_v34 = vadd.f32 %v2278_v21, %v9731_v38 }
 0x19d   : > { %v8707_v44 = vpop.f32.mrf.mxu1  ;;  %v2187_v1 = vpop.f32.mrf.mxu0 }
 0x19e   : > { %v2057_v25 = vadd.f32 %v8706_v43, %v9664_v37  ;;  %v9737_v11 = vadd.f32 %v2187_v1, %v2052_v41  ;;  %v2311_v37 = vmul.f32 %v9725_v26, %v9725_v26 }
 0x19f   : > { %v8708_v49 = vpop.f32.mrf.mxu1  ;;  %v8814_v47 = vpop.f32.mrf.mxu0 }
 0x1a0   : > { %v8709_v60 = vadd.f32 %v8708_v49, %v8707_v44  ;;  %v2336_v22 = vadd.f32 %v2312_v27, %v2311_v37  ;;  %v2314_v50 = vmul.f32 %v9737_v11, %v9737_v11  ;;  %v2280_v43 = vadd.f32 %v2279_v34, %v9737_v11 }
 0x1a1   : > { %v8710_v18 = vpop.f32.mrf.mxu1  ;;  %v2192_v14 = vpop.f32.mrf.mxu0 }
 0x1a2   : > { %v9743_v12 = vadd.f32 %v2192_v14, %v2057_v25  ;;  %v2060_v36 = vadd.f32 %v8709_v60, %v9667_v48  ;;  %v2337_v48 = vadd.f32 %v2336_v22, %v2313_v5 }
 0x1a3   : > { %v8711_v53 = vpop.f32.mrf.mxu1  ;;  %v8817_v55 = vpop.f32.mrf.mxu0 }
 0x1a4   : > { %v8712_v3 = vadd.f32 %v8711_v53, %v8710_v18  ;;  %v2315_v59 = vmul.f32 %v9743_v12, %v9743_v12  ;;  %v2338_v1 = vadd.f32 %v2337_v48, %v2314_v50  ;;  %v2281_v14 = vadd.f32 %v2280_v43, %v9743_v12 }
 0x1a5   : > { %v8713_v10 = vpop.f32.mrf.mxu1  ;;  %v2195_v31 = vpop.f32.mrf.mxu0 }
 0x1a6   : > { %v9750_v9 = vadd.f32 %v2195_v31, %v2060_v36  ;;  %v2065_v28 = vadd.f32 %v8712_v3, %v9670_v61  ;;  %v2339_v53 = vadd.f32 %v2338_v1, %v2315_v59 }
 0x1a7   : > { %v8714_v63 = vpop.f32.mrf.mxu1  ;;  %v8818_v23 = vpop.f32.mrf.mxu0 }
 0x1a8   : > { %v8715_v0 = vadd.f32 %v8714_v63, %v8713_v10  ;;  %v2316_v61 = vmul.f32 %v9750_v9, %v9750_v9  ;;  %v2282_v60 = vadd.f32 %v2281_v14, %v9750_v9 }
 0x1a9   : > { %v8716_v17 = vpop.f32.mrf.mxu1  ;;  %v2200_v8 = vpop.f32.mrf.mxu0 }
 0x1aa   : > { %v9756_v16 = vadd.f32 %v2200_v8, %v2065_v28  ;;  %v2068_v41 = vadd.f32 %v8715_v0, %v9673_v7  ;;  %v2340_v27 = vadd.f32 %v2339_v53, %v2316_v61 }
 0x1ab   : > { %v8717_v15 = vpop.f32.mrf.mxu1  ;;  %v8821_v46 = vpop.f32.mrf.mxu0 }
 0x1ac   : > { %v8718_v57 = vadd.f32 %v8717_v15, %v8716_v17  ;;  %v2317_v7 = vmul.f32 %v9756_v16, %v9756_v16  ;;  %v2283_v8 = vadd.f32 %v2282_v60, %v9756_v16 }
 0x1ad   : > { %v8719_v33 = vpop.f32.mrf.mxu1  ;;  %v2203_v54 = vpop.f32.mrf.mxu0 }
 0x1ae   : > { %v9762_v25 = vadd.f32 %v2203_v54, %v2068_v41  ;;  %v2073_v47 = vadd.f32 %v8718_v57, %v9676_v20  ;;  %v2341_v5 = vadd.f32 %v2340_v27, %v2317_v7 }
 0x1af   : > { %v8720_v4 = vpop.f32.mrf.mxu1  ;;  %v8822_v2 = vpop.f32.mrf.mxu0 }
 0x1b0   : > { %v8721_v44 = vadd.f32 %v8720_v4, %v8719_v33  ;;  %v2318_v20 = vmul.f32 %v9762_v25, %v9762_v25  ;;  %v2284_v46 = vadd.f32 %v2283_v8, %v9762_v25 }
 0x1b1   : > { %v8722_v49 = vpop.f32.mrf.mxu1  ;;  %v2208_v18 = vpop.f32.mrf.mxu0 }
 0x1b2   : > { %v9768_v55 = vadd.f32 %v2208_v18, %v2073_v47  ;;  %v2076_v23 = vadd.f32 %v8721_v44, %v9679_v30  ;;  %v2342_v22 = vadd.f32 %v2341_v5, %v2318_v20 }
 0x1b3   : > { %v8723_v10 = vpop.f32.mrf.mxu1  ;;  %v8825_v31 = vpop.f32.mrf.mxu0 }
 0x1b4   : > { %v8724_v63 = vadd.f32 %v8723_v10, %v8722_v49  ;;  %v2319_v36 = vmul.f32 %v9768_v55, %v9768_v55  ;;  %v2285_v33 = vadd.f32 %v2284_v46, %v9768_v55 }
 0x1b5   : > { %v8725_v3 = vpop.f32.mrf.mxu1  ;;  %v2211_v17 = vpop.f32.mrf.mxu0 }
 0x1b6   : > { %v9775_v37 = vadd.f32 %v2211_v17, %v2076_v23  ;;  %v2081_v30 = vadd.f32 %v8724_v63, %v9682_v42  ;;  %v2343_v34 = vadd.f32 %v2342_v22, %v2319_v36 }
 0x1b7   : > { %v8726_v0 = vpop.f32.mrf.mxu1  ;;  %v8826_v15 = vpop.f32.mrf.mxu0 }
 0x1b8   : > { %v8727_v21 = vadd.f32 %v8726_v0, %v8725_v3  ;;  %v2320_v50 = vmul.f32 %v9775_v37, %v9775_v37  ;;  %v2286_v41 = vadd.f32 %v2285_v33, %v9775_v37 }
 0x1b9   : > { %v8728_v28 = vpop.f32.mrf.mxu1  ;;  %v2216_v57 = vpop.f32.mrf.mxu0 }
 0x1ba   : > { %v9784_v54 = vadd.f32 %v2216_v57, %v2081_v30  ;;  %v2084_v42 = vadd.f32 %v8727_v21, %v9685_v52  ;;  %v2344_v43 = vadd.f32 %v2343_v34, %v2320_v50 }
 0x1bb   : > { %v8729_v48 = vpop.f32.mrf.mxu1  ;;  %v8829_v59 = vpop.f32.mrf.mxu0 }
 0x1bc   : > { %v2321_v4 = vmul.f32 %v9784_v54, %v9784_v54  ;;  %v8730_v2 = vadd.f32 %v8729_v48, %v8728_v28  ;;  %v2287_v61 = vadd.f32 %v2286_v41, %v9784_v54 }
 0x1bd   : > { %v8731_v44 = vpop.f32.mrf.mxu1  ;;  %v2219_v1 = vpop.f32.mrf.mxu0 }
 0x1be   : > { %v9791_v49 = vadd.f32 %v2219_v1, %v2084_v42  ;;  %v2345_v47 = vadd.f32 %v2344_v43, %v2321_v4  ;;  %v2089_v31 = vadd.f32 %v8730_v2, %v9688_v58 }
 0x1bf   : > { %v8732_v18 = vpop.f32.mrf.mxu1  ;;  %v8830_v14 = vpop.f32.mrf.mxu0 }
 0x1c0   : > { %v2288_v53 = vadd.f32 %v2287_v61, %v9791_v49  ;;  %v2322_v7 = vmul.f32 %v9791_v49, %v9791_v49  ;;  %v8733_v10 = vadd.f32 %v8732_v18, %v8731_v44 }
 0x1c1   : > { %v8734_v60 = vpop.f32.mrf.mxu1  ;;  %v2224_v52 = vpop.f32.mrf.mxu0 }
 0x1c2   : > { %v2346_v63 = vadd.f32 %v2345_v47, %v2322_v7  ;;  %v9797_v23 = vadd.f32 %v2224_v52, %v2089_v31  ;;  %v2092_v5 = vadd.f32 %v8733_v10, %v9691_v13 }
 0x1c3   : > { %v8735_v27 = vpop.f32.mrf.mxu1  ;;  %v8833_v20 = vpop.f32.mrf.mxu0 }
 0x1c4   : > { %v2289_v3 = vadd.f32 %v2288_v53, %v9797_v23  ;;  %v2323_v17 = vmul.f32 %v9797_v23, %v9797_v23  ;;  %v8736_v8 = vadd.f32 %v8735_v27, %v8734_v60 }
 0x1c5   : > { %v8737_v36 = vpop.f32.mrf.mxu1  ;;  %v2227_v0 = vpop.f32.mrf.mxu0 }
 0x1c6   : > { %v2347_v15 = vadd.f32 %v2346_v63, %v2323_v17  ;;  %v9803_v46 = vadd.f32 %v2227_v0, %v2092_v5  ;;  %v2097_v28 = vadd.f32 %v8736_v8, %v9694_v24 }
 0x1c7   : > { %v8738_v58 = vpop.f32.mrf.mxu1  ;;  %v8834_v21 = vpop.f32.mrf.mxu0 }
 0x1c8   : > { %v2290_v30 = vadd.f32 %v2289_v3, %v9803_v46  ;;  %v2324_v22 = vmul.f32 %v9803_v46, %v9803_v46  ;;  %v8739_v50 = vadd.f32 %v8738_v58, %v8737_v36 }
 0x1c9   : > { %v8740_v57 = vpop.f32.mrf.mxu1  ;;  %v2232_v33 = vpop.f32.mrf.mxu0 }
 0x1ca   : > { %v2348_v34 = vadd.f32 %v2347_v15, %v2324_v22  ;;  %v9809_v48 = vadd.f32 %v2232_v33, %v2097_v28  ;;  %v2100_v42 = vadd.f32 %v8739_v50, %v9697_v35 }
 0x1cb   : > { %v8741_v13 = vpop.f32.mrf.mxu1  ;;  %v8837_v59 = vpop.f32.mrf.mxu0 }
 0x1cc   : > { %v2291_v41 = vadd.f32 %v2290_v30, %v9809_v48  ;;  %v2325_v4 = vmul.f32 %v9809_v48, %v9809_v48  ;;  %v8742_v2 = vadd.f32 %v8741_v13, %v8740_v57 }
 0x1cd   : > { %v8743_v43 = vpop.f32.mrf.mxu1  ;;  %v2235_v44 = vpop.f32.mrf.mxu0 }
 0x1ce   : > { %v2349_v1 = vadd.f32 %v2348_v34, %v2325_v4  ;;  %v9815_v61 = vadd.f32 %v2235_v44, %v2100_v42  ;;  %v2105_v7 = vadd.f32 %v8742_v2, %v9700_v45 }
 0x1cf   : > { %v8744_v24 = vpop.f32.mrf.mxu1  ;;  %v8838_v47 = vpop.f32.mrf.mxu0 }
 0x1d0   : > { %v2292_v18 = vadd.f32 %v2291_v41, %v9815_v61  ;;  %v2326_v14 = vmul.f32 %v9815_v61, %v9815_v61  ;;  %v8745_v53 = vadd.f32 %v8744_v24, %v8743_v43 }
 0x1d1   : > { %v8746_v10 = vpop.f32.mrf.mxu1  ;;  %v2240_v31 = vpop.f32.mrf.mxu0 }
 0x1d2   : > { %v2350_v60 = vadd.f32 %v2349_v1, %v2326_v14  ;;  %v9821_v52 = vadd.f32 %v2240_v31, %v2105_v7  ;;  %v2108_v17 = vadd.f32 %v8745_v53, %v9703_v56 }
 0x1d3   : > { %v8747_v35 = vpop.f32.mrf.mxu1  ;;  %v8841_v63 = vpop.f32.mrf.mxu0 }
 0x1d4   : > { %v2293_v27 = vadd.f32 %v2292_v18, %v9821_v52  ;;  %v2327_v20 = vmul.f32 %v9821_v52, %v9821_v52  ;;  %v8748_v3 = vadd.f32 %v8747_v35, %v8746_v10 }
 0x1d5   : > { %v8749_v8 = vpop.f32.mrf.mxu1  ;;  %v2243_v5 = vpop.f32.mrf.mxu0 }
 0x1d6   : > { %v2351_v36 = vadd.f32 %v2350_v60, %v2327_v20  ;;  %v9827_v0 = vadd.f32 %v2243_v5, %v2108_v17  ;;  %v2113_v22 = vadd.f32 %v8748_v3, %v9706_v6 }
 0x1d7   : > { %v8750_v45 = vpop.f32.mrf.mxu1  ;;  %v8842_v15 = vpop.f32.mrf.mxu0 }
 0x1d8   : > { %v2294_v58 = vadd.f32 %v2293_v27, %v9827_v0  ;;  %v2328_v21 = vmul.f32 %v9827_v0, %v9827_v0  ;;  %v8751_v30 = vadd.f32 %v8750_v45, %v8749_v8 }
 0x1d9   : > { %v8752_v50 = vpop.f32.mrf.mxu1  ;;  %v2248_v28 = vpop.f32.mrf.mxu0 }
 0x1da   : > { %v2352_v57 = vadd.f32 %v2351_v36, %v2328_v21  ;;  %v9833_v33 = vadd.f32 %v2248_v28, %v2113_v22  ;;  %v2116_v4 = vadd.f32 %v8751_v30, %v9709_v19 }
 0x1db   : > { %v8753_v56 = vpop.f32.mrf.mxu1  ;;  %v8845_v34 = vpop.f32.mrf.mxu0 }
 0x1dc   : > { %v2295_v13 = vadd.f32 %v2294_v58, %v9833_v33  ;;  %v2329_v59 = vmul.f32 %v9833_v33, %v9833_v33  ;;  %v8754_v41 = vadd.f32 %v8753_v56, %v8752_v50 }
 0x1dd   : > { %v8755_v2 = vpop.f32.mrf.mxu1  ;;  %v2251_v42 = vpop.f32.mrf.mxu0 }
 0x1de   : > { %v2353_v43 = vadd.f32 %v2352_v57, %v2329_v59  ;;  %v9839_v44 = vadd.f32 %v2251_v42, %v2116_v4  ;;  %v2121_v14 = vadd.f32 %v8754_v41, %v9712_v29 }
 0x1df   : > { %v8756_v6 = vpop.f32.mrf.mxu1  ;;  %v8846_v1 = vpop.f32.mrf.mxu0 }
 0x1e0   : > { %v2296_v24 = vadd.f32 %v2295_v13, %v9839_v44  ;;  %v2330_v47 = vmul.f32 %v9839_v44, %v9839_v44  ;;  %v8757_v18 = vadd.f32 %v8756_v6, %v8755_v2 }
 0x1e1   : > { %v8758_v53 = vpop.f32.mrf.mxu1  ;;  %v2256_v7 = vpop.f32.mrf.mxu0 }
 0x1e2   : > { %v2354_v10 = vadd.f32 %v2353_v43, %v2330_v47  ;;  %v9845_v31 = vadd.f32 %v2256_v7, %v2121_v14  ;;  %v2124_v20 = vadd.f32 %v8757_v18, %v9715_v39 }
 0x1e3   : > { %v8759_v19 = vpop.f32.mrf.mxu1  ;;  %v8849_v60 = vpop.f32.mrf.mxu0 }
 0x1e4   : > { %v2297_v35 = vadd.f32 %v2296_v24, %v9845_v31  ;;  %v2331_v63 = vmul.f32 %v9845_v31, %v9845_v31  ;;  %v8760_v27 = vadd.f32 %v8759_v19, %v8758_v53 }
 0x1e5   : > { %v8761_v3 = vpop.f32.mrf.mxu1  ;;  %v2259_v17 = vpop.f32.mrf.mxu0 }
 0x1e6   : > { %v2355_v8 = vadd.f32 %v2354_v10, %v2331_v63  ;;  %v9851_v5 = vadd.f32 %v2259_v17, %v2124_v20  ;;  %v2129_v21 = vadd.f32 %v8760_v27, %v9718_v51 }
 0x1e7   : > { %v8762_v29 = vpop.f32.mrf.mxu1  ;;  %v8850_v36 = vpop.f32.mrf.mxu0 }
 0x1e8   : > { %v2298_v45 = vadd.f32 %v2297_v35, %v9851_v5  ;;  %v2332_v15 = vmul.f32 %v9851_v5, %v9851_v5  ;;  %v8763_v58 = vadd.f32 %v8762_v29, %v8761_v3 }
 0x1e9   : > { %v8764_v30 = vpop.f32.mrf.mxu1  ;;  %v2264_v22 = vpop.f32.mrf.mxu0 }
 0x1ea   : > { %v2356_v50 = vadd.f32 %v2355_v8, %v2332_v15  ;;  %v9857_v28 = vadd.f32 %v2264_v22, %v2129_v21  ;;  %v2132_v59 = vadd.f32 %v8763_v58, %v9720_v62 }
 0x1eb   : > { %v8765_v39 = vpop.f32.mrf.mxu1  ;;  %v8853_v57 = vpop.f32.mrf.mxu0 }
 0x1ec   : > { %v2299_v56 = vadd.f32 %v2298_v45, %v9857_v28  ;;  %v2333_v34 = vmul.f32 %v9857_v28, %v9857_v28  ;;  %v8766_v13 = vadd.f32 %v8765_v39, %v8764_v30 }
 0x1ed   : > { %v8767_v41 = vpop.f32.mrf.mxu1  ;;  %v2267_v4 = vpop.f32.mrf.mxu0 }
 0x1ee   : > { %v2357_v2 = vadd.f32 %v2356_v50, %v2333_v34  ;;  %v9863_v42 = vadd.f32 %v2267_v4, %v2132_v59  ;;  %v2137_v24 = vadd.f32 %v8766_v13, %v9722_v40 }
 0x1ef   : > { %v8768_v51 = vpop.f32.mrf.mxu1  ;;  %v8854_v43 = vpop.f32.mrf.mxu0 }
 0x1f0   : > { %v2300_v6 = vadd.f32 %v2299_v56, %v9863_v42  ;;  %v2334_v1 = vmul.f32 %v9863_v42, %v9863_v42 }
 0x1f1   : > { %v2272_v47 = vpop.f32.mrf.mxu0 }
 0x1f2   : > { %v2358_v18 = vadd.f32 %v2357_v2, %v2334_v1  ;;  %v9869_v14 = vadd.f32 %v2272_v47, %v2137_v24 }
 0x1f3   : > { %v8857_v62 = vpop.f32.mrf.mxu0 }
 0x1f4   : > { %v2302_v53 = vsel %vm2301_vm1, %v9869_v14, 0.0  ;;  %v2335_v7 = vmul.f32 %v9869_v14, %v9869_v14 }
 0x1f5   : > { %v2303_v10 = vadd.f32 %v2302_v53, %v2300_v6  ;;  %v2275_v19 = vpop.f32.mrf.mxu0 }
 0x1f6   : > { %v2359_v60 = vsel %vm2301_vm1, %v2335_v7, 0.0 }
 0x1f7   : > { %v2304_v35 = vrot.slane %v2303_v10, 4  ;;  %v2360_v63 = vadd.f32 %v2359_v60, %v2358_v18  ;;  %v8858_v27 = vpop.f32.mrf.mxu0 }
 0x1f9   : > { %v2305_v40 = vadd.f32 %v2304_v35, %v2303_v10  ;;  %v2361_v20 = vrot.slane %v2360_v63, 4  ;;  %v7958_v10 = vld [vmem:[%s308_s14] ss:$0 sm:$0xff] }
 0x1fb   : > { %v2306_v3 = vrot.slane %v2305_v40, 2  ;;  %v2362_v17 = vadd.f32 %v2361_v20, %v2360_v63 }
 0x1fd   : > { %v2307_v8 = vadd.f32 %v2306_v3, %v2305_v40  ;;  %v2363_v29 = vrot.slane %v2362_v17, 2 }
 0x1ff   : > { %v2308_v36 = vrot.slane %v2307_v8, 1  ;;  %v2364_v45 = vadd.f32 %v2363_v29, %v2362_v17 }
 0x201   : > { %v2309_v15 = vadd.f32 %v2308_v36, %v2307_v8  ;;  %v2365_v58 = vrot.slane %v2364_v45, 1 }
 0x203   : > { %v2310_v21 = vmul.f32 0.0051020407, %v2309_v15  ;;  %v2366_v30 = vadd.f32 %v2365_v58, %v2364_v45 }
 0x205   : > { %v2367_v22 = vmul.f32 0.0051020407, %v2366_v30  ;;  %v2368_v50 = vmul.f32 %v2310_v21, %v2310_v21  ;;  %v2380_v57 = vsub.f32 %v9784_v54, %v2310_v21  ;;  %v2381_v56 = vsub.f32 %v9791_v49, %v2310_v21 }
 0x206   : > { %v2382_v34 = vsub.f32 %v9797_v23, %v2310_v21  ;;  %v2383_v13 = vsub.f32 %v9803_v46, %v2310_v21  ;;  %v2384_v59 = vsub.f32 %v9809_v48, %v2310_v21  ;;  %v2385_v41 = vsub.f32 %v9815_v61, %v2310_v21 }
 0x207   : > { %v2369_v39 = vsub.f32 %v2367_v22, %v2368_v50  ;;  %v2386_v4 = vsub.f32 %v9821_v52, %v2310_v21  ;;  %v2387_v2 = vsub.f32 %v9827_v0, %v2310_v21  ;;  %v2388_v51 = vsub.f32 %v9833_v33, %v2310_v21 }
 0x208   : > { %v2389_v43 = vsub.f32 %v9839_v44, %v2310_v21  ;;  %v2390_v54 = vsub.f32 %v9845_v31, %v2310_v21  ;;  %v2391_v49 = vsub.f32 %v9851_v5, %v2310_v21  ;;  %v2392_v23 = vsub.f32 %v9857_v28, %v2310_v21 }
 0x209   : > { %v2393_v46 = vsub.f32 %v9863_v42, %v2310_v21  ;;  %v2394_v48 = vsub.f32 %v9869_v14, %v2310_v21  ;;  %v2395_v61 = vadd.f32 1e-05, %v2369_v39  ;;  %v2370_v52 = vsub.f32 %v9725_v26, %v2310_v21 }
 0x20a   : > { %v2371_v0 = vsub.f32 %v9728_v32, %v2310_v21  ;;  %v2372_v33 = vsub.f32 %v9731_v38, %v2310_v21  ;;  %v2373_v44 = vsub.f32 %v9737_v11, %v2310_v21  ;;  %v2374_v31 = vsub.f32 %v9743_v12, %v2310_v21 }
 0x20b   : > { %9124 = vrsqrt.f32 %v2395_v61  ;;  %v2375_v5 = vsub.f32 %v9750_v9, %v2310_v21  ;;  %v2376_v6 = vsub.f32 %v9756_v16, %v2310_v21  ;;  %v2377_v42 = vsub.f32 %v9762_v25, %v2310_v21 }
 0x20c   : > { %v2378_v1 = vsub.f32 %v9768_v55, %v2310_v21  ;;  %v2379_v24 = vsub.f32 %v9775_v37, %v2310_v21 }
 0x218   : > { %v9125_v28 = vpop.eup %9124 }
 0x219   : > { %v2397_v26 = vmul.f32 %v9125_v28, %v2370_v52  ;;  %v2398_v32 = vmul.f32 %v9125_v28, %v2371_v0  ;;  %v2399_v38 = vmul.f32 %v9125_v28, %v2372_v33  ;;  %v2400_v11 = vmul.f32 %v9125_v28, %v2373_v44 }
 0x21a   : > { %v2401_v12 = vmul.f32 %v9125_v28, %v2374_v31  ;;  %v2402_v47 = vmul.f32 %v9125_v28, %v2375_v5  ;;  %v2403_v9 = vmul.f32 %v9125_v28, %v2376_v6  ;;  %v2404_v18 = vmul.f32 %v9125_v28, %v2377_v42 }
 0x21b   : > { %v2405_v14 = vmul.f32 %v9125_v28, %v2378_v1  ;;  %v2406_v16 = vmul.f32 %v9125_v28, %v2379_v24  ;;  %v2407_v25 = vmul.f32 %v9125_v28, %v2380_v57  ;;  %v2408_v62 = vmul.f32 %v9125_v28, %v2381_v56 }
 0x21c   : > { %v2409_v55 = vmul.f32 %v9125_v28, %v2382_v34  ;;  %v2410_v53 = vmul.f32 %v9125_v28, %v2383_v13  ;;  %v2411_v37 = vmul.f32 %v9125_v28, %v2384_v59  ;;  %v2412_v7 = vmul.f32 %v9125_v28, %v2385_v41  ;;  %v7959_v59 = vld [vmem:[%s311_s17] ss:$0 sm:$0xff] }
 0x21d   : > { %v2413_v19 = vmul.f32 %v9125_v28, %v2386_v4  ;;  %v2414_v60 = vmul.f32 %v9125_v28, %v2387_v2  ;;  %v2415_v35 = vmul.f32 %v9125_v28, %v2388_v51  ;;  %v2416_v63 = vmul.f32 %v9125_v28, %v2389_v43 }
 0x21e   : > { %v2417_v27 = vmul.f32 %v9125_v28, %v2390_v54  ;;  %v2418_v40 = vmul.f32 %v9125_v28, %v2391_v49  ;;  %v2419_v20 = vmul.f32 %v9125_v28, %v2392_v23  ;;  %v2420_v3 = vmul.f32 %v9125_v28, %v2393_v46 }
 0x21f   : > { %v2421_v17 = vmul.f32 %v9125_v28, %v2394_v48  ;;  %v2429_v8 = vmul.f32 %v7958_v10, %v2397_v26  ;;  %v2430_v29 = vmul.f32 %v7958_v10, %v2398_v32  ;;  %v2431_v36 = vmul.f32 %v7958_v10, %v2399_v38 }
 0x220   : > { %v2432_v45 = vmul.f32 %v7958_v10, %v2400_v11  ;;  %v2433_v15 = vmul.f32 %v7958_v10, %v2401_v12  ;;  %v2434_v58 = vmul.f32 %v7958_v10, %v2402_v47  ;;  %v2435_v21 = vmul.f32 %v7958_v10, %v2403_v9 }
 0x221   : > { %v2436_v30 = vmul.f32 %v7958_v10, %v2404_v18  ;;  %v2437_v22 = vmul.f32 %v7958_v10, %v2405_v14  ;;  %v2438_v50 = vmul.f32 %v7958_v10, %v2406_v16  ;;  %v2439_v39 = vmul.f32 %v7958_v10, %v2407_v25 }
 0x222   : > { %v2440_v57 = vmul.f32 %v7958_v10, %v2408_v62  ;;  %v2441_v56 = vmul.f32 %v7958_v10, %v2409_v55  ;;  %v2442_v34 = vmul.f32 %v7958_v10, %v2410_v53  ;;  %v2443_v13 = vmul.f32 %v7958_v10, %v2411_v37 }
 0x223   : > { %v2444_v41 = vmul.f32 %v7958_v10, %v2412_v7  ;;  %v2445_v4 = vmul.f32 %v7958_v10, %v2413_v19  ;;  %v2446_v2 = vmul.f32 %v7958_v10, %v2414_v60  ;;  %v2447_v51 = vmul.f32 %v7958_v10, %v2415_v35 }
 0x224   : > { %v2448_v43 = vmul.f32 %v7958_v10, %v2416_v63  ;;  %v2449_v54 = vmul.f32 %v7958_v10, %v2417_v27  ;;  %v2450_v49 = vmul.f32 %v7958_v10, %v2418_v40  ;;  %v2451_v23 = vmul.f32 %v7958_v10, %v2419_v20 }
 0x225   : > { %v2452_v46 = vmul.f32 %v7958_v10, %v2420_v3  ;;  %v2453_v48 = vmul.f32 %v7958_v10, %v2421_v17  ;;  %v2461_v61 = vadd.f32 %v7959_v59, %v2429_v8  ;;  %v2462_v52 = vadd.f32 %v7959_v59, %v2430_v29 }
 0x226   : > { %v2463_v0 = vadd.f32 %v7959_v59, %v2431_v36  ;;  %v2464_v33 = vadd.f32 %v7959_v59, %v2432_v45  ;;  %v2465_v44 = vadd.f32 %v7959_v59, %v2433_v15  ;;  %v2466_v31 = vadd.f32 %v7959_v59, %v2434_v58 }
 0x227   : > { %v2467_v5 = vadd.f32 %v7959_v59, %v2435_v21  ;;  %v2468_v28 = vadd.f32 %v7959_v59, %v2436_v30  ;;  %v2469_v6 = vadd.f32 %v7959_v59, %v2437_v22  ;;  %v2470_v42 = vadd.f32 %v7959_v59, %v2438_v50 }
 0x228   : > { %v2471_v1 = vadd.f32 %v7959_v59, %v2439_v39  ;;  %v2472_v24 = vadd.f32 %v7959_v59, %v2440_v57  ;;  %v2473_v26 = vadd.f32 %v7959_v59, %v2441_v56  ;;  %v2474_v32 = vadd.f32 %v7959_v59, %v2442_v34 }
 0x229   : > { %v2475_v38 = vadd.f32 %v7959_v59, %v2443_v13  ;;  %v2476_v11 = vadd.f32 %v7959_v59, %v2444_v41  ;;  %v2477_v12 = vadd.f32 %v7959_v59, %v2445_v4  ;;  %v2478_v47 = vadd.f32 %v7959_v59, %v2446_v2 }
 0x22a   : > { %v2479_v9 = vadd.f32 %v7959_v59, %v2447_v51  ;;  %v2480_v18 = vadd.f32 %v7959_v59, %v2448_v43  ;;  %v2481_v14 = vadd.f32 %v7959_v59, %v2449_v54  ;;  %v2482_v16 = vadd.f32 %v7959_v59, %v2450_v49 }
 0x22b   : > { %v2483_v25 = vadd.f32 %v7959_v59, %v2451_v23  ;;  %v2484_v62 = vadd.f32 %v7959_v59, %v2452_v46  ;;  %v2485_v55 = vadd.f32 %v7959_v59, %v2453_v48  ;;  %v2486_v53 = vmax.f32 %v2461_v61, 0.0 }
 0x22c   : > { %v2487_v37 = vmax.f32 %v2462_v52, 0.0  ;;  %v2488_v7 = vmax.f32 %v2463_v0, 0.0  ;;  %v2489_v10 = vmax.f32 %v2464_v33, 0.0  ;;  %v2490_v19 = vmax.f32 %v2465_v44, 0.0 }
 0x22d   : > { %v2491_v60 = vmax.f32 %v2466_v31, 0.0  ;;  %v2492_v35 = vmax.f32 %v2467_v5, 0.0  ;;  %v2493_v63 = vmax.f32 %v2468_v28, 0.0  ;;  %v2494_v27 = vmax.f32 %v2469_v6, 0.0 }
 0x22e   : > { %v2495_v40 = vmax.f32 %v2470_v42, 0.0  ;;  %v2496_v20 = vmax.f32 %v2471_v1, 0.0  ;;  %v2497_v3 = vmax.f32 %v2472_v24, 0.0  ;;  %v2498_v17 = vmax.f32 %v2473_v26, 0.0 }
 0x22f   : > { %v2499_v8 = vmax.f32 %v2474_v32, 0.0  ;;  %v2500_v29 = vmax.f32 %v2475_v38, 0.0  ;;  %v2501_v36 = vmax.f32 %v2476_v11, 0.0  ;;  %v2502_v45 = vmax.f32 %v2477_v12, 0.0 }
 0x230   : > { %v2503_v15 = vmax.f32 %v2478_v47, 0.0  ;;  %v2504_v58 = vmax.f32 %v2479_v9, 0.0  ;;  %v2505_v21 = vmax.f32 %v2480_v18, 0.0  ;;  %v2506_v30 = vmax.f32 %v2481_v14, 0.0 }
 0x231   : > { %v2507_v22 = vmax.f32 %v2482_v16, 0.0  ;;  %v2508_v50 = vmax.f32 %v2483_v25, 0.0  ;;  %v2509_v39 = vmax.f32 %v2484_v62, 0.0  ;;  %v2510_v57 = vmax.f32 %v2485_v55, 0.0 }
 0x232   : > { %v8326_v56 = vpack.c.bf16 %v2487_v37, %v2486_v53  ;;  %v8331_v34 = vpack.c.bf16 %v2489_v10, %v2488_v7  ;;  %v8336_v13 = vpack.c.bf16 %v2491_v60, %v2490_v19  ;;  %v8341_v59 = vpack.c.bf16 %v2493_v63, %v2492_v35 }
 0x233   : > { %v8321_v41 = vpack.c.bf16 %v2510_v57, %v2510_v57  ;;  %v8346_v4 = vpack.c.bf16 %v2495_v40, %v2494_v27  ;;  %v8351_v2 = vpack.c.bf16 %v2497_v3, %v2496_v20  ;;  %v8356_v51 = vpack.c.bf16 %v2499_v8, %v2498_v17 }
 0x234   : > { %8327 = vst [vmem:[%s2614_s19] sm:$0xff] %v8326_v56   ;;  %8383 = vst [vmem:[%s2614_s19 + $0x8] sm:$0xff] %v8331_v34   ;;  %v8361_v43 = vpack.c.bf16 %v2501_v36, %v2500_v29  ;;  %v8366_v54 = vpack.c.bf16 %v2503_v15, %v2502_v45  ;;  %v8371_v49 = vpack.c.bf16 %v2505_v21, %v2504_v58 }
 0x235   : > { %8384 = vst [vmem:[%s2614_s19 + $0x10] sm:$0xff] %v8336_v13   ;;  %8385 = vst [vmem:[%s2614_s19 + $0x18] sm:$0xff] %v8341_v59   ;;  %v8376_v23 = vpack.c.bf16 %v2507_v22, %v2506_v30  ;;  %v8381_v46 = vpack.c.bf16 %v2509_v39, %v2508_v50 }
 0x236   : > { %8386 = vst [vmem:[%s2614_s19 + $0x20] sm:$0xff] %v8346_v4   ;;  %8387 = vst [vmem:[%s2614_s19 + $0x28] sm:$0xff] %v8351_v2   ;;  %2643 = sbr.rel (%p7986_p4) target bundleno = 1412 (0x584), region = 52 }
 0x237   : > { %8388 = vst [vmem:[%s2614_s19 + $0x30] sm:$0xff] %v8356_v51   ;;  %2639 = vst [vmem:[%s2614_s19 + $0x60] sm:$0x3] %v8321_v41 }
 0x238   : > { %8389 = vst [vmem:[%s2614_s19 + $0x38] sm:$0xff] %v8361_v43   ;;  %8390 = vst [vmem:[%s2614_s19 + $0x40] sm:$0xff] %v8366_v54  }
 0x239   : > { %8391 = vst [vmem:[%s2614_s19 + $0x48] sm:$0xff] %v8371_v49   ;;  %8392 = vst [vmem:[%s2614_s19 + $0x50] sm:$0xff] %v8376_v23  }
 0x23a   : > { %8393 = vst [vmem:[%s2614_s19 + $0x58] sm:$0xff] %v8381_v46  }
 0x23b   : > { %v3107_v48 = vld [vmem:[%s15323_s4 + $0x1c0] sm:$0xff] }
 0x23c   : > { %v3111_v61 = vld [vmem:[%s15323_s4 + $0x1e0] sm:$0xff] }
 0x23d   : > { %v3235_v52 = vld [vmem:[%s15323_s4 + $0x5c0] sm:$0xff]  ;;  %v8096_v0 = vcombine.high %v3107_v48, %v3111_v61  ;;  %v8095_v44 = vcombine.low %v3107_v48, %v3111_v61 }
 0x23e   : > { %v3239_v33 = vld [vmem:[%s15323_s4 + $0x5e0] sm:$0xff] }
 0x23f   : > { %v3099_v31 = vld [vmem:[%s15323_s4 + $0x180] sm:$0xff]  ;;  %v8224_v28 = vcombine.high %v3235_v52, %v3239_v33  ;;  %v8223_v6 = vcombine.low %v3235_v52, %v3239_v33  ;;  %4587 = vmatprep.subr.bf16.mxu0 %v8096_v0 }
 0x240   : > { %v3103_v5 = vld [vmem:[%s15323_s4 + $0x1a0] sm:$0xff]  ;;  %4588 = vmatpush1.bf16.msra.mxu0 %v8095_v44 }
 0x241   : > { %v8088_v42 = vcombine.high %v3099_v31, %v3103_v5  ;;  %v3227_v1 = vld [vmem:[%s15323_s4 + $0x580] sm:$0xff]  ;;  %4748 = vmatprep.subr.bf16.mxu1 %v8224_v28  ;;  %v8087_v47 = vcombine.low %v3099_v31, %v3103_v5  ;;  %v9127_v43 = vld [vmem:[#allocation2 + $0x12c] sm:$0xff]  }
 0x242   : > { %v3231_v24 = vld [vmem:[%s15323_s4 + $0x5a0] sm:$0xff]  ;;  %4749 = vmatpush1.bf16.msra.mxu1 %v8223_v6  ;;  %4780 = vmatprep.mubr.bf16.mxu1 %v9127_v43 }
 0x243   : > { %v3091_v26 = vld [vmem:[%s15323_s4 + $0x140] sm:$0xff]  ;;  %v8216_v32 = vcombine.high %v3227_v1, %v3231_v24  ;;  %4589 = vmatprep.subr.bf16.mxu0 %v8088_v42  ;;  %v8215_v9 = vcombine.low %v3227_v1, %v3231_v24 }
 0x244   : > { %v3095_v38 = vld [vmem:[%s15323_s4 + $0x160] sm:$0xff]  ;;  %4590 = vmatpush1.bf16.msra.mxu0 %v8087_v47 }
 0x245   : > { %v3219_v11 = vld [vmem:[%s15323_s4 + $0x540] sm:$0xff]  ;;  %v8080_v18 = vcombine.high %v3091_v26, %v3095_v38  ;;  %4750 = vmatprep.subr.bf16.mxu1 %v8216_v32  ;;  %v8079_v53 = vcombine.low %v3091_v26, %v3095_v38 }
 0x246   : > { %v3223_v12 = vld [vmem:[%s15323_s4 + $0x560] sm:$0xff]  ;;  %4751 = vmatpush1.bf16.msra.mxu1 %v8215_v9 }
 0x247   : > { %v8208_v14 = vcombine.high %v3219_v11, %v3223_v12  ;;  %v3083_v16 = vld [vmem:[%s15323_s4 + $0x100] sm:$0xff]  ;;  %4591 = vmatprep.subr.bf16.mxu0 %v8080_v18  ;;  %v8207_v37 = vcombine.low %v3219_v11, %v3223_v12 }
 0x248   : > { %v3087_v25 = vld [vmem:[%s15323_s4 + $0x120] sm:$0xff]  ;;  %4592 = vmatpush1.bf16.msra.mxu0 %v8079_v53 }
 0x249   : > { %v3211_v62 = vld [vmem:[%s15323_s4 + $0x500] sm:$0xff]  ;;  %v8072_v7 = vcombine.high %v3083_v16, %v3087_v25  ;;  %4752 = vmatprep.subr.bf16.mxu1 %v8208_v14  ;;  %v8071_v27 = vcombine.low %v3083_v16, %v3087_v25 }
 0x24a   : > { %v3215_v55 = vld [vmem:[%s15323_s4 + $0x520] sm:$0xff]  ;;  %4753 = vmatpush1.bf16.msra.mxu1 %v8207_v37 }
 0x24b   : > { %v8200_v10 = vcombine.high %v3211_v62, %v3215_v55  ;;  %v3075_v19 = vld [vmem:[%s15323_s4 + $0xc0] sm:$0xff]  ;;  %4593 = vmatprep.subr.bf16.mxu0 %v8072_v7  ;;  %v8199_v40 = vcombine.low %v3211_v62, %v3215_v55 }
 0x24c   : > { %v3079_v60 = vld [vmem:[%s15323_s4 + $0xe0] sm:$0xff]  ;;  %4594 = vmatpush1.bf16.msra.mxu0 %v8071_v27 }
 0x24d   : > { %v3203_v35 = vld [vmem:[%s15323_s4 + $0x4c0] sm:$0xff]  ;;  %v8064_v20 = vcombine.high %v3075_v19, %v3079_v60  ;;  %4754 = vmatprep.subr.bf16.mxu1 %v8200_v10  ;;  %v8063_v45 = vcombine.low %v3075_v19, %v3079_v60 }
 0x24e   : > { %v3207_v63 = vld [vmem:[%s15323_s4 + $0x4e0] sm:$0xff]  ;;  %4755 = vmatpush1.bf16.msra.mxu1 %v8199_v40 }
 0x24f   : > { %v8192_v3 = vcombine.high %v3203_v35, %v3207_v63  ;;  %v3067_v17 = vld [vmem:[%s15323_s4 + $0x80] sm:$0xff]  ;;  %4595 = vmatprep.subr.bf16.mxu0 %v8064_v20  ;;  %v8191_v15 = vcombine.low %v3203_v35, %v3207_v63 }
 0x250   : > { %v3071_v8 = vld [vmem:[%s15323_s4 + $0xa0] sm:$0xff]  ;;  %4596 = vmatpush1.bf16.msra.mxu0 %v8063_v45 }
 0x251   : > { %v3195_v29 = vld [vmem:[%s15323_s4 + $0x480] sm:$0xff]  ;;  %v8056_v58 = vcombine.high %v3067_v17, %v3071_v8  ;;  %4756 = vmatprep.subr.bf16.mxu1 %v8192_v3  ;;  %v8055_v57 = vcombine.low %v3067_v17, %v3071_v8 }
 0x252   : > { %v3199_v36 = vld [vmem:[%s15323_s4 + $0x4a0] sm:$0xff]  ;;  %4757 = vmatpush1.bf16.msra.mxu1 %v8191_v15 }
 0x253   : > { %v8184_v21 = vcombine.high %v3195_v29, %v3199_v36  ;;  %v3059_v30 = vld [vmem:[%s15323_s4 + $0x40] sm:$0xff]  ;;  %4597 = vmatprep.subr.bf16.mxu0 %v8056_v58  ;;  %v8183_v13 = vcombine.low %v3195_v29, %v3199_v36 }
 0x254   : > { %v3063_v22 = vld [vmem:[%s15323_s4 + $0x60] sm:$0xff]  ;;  %4598 = vmatpush1.bf16.msra.mxu0 %v8055_v57 }
 0x255   : > { %v3187_v50 = vld [vmem:[%s15323_s4 + $0x440] sm:$0xff]  ;;  %v8048_v59 = vcombine.high %v3059_v30, %v3063_v22  ;;  %4758 = vmatprep.subr.bf16.mxu1 %v8184_v21  ;;  %v8047_v54 = vcombine.low %v3059_v30, %v3063_v22 }
 0x256   : > { %v3191_v39 = vld [vmem:[%s15323_s4 + $0x460] sm:$0xff]  ;;  %4759 = vmatpush1.bf16.msra.mxu1 %v8183_v13 }
 0x257   : > { %v3051_v56 = vld [vmem:[%s15323_s4] sm:$0xff]  ;;  %v8176_v2 = vcombine.high %v3187_v50, %v3191_v39  ;;  %4599 = vmatprep.subr.bf16.mxu0 %v8048_v59  ;;  %v8175_v49 = vcombine.low %v3187_v50, %v3191_v39 }
 0x258   : > { %v3055_v34 = vld [vmem:[%s15323_s4 + $0x20] sm:$0xff]  ;;  %4600 = vmatpush1.bf16.msra.mxu0 %v8047_v54 }
 0x259   : > { %v3179_v41 = vld [vmem:[%s15323_s4 + $0x400] sm:$0xff]  ;;  %v8040_v23 = vcombine.high %v3051_v56, %v3055_v34  ;;  %4760 = vmatprep.subr.bf16.mxu1 %v8176_v2  ;;  %v8039_v33 = vcombine.low %v3051_v56, %v3055_v34 }
 0x25a   : > { %v3183_v4 = vld [vmem:[%s15323_s4 + $0x420] sm:$0xff]  ;;  %4761 = vmatpush1.bf16.msra.mxu1 %v8175_v49  ;;  %v3108_v49 = vld [vmem:[%s15323_s4 + $0x1c8] sm:$0xff] }
 0x25b   : > { %v9126_v51 = vld [vmem:[#allocation2 + $0x64] sm:$0xff]   ;;  %v8168_v48 = vcombine.high %v3179_v41, %v3183_v4  ;;  %4601 = vmatprep.subr.bf16.mxu0 %v8040_v23  ;;  %v8167_v44 = vcombine.low %v3179_v41, %v3183_v4 }
 0x25c   : > { %4619 = vmatprep.mubr.bf16.mxu0 %v9126_v51  ;;  %v3171_v46 = vld [vmem:[%s15323_s4 + $0x3c0] sm:$0xff]  ;;  %4602 = vmatpush1.bf16.msra.mxu0 %v8039_v33 }
 0x25d   : > { %v3175_v61 = vld [vmem:[%s15323_s4 + $0x3e0] sm:$0xff]  ;;  %4762 = vmatprep.subr.bf16.mxu1 %v8168_v48  ;;  %v3112_v48 = vld [vmem:[%s15323_s4 + $0x1e8] sm:$0xff] }
 0x25e   : > { %v3299_v52 = vld [vmem:[%s15323_s4 + $0x7c0] sm:$0xff]  ;;  %v8160_v31 = vcombine.high %v3171_v46, %v3175_v61  ;;  %v8159_v24 = vcombine.low %v3171_v46, %v3175_v61  ;;  %4763 = vmatpush1.bf16.msra.mxu1 %v8167_v44 }
 0x25f   : > { %v3303_v0 = vld [vmem:[%s15323_s4 + $0x7e0] sm:$0xff] }
 0x260   : > { %v3163_v5 = vld [vmem:[%s15323_s4 + $0x380] sm:$0xff]  ;;  %v8288_v6 = vcombine.high %v3299_v52, %v3303_v0  ;;  %4603 = vmatprep.subr.bf16.mxu0 %v8160_v31  ;;  %v8287_v32 = vcombine.low %v3299_v52, %v3303_v0  ;;  %v3236_v52 = vld [vmem:[%s15323_s4 + $0x5c8] sm:$0xff] }
 0x261   : > { %v3167_v28 = vld [vmem:[%s15323_s4 + $0x3a0] sm:$0xff]  ;;  %4604 = vmatpush2.bf16.msra.mxu0 %v8159_v24  ;;  %v3240_v0 = vld [vmem:[%s15323_s4 + $0x5e8] sm:$0xff] }
 0x262   : > { %v3291_v42 = vld [vmem:[%s15323_s4 + $0x780] sm:$0xff]  ;;  %v8152_v38 = vcombine.high %v3163_v5, %v3167_v28  ;;  %4764 = vmatprep.subr.bf16.mxu1 %v8288_v6  ;;  %v8151_v18 = vcombine.low %v3163_v5, %v3167_v28  ;;  %v8098_v5 = vcombine.high %v3108_v49, %v3112_v48  ;;  %v3100_v28 = vld [vmem:[%s15323_s4 + $0x188] sm:$0xff] }
 0x263   : > { %v3295_v1 = vld [vmem:[%s15323_s4 + $0x7a0] sm:$0xff]  ;;  %4765 = vmatpush2.bf16.msra.mxu1 %v8287_v32  ;;  %v10120_v6 = vld [vmem:[#allocation2 + $0xc8] sm:$0xff]  }
 0x264   : > { %v3155_v26 = vld [vmem:[%s15323_s4 + $0x340] sm:$0xff]  ;;  %v8280_v12 = vcombine.high %v3291_v42, %v3295_v1  ;;  %4605 = vmatprep.subr.bf16.mxu0 %v8152_v38  ;;  %v8279_v14 = vcombine.low %v3291_v42, %v3295_v1  ;;  %v8226_v42 = vcombine.high %v3236_v52, %v3240_v0  ;;  %v3104_v1 = vld [vmem:[%s15323_s4 + $0x1a8] sm:$0xff]  ;;  %v8225_v38 = vcombine.low %v3236_v52, %v3240_v0 }
 0x265   : > { %v3159_v11 = vld [vmem:[%s15323_s4 + $0x360] sm:$0xff]  ;;  %4606 = vmatpush2.bf16.msra.mxu0 %v8151_v18  ;;  %v3228_v24 = vld [vmem:[%s15323_s4 + $0x588] sm:$0xff] }
 0x266   : > { %v3283_v47 = vld [vmem:[%s15323_s4 + $0x740] sm:$0xff]  ;;  %v8144_v16 = vcombine.high %v3155_v26, %v3159_v11  ;;  %4766 = vmatprep.subr.bf16.mxu1 %v8280_v12  ;;  %v8143_v7 = vcombine.low %v3155_v26, %v3159_v11  ;;  %v8097_v26 = vcombine.low %v3108_v49, %v3112_v48  ;;  %v3232_v32 = vld [vmem:[%s15323_s4 + $0x5a8] sm:$0xff]  ;;  %v10133_v12 = vld [vmem:[#allocation2 + $0x134] sm:$0xff]  }
 0x267   : > { %v3287_v9 = vld [vmem:[%s15323_s4 + $0x760] sm:$0xff]  ;;  %4767 = vmatpush2.bf16.msra.mxu1 %v8279_v14  ;;  %v10131_v11 = vld [vmem:[#allocation2 + $0x6c] sm:$0xff]   ;;  %v10223_v48 = vld [vmem:[#allocation2 + $0x18] sm:$0xff]  }
 0x268   : > { %v3147_v25 = vld [vmem:[%s15323_s4 + $0x300] sm:$0xff]  ;;  %v8272_v62 = vcombine.high %v3283_v47, %v3287_v9  ;;  %4607 = vmatprep.subr.bf16.mxu0 %v8144_v16  ;;  %v8271_v10 = vcombine.low %v3283_v47, %v3287_v9  ;;  %v3092_v47 = vld [vmem:[%s15323_s4 + $0x148] sm:$0xff]  ;;  %v8090_v9 = vcombine.high %v3100_v28, %v3104_v1  ;;  %v8218_v16 = vcombine.high %v3228_v24, %v3232_v32 }
 0x269   : > { %v3151_v55 = vld [vmem:[%s15323_s4 + $0x320] sm:$0xff]  ;;  %4608 = vmatpush2.bf16.msra.mxu0 %v8143_v7  ;;  %v3096_v18 = vld [vmem:[%s15323_s4 + $0x168] sm:$0xff]  ;;  %v10153_v7 = vld [vmem:[#allocation2 + $0xd0] sm:$0xff]  }
 0x26a   : > { %v3275_v53 = vld [vmem:[%s15323_s4 + $0x700] sm:$0xff]  ;;  %v8136_v19 = vcombine.high %v3147_v25, %v3151_v55  ;;  %4768 = vmatprep.subr.bf16.mxu1 %v8272_v62  ;;  %v8135_v20 = vcombine.low %v3147_v25, %v3151_v55  ;;  %v3220_v14 = vld [vmem:[%s15323_s4 + $0x548] sm:$0xff]  ;;  %v8089_v62 = vcombine.low %v3100_v28, %v3104_v1  ;;  %v8217_v55 = vcombine.low %v3228_v24, %v3232_v32 }
 0x26b   : > { %v3279_v37 = vld [vmem:[%s15323_s4 + $0x720] sm:$0xff]  ;;  %4769 = vmatpush2.bf16.msra.mxu1 %v8271_v10  ;;  %v3224_v25 = vld [vmem:[%s15323_s4 + $0x568] sm:$0xff] }
 0x26c   : > { %v8264_v60 = vcombine.high %v3275_v53, %v3279_v37  ;;  %v3139_v35 = vld [vmem:[%s15323_s4 + $0x2c0] sm:$0xff]  ;;  %4609 = vmatprep.subr.bf16.mxu0 %v8136_v19  ;;  %v8263_v17 = vcombine.low %v3275_v53, %v3279_v37  ;;  %v10150_v53 = vld [vmem:[#allocation2 + $0x8] sm:$0xff]   ;;  %v8082_v37 = vcombine.high %v3092_v47, %v3096_v18  ;;  %v8210_v10 = vcombine.high %v3220_v14, %v3224_v25 }
 0x26d   : > { %v3143_v63 = vld [vmem:[%s15323_s4 + $0x2e0] sm:$0xff]  ;;  %4610 = vmatpush2.bf16.msra.mxu0 %v8135_v20  ;;  %v3084_v19 = vld [vmem:[%s15323_s4 + $0x108] sm:$0xff] }
 0x26e   : > { %v3267_v27 = vld [vmem:[%s15323_s4 + $0x6c0] sm:$0xff]  ;;  %v8128_v8 = vcombine.high %v3139_v35, %v3143_v63  ;;  %4770 = vmatprep.subr.bf16.mxu1 %v8264_v60  ;;  %v8127_v58 = vcombine.low %v3139_v35, %v3143_v63  ;;  %v10158_v60 = vld [vmem:[#allocation2 + $0x74] sm:$0xff]   ;;  %v3088_v35 = vld [vmem:[%s15323_s4 + $0x128] sm:$0xff] }
 0x26f   : > { %v3271_v40 = vld [vmem:[%s15323_s4 + $0x6e0] sm:$0xff]  ;;  %4771 = vmatpush2.bf16.msra.mxu1 %v8263_v17  ;;  %v3212_v63 = vld [vmem:[%s15323_s4 + $0x508] sm:$0xff]  ;;  %v8209_v17 = vcombine.low %v3220_v14, %v3224_v25 }
 0x270   : > { %v3131_v3 = vld [vmem:[%s15323_s4 + $0x280] sm:$0xff]  ;;  %v8256_v36 = vcombine.high %v3267_v27, %v3271_v40  ;;  %4611 = vmatprep.subr.bf16.mxu0 %v8128_v8  ;;  %v8255_v21 = vcombine.low %v3267_v27, %v3271_v40  ;;  %v3216_v27 = vld [vmem:[%s15323_s4 + $0x528] sm:$0xff]  ;;  %v8081_v40 = vcombine.low %v3092_v47, %v3096_v18 }
 0x271   : > { %v3135_v29 = vld [vmem:[%s15323_s4 + $0x2a0] sm:$0xff]  ;;  %4612 = vmatpush2.bf16.msra.mxu0 %v8127_v58  ;;  %v3080_v8 = vld [vmem:[%s15323_s4 + $0xe8] sm:$0xff]  ;;  %v8073_v58 = vcombine.low %v3084_v19, %v3088_v35 }
 0x272   : > { %v3259_v45 = vld [vmem:[%s15323_s4 + $0x680] sm:$0xff]  ;;  %v8120_v30 = vcombine.high %v3131_v3, %v3135_v29  ;;  %4772 = vmatprep.subr.bf16.mxu1 %v8256_v36  ;;  %v8119_v34 = vcombine.low %v3131_v3, %v3135_v29  ;;  %v3076_v3 = vld [vmem:[%s15323_s4 + $0xc8] sm:$0xff]  ;;  %v8074_v29 = vcombine.high %v3084_v19, %v3088_v35 }
 0x273   : > { %v3263_v15 = vld [vmem:[%s15323_s4 + $0x6a0] sm:$0xff]  ;;  %4773 = vmatpush2.bf16.msra.mxu1 %v8255_v21  ;;  %v3204_v36 = vld [vmem:[%s15323_s4 + $0x4c8] sm:$0xff]  ;;  %v10186_v21 = vld [vmem:[#allocation2 + $0x10] sm:$0xff]  }
 0x274   : > { %v3123_v22 = vld [vmem:[%s15323_s4 + $0x240] sm:$0xff]  ;;  %v8248_v50 = vcombine.high %v3259_v45, %v3263_v15  ;;  %4613 = vmatprep.subr.bf16.mxu0 %v8120_v30  ;;  %v8247_v13 = vcombine.low %v3259_v45, %v3263_v15  ;;  %v8202_v45 = vcombine.high %v3212_v63, %v3216_v27  ;;  %v3208_v15 = vld [vmem:[%s15323_s4 + $0x4e8] sm:$0xff]  ;;  %v8201_v30 = vcombine.low %v3212_v63, %v3216_v27 }
 0x275   : > { %v3127_v39 = vld [vmem:[%s15323_s4 + $0x260] sm:$0xff]  ;;  %4614 = vmatpush2.bf16.msra.mxu0 %v8119_v34  ;;  %v3072_v34 = vld [vmem:[%s15323_s4 + $0xa8] sm:$0xff] }
 0x276   : > { %v3251_v57 = vld [vmem:[%s15323_s4 + $0x640] sm:$0xff]  ;;  %v8112_v59 = vcombine.high %v3123_v22, %v3127_v39  ;;  %4774 = vmatprep.subr.bf16.mxu1 %v8248_v50  ;;  %v8111_v54 = vcombine.low %v3123_v22, %v3127_v39  ;;  %v8066_v22 = vcombine.high %v3076_v3, %v3080_v8  ;;  %v10189_v50 = vld [vmem:[#allocation2 + $0xd8] sm:$0xff]   ;;  %v3064_v49 = vld [vmem:[%s15323_s4 + $0x68] sm:$0xff] }
 0x277   : > { %v3255_v56 = vld [vmem:[%s15323_s4 + $0x660] sm:$0xff]  ;;  %4775 = vmatpush2.bf16.msra.mxu1 %v8247_v13  ;;  %v3196_v13 = vld [vmem:[%s15323_s4 + $0x488] sm:$0xff] }
 0x278   : > { %v8240_v41 = vcombine.high %v3251_v57, %v3255_v56  ;;  %v3115_v4 = vld [vmem:[%s15323_s4 + $0x200] sm:$0xff]  ;;  %4615 = vmatprep.subr.bf16.mxu0 %v8112_v59  ;;  %v8239_v23 = vcombine.low %v3251_v57, %v3255_v56  ;;  %v8194_v57 = vcombine.high %v3204_v36, %v3208_v15  ;;  %v3068_v56 = vld [vmem:[%s15323_s4 + $0x88] sm:$0xff] }
 0x279   : > { %v3119_v2 = vld [vmem:[%s15323_s4 + $0x220] sm:$0xff]  ;;  %4616 = vmatpush2.bf16.msra.mxu0 %v8111_v54  ;;  %v3200_v59 = vld [vmem:[%s15323_s4 + $0x4a8] sm:$0xff] }
 0x27a   : > { %v3243_v51 = vld [vmem:[%s15323_s4 + $0x600] sm:$0xff]  ;;  %v8104_v46 = vcombine.high %v3115_v4, %v3119_v2  ;;  %4776 = vmatprep.subr.bf16.mxu1 %v8240_v41  ;;  %v8103_v33 = vcombine.low %v3115_v4, %v3119_v2  ;;  %v8065_v4 = vcombine.low %v3076_v3, %v3080_v8  ;;  %v8193_v2 = vcombine.low %v3204_v36, %v3208_v15  ;;  %v3060_v54 = vld [vmem:[%s15323_s4 + $0x48] sm:$0xff]  ;;  %v10277_v8 = vld [vmem:[#allocation2 + $0x154] sm:$0xff]  }
 0x27b   : > { %v3247_v43 = vld [vmem:[%s15323_s4 + $0x620] sm:$0xff]  ;;  %4777 = vmatpush2.bf16.msra.mxu1 %v8239_v23  ;;  %v3188_v23 = vld [vmem:[%s15323_s4 + $0x448] sm:$0xff]  ;;  %v8185_v0 = vcombine.low %v3196_v13, %v3200_v59  ;;  %v8049_v32 = vcombine.low %v3060_v54, %v3064_v49 }
 0x27c   : > { %v8232_v61 = vcombine.high %v3243_v51, %v3247_v43  ;;  %4617 = vmatprep.subr.bf16.mxu0 %v8104_v46  ;;  %v8231_v44 = vcombine.low %v3243_v51, %v3247_v43  ;;  %v10115_v31 = vld [vmem:[#allocation2] sm:$0xff]   ;;  %v8058_v51 = vcombine.high %v3068_v56, %v3072_v34  ;;  %v8186_v43 = vcombine.high %v3196_v13, %v3200_v59  ;;  %v3192_v46 = vld [vmem:[%s15323_s4 + $0x468] sm:$0xff] }
 0x27d   : > { %4618 = vmatpush2.bf16.msra.mxu0 %v8103_v33  ;;  %v10169_v20 = vld [vmem:[#allocation2 + $0x13c] sm:$0xff]   ;;  %v10205_v41 = vld [vmem:[#allocation2 + $0x144] sm:$0xff]   ;;  %v8050_v33 = vcombine.high %v3060_v54, %v3064_v49  ;;  %v10305_v54 = vld [vmem:[#allocation2 + $0x94] sm:$0xff]  }
 0x27e   : > { %4778 = vmatprep.subr.bf16.mxu1 %v8232_v61  ;;  %4909 = vmatprep.subr.bf16.mxu0 %v8098_v5  ;;  %v10191_v39 = vld [vmem:[#allocation2 + $0x7c] sm:$0xff]   ;;  %v8057_v61 = vcombine.low %v3068_v56, %v3072_v34  ;;  %v8178_v5 = vcombine.high %v3188_v23, %v3192_v46  ;;  %v3056_v28 = vld [vmem:[%s15323_s4 + $0x28] sm:$0xff] }
 0x27f   : > { %4779 = vmatpush2.bf16.msra.mxu1 %v8231_v44  ;;  %v10225_v52 = vld [vmem:[#allocation2 + $0xe0] sm:$0xff]   ;;  %v3052_v44 = vld [vmem:[%s15323_s4 + $0x8] sm:$0xff] }
 0x280   : > { %5070 = vmatprep.subr.bf16.mxu1 %v8226_v42  ;;  %4620 = vmatmul.mubr.bf16.vlgmr.msra.gmra.mxu0 %v10115_v31  ;;  %v10233_v42 = vld [vmem:[#allocation2 + $0x84] sm:$0xff]   ;;  %v8042_v47 = vcombine.high %v3052_v44, %v3056_v28 }
 0x281   : > { %4910 = vmatpush1.bf16.msra.mxu0 %v8097_v26  ;;  %4629 = vmatprep.mubr.bf16.mxu0 %v10131_v11  ;;  %v3180_v1 = vld [vmem:[%s15323_s4 + $0x408] sm:$0xff] }
 0x282   : > { %4781 = vmatmul.mubr.bf16.vlgmr.msra.gmra.mxu1 %v10120_v6  ;;  %4911 = vmatprep.subr.bf16.mxu0 %v8090_v9  ;;  %v3184_v24 = vld [vmem:[%s15323_s4 + $0x428] sm:$0xff] }
 0x283   : > { %5071 = vmatpush1.bf16.msra.mxu1 %v8225_v38  ;;  %4790 = vmatprep.mubr.bf16.mxu1 %v10133_v12  ;;  %v10241_v26 = vld [vmem:[#allocation2 + $0x14c] sm:$0xff]   ;;  %v8177_v38 = vcombine.low %v3188_v23, %v3192_v46  ;;  %v8170_v9 = vcombine.high %v3180_v1, %v3184_v24  ;;  %v10313_v46 = vld [vmem:[#allocation2 + $0x15c] sm:$0xff]  }
 0x284   : > { %5072 = vmatprep.subr.bf16.mxu1 %v8218_v16  ;;  %v3172_v18 = vld [vmem:[%s15323_s4 + $0x3c8] sm:$0xff] }
 0x285   : > { %4912 = vmatpush1.bf16.msra.mxu0 %v8089_v62  ;;  %v3176_v14 = vld [vmem:[%s15323_s4 + $0x3e8] sm:$0xff]  ;;  %v8041_v62 = vcombine.low %v3052_v44, %v3056_v28 }
 0x286   : > { %4913 = vmatprep.subr.bf16.mxu0 %v8082_v37  ;;  %v3300_v16 = vld [vmem:[%s15323_s4 + $0x7c8] sm:$0xff]  ;;  %v8169_v37 = vcombine.low %v3180_v1, %v3184_v24 }
 0x287   : > { %5073 = vmatpush1.bf16.msra.mxu1 %v8217_v55  ;;  %v3304_v25 = vld [vmem:[%s15323_s4 + $0x7e8] sm:$0xff]  ;;  %v10259_v55 = vld [vmem:[#allocation2 + $0x20] sm:$0xff]  }
 0x288   : > { %5074 = vmatprep.subr.bf16.mxu1 %v8210_v10  ;;  %4630 = vmatmul.mubr.bf16.gmra.mxu0 %v10150_v53  ;;  %v8162_v10 = vcombine.high %v3172_v18, %v3176_v14  ;;  %v10261_v19 = vld [vmem:[#allocation2 + $0xe8] sm:$0xff]   ;;  %v8290_v35 = vcombine.high %v3300_v16, %v3304_v25  ;;  %v8289_v36 = vcombine.low %v3300_v16, %v3304_v25 }
 0x289   : > { %4914 = vmatpush1.bf16.msra.mxu0 %v8081_v40  ;;  %4639 = vmatprep.mubr.bf16.mxu0 %v10158_v60  ;;  %v3164_v63 = vld [vmem:[%s15323_s4 + $0x388] sm:$0xff] }
 0x28a   : > { %4791 = vmatmul.mubr.bf16.gmra.mxu1 %v10153_v7  ;;  %4915 = vmatprep.subr.bf16.mxu0 %v8074_v29  ;;  %v3168_v27 = vld [vmem:[%s15323_s4 + $0x3a8] sm:$0xff]  ;;  %v8161_v29 = vcombine.low %v3172_v18, %v3176_v14  ;;  %v10333_v18 = vld [vmem:[#allocation2 + $0xf8] sm:$0xff]  }
 0x28b   : > { %5075 = vmatpush1.bf16.msra.mxu1 %v8209_v17  ;;  %4800 = vmatprep.mubr.bf16.mxu1 %v10169_v20  ;;  %v10269_v40 = vld [vmem:[#allocation2 + $0x8c] sm:$0xff]   ;;  %v8153_v56 = vcombine.low %v3164_v63, %v3168_v27 }
 0x28c   : > { %5076 = vmatprep.subr.bf16.mxu1 %v8202_v45  ;;  %v3292_v3 = vld [vmem:[%s15323_s4 + $0x788] sm:$0xff]  ;;  %v8154_v45 = vcombine.high %v3164_v63, %v3168_v27 }
 0x28d   : > { %4916 = vmatpush1.bf16.msra.mxu0 %v8073_v58  ;;  %v3296_v17 = vld [vmem:[%s15323_s4 + $0x7a8] sm:$0xff] }
 0x28e   : > { %4917 = vmatprep.subr.bf16.mxu0 %v8066_v22  ;;  %v8282_v15 = vcombine.high %v3292_v3, %v3296_v17  ;;  %v3156_v58 = vld [vmem:[%s15323_s4 + $0x348] sm:$0xff]  ;;  %v8281_v13 = vcombine.low %v3292_v3, %v3296_v17 }
 0x28f   : > { %5077 = vmatpush1.bf16.msra.mxu1 %v8201_v30  ;;  %v3160_v30 = vld [vmem:[%s15323_s4 + $0x368] sm:$0xff] }
 0x290   : > { %5078 = vmatprep.subr.bf16.mxu1 %v8194_v57  ;;  %4640 = vmatmul.mubr.bf16.gmra.mxu0 %v10186_v21  ;;  %v3284_v22 = vld [vmem:[%s15323_s4 + $0x748] sm:$0xff]  ;;  %v8146_v59 = vcombine.high %v3156_v58, %v3160_v30 }
 0x291   : > { %4649 = vmatprep.mubr.bf16.mxu0 %v10191_v39  ;;  %4918 = vmatpush1.bf16.msra.mxu0 %v8065_v4  ;;  %v3288_v57 = vld [vmem:[%s15323_s4 + $0x768] sm:$0xff]  ;;  %v10297_v4 = vld [vmem:[#allocation2 + $0xf0] sm:$0xff]  }
 0x292   : > { %4801 = vmatmul.mubr.bf16.gmra.mxu1 %v10189_v50  ;;  %4919 = vmatprep.subr.bf16.mxu0 %v8058_v51  ;;  %v10295_v34 = vld [vmem:[#allocation2 + $0x28] sm:$0xff]  }
 0x293   : > { %4810 = vmatprep.mubr.bf16.mxu1 %v10205_v41  ;;  %5079 = vmatpush1.bf16.msra.mxu1 %v8193_v2  ;;  %v8274_v2 = vcombine.high %v3284_v22, %v3288_v57  ;;  %v3148_v51 = vld [vmem:[%s15323_s4 + $0x308] sm:$0xff] }
 0x294   : > { %5080 = vmatprep.subr.bf16.mxu1 %v8186_v43  ;;  %v3152_v43 = vld [vmem:[%s15323_s4 + $0x328] sm:$0xff] }
 0x295   : > { %4920 = vmatpush1.bf16.msra.mxu0 %v8057_v61  ;;  %v3276_v49 = vld [vmem:[%s15323_s4 + $0x708] sm:$0xff]  ;;  %v8145_v61 = vcombine.low %v3156_v58, %v3160_v30  ;;  %v10367_v30 = vld [vmem:[#allocation2 + $0x38] sm:$0xff]  }
 0x296   : > { %4921 = vmatprep.subr.bf16.mxu0 %v8050_v33  ;;  %v3280_v23 = vld [vmem:[%s15323_s4 + $0x728] sm:$0xff]  ;;  %v8138_v33 = vcombine.high %v3148_v51, %v3152_v43 }
 0x297   : > { %5081 = vmatpush1.bf16.msra.mxu1 %v8185_v0  ;;  %v8273_v0 = vcombine.low %v3284_v22, %v3288_v57  ;;  %v8266_v44 = vcombine.high %v3276_v49, %v3280_v23  ;;  %v3144_v28 = vld [vmem:[%s15323_s4 + $0x2e8] sm:$0xff] }
 0x298   : > { %4650 = vmatmul.mubr.bf16.gmra.mxu0 %v10223_v48  ;;  %5082 = vmatprep.subr.bf16.mxu1 %v8178_v5  ;;  %v3140_v5 = vld [vmem:[%s15323_s4 + $0x2c8] sm:$0xff] }
 0x299   : > { %4659 = vmatprep.mubr.bf16.mxu0 %v10233_v42  ;;  %4922 = vmatpush1.bf16.msra.mxu0 %v8049_v32  ;;  %v3268_v1 = vld [vmem:[%s15323_s4 + $0x6c8] sm:$0xff]  ;;  %v8137_v32 = vcombine.low %v3148_v51, %v3152_v43  ;;  %v8129_v63 = vcombine.low %v3140_v5, %v3144_v28 }
 0x29a   : > { %4811 = vmatmul.mubr.bf16.gmra.mxu1 %v10225_v52  ;;  %4923 = vmatprep.subr.bf16.mxu0 %v8042_v47  ;;  %v3272_v24 = vld [vmem:[%s15323_s4 + $0x6e8] sm:$0xff]  ;;  %v8265_v47 = vcombine.low %v3276_v49, %v3280_v23 }
 0x29b   : > { %4820 = vmatprep.mubr.bf16.mxu1 %v10241_v26  ;;  %5083 = vmatpush1.bf16.msra.mxu1 %v8177_v38  ;;  %v10331_v38 = vld [vmem:[#allocation2 + $0x30] sm:$0xff]   ;;  %v8258_v14 = vcombine.high %v3268_v1, %v3272_v24  ;;  %v3132_v16 = vld [vmem:[%s15323_s4 + $0x288] sm:$0xff]  ;;  %v8257_v27 = vcombine.low %v3268_v1, %v3272_v24 }
 0x29c   : > { %5084 = vmatprep.subr.bf16.mxu1 %v8170_v9  ;;  %v8130_v9 = vcombine.high %v3140_v5, %v3144_v28  ;;  %v3136_v25 = vld [vmem:[%s15323_s4 + $0x2a8] sm:$0xff]  ;;  %v10391_v5 = vld [vmem:[%s15323_s4 + $0x1d0] sm:$0xff] }
 0x29d   : > { %4924 = vmatpush1.bf16.msra.mxu0 %v8041_v62  ;;  %v10341_v62 = vld [vmem:[#allocation2 + $0x9c] sm:$0xff]   ;;  %v8122_v3 = vcombine.high %v3132_v16, %v3136_v25  ;;  %v8121_v58 = vcombine.low %v3132_v16, %v3136_v25  ;;  %v10377_v51 = vld [vmem:[#allocation2 + $0xa4] sm:$0xff]   ;;  %v10385_v23 = vld [vmem:[#allocation2 + $0x16c] sm:$0xff]  }
 0x29e   : > { %4925 = vmatprep.subr.bf16.mxu0 %v8162_v10  ;;  %v3264_v10 = vld [vmem:[%s15323_s4 + $0x6a8] sm:$0xff]  ;;  %v10396_v28 = vld [vmem:[%s15323_s4 + $0x1f0] sm:$0xff] }
 0x29f   : > { %5085 = vmatpush1.bf16.msra.mxu1 %v8169_v37  ;;  %v3260_v37 = vld [vmem:[%s15323_s4 + $0x688] sm:$0xff]  ;;  %v10403_v1 = vld [vmem:[%s15323_s4 + $0x5d0] sm:$0xff] }
 0x2a0   : > { %4660 = vmatmul.mubr.bf16.gmra.mxu0 %v10259_v55  ;;  %5086 = vmatprep.subr.bf16.mxu1 %v8290_v35  ;;  %v10349_v35 = vld [vmem:[#allocation2 + $0x164] sm:$0xff]   ;;  %v8250_v17 = vcombine.high %v3260_v37, %v3264_v10  ;;  %v8249_v22 = vcombine.low %v3260_v37, %v3264_v10  ;;  %v10408_v24 = vld [vmem:[%s15323_s4 + $0x5f0] sm:$0xff] }
 0x2a1   : > { %4669 = vmatprep.mubr.bf16.mxu0 %v10269_v40  ;;  %4926 = vmatpush2.bf16.msra.mxu0 %v8161_v29  ;;  %v3124_v29 = vld [vmem:[%s15323_s4 + $0x248] sm:$0xff]  ;;  %v8228_v16 = vcombine.high %v10403_v1, %v10408_v24  ;;  %v10421_v10 = vld [vmem:[#allocation2 + $0x174] sm:$0xff]  }
 0x2a2   : > { %4821 = vmatmul.mubr.bf16.gmra.mxu1 %v10261_v19  ;;  %4927 = vmatprep.subr.bf16.mxu0 %v8154_v45  ;;  %v3252_v45 = vld [vmem:[%s15323_s4 + $0x648] sm:$0xff] }
 0x2a3   : > { %4830 = vmatprep.mubr.bf16.mxu1 %v10277_v8  ;;  %5087 = vmatpush2.bf16.msra.mxu1 %v8289_v36  ;;  %v3128_v36 = vld [vmem:[%s15323_s4 + $0x268] sm:$0xff] }
 0x2a4   : > { %5088 = vmatprep.subr.bf16.mxu1 %v8282_v15  ;;  %v3256_v15 = vld [vmem:[%s15323_s4 + $0x668] sm:$0xff]  ;;  %v8114_v57 = vcombine.high %v3124_v29, %v3128_v36 }
 0x2a5   : > { %4928 = vmatpush2.bf16.msra.mxu0 %v8153_v56  ;;  %v10369_v56 = vld [vmem:[#allocation2 + $0x100] sm:$0xff]   ;;  %v3244_v43 = vld [vmem:[%s15323_s4 + $0x608] sm:$0xff] }
 0x2a6   : > { %4929 = vmatprep.subr.bf16.mxu0 %v8146_v59  ;;  %v3116_v59 = vld [vmem:[%s15323_s4 + $0x208] sm:$0xff] }
 0x2a7   : > { %5089 = vmatpush2.bf16.msra.mxu1 %v8281_v13  ;;  %v8242_v13 = vcombine.high %v3252_v45, %v3256_v15  ;;  %v3248_v49 = vld [vmem:[%s15323_s4 + $0x628] sm:$0xff] }
 0x2a8   : > { %4670 = vmatmul.mubr.bf16.gmra.mxu0 %v10295_v34  ;;  %5090 = vmatprep.subr.bf16.mxu1 %v8274_v2  ;;  %v3120_v2 = vld [vmem:[%s15323_s4 + $0x228] sm:$0xff] }
 0x2a9   : > { %4679 = vmatprep.mubr.bf16.mxu0 %v10305_v54  ;;  %4930 = vmatpush2.bf16.msra.mxu0 %v8145_v61  ;;  %v8113_v61 = vcombine.low %v3124_v29, %v3128_v36  ;;  %v10417_v25 = vld [vmem:[#allocation2 + $0x108] sm:$0xff]   ;;  %v10439_v29 = vld [vmem:[#allocation2 + $0x50] sm:$0xff]   ;;  %v10441_v36 = vld [vmem:[#allocation2 + $0x118] sm:$0xff]  }
 0x2aa   : > { %4831 = vmatmul.mubr.bf16.gmra.mxu1 %v10297_v4  ;;  %4931 = vmatprep.subr.bf16.mxu0 %v8138_v33  ;;  %v8106_v33 = vcombine.high %v3116_v59, %v3120_v2  ;;  %v10419_v37 = vld [vmem:[#allocation2 + $0xac] sm:$0xff]  }
 0x2ab   : > { %4840 = vmatprep.mubr.bf16.mxu1 %v10313_v46  ;;  %5091 = vmatpush2.bf16.msra.mxu1 %v8273_v0  ;;  %v8241_v0 = vcombine.low %v3252_v45, %v3256_v15  ;;  %v10443_v45 = vld [vmem:[#allocation2 + $0xbc] sm:$0xff]   ;;  %v10445_v15 = vld [vmem:[#allocation2 + $0x184] sm:$0xff]  }
 0x2ac   : > { %5092 = vmatprep.subr.bf16.mxu1 %v8266_v44  ;;  %v8234_v44 = vcombine.high %v3244_v43, %v3248_v49 }
 0x2ad   : > { %4932 = vmatpush2.bf16.msra.mxu0 %v8137_v32  ;;  %v8105_v32 = vcombine.low %v3116_v59, %v3120_v2  ;;  %v10463_v59 = vld [vmem:[#allocation2 + $0x60] ss:$0 sps:$4 sm:$0x33]   ;;  %v10465_v2 = vld [vmem:[#allocation2 + $0x128] ss:$0 sps:$4 sm:$0x33]  }
 0x2ae   : > { %4933 = vmatprep.subr.bf16.mxu0 %v8130_v9  ;;  %v8100_v9 = vcombine.high %v10391_v5, %v10396_v28  ;;  %15559 = vst [vmem:[#allocation3_spill] sm:$0xff] %v10463_v59  ;;  %15560 = vst [vmem:[#allocation4_spill] sm:$0xff] %v10465_v2 }
 0x2af   : > { %5093 = vmatpush2.bf16.msra.mxu1 %v8265_v47  ;;  %v8233_v47 = vcombine.low %v3244_v43, %v3248_v49  ;;  %v10469_v43 = vld [vmem:[#allocation2 + $0x64] sm:$0xff]   ;;  %v10472_v49 = vld [vmem:[#allocation2 + $0x12c] sm:$0xff]  }
 0x2b0   : > { %4680 = vmatmul.mubr.bf16.gmra.mxu0 %v10331_v38  ;;  %5094 = vmatprep.subr.bf16.mxu1 %v8258_v14  ;;  %v10413_v14 = vld [vmem:[#allocation2 + $0x40] sm:$0xff]   ;;  %15561 = vst [vmem:[#allocation5_spill] sm:$0xff] %v10469_v43  ;;  %15562 = vst [vmem:[#allocation6_spill] sm:$0xff] %v10472_v49 }
 0x2b1   : > { %4689 = vmatprep.mubr.bf16.mxu0 %v10341_v62  ;;  %4934 = vmatpush2.bf16.msra.mxu0 %v8129_v63  ;;  %v10427_v63 = vld [vmem:[#allocation2 + $0x48] sm:$0xff]  }
 0x2b2   : > { %4841 = vmatmul.mubr.bf16.gmra.mxu1 %v10333_v18  ;;  %4935 = vmatprep.subr.bf16.mxu0 %v8122_v3  ;;  %v10431_v3 = vld [vmem:[#allocation2 + $0xb4] sm:$0xff]  }
 0x2b3   : > { %4850 = vmatprep.mubr.bf16.mxu1 %v10349_v35  ;;  %5095 = vmatpush2.bf16.msra.mxu1 %v8257_v27  ;;  %v10429_v27 = vld [vmem:[#allocation2 + $0x110] sm:$0xff]  }
 0x2b4   : > { %5096 = vmatprep.subr.bf16.mxu1 %v8250_v17  ;;  %v10433_v17 = vld [vmem:[#allocation2 + $0x17c] sm:$0xff]  }
 0x2b5   : > { %4936 = vmatpush2.bf16.msra.mxu0 %v8121_v58  ;;  %v10451_v58 = vld [vmem:[#allocation2 + $0x58] sm:$0xff]  }
 0x2b6   : > { %4937 = vmatprep.subr.bf16.mxu0 %v8114_v57  ;;  %v10455_v57 = vld [vmem:[#allocation2 + $0xc4] ss:$0 sps:$4 sm:$0x33]  }
 0x2b7   : > { %5097 = vmatpush2.bf16.msra.mxu1 %v8249_v22  ;;  %v10453_v22 = vld [vmem:[#allocation2 + $0x120] sm:$0xff]  }
 0x2b8   : > { %4690 = vmatmul.mubr.bf16.gmra.mxu0 %v10367_v30  ;;  %5098 = vmatprep.subr.bf16.mxu1 %v8242_v13  ;;  %v10457_v13 = vld [vmem:[#allocation2 + $0x18c] ss:$0 sps:$4 sm:$0x33]  }
 0x2b9   : > { %4699 = vmatprep.mubr.bf16.mxu0 %v10377_v51  ;;  %4938 = vmatpush2.bf16.msra.mxu0 %v8113_v61  ;;  %v3101_v61 = vld [vmem:[%s15323_s4 + $0x190] sm:$0xff] }
 0x2ba   : > { %4851 = vmatmul.mubr.bf16.gmra.mxu1 %v10369_v56  ;;  %4939 = vmatprep.subr.bf16.mxu0 %v8106_v33  ;;  %v8099_v33 = vcombine.low %v10391_v5, %v10396_v28  ;;  %v3097_v5 = vld [vmem:[%s15323_s4 + $0x170] sm:$0xff] }
 0x2bb   : > { %4860 = vmatprep.mubr.bf16.mxu1 %v10385_v23  ;;  %5099 = vmatpush2.bf16.msra.mxu1 %v8241_v0  ;;  %v3105_v0 = vld [vmem:[%s15323_s4 + $0x1b0] sm:$0xff] }
 0x2bc   : > { %5100 = vmatprep.subr.bf16.mxu1 %v8234_v44  ;;  %v3229_v44 = vld [vmem:[%s15323_s4 + $0x590] sm:$0xff] }
 0x2bd   : > { %4940 = vmatpush2.bf16.msra.mxu0 %v8105_v32  ;;  %v3233_v32 = vld [vmem:[%s15323_s4 + $0x5b0] sm:$0xff] }
 0x2be   : > { %5231 = vmatprep.subr.bf16.mxu0 %v8100_v9  ;;  %v8092_v9 = vcombine.high %v3101_v61, %v3105_v0  ;;  %v8220_v28 = vcombine.high %v3229_v44, %v3233_v32 }
 0x2bf   : > { %5101 = vmatpush2.bf16.msra.mxu1 %v8233_v47  ;;  %v8227_v47 = vcombine.low %v10403_v1, %v10408_v24  ;;  %v3225_v1 = vld [vmem:[%s15323_s4 + $0x570] sm:$0xff]  ;;  %v8091_v24 = vcombine.low %v3101_v61, %v3105_v0 }
 0x2c0   : > { %4700 = vmatmul.mubr.bf16.gmra.mxu0 %v10413_v14  ;;  %5392 = vmatprep.subr.bf16.mxu1 %v8228_v16  ;;  %v3093_v16 = vld [vmem:[%s15323_s4 + $0x150] sm:$0xff] }
 0x2c1   : > { %4709 = vmatprep.mubr.bf16.mxu0 %v10419_v37  ;;  %v8083_v61 = vcombine.low %v3093_v16, %v3097_v5 }
 0x2c2   : > { %4861 = vmatmul.mubr.bf16.gmra.mxu1 %v10417_v25 }
 0x2c3   : > { %4870 = vmatprep.mubr.bf16.mxu1 %v10421_v10 }
 0x2c8   : > { %4710 = vmatmul.mubr.bf16.gmra.mxu0 %v10427_v63 }
 0x2c9   : > { %4719 = vmatprep.mubr.bf16.mxu0 %v10431_v3 }
 0x2ca   : > { %4871 = vmatmul.mubr.bf16.gmra.mxu1 %v10429_v27 }
 0x2cb   : > { %4880 = vmatprep.mubr.bf16.mxu1 %v10433_v17 }
 0x2d0   : > { %4720 = vmatmul.mubr.bf16.gmra.mxu0 %v10439_v29 }
 0x2d1   : > { %4729 = vmatprep.mubr.bf16.mxu0 %v10443_v45 }
 0x2d2   : > { %4881 = vmatmul.mubr.bf16.gmra.mxu1 %v10441_v36 }
 0x2d3   : > { %4890 = vmatprep.mubr.bf16.mxu1 %v10445_v15 }
 0x2d8   : > { %4730 = vmatmul.mubr.bf16.gmra.mxu0 %v10451_v58 }
 0x2d9   : > { %4739 = vmatprep.mubr.bf16.mxu0 %v10455_v57 }
 0x2da   : > { %4891 = vmatmul.mubr.bf16.gmra.mxu1 %v10453_v22 }
 0x2db   : > { %4900 = vmatprep.mubr.bf16.mxu1 %v10457_v13 }
 0x2e0   : > { %4740 = vmatmul.mubr.bf16.gmra.mxu0 %v10463_v59  ;;  %v3085_v59 = vld [vmem:[%s15323_s4 + $0x110] sm:$0xff] }
 0x2e1   : > { %4941 = vmatprep.mubr.bf16.mxu0 %v10469_v43  ;;  %v8219_v43 = vcombine.low %v3229_v44, %v3233_v32  ;;  %v3077_v44 = vld [vmem:[%s15323_s4 + $0xd0] sm:$0xff] }
 0x2e2   : > { %4901 = vmatmul.mubr.bf16.gmra.mxu1 %v10465_v2  ;;  %v8084_v2 = vcombine.high %v3093_v16, %v3097_v5  ;;  %v3081_v32 = vld [vmem:[%s15323_s4 + $0xf0] sm:$0xff] }
 0x2e3   : > { %5102 = vmatprep.mubr.bf16.mxu1 %v10472_v49  ;;  %v3221_v49 = vld [vmem:[%s15323_s4 + $0x550] sm:$0xff]  ;;  %v8068_v16 = vcombine.high %v3077_v44, %v3081_v32 }
 0x2e4   : > { %v8211_v0 = vcombine.low %v3221_v49, %v3225_v1  ;;  %v3069_v5 = vld [vmem:[%s15323_s4 + $0x90] sm:$0xff] }
 0x2e8   : > { %4942 = vmatmul.mubr.bf16.vlgmr.msra.gmra.mxu0 %v10115_v31  ;;  %v8212_v31 = vcombine.high %v3221_v49, %v3225_v1 }
 0x2e9   : > { %5232 = vmatpush1.bf16.msra.mxu0 %v8099_v33  ;;  %4951 = vmatprep.mubr.bf16.mxu0 %v10131_v11  ;;  %v3213_v11 = vld [vmem:[%s15323_s4 + $0x510] sm:$0xff] }
 0x2ea   : > { %5103 = vmatmul.mubr.bf16.vlgmr.msra.gmra.mxu1 %v10120_v6  ;;  %5233 = vmatprep.subr.bf16.mxu0 %v8092_v9  ;;  %v3089_v6 = vld [vmem:[%s15323_s4 + $0x130] sm:$0xff] }
 0x2eb   : > { %5393 = vmatpush1.bf16.msra.mxu1 %v8227_v47  ;;  %5112 = vmatprep.mubr.bf16.mxu1 %v10133_v12  ;;  %v3217_v12 = vld [vmem:[%s15323_s4 + $0x530] sm:$0xff]  ;;  %v8076_v33 = vcombine.high %v3085_v59, %v3089_v6 }
 0x2ec   : > { %5394 = vmatprep.subr.bf16.mxu1 %v8220_v28  ;;  %v8204_v47 = vcombine.high %v3213_v11, %v3217_v12  ;;  %v3205_v9 = vld [vmem:[%s15323_s4 + $0x4d0] sm:$0xff]  ;;  %v8203_v49 = vcombine.low %v3213_v11, %v3217_v12 }
 0x2ed   : > { %5234 = vmatpush1.bf16.msra.mxu0 %v8091_v24 }
 0x2ee   : > { %5235 = vmatprep.subr.bf16.mxu0 %v8084_v2  ;;  %v3209_v2 = vld [vmem:[%s15323_s4 + $0x4f0] sm:$0xff] }
 0x2ef   : > { %5395 = vmatpush1.bf16.msra.mxu1 %v8219_v43  ;;  %v8075_v43 = vcombine.low %v3085_v59, %v3089_v6  ;;  %v8067_v59 = vcombine.low %v3077_v44, %v3081_v32  ;;  %v8195_v28 = vcombine.low %v3205_v9, %v3209_v2  ;;  %v3065_v6 = vld [vmem:[%s15323_s4 + $0x70] sm:$0xff] }
 0x2f0   : > { %5396 = vmatprep.subr.bf16.mxu1 %v8212_v31  ;;  %4952 = vmatmul.mubr.bf16.gmra.mxu0 %v10150_v53  ;;  %v8196_v53 = vcombine.high %v3205_v9, %v3209_v2  ;;  %v3061_v31 = vld [vmem:[%s15323_s4 + $0x50] sm:$0xff] }
 0x2f1   : > { %5236 = vmatpush1.bf16.msra.mxu0 %v8083_v61  ;;  %4961 = vmatprep.mubr.bf16.mxu0 %v10158_v60  ;;  %v3197_v60 = vld [vmem:[%s15323_s4 + $0x490] sm:$0xff]  ;;  %v8051_v32 = vcombine.low %v3061_v31, %v3065_v6 }
 0x2f2   : > { %5113 = vmatmul.mubr.bf16.gmra.mxu1 %v10153_v7  ;;  %5237 = vmatprep.subr.bf16.mxu0 %v8076_v33  ;;  %v3073_v7 = vld [vmem:[%s15323_s4 + $0xb0] sm:$0xff] }
 0x2f3   : > { %5397 = vmatpush1.bf16.msra.mxu1 %v8211_v0  ;;  %5122 = vmatprep.mubr.bf16.mxu1 %v10169_v20  ;;  %v3201_v20 = vld [vmem:[%s15323_s4 + $0x4b0] sm:$0xff]  ;;  %v8060_v1 = vcombine.high %v3069_v5, %v3073_v7  ;;  %v8059_v11 = vcombine.low %v3069_v5, %v3073_v7  ;;  %v8052_v0 = vcombine.high %v3061_v31, %v3065_v6 }
 0x2f4   : > { %5398 = vmatprep.subr.bf16.mxu1 %v8204_v47  ;;  %v8188_v24 = vcombine.high %v3197_v60, %v3201_v20  ;;  %v3189_v61 = vld [vmem:[%s15323_s4 + $0x450] sm:$0xff]  ;;  %v8187_v12 = vcombine.low %v3197_v60, %v3201_v20 }
 0x2f5   : > { %5238 = vmatpush1.bf16.msra.mxu0 %v8075_v43  ;;  %v3057_v33 = vld [vmem:[%s15323_s4 + $0x30] sm:$0xff] }
 0x2f6   : > { %5239 = vmatprep.subr.bf16.mxu0 %v8068_v16  ;;  %v3185_v44 = vld [vmem:[%s15323_s4 + $0x430] sm:$0xff] }
 0x2f7   : > { %5399 = vmatpush1.bf16.msra.mxu1 %v8203_v49  ;;  %v3173_v43 = vld [vmem:[%s15323_s4 + $0x3d0] sm:$0xff] }
 0x2f8   : > { %5400 = vmatprep.subr.bf16.mxu1 %v8196_v53  ;;  %4962 = vmatmul.mubr.bf16.gmra.mxu0 %v10186_v21  ;;  %v3193_v21 = vld [vmem:[%s15323_s4 + $0x470] sm:$0xff] }
 0x2f9   : > { %4971 = vmatprep.mubr.bf16.mxu0 %v10191_v39  ;;  %5240 = vmatpush1.bf16.msra.mxu0 %v8067_v59  ;;  %v3053_v39 = vld [vmem:[%s15323_s4 + $0x10] sm:$0xff]  ;;  %v8179_v47 = vcombine.low %v3189_v61, %v3193_v21 }
 0x2fa   : > { %5123 = vmatmul.mubr.bf16.gmra.mxu1 %v10189_v50  ;;  %5241 = vmatprep.subr.bf16.mxu0 %v8060_v1  ;;  %v8180_v50 = vcombine.high %v3189_v61, %v3193_v21  ;;  %v8044_v9 = vcombine.high %v3053_v39, %v3057_v33  ;;  %v3177_v49 = vld [vmem:[%s15323_s4 + $0x3f0] sm:$0xff]  ;;  %v8043_v53 = vcombine.low %v3053_v39, %v3057_v33 }
 0x2fb   : > { %5132 = vmatprep.mubr.bf16.mxu1 %v10205_v41  ;;  %5401 = vmatpush1.bf16.msra.mxu1 %v8195_v28  ;;  %v3181_v41 = vld [vmem:[%s15323_s4 + $0x410] sm:$0xff]  ;;  %v8164_v7 = vcombine.high %v3173_v43, %v3177_v49  ;;  %v8163_v59 = vcombine.low %v3173_v43, %v3177_v49 }
 0x2fc   : > { %5402 = vmatprep.subr.bf16.mxu1 %v8188_v24  ;;  %v8172_v2 = vcombine.high %v3181_v41, %v3185_v44  ;;  %v3301_v16 = vld [vmem:[%s15323_s4 + $0x7d0] sm:$0xff]  ;;  %v8171_v5 = vcombine.low %v3181_v41, %v3185_v44 }
 0x2fd   : > { %5242 = vmatpush1.bf16.msra.mxu0 %v8059_v11  ;;  %v3169_v60 = vld [vmem:[%s15323_s4 + $0x3b0] sm:$0xff] }
 0x2fe   : > { %5243 = vmatprep.subr.bf16.mxu0 %v8052_v0  ;;  %v3297_v20 = vld [vmem:[%s15323_s4 + $0x7b0] sm:$0xff] }
 0x2ff   : > { %5403 = vmatpush1.bf16.msra.mxu1 %v8187_v12  ;;  %v3157_v31 = vld [vmem:[%s15323_s4 + $0x350] sm:$0xff] }
 0x300   : > { %4972 = vmatmul.mubr.bf16.gmra.mxu0 %v10223_v48  ;;  %5404 = vmatprep.subr.bf16.mxu1 %v8180_v50  ;;  %v3305_v48 = vld [vmem:[%s15323_s4 + $0x7f0] sm:$0xff] }
 0x301   : > { %4981 = vmatprep.mubr.bf16.mxu0 %v10233_v42  ;;  %5244 = vmatpush1.bf16.msra.mxu0 %v8051_v32  ;;  %v3165_v42 = vld [vmem:[%s15323_s4 + $0x390] sm:$0xff]  ;;  %v8291_v28 = vcombine.low %v3301_v16, %v3305_v48 }
 0x302   : > { %5133 = vmatmul.mubr.bf16.gmra.mxu1 %v10225_v52  ;;  %5245 = vmatprep.subr.bf16.mxu0 %v8044_v9  ;;  %v8292_v52 = vcombine.high %v3301_v16, %v3305_v48  ;;  %v8156_v1 = vcombine.high %v3165_v42, %v3169_v60  ;;  %v3161_v6 = vld [vmem:[%s15323_s4 + $0x370] sm:$0xff]  ;;  %v8155_v21 = vcombine.low %v3165_v42, %v3169_v60 }
 0x303   : > { %5142 = vmatprep.mubr.bf16.mxu1 %v10241_v26  ;;  %5405 = vmatpush1.bf16.msra.mxu1 %v8179_v47  ;;  %v3293_v26 = vld [vmem:[%s15323_s4 + $0x790] sm:$0xff]  ;;  %v8148_v12 = vcombine.high %v3157_v31, %v3161_v6  ;;  %v8147_v39 = vcombine.low %v3157_v31, %v3161_v6 }
 0x304   : > { %5406 = vmatprep.subr.bf16.mxu1 %v8172_v2  ;;  %v8284_v24 = vcombine.high %v3293_v26, %v3297_v20  ;;  %v3285_v61 = vld [vmem:[%s15323_s4 + $0x750] sm:$0xff]  ;;  %v8283_v11 = vcombine.low %v3293_v26, %v3297_v20 }
 0x305   : > { %5246 = vmatpush1.bf16.msra.mxu0 %v8043_v53  ;;  %v3153_v0 = vld [vmem:[%s15323_s4 + $0x330] sm:$0xff] }
 0x306   : > { %5247 = vmatprep.subr.bf16.mxu0 %v8164_v7  ;;  %v3281_v50 = vld [vmem:[%s15323_s4 + $0x730] sm:$0xff] }
 0x307   : > { %5407 = vmatpush1.bf16.msra.mxu1 %v8171_v5  ;;  %v3141_v32 = vld [vmem:[%s15323_s4 + $0x2d0] sm:$0xff] }
 0x308   : > { %4982 = vmatmul.mubr.bf16.gmra.mxu0 %v10259_v55  ;;  %5408 = vmatprep.subr.bf16.mxu1 %v8292_v52  ;;  %v3289_v55 = vld [vmem:[%s15323_s4 + $0x770] sm:$0xff] }
 0x309   : > { %4991 = vmatprep.mubr.bf16.mxu0 %v10269_v40  ;;  %5248 = vmatpush2.bf16.msra.mxu0 %v8163_v59  ;;  %v3149_v40 = vld [vmem:[%s15323_s4 + $0x310] sm:$0xff]  ;;  %v8275_v33 = vcombine.low %v3285_v61, %v3289_v55 }
 0x30a   : > { %5143 = vmatmul.mubr.bf16.gmra.mxu1 %v10261_v19  ;;  %5249 = vmatprep.subr.bf16.mxu0 %v8156_v1  ;;  %v8276_v19 = vcombine.high %v3285_v61, %v3289_v55  ;;  %v8140_v41 = vcombine.high %v3149_v40, %v3153_v0  ;;  %v3145_v47 = vld [vmem:[%s15323_s4 + $0x2f0] sm:$0xff]  ;;  %v8139_v2 = vcombine.low %v3149_v40, %v3153_v0 }
 0x30b   : > { %5152 = vmatprep.mubr.bf16.mxu1 %v10277_v8  ;;  %5409 = vmatpush2.bf16.msra.mxu1 %v8291_v28  ;;  %v3277_v8 = vld [vmem:[%s15323_s4 + $0x710] sm:$0xff]  ;;  %v8132_v49 = vcombine.high %v3141_v32, %v3145_v47  ;;  %v8131_v53 = vcombine.low %v3141_v32, %v3145_v47 }
 0x30c   : > { %5410 = vmatprep.subr.bf16.mxu1 %v8284_v24  ;;  %v8268_v44 = vcombine.high %v3277_v8, %v3281_v50  ;;  %v3269_v9 = vld [vmem:[%s15323_s4 + $0x6d0] sm:$0xff]  ;;  %v8267_v43 = vcombine.low %v3277_v8, %v3281_v50 }
 0x30d   : > { %5250 = vmatpush2.bf16.msra.mxu0 %v8155_v21  ;;  %v3137_v16 = vld [vmem:[%s15323_s4 + $0x2b0] sm:$0xff]  ;;  %v10691_v21 = vld [vmem:[%s15323_s4 + $0x1d8] sm:$0xff] }
 0x30e   : > { %5251 = vmatprep.subr.bf16.mxu0 %v8148_v12  ;;  %v3265_v48 = vld [vmem:[%s15323_s4 + $0x6b0] sm:$0xff]  ;;  %v10708_v12 = vld [vmem:[%s15323_s4 + $0x5f8] sm:$0xff] }
 0x30f   : > { %5411 = vmatpush2.bf16.msra.mxu1 %v8283_v11  ;;  %v3125_v42 = vld [vmem:[%s15323_s4 + $0x250] sm:$0xff]  ;;  %v10696_v11 = vld [vmem:[%s15323_s4 + $0x1f8] sm:$0xff] }
 0x310   : > { %4992 = vmatmul.mubr.bf16.gmra.mxu0 %v10295_v34  ;;  %5412 = vmatprep.subr.bf16.mxu1 %v8276_v19  ;;  %v3273_v34 = vld [vmem:[%s15323_s4 + $0x6f0] sm:$0xff] }
 0x311   : > { %5001 = vmatprep.mubr.bf16.mxu0 %v10305_v54  ;;  %5252 = vmatpush2.bf16.msra.mxu0 %v8147_v39  ;;  %v3133_v54 = vld [vmem:[%s15323_s4 + $0x290] sm:$0xff]  ;;  %v8259_v5 = vcombine.low %v3269_v9, %v3273_v34 }
 0x312   : > { %5153 = vmatmul.mubr.bf16.gmra.mxu1 %v10297_v4  ;;  %5253 = vmatprep.subr.bf16.mxu0 %v8140_v41  ;;  %v8260_v4 = vcombine.high %v3269_v9, %v3273_v34  ;;  %v8124_v7 = vcombine.high %v3133_v54, %v3137_v16  ;;  %v3129_v60 = vld [vmem:[%s15323_s4 + $0x270] sm:$0xff]  ;;  %v8123_v20 = vcombine.low %v3133_v54, %v3137_v16  ;;  %v3102_v41 = vld [vmem:[%s15323_s4 + $0x198] sm:$0xff]  ;;  %v9196_v54 = vld [vmem:[#allocation2] sm:$0xff]  }
 0x313   : > { %5162 = vmatprep.mubr.bf16.mxu1 %v10313_v46  ;;  %5413 = vmatpush2.bf16.msra.mxu1 %v8275_v33  ;;  %v3261_v46 = vld [vmem:[%s15323_s4 + $0x690] sm:$0xff]  ;;  %v8116_v28 = vcombine.high %v3125_v42, %v3129_v60  ;;  %v8115_v31 = vcombine.low %v3125_v42, %v3129_v60  ;;  %v8101_v33 = vcombine.low %v10691_v21, %v10696_v11  ;;  %v3230_v9 = vld [vmem:[%s15323_s4 + $0x598] sm:$0xff] }
 0x314   : > { %5414 = vmatprep.subr.bf16.mxu1 %v8268_v44  ;;  %v8252_v52 = vcombine.high %v3261_v46, %v3265_v48  ;;  %v3253_v26 = vld [vmem:[%s15323_s4 + $0x650] sm:$0xff]  ;;  %v8251_v59 = vcombine.low %v3261_v46, %v3265_v48  ;;  %v3106_v44 = vld [vmem:[%s15323_s4 + $0x1b8] sm:$0xff] }
 0x315   : > { %5254 = vmatpush2.bf16.msra.mxu0 %v8139_v2  ;;  %v3121_v1 = vld [vmem:[%s15323_s4 + $0x230] sm:$0xff]  ;;  %v3234_v34 = vld [vmem:[%s15323_s4 + $0x5b8] sm:$0xff]  ;;  %v8094_v16 = vcombine.high %v3102_v41, %v3106_v44 }
 0x316   : > { %5255 = vmatprep.subr.bf16.mxu0 %v8132_v49  ;;  %v3249_v24 = vld [vmem:[%s15323_s4 + $0x630] sm:$0xff]  ;;  %v3098_v46 = vld [vmem:[%s15323_s4 + $0x178] sm:$0xff]  ;;  %v8222_v42 = vcombine.high %v3230_v9, %v3234_v34 }
 0x317   : > { %5415 = vmatpush2.bf16.msra.mxu1 %v8267_v43  ;;  %v3094_v43 = vld [vmem:[%s15323_s4 + $0x158] sm:$0xff] }
 0x318   : > { %5002 = vmatmul.mubr.bf16.gmra.mxu0 %v10331_v38  ;;  %5416 = vmatprep.subr.bf16.mxu1 %v8260_v4  ;;  %v3257_v38 = vld [vmem:[%s15323_s4 + $0x670] sm:$0xff]  ;;  %v3222_v48 = vld [vmem:[%s15323_s4 + $0x558] sm:$0xff] }
 0x319   : > { %5011 = vmatprep.mubr.bf16.mxu0 %v10341_v62  ;;  %5256 = vmatpush2.bf16.msra.mxu0 %v8131_v53  ;;  %v3117_v62 = vld [vmem:[%s15323_s4 + $0x210] sm:$0xff]  ;;  %v8243_v6 = vcombine.low %v3253_v26, %v3257_v38  ;;  %v3226_v53 = vld [vmem:[%s15323_s4 + $0x578] sm:$0xff] }
 0x31a   : > { %5163 = vmatmul.mubr.bf16.gmra.mxu1 %v10333_v18  ;;  %5257 = vmatprep.subr.bf16.mxu0 %v8124_v7  ;;  %v8244_v18 = vcombine.high %v3253_v26, %v3257_v38  ;;  %v8108_v61 = vcombine.high %v3117_v62, %v3121_v1  ;;  %v8107_v19 = vcombine.low %v3117_v62, %v3121_v1  ;;  %v9197_v7 = vld [vmem:[#allocation2 + $0xc8] sm:$0xff]  }
 0x31b   : > { %5172 = vmatprep.mubr.bf16.mxu1 %v10349_v35  ;;  %5417 = vmatpush2.bf16.msra.mxu1 %v8259_v5  ;;  %v3245_v35 = vld [vmem:[%s15323_s4 + $0x610] sm:$0xff]  ;;  %v8221_v26 = vcombine.low %v3230_v9, %v3234_v34 }
 0x31c   : > { %5418 = vmatprep.subr.bf16.mxu1 %v8252_v52  ;;  %v8236_v55 = vcombine.high %v3245_v35, %v3249_v24  ;;  %v8235_v40 = vcombine.low %v3245_v35, %v3249_v24  ;;  %v8093_v52 = vcombine.low %v3102_v41, %v3106_v44  ;;  %v8085_v24 = vcombine.low %v3094_v43, %v3098_v46  ;;  %v9203_v41 = vld [vmem:[#allocation2 + $0x13c] sm:$0xff]  }
 0x31d   : > { %5258 = vmatpush2.bf16.msra.mxu0 %v8123_v20  ;;  %v9198_v20 = vld [vmem:[#allocation2 + $0x6c] sm:$0xff]  }
 0x31e   : > { %5259 = vmatprep.subr.bf16.mxu0 %v8116_v28  ;;  %v8086_v28 = vcombine.high %v3094_v43, %v3098_v46  ;;  %v3074_v43 = vld [vmem:[%s15323_s4 + $0xb8] sm:$0xff] }
 0x31f   : > { %5419 = vmatpush2.bf16.msra.mxu1 %v8251_v59  ;;  %v9199_v59 = vld [vmem:[#allocation2 + $0x134] sm:$0xff]  }
 0x320   : > { %5012 = vmatmul.mubr.bf16.gmra.mxu0 %v10367_v30  ;;  %5420 = vmatprep.subr.bf16.mxu1 %v8244_v18  ;;  %v10703_v30 = vld [vmem:[%s15323_s4 + $0x5d8] sm:$0xff]  ;;  %v8214_v18 = vcombine.high %v3222_v48, %v3226_v53 }
 0x321   : > { %5021 = vmatprep.mubr.bf16.mxu0 %v10377_v51  ;;  %5260 = vmatpush2.bf16.msra.mxu0 %v8115_v31  ;;  %v8230_v51 = vcombine.high %v10703_v30, %v10708_v12  ;;  %v8229_v47 = vcombine.low %v10703_v30, %v10708_v12  ;;  %v3086_v31 = vld [vmem:[%s15323_s4 + $0x118] sm:$0xff] }
 0x322   : > { %5173 = vmatmul.mubr.bf16.gmra.mxu1 %v10369_v56  ;;  %5261 = vmatprep.subr.bf16.mxu0 %v8108_v61  ;;  %v8102_v56 = vcombine.high %v10691_v21, %v10696_v11  ;;  %v3214_v21 = vld [vmem:[%s15323_s4 + $0x518] sm:$0xff] }
 0x323   : > { %5182 = vmatprep.mubr.bf16.mxu1 %v10385_v23  ;;  %5421 = vmatpush2.bf16.msra.mxu1 %v8243_v6  ;;  %v3090_v6 = vld [vmem:[%s15323_s4 + $0x138] sm:$0xff] }
 0x324   : > { %5422 = vmatprep.subr.bf16.mxu1 %v8236_v55  ;;  %v8213_v55 = vcombine.low %v3222_v48, %v3226_v53  ;;  %v3218_v11 = vld [vmem:[%s15323_s4 + $0x538] sm:$0xff] }
 0x325   : > { %5262 = vmatpush2.bf16.msra.mxu0 %v8107_v19  ;;  %v3078_v12 = vld [vmem:[%s15323_s4 + $0xd8] sm:$0xff] }
 0x326   : > { %5553 = vmatprep.subr.bf16.mxu0 %v8102_v56  ;;  %v9200_v56 = vld [vmem:[#allocation2 + $0x8] sm:$0xff]   ;;  %v3202_v46 = vld [vmem:[%s15323_s4 + $0x4b8] sm:$0xff] }
 0x327   : > { %5423 = vmatpush2.bf16.msra.mxu1 %v8235_v40 }
 0x328   : > { %5022 = vmatmul.mubr.bf16.gmra.mxu0 %v10413_v14  ;;  %5714 = vmatprep.subr.bf16.mxu1 %v8230_v51  ;;  %v8078_v51 = vcombine.high %v3086_v31, %v3090_v6 }
 0x329   : > { %5031 = vmatprep.mubr.bf16.mxu0 %v10419_v37 }
 0x32a   : > { %5183 = vmatmul.mubr.bf16.gmra.mxu1 %v10417_v25 }
 0x32b   : > { %5192 = vmatprep.mubr.bf16.mxu1 %v10421_v10 }
 0x330   : > { %5032 = vmatmul.mubr.bf16.gmra.mxu0 %v10427_v63 }
 0x331   : > { %5041 = vmatprep.mubr.bf16.mxu0 %v10431_v3 }
 0x332   : > { %5193 = vmatmul.mubr.bf16.gmra.mxu1 %v10429_v27 }
 0x333   : > { %5202 = vmatprep.mubr.bf16.mxu1 %v10433_v17 }
 0x338   : > { %5042 = vmatmul.mubr.bf16.gmra.mxu0 %v10439_v29 }
 0x339   : > { %5051 = vmatprep.mubr.bf16.mxu0 %v10443_v45  ;;  %v15565_v45 = vld [vmem:[#allocation3_spill] sm:$0xff] }
 0x33a   : > { %5203 = vmatmul.mubr.bf16.gmra.mxu1 %v10441_v36 }
 0x33b   : > { %5212 = vmatprep.mubr.bf16.mxu1 %v10445_v15 }
 0x340   : > { %v10727_v23 = vpop.f32.mrf.mxu0  ;;  %5052 = vmatmul.mubr.bf16.gmra.mxu0 %v10451_v58  ;;  %v15566_v58 = vld [vmem:[#allocation4_spill] sm:$0xff] }
 0x341   : > { %5061 = vmatprep.mubr.bf16.mxu0 %v10455_v57 }
 0x342   : > { %v10730_v14 = vpop.f32.mrf.mxu1  ;;  %5213 = vmatmul.mubr.bf16.gmra.mxu1 %v10453_v22  ;;  %v4623_v25 = vpop.f32.mrf.mxu0  ;;  %v15567_v22 = vld [vmem:[#allocation5_spill] sm:$0xff] }
 0x343   : > { %5222 = vmatprep.mubr.bf16.mxu1 %v10457_v13  ;;  %v15568_v13 = vld [vmem:[#allocation6_spill] sm:$0xff] }
 0x344   : > { %v4784_v37 = vpop.f32.mrf.mxu1  ;;  %v10737_v63 = vpop.f32.mrf.mxu0 }
 0x345   : > { %v10735_v10 = vadd.f32 %v4784_v37, %v4623_v25  ;;  %v3082_v25 = vld [vmem:[%s15323_s4 + $0xf8] sm:$0xff] }
 0x346   : > { %v10739_v27 = vpop.f32.mrf.mxu1  ;;  %v4627_v3 = vpop.f32.mrf.mxu0  ;;  %v3206_v37 = vld [vmem:[%s15323_s4 + $0x4d8] sm:$0xff]  ;;  %v8070_v44 = vcombine.high %v3078_v12, %v3082_v25  ;;  %v8069_v53 = vcombine.low %v3078_v12, %v3082_v25 }
 0x347   : > { %15563 = vst [vmem:[#allocation7_spill] sm:$0xff] %v10735_v10  ;;  %v10882_v12 = vld [vmem:[%s15323_s4 + $0x18] sm:$0xff] }
 0x348   : > { %v4788_v17 = vpop.f32.mrf.mxu1  ;;  %v10743_v36 = vpop.f32.mrf.mxu0  ;;  %5062 = vmatmul.mubr.bf16.gmra.mxu0 %v15565_v45  ;;  %v9201_v45 = vld [vmem:[#allocation2 + $0xd0] sm:$0xff]   ;;  %v10894_v25 = vld [vmem:[%s15323_s4 + $0x418] sm:$0xff] }
 0x349   : > { %v10741_v29 = vadd.f32 %v4788_v17, %v4627_v3  ;;  %5263 = vmatprep.mubr.bf16.mxu0 %v15567_v22  ;;  %v3210_v3 = vld [vmem:[%s15323_s4 + $0x4f8] sm:$0xff]  ;;  %v8206_v22 = vcombine.high %v3214_v21, %v3218_v11 }
 0x34a   : > { %v10746_v15 = vpop.f32.mrf.mxu1  ;;  %5223 = vmatmul.mubr.bf16.gmra.mxu1 %v15566_v58  ;;  %v4633_v57 = vpop.f32.mrf.mxu0  ;;  %v8077_v58 = vcombine.low %v3086_v31, %v3090_v6 }
 0x34b   : > { %15564 = vst [vmem:[#allocation8_spill] sm:$0xff] %v10741_v29  ;;  %5424 = vmatprep.mubr.bf16.mxu1 %v15568_v13  ;;  %v8205_v13 = vcombine.low %v3214_v21, %v3218_v11  ;;  %v10872_v11 = vld [vmem:[%s15323_s4 + $0x458] sm:$0xff] }
 0x34c   : > { %v4794_v0 = vpop.f32.mrf.mxu1  ;;  %v10753_v50 = vpop.f32.mrf.mxu0 }
 0x34d   : > { %v10751_v8 = vadd.f32 %v4794_v0, %v4633_v57 }
 0x34e   : > { %v10755_v39 = vpop.f32.mrf.mxu1  ;;  %v4637_v32 = vpop.f32.mrf.mxu0 }
 0x34f   : > { %15569 = vst [vmem:[#allocation3_spill] sm:$0xff] %v10751_v8 }
 0x350   : > { %v4798_v2 = vpop.f32.mrf.mxu1  ;;  %v10778_v4 = vpop.f32.mrf.mxu0  ;;  %5264 = vmatmul.mubr.bf16.vlgmr.msra.gmra.mxu0 %v9196_v54 }
 0x351   : > { %v10776_v49 = vadd.f32 %v4798_v2, %v4637_v32  ;;  %5554 = vmatpush1.bf16.msra.mxu0 %v8101_v33  ;;  %5273 = vmatprep.mubr.bf16.mxu0 %v9198_v20  ;;  %v9202_v33 = vld [vmem:[#allocation2 + $0x74] sm:$0xff]   ;;  %v8198_v32 = vcombine.high %v3206_v37, %v3210_v3  ;;  %v9206_v20 = vld [vmem:[#allocation2 + $0x7c] sm:$0xff]  }
 0x352   : > { %v10789_v5 = vpop.f32.mrf.mxu1  ;;  %5425 = vmatmul.mubr.bf16.vlgmr.msra.gmra.mxu1 %v9197_v7  ;;  %v4643_v60 = vpop.f32.mrf.mxu0  ;;  %5555 = vmatprep.subr.bf16.mxu0 %v8094_v16  ;;  %v3070_v2 = vld [vmem:[%s15323_s4 + $0x98] sm:$0xff]  ;;  %v8197_v7 = vcombine.low %v3206_v37, %v3210_v3 }
 0x353   : > { %15570 = vst [vmem:[#allocation4_spill] sm:$0xff] %v10776_v49  ;;  %5715 = vmatpush1.bf16.msra.mxu1 %v8229_v47  ;;  %5434 = vmatprep.mubr.bf16.mxu1 %v9199_v59  ;;  %v3198_v16 = vld [vmem:[%s15323_s4 + $0x498] sm:$0xff]  ;;  %v8061_v31 = vcombine.low %v3070_v2, %v3074_v43 }
 0x354   : > { %v4804_v38 = vpop.f32.mrf.mxu1  ;;  %v10793_v1 = vpop.f32.mrf.mxu0  ;;  %5716 = vmatprep.subr.bf16.mxu1 %v8222_v42  ;;  %v9204_v42 = vld [vmem:[#allocation2 + $0x10] sm:$0xff]   ;;  %v8190_v59 = vcombine.high %v3198_v16, %v3202_v46  ;;  %v8189_v6 = vcombine.low %v3198_v16, %v3202_v46  ;;  %v10899_v37 = vld [vmem:[%s15323_s4 + $0x438] sm:$0xff] }
 0x355   : > { %v10791_v62 = vadd.f32 %v4804_v38, %v4643_v60  ;;  %5556 = vmatpush1.bf16.msra.mxu0 %v8093_v52  ;;  %v8062_v60 = vcombine.high %v3070_v2, %v3074_v43  ;;  %v9205_v38 = vld [vmem:[#allocation2 + $0xd8] sm:$0xff]  }
 0x356   : > { %v10795_v35 = vpop.f32.mrf.mxu1  ;;  %v4647_v61 = vpop.f32.mrf.mxu0  ;;  %5557 = vmatprep.subr.bf16.mxu0 %v8086_v28  ;;  %v10941_v2 = vld [vmem:[%s15323_s4 + $0x3b8] sm:$0xff] }
 0x357   : > { %15571 = vst [vmem:[#allocation5_spill] sm:$0xff] %v10791_v62  ;;  %5717 = vmatpush1.bf16.msra.mxu1 %v8221_v26  ;;  %v9208_v16 = vld [vmem:[#allocation2 + $0x18] sm:$0xff]  }
 0x358   : > { %v4808_v30 = vpop.f32.mrf.mxu1  ;;  %5718 = vmatprep.subr.bf16.mxu1 %v8214_v18  ;;  %v10814_v40 = vpop.f32.mrf.mxu0  ;;  %5274 = vmatmul.mubr.bf16.gmra.mxu0 %v9200_v56  ;;  %v9207_v18 = vld [vmem:[#allocation2 + $0x144] sm:$0xff]   ;;  %v11028_v46 = vld [vmem:[%s15323_s4 + $0x718] sm:$0xff] }
 0x359   : > { %v10812_v19 = vadd.f32 %v4808_v30, %v4647_v61  ;;  %5558 = vmatpush1.bf16.msra.mxu0 %v8085_v24  ;;  %5283 = vmatprep.mubr.bf16.mxu0 %v9202_v33  ;;  %v10860_v61 = vld [vmem:[%s15323_s4 + $0x58] sm:$0xff] }
 0x35a   : > { %v10825_v17 = vpop.f32.mrf.mxu1  ;;  %5435 = vmatmul.mubr.bf16.gmra.mxu1 %v9201_v45  ;;  %v4653_v57 = vpop.f32.mrf.mxu0  ;;  %5559 = vmatprep.subr.bf16.mxu0 %v8078_v51  ;;  %v10877_v30 = vld [vmem:[%s15323_s4 + $0x478] sm:$0xff] }
 0x35b   : > { %15572 = vst [vmem:[#allocation6_spill] sm:$0xff] %v10812_v19  ;;  %5719 = vmatpush1.bf16.msra.mxu1 %v8213_v55  ;;  %5444 = vmatprep.mubr.bf16.mxu1 %v9203_v41  ;;  %v10865_v55 = vld [vmem:[%s15323_s4 + $0x78] sm:$0xff]  ;;  %v8181_v33 = vcombine.low %v10872_v11, %v10877_v30  ;;  %v8182_v41 = vcombine.high %v10872_v11, %v10877_v30 }
 0x35c   : > { %v4814_v0 = vpop.f32.mrf.mxu1  ;;  %v10829_v9 = vpop.f32.mrf.mxu0  ;;  %5720 = vmatprep.subr.bf16.mxu1 %v8206_v22  ;;  %v10889_v51 = vld [vmem:[%s15323_s4 + $0x38] sm:$0xff]  ;;  %v8053_v45 = vcombine.low %v10860_v61, %v10865_v55 }
 0x35d   : > { %v10827_v47 = vadd.f32 %v4814_v0, %v4653_v57  ;;  %5560 = vmatpush1.bf16.msra.mxu0 %v8077_v58  ;;  %v10908_v58 = vld [vmem:[%s15323_s4 + $0x3d8] sm:$0xff]  ;;  %v8054_v0 = vcombine.high %v10860_v61, %v10865_v55  ;;  %v11019_v61 = vadd.f32 %v10746_v15, %v10743_v36 }
 0x35e   : > { %v10831_v34 = vpop.f32.mrf.mxu1  ;;  %v10839_v54 = vpop.f32.mrf.mxu0  ;;  %5561 = vmatprep.subr.bf16.mxu0 %v8070_v44  ;;  %v10913_v22 = vld [vmem:[%s15323_s4 + $0x3f8] sm:$0xff] }
 0x35f   : > { %15573 = vst [vmem:[#allocation9_spill] sm:$0xff] %v10827_v47  ;;  %5721 = vmatpush1.bf16.msra.mxu1 %v8205_v13  ;;  %v10918_v57 = vld [vmem:[%s15323_s4 + $0x7d8] sm:$0xff]  ;;  %15580 = vst [vmem:[#allocation16_spill] sm:$0xff] %v11019_v61 }
 0x360   : > { %v10847_v48 = vpop.f32.mrf.mxu1  ;;  %5722 = vmatprep.subr.bf16.mxu1 %v8198_v32  ;;  %v10849_v52 = vpop.f32.mrf.mxu0  ;;  %5284 = vmatmul.mubr.bf16.gmra.mxu0 %v9204_v42  ;;  %v10931_v44 = vld [vmem:[%s15323_s4 + $0x7f8] sm:$0xff]  ;;  %v8174_v42 = vcombine.high %v10894_v25, %v10899_v37 }
 0x361   : > { %5293 = vmatprep.mubr.bf16.mxu0 %v9206_v20  ;;  %5562 = vmatpush1.bf16.msra.mxu0 %v8069_v53  ;;  %v10936_v32 = vld [vmem:[%s15323_s4 + $0x398] sm:$0xff]  ;;  %v8046_v53 = vcombine.high %v10882_v12, %v10889_v51 }
 0x362   : > { %v10851_v26 = vpop.f32.mrf.mxu1  ;;  %5445 = vmatmul.mubr.bf16.gmra.mxu1 %v9205_v38  ;;  %v10853_v28 = vpop.f32.mrf.mxu0  ;;  %5563 = vmatprep.subr.bf16.mxu0 %v8062_v60  ;;  %v10956_v60 = vld [vmem:[%s15323_s4 + $0x798] sm:$0xff] }
 0x363   : > { %5454 = vmatprep.mubr.bf16.mxu1 %v9207_v18  ;;  %5723 = vmatpush1.bf16.msra.mxu1 %v8197_v7  ;;  %v10961_v38 = vld [vmem:[%s15323_s4 + $0x7b8] sm:$0xff] }
 0x364   : > { %v10855_v24 = vpop.f32.mrf.mxu1  ;;  %v10867_v21 = vpop.f32.mrf.mxu0  ;;  %5724 = vmatprep.subr.bf16.mxu1 %v8190_v59  ;;  %v10966_v20 = vld [vmem:[%s15323_s4 + $0x358] sm:$0xff]  ;;  %v10970_v59 = vadd.f32 %v10739_v27, %v10737_v63 }
 0x365   : > { %5564 = vmatpush1.bf16.msra.mxu0 %v8061_v31  ;;  %v9209_v31 = vld [vmem:[#allocation2 + $0xe0] sm:$0xff]   ;;  %v10981_v11 = vld [vmem:[%s15323_s4 + $0x378] sm:$0xff] }
 0x366   : > { %v10884_v56 = vpop.f32.mrf.mxu1  ;;  %v10901_v3 = vpop.f32.mrf.mxu0  ;;  %15575 = vst [vmem:[#allocation11_spill] sm:$0xff] %v10970_v59  ;;  %v10986_v63 = vld [vmem:[%s15323_s4 + $0x758] sm:$0xff]  ;;  %5565 = vmatprep.subr.bf16.mxu0 %v8054_v0  ;;  %v6139_v36 = vmul.f32 %v10970_v59, %v10970_v59 }
 0x367   : > { %5725 = vmatpush1.bf16.msra.mxu1 %v8189_v6  ;;  %v9210_v6 = vld [vmem:[#allocation2 + $0x84] sm:$0xff]   ;;  %v10991_v27 = vld [vmem:[%s15323_s4 + $0x778] sm:$0xff] }
 0x368   : > { %v10920_v13 = vpop.f32.mrf.mxu1  ;;  %v10943_v43 = vpop.f32.mrf.mxu0  ;;  %5294 = vmatmul.mubr.bf16.gmra.mxu0 %v9208_v16  ;;  %v9211_v16 = vld [vmem:[#allocation2 + $0x14c] sm:$0xff]   ;;  %v11006_v7 = vld [vmem:[%s15323_s4 + $0x318] sm:$0xff]  ;;  %5726 = vmatprep.subr.bf16.mxu1 %v8182_v41 }
 0x369   : > { %15574 = vst [vmem:[#allocation10_spill] sm:$0xff] %v10943_v43  ;;  %5303 = vmatprep.mubr.bf16.mxu0 %v9210_v6  ;;  %15578 = vst [vmem:[#allocation14_spill] sm:$0xff] %v11006_v7  ;;  %5566 = vmatpush1.bf16.msra.mxu0 %v8053_v45  ;;  %v11048_v55 = vld [vmem:[%s15323_s4 + $0x2d8] sm:$0xff]  ;;  %v6148_v7 = vmul.f32 %v10751_v8, %v10751_v8 }
 0x36a   : > { %v10972_v18 = vpop.f32.mrf.mxu1  ;;  %5455 = vmatmul.mubr.bf16.gmra.mxu1 %v9209_v31  ;;  %v10993_v30 = vpop.f32.mrf.mxu0  ;;  %v11015_v31 = vadd.f32 %v10730_v14, %v10727_v23  ;;  %v11033_v23 = vld [vmem:[%s15323_s4 + $0x738] sm:$0xff]  ;;  %15584 = vst [vmem:[#allocation20_spill] sm:$0xff] %v11048_v55  ;;  %5567 = vmatprep.subr.bf16.mxu0 %v8046_v53  ;;  %v11077_v53 = vadd.f32 %v10755_v39, %v10753_v50 }
 0x36b   : > { %15576 = vst [vmem:[#allocation12_spill] sm:$0xff] %v10972_v18  ;;  %15577 = vst [vmem:[#allocation13_spill] sm:$0xff] %v10993_v30  ;;  %5464 = vmatprep.mubr.bf16.mxu1 %v9211_v16  ;;  %v11011_v16 = vld [vmem:[%s15323_s4 + $0x338] sm:$0xff]  ;;  %5727 = vmatpush1.bf16.msra.mxu1 %v8181_v33  ;;  %v6140_v33 = vmul.f32 %v10741_v29, %v10741_v29  ;;  %v6147_v18 = vmul.f32 %v11019_v61, %v11019_v61 }
 0x36c   : > { %15579 = vst [vmem:[#allocation15_spill] sm:$0xff] %v11011_v16  ;;  %v11021_v6 = vpop.f32.mrf.mxu1  ;;  %15582 = vst [vmem:[#allocation18_spill] sm:$0xff] %v11033_v23  ;;  %v11035_v14 = vpop.f32.mrf.mxu0  ;;  %v11053_v45 = vld [vmem:[%s15323_s4 + $0x2f8] sm:$0xff]  ;;  %5728 = vmatprep.subr.bf16.mxu1 %v8174_v42  ;;  %v6131_v30 = vmul.f32 %v11015_v31, %v11015_v31  ;;  %v6132_v42 = vmul.f32 %v10735_v10, %v10735_v10  ;;  %v6155_v23 = vmul.f32 %v11077_v53, %v11077_v53 }
 0x36d   : > { %15581 = vst [vmem:[#allocation17_spill] sm:$0xff] %v11021_v6  ;;  %15583 = vst [vmem:[#allocation19_spill] sm:$0xff] %v11035_v14  ;;  %v11066_v14 = vld [vmem:[%s15323_s4 + $0x6d8] sm:$0xff] }
 0x36e   : > { %15585 = vst [vmem:[#allocation21_spill] sm:$0xff] %v11053_v45  ;;  %v11057_v15 = vpop.f32.mrf.mxu1  ;;  %15587 = vst [vmem:[#allocation23_spill] sm:$0xff] %v11066_v14  ;;  %v11071_v6 = vld [vmem:[%s15323_s4 + $0x6f8] sm:$0xff]  ;;  %v11079_v41 = vpop.f32.mrf.mxu0  ;;  %v6331_v16 = vadd.f32 %v6139_v36, %v6131_v30  ;;  %v5906_v14 = vadd.f32 %v10741_v29, %v10735_v10  ;;  %v6362_v55 = vadd.f32 %v6140_v33, %v6132_v42 }
 0x36f   : > { %15586 = vst [vmem:[#allocation22_spill] sm:$0xff] %v11057_v15  ;;  %15588 = vst [vmem:[#allocation24_spill] sm:$0xff] %v11071_v6  ;;  %v9212_v15 = vld [vmem:[#allocation2 + $0x20] sm:$0xff]   ;;  %v11108_v39 = vld [vmem:[%s15323_s4 + $0x298] sm:$0xff] }
 0x370   : > { %15589 = vst [vmem:[#allocation25_spill] sm:$0xff] %v11077_v53  ;;  %v11089_v43 = vpop.f32.mrf.mxu1  ;;  %v11097_v0 = vpop.f32.mrf.mxu0  ;;  %5304 = vmatmul.mubr.bf16.gmra.mxu0 %v9212_v15  ;;  %v11113_v50 = vld [vmem:[%s15323_s4 + $0x2b8] sm:$0xff]  ;;  %v5875_v15 = vadd.f32 %v10970_v59, %v11015_v31  ;;  %v9214_v6 = vld [vmem:[#allocation2 + $0x8c] sm:$0xff]   ;;  %v11127_v59 = vadd.f32 %v10789_v5, %v10778_v4  ;;  %v6332_v42 = vadd.f32 %v6331_v16, %v6147_v18 }
 0x371   : > { %15590 = vst [vmem:[#allocation26_spill] sm:$0xff] %v11089_v43  ;;  %v9213_v43 = vld [vmem:[#allocation2 + $0xe8] sm:$0xff]   ;;  %5313 = vmatprep.mubr.bf16.mxu0 %v9214_v6  ;;  %v9215_v36 = vld [vmem:[#allocation2 + $0x154] sm:$0xff]   ;;  %v15591_v4 = vcombine.low %v10882_v12, %v10889_v51  ;;  %v15592_v5 = vcombine.low %v10894_v25, %v10899_v37  ;;  %v5907_v12 = vadd.f32 %v5906_v14, %v10751_v8 }
 0x372   : > { %v11119_v45 = vpop.f32.mrf.mxu1  ;;  %5465 = vmatmul.mubr.bf16.gmra.mxu1 %v9213_v43  ;;  %v11129_v30 = vpop.f32.mrf.mxu0  ;;  %v11134_v43 = vld [vmem:[%s15323_s4 + $0x698] sm:$0xff]  ;;  %v5876_v33 = vadd.f32 %v5875_v15, %v11019_v61  ;;  %v6156_v51 = vmul.f32 %v10776_v49, %v10776_v49  ;;  %v11167_v25 = vadd.f32 %v10795_v35, %v10793_v1  ;;  %v15593_v16 = vcombine.high %v10908_v58, %v10913_v22  ;;  %v9216_v61 = vld [vmem:[#allocation2 + $0x28] sm:$0xff]  }
 0x373   : > { %5474 = vmatprep.mubr.bf16.mxu1 %v9215_v36  ;;  %v11139_v6 = vld [vmem:[%s15323_s4 + $0x6b8] sm:$0xff]  ;;  %5568 = vmatpush1.bf16.msra.mxu0 %v15591_v4  ;;  %v6363_v4 = vadd.f32 %v6362_v55, %v6148_v7  ;;  %v15594_v36 = vcombine.high %v10918_v57, %v10931_v44  ;;  %v6333_v55 = vadd.f32 %v6332_v42, %v6155_v23 }
 0x374   : > { %v11142_v29 = vpop.f32.mrf.mxu1  ;;  %5729 = vmatpush1.bf16.msra.mxu1 %v15592_v5  ;;  %v11155_v10 = vld [vmem:[%s15323_s4 + $0x258] sm:$0xff]  ;;  %v11169_v37 = vpop.f32.mrf.mxu0  ;;  %5569 = vmatprep.subr.bf16.mxu0 %v15593_v16  ;;  %v5877_v5 = vadd.f32 %v5876_v33, %v11077_v53  ;;  %v6163_v33 = vmul.f32 %v11127_v59, %v11127_v59  ;;  %v5908_v35 = vadd.f32 %v5907_v12, %v10776_v49 }
 0x375   : > { %v11160_v18 = vld [vmem:[%s15323_s4 + $0x278] sm:$0xff]  ;;  %5730 = vmatprep.subr.bf16.mxu1 %v15594_v36  ;;  %v11200_v36 = vadd.f32 %v10825_v17, %v10814_v40  ;;  %v6164_v8 = vmul.f32 %v10791_v62, %v10791_v62  ;;  %v15595_v23 = vcombine.low %v10908_v58, %v10913_v22  ;;  %v15596_v40 = vcombine.low %v10918_v57, %v10931_v44 }
 0x376   : > { %v11177_v14 = vpop.f32.mrf.mxu1  ;;  %v11189_v16 = vld [vmem:[%s15323_s4 + $0x658] sm:$0xff]  ;;  %v11202_v1 = vpop.f32.mrf.mxu0  ;;  %v6364_v42 = vadd.f32 %v6363_v4, %v6156_v51  ;;  %v6171_v12 = vmul.f32 %v11167_v25, %v11167_v25  ;;  %v11223_v15 = vadd.f32 %v10831_v34, %v10829_v9  ;;  %v5878_v22 = vadd.f32 %v5877_v5, %v11127_v59  ;;  %v9217_v51 = vld [vmem:[#allocation2 + $0xf0] sm:$0xff]  }
 0x377   : > { %v11194_v7 = vld [vmem:[%s15323_s4 + $0x678] sm:$0xff]  ;;  %5570 = vmatpush2.bf16.msra.mxu0 %v15595_v23  ;;  %v6172_v57 = vmul.f32 %v10812_v19, %v10812_v19  ;;  %v6334_v34 = vadd.f32 %v6333_v55, %v6163_v33  ;;  %v6179_v23 = vmul.f32 %v11200_v36, %v11200_v36  ;;  %v11241_v5 = vadd.f32 %v10847_v48, %v10839_v54 }
 0x378   : > { %v11209_v53 = vpop.f32.mrf.mxu1  ;;  %5731 = vmatpush2.bf16.msra.mxu1 %v15596_v40  ;;  %v11225_v49 = vpop.f32.mrf.mxu0  ;;  %5314 = vmatmul.mubr.bf16.gmra.mxu0 %v9216_v61  ;;  %v9218_v4 = vld [vmem:[#allocation2 + $0x94] sm:$0xff]   ;;  %v5909_v61 = vadd.f32 %v5908_v35, %v10791_v62  ;;  %v9219_v58 = vld [vmem:[#allocation2 + $0x15c] sm:$0xff]   ;;  %v11248_v17 = vadd.f32 %v10851_v26, %v10849_v52  ;;  %v15599_v35 = vcombine.high %v10936_v32, %v10941_v2 }
 0x379   : > { %5323 = vmatprep.mubr.bf16.mxu0 %v9218_v4  ;;  %15597 = vst [vmem:[#allocation27_spill] sm:$0xff] %v11241_v5  ;;  %v5879_v4 = vadd.f32 %v5878_v22, %v11167_v25  ;;  %v15600_v54 = vcombine.high %v10956_v60, %v10961_v38  ;;  %v6335_v48 = vadd.f32 %v6334_v34, %v6171_v12  ;;  %v11274_v12 = vld [vmem:[%s15323_s4 + $0x218] sm:$0xff] }
 0x37a   : > { %v11232_v44 = vpop.f32.mrf.mxu1  ;;  %5475 = vmatmul.mubr.bf16.gmra.mxu1 %v9217_v51  ;;  %v11243_v40 = vpop.f32.mrf.mxu0  ;;  %v6365_v51 = vadd.f32 %v6364_v42, %v6164_v8  ;;  %15598 = vst [vmem:[#allocation28_spill] sm:$0xff] %v11248_v17  ;;  %5571 = vmatprep.subr.bf16.mxu0 %v15599_v35  ;;  %v6180_v8 = vmul.f32 %v10827_v47, %v10827_v47 }
 0x37b   : > { %5484 = vmatprep.mubr.bf16.mxu1 %v9219_v58  ;;  %5732 = vmatprep.subr.bf16.mxu1 %v15600_v54  ;;  %v6187_v33 = vmul.f32 %v11223_v15, %v11223_v15  ;;  %v11264_v52 = vadd.f32 %v10855_v24, %v10853_v28  ;;  %v15601_v42 = vcombine.low %v10936_v32, %v10941_v2  ;;  %v11279_v58 = vld [vmem:[%s15323_s4 + $0x238] sm:$0xff] }
 0x37c   : > { %v11250_v55 = vpop.f32.mrf.mxu1  ;;  %v11266_v26 = vpop.f32.mrf.mxu0  ;;  %v5910_v22 = vadd.f32 %v5909_v61, %v10812_v19  ;;  %v6366_v28 = vadd.f32 %v6365_v51, %v6172_v57  ;;  %v11284_v24 = vadd.f32 %v10884_v56, %v10867_v21  ;;  %v15602_v32 = vcombine.low %v10956_v60, %v10961_v38  ;;  %v15606_v51 = vld [vmem:[#allocation10_spill] sm:$0xff] }
 0x37d   : > { %5572 = vmatpush2.bf16.msra.mxu0 %v15601_v42  ;;  %v15603_v2 = vcombine.high %v10966_v20, %v10981_v11  ;;  %v5880_v35 = vadd.f32 %v5879_v4, %v11200_v36  ;;  %v6336_v54 = vadd.f32 %v6335_v48, %v6179_v23  ;;  %v6188_v57 = vmul.f32 %v11241_v5, %v11241_v5  ;;  %v15607_v23 = vld [vmem:[#allocation12_spill] sm:$0xff] }
 0x37e   : > { %v11286_v34 = vpop.f32.mrf.mxu1  ;;  %5733 = vmatpush2.bf16.msra.mxu1 %v15602_v32  ;;  %v11299_v21 = vadd.f32 %v10920_v13, %v10901_v3  ;;  %v11301_v56 = vpop.f32.mrf.mxu0  ;;  %v15605_v60 = vcombine.high %v10986_v63, %v10991_v27  ;;  %v5911_v38 = vadd.f32 %v5910_v22, %v10827_v47  ;;  %v6195_v61 = vmul.f32 %v11248_v17, %v11248_v17  ;;  %v15609_v47 = vld [vmem:[#allocation17_spill] sm:$0xff]  ;;  %v15611_v3 = vld [vmem:[#allocation22_spill] sm:$0xff] }
 0x37f   : > { %5573 = vmatprep.subr.bf16.mxu0 %v15603_v2  ;;  %v11311_v4 = vadd.f32 %v15607_v23, %v15606_v51  ;;  %v6367_v13 = vadd.f32 %v6366_v28, %v6180_v8  ;;  %v5881_v42 = vadd.f32 %v5880_v35, %v11223_v15  ;;  %v6337_v32 = vadd.f32 %v6336_v54, %v6187_v33  ;;  %v15608_v23 = vld [vmem:[#allocation13_spill] sm:$0xff]  ;;  %v9221_v28 = vld [vmem:[#allocation2 + $0xf8] sm:$0xff]  }
 0x380   : > { %15604 = vst [vmem:[#allocation29_spill] sm:$0xff] %v11299_v21  ;;  %5734 = vmatprep.subr.bf16.mxu1 %v15605_v60  ;;  %v11313_v48 = vpop.f32.mrf.mxu1  ;;  %v6196_v2 = vmul.f32 %v11264_v52, %v11264_v52  ;;  %v11320_v22 = vpop.f32.mrf.mxu0  ;;  %v9220_v60 = vld [vmem:[#allocation2 + $0x30] sm:$0xff]   ;;  %v5912_v9 = vadd.f32 %v5911_v38, %v11241_v5  ;;  %v6203_v51 = vmul.f32 %v11284_v24, %v11284_v24  ;;  %v9222_v33 = vld [vmem:[#allocation2 + $0x9c] sm:$0xff]  }
 0x381   : > { %5324 = vmatmul.mubr.bf16.gmra.mxu0 %v9220_v60  ;;  %v11327_v19 = vadd.f32 %v15609_v47, %v15608_v23  ;;  %v6368_v35 = vadd.f32 %v6367_v13, %v6188_v57  ;;  %v5882_v54 = vadd.f32 %v5881_v42, %v11248_v17  ;;  %v6204_v60 = vmul.f32 %v11299_v21, %v11299_v21  ;;  %v15610_v38 = vld [vmem:[#allocation19_spill] sm:$0xff]  ;;  %v9223_v47 = vld [vmem:[#allocation2 + $0x164] sm:$0xff]  }
 0x382   : > { %v11329_v8 = vpop.f32.mrf.mxu1  ;;  %5485 = vmatmul.mubr.bf16.gmra.mxu1 %v9221_v28  ;;  %5333 = vmatprep.mubr.bf16.mxu0 %v9222_v33  ;;  %v11336_v5 = vadd.f32 %v15611_v3, %v15610_v38  ;;  %v11338_v62 = vpop.f32.mrf.mxu0  ;;  %v6338_v23 = vadd.f32 %v6337_v32, %v6195_v61  ;;  %v6211_v28 = vmul.f32 %v11311_v4, %v11311_v4  ;;  %v15612_v33 = vld [vmem:[#allocation26_spill] sm:$0xff] }
 0x383   : > { %5494 = vmatprep.mubr.bf16.mxu1 %v9223_v47  ;;  %v11344_v57 = vadd.f32 %v15612_v33, %v11079_v41  ;;  %v15613_v42 = vcombine.low %v10966_v20, %v10981_v11  ;;  %v15614_v3 = vcombine.low %v10986_v63, %v10991_v27  ;;  %v5913_v38 = vadd.f32 %v5912_v9, %v11264_v52  ;;  %v15615_v41 = vld [vmem:[#allocation14_spill] sm:$0xff]  ;;  %v15616_v33 = vld [vmem:[#allocation15_spill] sm:$0xff] }
 0x384   : > { %v11346_v13 = vpop.f32.mrf.mxu1  ;;  %v6369_v61 = vadd.f32 %v6368_v35, %v6196_v2  ;;  %v11357_v32 = vadd.f32 %v11119_v45, %v11097_v0  ;;  %v11359_v47 = vpop.f32.mrf.mxu0  ;;  %v15617_v17 = vcombine.high %v15615_v41, %v15616_v33  ;;  %v5883_v11 = vadd.f32 %v5882_v54, %v11284_v24  ;;  %v15618_v45 = vld [vmem:[#allocation18_spill] sm:$0xff] }
 0x385   : > { %5574 = vmatpush2.bf16.msra.mxu0 %v15613_v42  ;;  %5735 = vmatpush2.bf16.msra.mxu1 %v15614_v3  ;;  %v6339_v63 = vadd.f32 %v6338_v23, %v6203_v51  ;;  %v6212_v27 = vmul.f32 %v11327_v19, %v11327_v19  ;;  %v11371_v9 = vadd.f32 %v11142_v29, %v11129_v30 }
 0x386   : > { %5575 = vmatprep.subr.bf16.mxu0 %v15617_v17  ;;  %v11373_v0 = vpop.f32.mrf.mxu1  ;;  %v15619_v2 = vcombine.high %v11028_v46, %v15618_v45  ;;  %v5914_v17 = vadd.f32 %v5913_v38, %v11299_v21  ;;  %v6370_v35 = vadd.f32 %v6369_v61, %v6204_v60  ;;  %v6219_v54 = vmul.f32 %v11336_v5, %v11336_v5  ;;  %v11385_v23 = vpop.f32.mrf.mxu0 }
 0x387   : > { %v11383_v51 = vadd.f32 %v11177_v14, %v11169_v37  ;;  %v5884_v29 = vadd.f32 %v5883_v11, %v11311_v4  ;;  %v6340_v30 = vadd.f32 %v6339_v63, %v6211_v28  ;;  %v6220_v42 = vmul.f32 %v11344_v57, %v11344_v57 }
 0x388   : > { %5736 = vmatprep.subr.bf16.mxu1 %v15619_v2  ;;  %v11390_v3 = vpop.f32.mrf.mxu1  ;;  %v15620_v60 = vcombine.low %v15615_v41, %v15616_v33  ;;  %v15621_v38 = vcombine.low %v11028_v46, %v15618_v45  ;;  %v5915_v37 = vadd.f32 %v5914_v17, %v11327_v19  ;;  %v6227_v14 = vmul.f32 %v11357_v32, %v11357_v32  ;;  %v11409_v11 = vpop.f32.mrf.mxu0  ;;  %v9224_v41 = vld [vmem:[#allocation2 + $0x38] sm:$0xff]   ;;  %v9225_v2 = vld [vmem:[#allocation2 + $0x100] sm:$0xff]  }
 0x389   : > { %v11403_v28 = vadd.f32 %v11209_v53, %v11202_v1  ;;  %v11407_v61 = vadd.f32 %v11232_v44, %v11225_v49  ;;  %5334 = vmatmul.mubr.bf16.gmra.mxu0 %v9224_v41  ;;  %v6371_v33 = vadd.f32 %v6370_v35, %v6212_v27  ;;  %v5885_v46 = vadd.f32 %v5884_v29, %v11336_v5  ;;  %v9226_v17 = vld [vmem:[#allocation2 + $0xa4] sm:$0xff]   ;;  %v9227_v35 = vld [vmem:[#allocation2 + $0x16c] sm:$0xff]  }
 0x38a   : > { %5576 = vmatpush2.bf16.msra.mxu0 %v15620_v60  ;;  %5737 = vmatpush2.bf16.msra.mxu1 %v15621_v38  ;;  %v6228_v63 = vmul.f32 %v11371_v9, %v11371_v9  ;;  %v4872_v45 = vpop.f32.mrf.mxu1  ;;  %v6341_v53 = vadd.f32 %v6340_v30, %v6219_v54  ;;  %v5916_v1 = vadd.f32 %v5915_v37, %v11344_v57  ;;  %v4713_v27 = vpop.f32.mrf.mxu0  ;;  %v15625_v30 = vld [vmem:[#allocation20_spill] sm:$0xff]  ;;  %v15626_v37 = vld [vmem:[#allocation21_spill] sm:$0xff] }
 0x38b   : > { %15622 = vst [vmem:[#allocation10_spill] sm:$0xff] %v11403_v28  ;;  %5495 = vmatmul.mubr.bf16.gmra.mxu1 %v9225_v2  ;;  %5343 = vmatprep.mubr.bf16.mxu0 %v9226_v17  ;;  %v6235_v49 = vmul.f32 %v11383_v51, %v11383_v51  ;;  %v11419_v44 = vadd.f32 %v11250_v55, %v11243_v40  ;;  %v15628_v2 = vld [vmem:[#allocation23_spill] sm:$0xff]  ;;  %v15629_v17 = vld [vmem:[#allocation24_spill] sm:$0xff] }
 0x38c   : > { %5504 = vmatprep.mubr.bf16.mxu1 %v9227_v35  ;;  %v6372_v29 = vadd.f32 %v6371_v33, %v6220_v42  ;;  %v5886_v60 = vadd.f32 %v5885_v46, %v11357_v32  ;;  %v11424_v38 = vadd.f32 %v11286_v34, %v11266_v26  ;;  %v4874_v54 = vpop.f32.mrf.mxu1  ;;  %v15627_v41 = vcombine.high %v15625_v30, %v15626_v37  ;;  %v4715_v34 = vpop.f32.mrf.mxu0 }
 0x38d   : > { %15623 = vst [vmem:[#allocation12_spill] sm:$0xff] %v11419_v44  ;;  %v15630_v20 = vcombine.high %v15628_v2, %v15629_v17  ;;  %v6342_v40 = vadd.f32 %v6341_v53, %v6227_v14  ;;  %v6236_v55 = vmul.f32 %v11403_v28, %v11403_v28  ;;  %v6243_v42 = vmul.f32 %v11407_v61, %v11407_v61  ;;  %v11451_v14 = vld [vmem:[%s15323_s4 + $0x638] sm:$0xff] }
 0x38e   : > { %15624 = vst [vmem:[#allocation13_spill] sm:$0xff] %v11424_v38  ;;  %5577 = vmatprep.subr.bf16.mxu0 %v15627_v41  ;;  %v11438_v26 = vadd.f32 %v11313_v48, %v11301_v56  ;;  %v15631_v33 = vcombine.low %v15625_v30, %v15626_v37  ;;  %v5917_v46 = vadd.f32 %v5916_v1, %v11371_v9  ;;  %v4876_v48 = vpop.f32.mrf.mxu1 }
 0x38f   : > { %5738 = vmatprep.subr.bf16.mxu1 %v15630_v20  ;;  %v11446_v20 = vld [vmem:[%s15323_s4 + $0x618] sm:$0xff]  ;;  %v6373_v53 = vadd.f32 %v6372_v29, %v6228_v63  ;;  %v11456_v56 = vadd.f32 %v11329_v8, %v11320_v22  ;;  %v15633_v35 = vcombine.low %v15628_v2, %v15629_v17  ;;  %v15634_v30 = vcombine.high %v11108_v39, %v11113_v50  ;;  %v4717_v22 = vpop.f32.mrf.mxu0 }
 0x390   : > { %5578 = vmatpush2.bf16.msra.mxu0 %v15631_v33  ;;  %v5887_v37 = vadd.f32 %v5886_v60, %v11383_v51  ;;  %v6343_v41 = vadd.f32 %v6342_v40, %v6235_v49  ;;  %v6244_v1 = vmul.f32 %v11419_v44, %v11419_v44  ;;  %v11469_v63 = vadd.f32 %v11346_v13, %v11338_v62  ;;  %v4878_v60 = vpop.f32.mrf.mxu1  ;;  %v9231_v17 = vld [vmem:[#allocation2 + $0x174] sm:$0xff]  }
 0x391   : > { %15632 = vst [vmem:[#allocation17_spill] sm:$0xff] %v11456_v56  ;;  %5739 = vmatpush2.bf16.msra.mxu1 %v15633_v35  ;;  %5579 = vmatprep.subr.bf16.mxu0 %v15634_v30  ;;  %v15635_v8 = vcombine.high %v11134_v43, %v11139_v6  ;;  %v5918_v29 = vadd.f32 %v5917_v46, %v11403_v28  ;;  %v4721_v35 = vpop.f32.mrf.mxu0  ;;  %v9228_v46 = vld [vmem:[#allocation2 + $0x40] sm:$0xff]  }
 0x392   : > { %v6251_v2 = vmul.f32 %v11424_v38, %v11424_v38  ;;  %v11479_v49 = vadd.f32 %v11373_v0, %v11359_v47  ;;  %v6374_v62 = vadd.f32 %v6373_v53, %v6236_v55  ;;  %v5888_v13 = vadd.f32 %v5887_v37, %v11407_v61  ;;  %5344 = vmatmul.mubr.bf16.gmra.mxu0 %v9228_v46  ;;  %v9229_v55 = vld [vmem:[#allocation2 + $0x108] sm:$0xff]  }
 0x393   : > { %5740 = vmatprep.subr.bf16.mxu1 %v15635_v8  ;;  %v6344_v40 = vadd.f32 %v6343_v41, %v6243_v42  ;;  %v6252_v33 = vmul.f32 %v11438_v26, %v11438_v26  ;;  %v5919_v30 = vadd.f32 %v5918_v29, %v11419_v44  ;;  %v6259_v47 = vmul.f32 %v11456_v56, %v11456_v56  ;;  %v4882_v8 = vpop.f32.mrf.mxu1  ;;  %v9230_v53 = vld [vmem:[#allocation2 + $0xac] sm:$0xff]   ;;  %v4723_v46 = vpop.f32.mrf.mxu0 }
 0x394   : > { %15636 = vst [vmem:[#allocation19_spill] sm:$0xff] %v11479_v49  ;;  %v11491_v0 = vadd.f32 %v11390_v3, %v11385_v23  ;;  %5505 = vmatmul.mubr.bf16.gmra.mxu1 %v9229_v55  ;;  %5353 = vmatprep.mubr.bf16.mxu0 %v9230_v53  ;;  %v6375_v42 = vadd.f32 %v6374_v62, %v6244_v1 }
 0x395   : > { %v5889_v37 = vadd.f32 %v5888_v13, %v11424_v38  ;;  %v6260_v41 = vmul.f32 %v11469_v63, %v11469_v63  ;;  %v11497_v29 = vadd.f32 %v4872_v45, %v11409_v11  ;;  %5514 = vmatprep.mubr.bf16.mxu1 %v9231_v17  ;;  %v6345_v44 = vadd.f32 %v6344_v40, %v6251_v2  ;;  %v4884_v55 = vpop.f32.mrf.mxu1  ;;  %v4725_v2 = vpop.f32.mrf.mxu0  ;;  %v9250_v38 = vld [vmem:[#allocation2 + $0x6c] sm:$0xff]  }
 0x396   : > { %15637 = vst [vmem:[#allocation22_spill] sm:$0xff] %v11491_v0  ;;  %v6267_v23 = vmul.f32 %v11479_v49, %v11479_v49  ;;  %v11501_v3 = vadd.f32 %v4874_v54, %v4713_v27  ;;  %v15640_v1 = vcombine.low %v11108_v39, %v11113_v50  ;;  %v15641_v62 = vcombine.low %v11134_v43, %v11139_v6 }
 0x397   : > { %15638 = vst [vmem:[#allocation26_spill] sm:$0xff] %v11497_v29  ;;  %v5920_v11 = vadd.f32 %v5919_v30, %v11438_v26  ;;  %v6376_v45 = vadd.f32 %v6375_v42, %v6252_v33  ;;  %v11510_v13 = vadd.f32 %v4876_v48, %v4715_v34  ;;  %v15643_v17 = vcombine.high %v11155_v10, %v11160_v18  ;;  %v4886_v54 = vpop.f32.mrf.mxu1  ;;  %v4727_v53 = vpop.f32.mrf.mxu0 }
 0x398   : > { %15639 = vst [vmem:[#allocation14_spill] sm:$0xff] %v11501_v3  ;;  %5580 = vmatpush2.bf16.msra.mxu0 %v15640_v1  ;;  %5741 = vmatpush2.bf16.msra.mxu1 %v15641_v62  ;;  %v8238_v27 = vcombine.high %v11446_v20, %v11451_v14  ;;  %v5890_v50 = vadd.f32 %v5889_v37, %v11456_v56  ;;  %v9232_v62 = vld [vmem:[#allocation2 + $0x48] sm:$0xff]  }
 0x399   : > { %15642 = vst [vmem:[#allocation15_spill] sm:$0xff] %v11510_v13  ;;  %5581 = vmatprep.subr.bf16.mxu0 %v15643_v17  ;;  %v6346_v39 = vadd.f32 %v6345_v44, %v6259_v47  ;;  %v6268_v43 = vmul.f32 %v11491_v0, %v11491_v0  ;;  %v11520_v6 = vadd.f32 %v4878_v60, %v4717_v22  ;;  %v4888_v60 = vpop.f32.mrf.mxu1  ;;  %v4731_v1 = vpop.f32.mrf.mxu0  ;;  %v9252_v56 = vld [vmem:[#allocation2 + $0x8] sm:$0xff]  }
 0x39a   : > { %v15645_v34 = vcombine.high %v11189_v16, %v11194_v7  ;;  %v5921_v48 = vadd.f32 %v5920_v11, %v11469_v63  ;;  %v6377_v40 = vadd.f32 %v6376_v45, %v6260_v41  ;;  %v6275_v33 = vmul.f32 %v11497_v29, %v11497_v29  ;;  %5354 = vmatmul.mubr.bf16.gmra.mxu0 %v9232_v62  ;;  %v9234_v45 = vld [vmem:[#allocation2 + $0xb4] sm:$0xff]  }
 0x39b   : > { %15644 = vst [vmem:[#allocation18_spill] sm:$0xff] %v11520_v6  ;;  %v11528_v30 = vadd.f32 %v4882_v8, %v4721_v35  ;;  %v5891_v44 = vadd.f32 %v5890_v50, %v11479_v49  ;;  %v6347_v47 = vadd.f32 %v6346_v39, %v6267_v23  ;;  %v6276_v22 = vmul.f32 %v11501_v3, %v11501_v3  ;;  %v4733_v50 = vpop.f32.mrf.mxu0  ;;  %v9235_v39 = vld [vmem:[#allocation2 + $0x17c] sm:$0xff]   ;;  %v15682_v49 = vld [vmem:[#allocation27_spill] sm:$0xff] }
 0x39c   : > { %5742 = vmatprep.subr.bf16.mxu1 %v15645_v34  ;;  %v15647_v42 = vcombine.low %v11155_v10, %v11160_v18  ;;  %v15648_v37 = vcombine.low %v11189_v16, %v11194_v7  ;;  %v5922_v41 = vadd.f32 %v5921_v48, %v11491_v0  ;;  %v6283_v35 = vmul.f32 %v11510_v13, %v11510_v13  ;;  %v4892_v16 = vpop.f32.mrf.mxu1  ;;  %v9233_v7 = vld [vmem:[#allocation2 + $0x110] sm:$0xff]  }
 0x39d   : > { %15646 = vst [vmem:[#allocation20_spill] sm:$0xff] %v11528_v30  ;;  %v11542_v8 = vadd.f32 %v4884_v55, %v4723_v46  ;;  %v11544_v23 = vadd.f32 %v4886_v54, %v4725_v2  ;;  %v6378_v11 = vadd.f32 %v6377_v40, %v6268_v43  ;;  %v5892_v10 = vadd.f32 %v5891_v44, %v11497_v29 }
 0x39e   : > { %5582 = vmatpush2.bf16.msra.mxu0 %v15647_v42  ;;  %5743 = vmatpush2.bf16.msra.mxu1 %v15648_v37  ;;  %v6284_v18 = vmul.f32 %v11520_v6, %v11520_v6  ;;  %v6348_v17 = vadd.f32 %v6347_v47, %v6275_v33  ;;  %v5923_v46 = vadd.f32 %v5922_v41, %v11501_v3  ;;  %v4894_v48 = vpop.f32.mrf.mxu1 }
 0x39f   : > { %15649 = vst [vmem:[#allocation21_spill] sm:$0xff] %v11544_v23  ;;  %5515 = vmatmul.mubr.bf16.gmra.mxu1 %v9233_v7  ;;  %5363 = vmatprep.mubr.bf16.mxu0 %v9234_v45  ;;  %v6291_v55 = vmul.f32 %v11528_v30, %v11528_v30  ;;  %v11552_v2 = vadd.f32 %v4888_v60, %v4727_v53  ;;  %v7021_v7 = vlaneseq }
 0x3a0   : > { %5524 = vmatprep.mubr.bf16.mxu1 %v9235_v39  ;;  %v6379_v43 = vadd.f32 %v6378_v11, %v6276_v22  ;;  %v5893_v54 = vadd.f32 %v5892_v10, %v11510_v13  ;;  %v11555_v34 = vadd.f32 %v4892_v16, %v4731_v1  ;;  %v15652_v40 = vcombine.high %v11274_v12, %v11279_v58  ;;  %v4735_v22 = vpop.f32.mrf.mxu0  ;;  %v9251_v13 = vld [vmem:[#allocation2 + $0x134] sm:$0xff]  }
 0x3a1   : > { %15650 = vst [vmem:[#allocation23_spill] sm:$0xff] %v11552_v2  ;;  %5744 = vmatprep.subr.bf16.mxu1 %v8238_v27  ;;  %v6349_v33 = vadd.f32 %v6348_v17, %v6283_v35  ;;  %v5924_v44 = vadd.f32 %v5923_v46, %v11520_v6  ;;  %v6292_v53 = vmul.f32 %v11542_v8, %v11542_v8  ;;  %v4896_v27 = vpop.f32.mrf.mxu1 }
 0x3a2   : > { %15651 = vst [vmem:[#allocation24_spill] sm:$0xff] %v11555_v34  ;;  %5583 = vmatprep.subr.bf16.mxu0 %v15652_v40  ;;  %v6299_v47 = vmul.f32 %v11544_v23, %v11544_v23  ;;  %v15653_v60 = vcombine.low %v11274_v12, %v11279_v58  ;;  %v6380_v42 = vadd.f32 %v6379_v43, %v6284_v18  ;;  %v4737_v12 = vpop.f32.mrf.mxu0  ;;  %v9238_v40 = vld [vmem:[#allocation2 + $0xbc] sm:$0xff]  }
 0x3a3   : > { %v5894_v37 = vadd.f32 %v5893_v54, %v11528_v30  ;;  %v11569_v41 = vadd.f32 %v4894_v48, %v4733_v50  ;;  %v15654_v35 = vcombine.low %v11446_v20, %v11451_v14  ;;  %v6350_v1 = vadd.f32 %v6349_v33, %v6291_v55  ;;  %v4898_v16 = vpop.f32.mrf.mxu1  ;;  %v9236_v55 = vld [vmem:[#allocation2 + $0x50] sm:$0xff]   ;;  %v9237_v48 = vld [vmem:[#allocation2 + $0x118] sm:$0xff]  }
 0x3a4   : > { %5584 = vmatpush2.bf16.msra.mxu0 %v15653_v60  ;;  %v5925_v62 = vadd.f32 %v5924_v44, %v11542_v8  ;;  %v6300_v11 = vmul.f32 %v11552_v2, %v11552_v2  ;;  %v11577_v10 = vadd.f32 %v4896_v27, %v4735_v22  ;;  %v6307_v18 = vmul.f32 %v11555_v34, %v11555_v34  ;;  %v4741_v46 = vpop.f32.mrf.mxu0 }
 0x3a5   : > { %5745 = vmatpush2.bf16.msra.mxu1 %v15654_v35  ;;  %v5895_v58 = vadd.f32 %v5894_v37, %v11544_v23  ;;  %v6381_v45 = vadd.f32 %v6380_v42, %v6292_v53  ;;  %v6351_v17 = vadd.f32 %v6350_v1, %v6299_v47  ;;  %v11583_v14 = vadd.f32 %v4898_v16, %v4737_v12  ;;  %v4902_v54 = vpop.f32.mrf.mxu1  ;;  %v9239_v47 = vld [vmem:[#allocation2 + $0x184] sm:$0xff]  }
 0x3a6   : > { %15655 = vst [vmem:[#allocation30_spill] sm:$0xff] %v11577_v10  ;;  %v5926_v20 = vadd.f32 %v5925_v62, %v11552_v2  ;;  %5364 = vmatmul.mubr.bf16.gmra.mxu0 %v9236_v55  ;;  %v6308_v39 = vmul.f32 %v11569_v41, %v11569_v41  ;;  %v6315_v43 = vmul.f32 %v11577_v10, %v11577_v10  ;;  %v4743_v53 = vpop.f32.mrf.mxu0  ;;  %v11600_v62 = vshrl.u32 %v7021_v7, 7 }
 0x3a7   : > { %v5896_v50 = vadd.f32 %v5895_v58, %v11555_v34  ;;  %5525 = vmatmul.mubr.bf16.gmra.mxu1 %v9237_v48  ;;  %5373 = vmatprep.mubr.bf16.mxu0 %v9238_v40  ;;  %v6382_v33 = vadd.f32 %v6381_v45, %v6300_v11  ;;  %v11590_v44 = vadd.f32 %v4902_v54, %v4741_v46  ;;  %v4904_v27 = vpop.f32.mrf.mxu1  ;;  %v15680_v34 = vld [vmem:[#allocation6_spill] sm:$0xff] }
 0x3a8   : > { %5534 = vmatprep.mubr.bf16.mxu1 %v9239_v47  ;;  %v6352_v22 = vadd.f32 %v6351_v17, %v6307_v18  ;;  %v5927_v60 = vadd.f32 %v5926_v20, %v11569_v41  ;;  %v6316_v37 = vmul.f32 %v11583_v14, %v11583_v14  ;;  %15657 = vst [vmem:[#allocation32_spill] sm:$0xff] %v11600_v62  ;;  %v4745_v12 = vpop.f32.mrf.mxu0  ;;  %v9240_v47 = vld [vmem:[#allocation2 + $0x58] sm:$0xff]  }
 0x3a9   : > { %15656 = vst [vmem:[#allocation31_spill] sm:$0xff] %v11590_v44  ;;  %v5897_v42 = vadd.f32 %v5896_v50, %v11577_v10  ;;  %v5898_v35 = vsel %vm2301_vm1, %v11590_v44, 0.0  ;;  %v6323_v1 = vmul.f32 %v11590_v44, %v11590_v44  ;;  %v11602_v11 = vadd.f32 %v4904_v27, %v4743_v53  ;;  %v4906_v17 = vpop.f32.mrf.mxu1  ;;  %v9241_v12 = vld [vmem:[#allocation2 + $0x120] sm:$0xff]   ;;  %v15677_v10 = vld [vmem:[#allocation3_spill] sm:$0xff] }
 0x3aa   : > { %v6383_v58 = vadd.f32 %v6382_v33, %v6308_v39  ;;  %v6353_v18 = vadd.f32 %v6352_v22, %v6315_v43  ;;  %v5928_v16 = vadd.f32 %v5927_v60, %v11583_v14  ;;  %v4746_v50 = vpop.f32.mrf.mxu0  ;;  %v7023_v39 = vsub.s32 0, %v11600_v62  ;;  %v9243_v17 = vld [vmem:[#allocation2 + $0x18c] ss:$0 sps:$4 sm:$0x33]  }
 0x3ab   : > { %15658 = vst [vmem:[#allocation33_spill] sm:$0xff] %v11602_v11  ;;  %v5899_v45 = vadd.f32 %v5898_v35, %v5897_v42  ;;  %v6354_v20 = vsel %vm2301_vm1, %v6323_v1, 0.0  ;;  %v5929_v46 = vsel %vm2301_vm1, %v11602_v11, 0.0  ;;  %v6324_v55 = vmul.f32 %v11602_v11, %v11602_v11  ;;  %v4907_v53 = vpop.f32.mrf.mxu1  ;;  %v7019_v42 = vld [vmem:[%s15324_s5] sm:$0xff] }
 0x3ac   : > { %v6384_v7 = vadd.f32 %v6383_v58, %v6316_v37  ;;  %v6355_v48 = vadd.f32 %v6354_v20, %v6353_v18  ;;  %v5930_v40 = vadd.f32 %v5929_v46, %v5928_v16  ;;  %v4943_v33 = vpop.f32.mrf.mxu0  ;;  %v7261_v37 = vld [vmem:[%s15325_s6] sm:$0xff]  ;;  %v7027_v18 = vsub.s32 1, %v11600_v62 }
 0x3ad   : > { %v5900_v54 = vrot.slane %v5899_v45, 4  ;;  %v6385_v43 = vsel %vm2301_vm1, %v6324_v55, 0.0  ;;  %v5104_v1 = vpop.f32.mrf.mxu1  ;;  %v9242_v58 = vld [vmem:[#allocation2 + $0xc4] ss:$0 sps:$4 sm:$0x33]   ;;  %v11621_v53 = vrot.slane %v7019_v42, %v7023_v39 }
 0x3ae   : > { %5374 = vmatmul.mubr.bf16.gmra.mxu0 %v9240_v47  ;;  %v6356_v60 = vrot.slane %v6355_v48, 4  ;;  %v5931_v27 = vrot.slane %v5930_v40, 4  ;;  %v6386_v35 = vadd.f32 %v6385_v43, %v6384_v7  ;;  %v11619_v16 = vadd.f32 %v5104_v1, %v4943_v33 }
 0x3af   : > { %v5901_v22 = vadd.f32 %v5900_v54, %v5899_v45  ;;  %5535 = vmatmul.mubr.bf16.gmra.mxu1 %v9241_v12  ;;  %5383 = vmatprep.mubr.bf16.mxu0 %v9242_v58  ;;  %v4945_v45 = vpop.f32.mrf.mxu0  ;;  %v5106_v54 = vpop.f32.mrf.mxu1  ;;  %15660 = vst [vmem:[#allocation35_spill] sm:$0xff] %v11621_v53  ;;  %v11623_v7 = vrot.slane %v7261_v37, %v7023_v39  ;;  %v9249_v53 = vld [vmem:[#allocation2 + $0xc8] sm:$0xff]  }
 0x3b0   : > { %15659 = vst [vmem:[#allocation34_spill] sm:$0xff] %v11619_v16  ;;  %5544 = vmatprep.mubr.bf16.mxu1 %v9243_v17  ;;  %v6357_v46 = vadd.f32 %v6356_v60, %v6355_v48  ;;  %v5932_v55 = vadd.f32 %v5931_v27, %v5930_v40  ;;  %v6387_v50 = vrot.slane %v6386_v35, 4  ;;  %v11625_v43 = vadd.f32 %v5106_v54, %v4945_v45 }
 0x3b1   : > { %v5902_v20 = vrot.slane %v5901_v22, 2  ;;  %15661 = vst [vmem:[#allocation36_spill] sm:$0xff] %v11623_v7  ;;  %v4947_v47 = vpop.f32.mrf.mxu0  ;;  %v5108_v1 = vpop.f32.mrf.mxu1  ;;  %v11627_v11 = vrot.slane %v7019_v42, %v7027_v18  ;;  %v11629_v17 = vrot.slane %v7261_v37, %v7027_v18  ;;  %v6133_v48 = vmul.f32 %v11619_v16, %v11619_v16 }
 0x3b2   : > { %15662 = vst [vmem:[#allocation37_spill] sm:$0xff] %v11625_v43  ;;  %v6358_v58 = vrot.slane %v6357_v46, 2  ;;  %v5933_v62 = vrot.slane %v5932_v55, 2  ;;  %v6388_v33 = vadd.f32 %v6387_v50, %v6386_v35  ;;  %v11633_v40 = vadd.f32 %v5108_v1, %v4947_v47  ;;  %v9246_v1 = vld [vmem:[#allocation2 + $0x64] sm:$0xff]  }
 0x3b3   : > { %v5903_v12 = vadd.f32 %v5902_v20, %v5901_v22  ;;  %15663 = vst [vmem:[#allocation38_spill] sm:$0xff] %v11627_v11  ;;  %15664 = vst [vmem:[#allocation39_spill] sm:$0xff] %v11629_v17  ;;  %v4949_v60 = vpop.f32.mrf.mxu0  ;;  %v5110_v7 = vpop.f32.mrf.mxu1  ;;  %v6134_v22 = vmul.f32 %v11625_v43, %v11625_v43  ;;  %v9244_v20 = vld [vmem:[#allocation2 + $0x60] ss:$0 sps:$4 sm:$0x33]  }
 0x3b4   : > { %15665 = vst [vmem:[#allocation40_spill] sm:$0xff] %v11633_v40  ;;  %v6359_v27 = vadd.f32 %v6358_v58, %v6357_v46  ;;  %v5934_v45 = vadd.f32 %v5933_v62, %v5932_v55  ;;  %v6389_v54 = vrot.slane %v6388_v33, 2  ;;  %v5937_v42 = vadd.f32 %v11633_v40, %v11619_v16  ;;  %v9245_v58 = vld [vmem:[#allocation2 + $0x128] ss:$0 sps:$4 sm:$0x33]   ;;  %v15672_v16 = vld [vmem:[#allocation28_spill] sm:$0xff] }
 0x3b5   : > { %v5904_v39 = vrot.slane %v5903_v12, 1  ;;  %v6141_v37 = vmul.f32 %v11633_v40, %v11633_v40  ;;  %v11641_v35 = vadd.f32 %v5110_v7, %v4949_v60  ;;  %v4953_v18 = vpop.f32.mrf.mxu0  ;;  %v5114_v55 = vpop.f32.mrf.mxu1 }
 0x3b6   : > { %5384 = vmatmul.mubr.bf16.gmra.mxu0 %v9244_v20  ;;  %v6360_v47 = vrot.slane %v6359_v27, 1  ;;  %v5935_v46 = vrot.slane %v5934_v45, 1  ;;  %v11643_v62 = vadd.f32 %v6389_v54, %v6388_v33  ;;  %v11653_v60 = vadd.f32 %v5114_v55, %v4953_v18 }
 0x3b7   : > { %15666 = vst [vmem:[#allocation41_spill] sm:$0xff] %v11641_v35  ;;  %v5905_v50 = vadd.f32 %v5904_v39, %v5903_v12  ;;  %5545 = vmatmul.mubr.bf16.gmra.mxu1 %v9245_v58  ;;  %5585 = vmatprep.mubr.bf16.mxu0 %v9246_v1  ;;  %v11645_v17 = vadd.f32 %v6141_v37, %v6133_v48  ;;  %v4955_v12 = vpop.f32.mrf.mxu0  ;;  %v9247_v39 = vld [vmem:[#allocation2 + $0x12c] sm:$0xff]   ;;  %v5116_v48 = vpop.f32.mrf.mxu1 }
 0x3b8   : > { %v11649_v40 = vadd.f32 %v11641_v35, %v11625_v43  ;;  %v6142_v7 = vmul.f32 %v11641_v35, %v11641_v35  ;;  %15667 = vst [vmem:[#allocation42_spill] sm:$0xff] %v11653_v60  ;;  %5746 = vmatprep.mubr.bf16.mxu1 %v9247_v39  ;;  %v6361_v54 = vadd.f32 %v6360_v47, %v6359_v27  ;;  %v6391_v58 = vrot.slane %v11643_v62, 1  ;;  %v9248_v27 = vld [vmem:[#allocation2] sm:$0xff]  }
 0x3b9   : > { %v11655_v33 = vmul.f32 0.0051020407, %v5905_v50  ;;  %v5936_v20 = vadd.f32 %v5935_v46, %v5934_v45  ;;  %v11661_v1 = vadd.f32 %v5937_v42, %v11653_v60  ;;  %v6149_v35 = vmul.f32 %v11653_v60, %v11653_v60  ;;  %v4957_v55 = vpop.f32.mrf.mxu0  ;;  %v15669_v45 = vld [vmem:[#allocation11_spill] sm:$0xff]  ;;  %v5118_v47 = vpop.f32.mrf.mxu1  ;;  %v15670_v42 = vld [vmem:[#allocation16_spill] sm:$0xff] }
 0x3ba   : > { %v11658_v37 = vadd.f32 %v6142_v7, %v6134_v22  ;;  %v11665_v18 = vadd.f32 %v5116_v48, %v4955_v12  ;;  %v6579_v43 = vmul.f32 0.0051020407, %v6361_v54  ;;  %v15671_v7 = vld [vmem:[#allocation25_spill] sm:$0xff] }
 0x3bb   : > { %v6587_v50 = vmul.f32 %v11655_v33, %v11655_v33  ;;  %v4959_v48 = vpop.f32.mrf.mxu0  ;;  %v5120_v11 = vpop.f32.mrf.mxu1  ;;  %v11727_v30 = vmul.f32 0.0051020407, %v5936_v20  ;;  %v11731_v12 = vadd.f32 %v11645_v17, %v6149_v35  ;;  %v15681_v35 = vld [vmem:[#allocation9_spill] sm:$0xff]  ;;  %v9253_v17 = vld [vmem:[#allocation2 + $0xd0] sm:$0xff]  }
 0x3bc   : > { %15668 = vst [vmem:[#allocation43_spill] sm:$0xff] %v11665_v18  ;;  %v11739_v44 = vadd.f32 %v5120_v11, %v4959_v48  ;;  %v15683_v11 = vld [vmem:[#allocation12_spill] sm:$0xff] }
 0x3bd   : > { %v6595_v60 = vsub.f32 %v6579_v43, %v6587_v50  ;;  %v11695_v50 = vpop.f32.mrf.mxu0  ;;  %v11705_v54 = vpop.f32.mrf.mxu1  ;;  %v6150_v43 = vmul.f32 %v11665_v18, %v11665_v18 }
 0x3be   : > { %5586 = vmatmul.mubr.bf16.vlgmr.msra.gmra.mxu0 %v9248_v27  ;;  %v11737_v27 = vadd.f32 %v5118_v47, %v4957_v55  ;;  %15674 = vst [vmem:[#allocation16_spill] sm:$0xff] %v11739_v44  ;;  %v15678_v55 = vld [vmem:[#allocation4_spill] sm:$0xff]  ;;  %v15679_v47 = vld [vmem:[#allocation5_spill] sm:$0xff] }
 0x3bf   : > { %5747 = vmatmul.mubr.bf16.vlgmr.msra.gmra.mxu1 %v9249_v53  ;;  %v11715_v39 = vpop.f32.mrf.mxu0  ;;  %5595 = vmatprep.mubr.bf16.mxu0 %v9250_v38  ;;  %v11725_v46 = vpop.f32.mrf.mxu1  ;;  %v6803_v22 = vadd.f32 1e-05, %v6595_v60  ;;  %v6392_v38 = vadd.f32 %v6391_v58, %v11643_v62  ;;  %v5969_v53 = vadd.f32 %v11649_v40, %v11665_v18  ;;  %v6588_v62 = vmul.f32 %v11727_v30, %v11727_v30  ;;  %v9255_v18 = vld [vmem:[#allocation2 + $0x13c] sm:$0xff]  }
 0x3c0   : > { %5756 = vmatprep.mubr.bf16.mxu1 %v9251_v13  ;;  %15673 = vst [vmem:[#allocation11_spill] sm:$0xff] %v11737_v27  ;;  %v15684_v40 = vld [vmem:[#allocation33_spill] sm:$0xff]  ;;  %v6425_v6 = vadd.f32 %v11658_v37, %v6150_v43  ;;  %v11807_v37 = vadd.f32 %v11725_v46, %v11715_v39 }
 0x3c1   : > { %v4967_v23 = vpop.f32.mrf.mxu0  ;;  %v5128_v13 = vpop.f32.mrf.mxu1  ;;  %9178 = vrsqrt.f32 %v6803_v22  ;;  %v6580_v60 = vmul.f32 0.0051020407, %v6392_v38  ;;  %v5970_v2 = vadd.f32 %v5969_v53, %v11739_v44 }
 0x3c2   : > { %15686 = vst [vmem:[#allocation28_spill] sm:$0xff] %v11807_v37 }
 0x3c3   : > { %v4969_v20 = vpop.f32.mrf.mxu0  ;;  %v5130_v48 = vpop.f32.mrf.mxu1  ;;  %v6596_v38 = vsub.f32 %v6580_v60, %v6588_v62  ;;  %v9254_v60 = vld [vmem:[#allocation2 + $0x74] sm:$0xff]   ;;  %v6158_v62 = vmul.f32 %v11739_v44, %v11739_v44  ;;  %v5971_v46 = vadd.f32 %v5970_v2, %v11807_v37 }
 0x3c4   : > { %v11811_v43 = vadd.f32 %v5130_v48, %v4969_v20 }
 0x3c5   : > { %v4973_v58 = vpop.f32.mrf.mxu0  ;;  %v5134_v29 = vpop.f32.mrf.mxu1 }
 0x3c6   : > { %5596 = vmatmul.mubr.bf16.gmra.mxu0 %v9252_v56  ;;  %v6804_v56 = vadd.f32 1e-05, %v6596_v38  ;;  %15688 = vst [vmem:[#allocation4_spill] sm:$0xff] %v11811_v43  ;;  %v11837_v2 = vadd.f32 %v5134_v29, %v4973_v58  ;;  %v9259_v29 = vld [vmem:[#allocation2 + $0x144] sm:$0xff]   ;;  %v15697_v58 = vsub.f32 %v15669_v45, %v11655_v33  ;;  %v15703_v45 = vsub.f32 %v11200_v36, %v11655_v33 }
 0x3c7   : > { %5757 = vmatmul.mubr.bf16.gmra.mxu1 %v9253_v17  ;;  %v4975_v21 = vpop.f32.mrf.mxu0  ;;  %5605 = vmatprep.mubr.bf16.mxu0 %v9254_v60  ;;  %v5136_v28 = vpop.f32.mrf.mxu1  ;;  %v6157_v60 = vmul.f32 %v11737_v27, %v11737_v27  ;;  %v11803_v17 = vadd.f32 %v11705_v54, %v11695_v50  ;;  %v15709_v36 = vsub.f32 %v11336_v5, %v11655_v33 }
 0x3c8   : > { %5766 = vmatprep.mubr.bf16.mxu1 %v9255_v18  ;;  %v5939_v18 = vadd.f32 %v11661_v1, %v11737_v27  ;;  %9180 = vrsqrt.f32 %v6804_v56  ;;  %v11809_v1 = vadd.f32 %v5128_v13, %v4967_v23  ;;  %v6426_v27 = vadd.f32 %v6425_v6, %v6158_v62  ;;  %v9256_v56 = vld [vmem:[#allocation2 + $0x10] sm:$0xff]   ;;  %v9257_v13 = vld [vmem:[#allocation2 + $0xd8] sm:$0xff]  }
 0x3c9   : > { %v4977_v0 = vpop.f32.mrf.mxu0  ;;  %v5138_v22 = vpop.f32.mrf.mxu1  ;;  %15685 = vst [vmem:[#allocation25_spill] sm:$0xff] %v11803_v17  ;;  %v6395_v53 = vadd.f32 %v11731_v12, %v6157_v60  ;;  %v6165_v54 = vmul.f32 %v11803_v17, %v11803_v17  ;;  %v6166_v23 = vmul.f32 %v11807_v37, %v11807_v37  ;;  %v11828_v6 = vmul.f32 %v11811_v43, %v11811_v43 }
 0x3ca   : > { %15687 = vst [vmem:[#allocation3_spill] sm:$0xff] %v11809_v1  ;;  %v5940_v44 = vadd.f32 %v5939_v18, %v11803_v17  ;;  %v11824_v39 = vmul.f32 %v11809_v1, %v11809_v1  ;;  %v11839_v62 = vadd.f32 %v5136_v28, %v4975_v21  ;;  %v9258_v18 = vld [vmem:[#allocation2 + $0x7c] sm:$0xff]   ;;  %v11846_v17 = vadd.f32 %v5971_v46, %v11811_v43 }
 0x3cb   : > { %v4979_v3 = vpop.f32.mrf.mxu0  ;;  %v5140_v38 = vpop.f32.mrf.mxu1  ;;  %v11832_v20 = vadd.f32 %v6395_v53, %v6165_v54  ;;  %v11843_v37 = vadd.f32 %v6426_v27, %v6166_v23  ;;  %v15696_v21 = vsub.f32 %v11015_v31, %v11655_v33  ;;  %v15698_v54 = vsub.f32 %v15670_v42, %v11655_v33 }
 0x3cc   : > { %v11835_v48 = vadd.f32 %v5940_v44, %v11809_v1  ;;  %15692 = vst [vmem:[#allocation27_spill] sm:$0xff] %v11846_v17  ;;  %v11850_v53 = vadd.f32 %v5140_v38, %v4979_v3  ;;  %v15701_v38 = vsub.f32 %v11127_v59, %v11655_v33  ;;  %v15702_v31 = vsub.f32 %v11167_v25, %v11655_v33 }
 0x3cd   : > { %v11817_v50 = vpop.f32.mrf.mxu0  ;;  %v11830_v12 = vpop.f32.mrf.mxu1  ;;  %v15704_v42 = vsub.f32 %v11223_v15, %v11655_v33  ;;  %v15707_v59 = vsub.f32 %v11284_v24, %v11655_v33  ;;  %v15708_v25 = vsub.f32 %v11311_v4, %v11655_v33  ;;  %v15713_v24 = vsub.f32 %v11407_v61, %v11655_v33  ;;  %v15714_v4 = vld [vmem:[#allocation13_spill] sm:$0xff]  ;;  %v15723_v61 = vld [vmem:[#allocation15_spill] sm:$0xff] }
 0x3ce   : > { %15689 = vst [vmem:[#allocation5_spill] sm:$0xff] %v11817_v50  ;;  %5606 = vmatmul.mubr.bf16.gmra.mxu0 %v9256_v56  ;;  %15690 = vst [vmem:[#allocation6_spill] sm:$0xff] %v11830_v12  ;;  %v9179_v56 = vpop.eup %9178  ;;  %v15730_v12 = vld [vmem:[#allocation24_spill] sm:$0xff]  ;;  %v15732_v50 = vld [vmem:[#allocation30_spill] sm:$0xff] }
 0x3cf   : > { %5767 = vmatmul.mubr.bf16.gmra.mxu1 %v9257_v13  ;;  %v11841_v60 = vpop.f32.mrf.mxu0  ;;  %5615 = vmatprep.mubr.bf16.mxu0 %v9258_v18  ;;  %v11848_v13 = vadd.f32 %v5138_v22, %v4977_v0  ;;  %15694 = vst [vmem:[#allocation33_spill] sm:$0xff] %v11850_v53  ;;  %v11852_v44 = vpop.f32.mrf.mxu1  ;;  %v6819_v28 = vmul.f32 %v9179_v56, %v15696_v21 }
 0x3d0   : > { %15691 = vst [vmem:[#allocation9_spill] sm:$0xff] %v11841_v60  ;;  %15695 = vst [vmem:[#allocation44_spill] sm:$0xff] %v11852_v44  ;;  %5776 = vmatprep.mubr.bf16.mxu1 %v9259_v29  ;;  %v6827_v27 = vmul.f32 %v9179_v56, %v15697_v58  ;;  %v6835_v46 = vmul.f32 %v9179_v56, %v15698_v54  ;;  %v15699_v0 = vsub.f32 %v15671_v7, %v11655_v33  ;;  %v15728_v60 = vld [vmem:[#allocation21_spill] sm:$0xff] }
 0x3d1   : > { %15693 = vst [vmem:[#allocation12_spill] sm:$0xff] %v11848_v13  ;;  %v11866_v22 = vpop.f32.mrf.mxu0  ;;  %v6851_v23 = vmul.f32 %v9179_v56, %v15701_v38  ;;  %v6859_v18 = vmul.f32 %v9179_v56, %v15702_v31  ;;  %v6867_v29 = vmul.f32 %v9179_v56, %v15703_v45  ;;  %v6875_v21 = vmul.f32 %v9179_v56, %v15704_v42  ;;  %v11880_v7 = vpop.f32.mrf.mxu1  ;;  %v15737_v13 = vld [vmem:[#allocation35_spill] sm:$0xff] }
 0x3d2   : > { %v6843_v3 = vmul.f32 %v9179_v56, %v15699_v0  ;;  %15700 = vst [vmem:[#allocation45_spill] sm:$0xff] %v11866_v22  ;;  %15705 = vst [vmem:[#allocation46_spill] sm:$0xff] %v11880_v7  ;;  %v15706_v58 = vsub.f32 %v15672_v16, %v11655_v33  ;;  %v6891_v0 = vmul.f32 %v9179_v56, %v15707_v59 }
 0x3d3   : > { %v6899_v38 = vmul.f32 %v9179_v56, %v15708_v25  ;;  %v6907_v31 = vmul.f32 %v9179_v56, %v15709_v36  ;;  %v11894_v15 = vpop.f32.mrf.mxu0  ;;  %v15711_v45 = vsub.f32 %v11357_v32, %v11655_v33  ;;  %v15712_v16 = vsub.f32 %v11383_v51, %v11655_v33  ;;  %v11908_v5 = vpop.f32.mrf.mxu1  ;;  %v15717_v36 = vld [vmem:[#allocation17_spill] sm:$0xff]  ;;  %v15719_v32 = vld [vmem:[#allocation19_spill] sm:$0xff]  ;;  %v15721_v51 = vld [vmem:[#allocation26_spill] sm:$0xff] }
 0x3d4   : > { %v6883_v54 = vmul.f32 %v9179_v56, %v15706_v58  ;;  %15710 = vst [vmem:[#allocation47_spill] sm:$0xff] %v11894_v15  ;;  %v6931_v59 = vmul.f32 %v9179_v56, %v15713_v24  ;;  %v15715_v25 = vsub.f32 %v15714_v4, %v11655_v33  ;;  %15716 = vst [vmem:[#allocation13_spill] sm:$0xff] %v11908_v5  ;;  %v15726_v5 = vld [vmem:[#allocation20_spill] sm:$0xff] }
 0x3d5   : > { %v6915_v42 = vmul.f32 %v9179_v56, %v15711_v45  ;;  %v6923_v58 = vmul.f32 %v9179_v56, %v15712_v16  ;;  %v15718_v1 = vsub.f32 %v15717_v36, %v11655_v33  ;;  %v15720_v45 = vsub.f32 %v15719_v32, %v11655_v33  ;;  %v11922_v4 = vpop.f32.mrf.mxu0  ;;  %v11936_v53 = vpop.f32.mrf.mxu1 }
 0x3d6   : > { %v6939_v43 = vmul.f32 %v9179_v56, %v15715_v25  ;;  %v15722_v16 = vsub.f32 %v15721_v51, %v11655_v33  ;;  %v15724_v24 = vsub.f32 %v15723_v61, %v11655_v33  ;;  %15725 = vst [vmem:[#allocation17_spill] sm:$0xff] %v11922_v4  ;;  %v9260_v25 = vld [vmem:[#allocation2 + $0x18] sm:$0xff]   ;;  %v15727_v36 = vsub.f32 %v15726_v5, %v11655_v33  ;;  %v9261_v4 = vld [vmem:[#allocation2 + $0xe0] sm:$0xff]  }
 0x3d7   : > { %v6947_v15 = vmul.f32 %v9179_v56, %v15718_v1  ;;  %v6955_v7 = vmul.f32 %v9179_v56, %v15720_v45  ;;  %5616 = vmatmul.mubr.bf16.gmra.mxu0 %v9260_v25  ;;  %v15729_v32 = vsub.f32 %v15728_v60, %v11655_v33  ;;  %v15731_v51 = vsub.f32 %v15730_v12, %v11655_v33  ;;  %v15735_v25 = vld [vmem:[#allocation31_spill] sm:$0xff]  ;;  %v11944_v12 = vpop.f32.mrf.mxu0 }
 0x3d8   : > { %v6963_v22 = vmul.f32 %v9179_v56, %v15722_v16  ;;  %v6971_v44 = vmul.f32 %v9179_v56, %v15724_v24  ;;  %v6979_v1 = vmul.f32 %v9179_v56, %v15727_v36  ;;  %v15733_v61 = vsub.f32 %v15732_v50, %v11655_v33  ;;  %15734 = vst [vmem:[#allocation19_spill] sm:$0xff] %v11936_v53 }
 0x3d9   : > { %v6987_v45 = vmul.f32 %v9179_v56, %v15729_v32  ;;  %v6995_v16 = vmul.f32 %v9179_v56, %v15731_v51  ;;  %5777 = vmatmul.mubr.bf16.gmra.mxu1 %v9261_v4  ;;  %v15736_v5 = vsub.f32 %v15735_v25, %v11655_v33  ;;  %v7061_v17 = vmul.f32 %v15737_v13, %v6819_v28  ;;  %v9262_v51 = vld [vmem:[#allocation2 + $0x84] sm:$0xff]   ;;  %v11950_v33 = vpop.f32.mrf.mxu1  ;;  %v11952_v28 = vpop.eup %9180 }
 0x3da   : > { %v7003_v24 = vmul.f32 %v9179_v56, %v15733_v61  ;;  %v7069_v60 = vmul.f32 %v15737_v13, %v6827_v27  ;;  %v7077_v32 = vmul.f32 %v15737_v13, %v6835_v46  ;;  %15738 = vst [vmem:[#allocation26_spill] sm:$0xff] %v11944_v12  ;;  %5625 = vmatprep.mubr.bf16.mxu0 %v9262_v51  ;;  %15739 = vst [vmem:[#allocation15_spill] sm:$0xff] %v11950_v33 }
 0x3db   : > { %v7011_v36 = vmul.f32 %v9179_v56, %v15736_v5  ;;  %v7085_v50 = vmul.f32 %v15737_v13, %v6843_v3  ;;  %v7093_v61 = vmul.f32 %v15737_v13, %v6851_v23  ;;  %v7101_v4 = vmul.f32 %v15737_v13, %v6859_v18  ;;  %v9263_v56 = vld [vmem:[#allocation2 + $0x14c] sm:$0xff]   ;;  %v11958_v5 = vpop.f32.mrf.mxu0 }
 0x3dc   : > { %v7109_v53 = vmul.f32 %v15737_v13, %v6867_v29  ;;  %5786 = vmatprep.mubr.bf16.mxu1 %v9263_v56  ;;  %v7117_v27 = vmul.f32 %v15737_v13, %v6875_v21  ;;  %v7125_v46 = vmul.f32 %v15737_v13, %v6883_v54  ;;  %v7133_v25 = vmul.f32 %v15737_v13, %v6891_v0  ;;  %v11964_v56 = vpop.f32.mrf.mxu1 }
 0x3dd   : > { %v7141_v3 = vmul.f32 %v15737_v13, %v6899_v38  ;;  %15740 = vst [vmem:[#allocation20_spill] sm:$0xff] %v11958_v5  ;;  %v7149_v23 = vmul.f32 %v15737_v13, %v6907_v31  ;;  %v7157_v18 = vmul.f32 %v15737_v13, %v6915_v42  ;;  %v7165_v29 = vmul.f32 %v15737_v13, %v6923_v58  ;;  %v11970_v33 = vpop.f32.mrf.mxu0 }
 0x3de   : > { %v7173_v51 = vmul.f32 %v15737_v13, %v6931_v59  ;;  %15741 = vst [vmem:[#allocation21_spill] sm:$0xff] %v11964_v56  ;;  %v7181_v21 = vmul.f32 %v15737_v13, %v6939_v43  ;;  %v7189_v54 = vmul.f32 %v15737_v13, %v6947_v15  ;;  %v7197_v0 = vmul.f32 %v15737_v13, %v6955_v7  ;;  %v11976_v5 = vpop.f32.mrf.mxu1  ;;  %v15744_v56 = vld [vmem:[#allocation36_spill] sm:$0xff] }
 0x3df   : > { %v7205_v38 = vmul.f32 %v15737_v13, %v6963_v22  ;;  %15742 = vst [vmem:[#allocation24_spill] sm:$0xff] %v11970_v33  ;;  %v7213_v31 = vmul.f32 %v15737_v13, %v6971_v44  ;;  %v7221_v42 = vmul.f32 %v15737_v13, %v6979_v1  ;;  %v7229_v58 = vmul.f32 %v15737_v13, %v6987_v45  ;;  %v11982_v12 = vpop.f32.mrf.mxu0  ;;  %v9264_v33 = vld [vmem:[#allocation2 + $0x20] sm:$0xff]  }
 0x3e0   : > { %v7237_v59 = vmul.f32 %v15737_v13, %v6995_v16  ;;  %15743 = vst [vmem:[#allocation30_spill] sm:$0xff] %v11976_v5  ;;  %v7245_v43 = vmul.f32 %v15737_v13, %v7003_v24  ;;  %v7253_v15 = vmul.f32 %v15737_v13, %v7011_v36  ;;  %v7303_v7 = vadd.f32 %v15744_v56, %v7061_v17  ;;  %v11988_v5 = vpop.f32.mrf.mxu1  ;;  %v9265_v24 = vld [vmem:[#allocation2 + $0xe8] sm:$0xff]  }
 0x3e1   : > { %v7311_v22 = vadd.f32 %v15744_v56, %v7069_v60  ;;  %5626 = vmatmul.mubr.bf16.gmra.mxu0 %v9264_v33  ;;  %v7319_v44 = vadd.f32 %v15744_v56, %v7077_v32  ;;  %v7327_v1 = vadd.f32 %v15744_v56, %v7085_v50  ;;  %v7335_v45 = vadd.f32 %v15744_v56, %v7093_v61  ;;  %v12000_v32 = vpop.f32.mrf.mxu0  ;;  %v9266_v50 = vld [vmem:[#allocation2 + $0x8c] sm:$0xff]  }
 0x3e2   : > { %v7343_v16 = vadd.f32 %v15744_v56, %v7101_v4  ;;  %5787 = vmatmul.mubr.bf16.gmra.mxu1 %v9265_v24  ;;  %v7351_v17 = vadd.f32 %v15744_v56, %v7109_v53  ;;  %v7359_v13 = vadd.f32 %v15744_v56, %v7117_v27  ;;  %v7367_v36 = vadd.f32 %v15744_v56, %v7125_v46  ;;  %v12018_v27 = vpop.f32.mrf.mxu1  ;;  %v9267_v46 = vld [vmem:[#allocation2 + $0x154] sm:$0xff]  }
 0x3e3   : > { %v7375_v60 = vadd.f32 %v15744_v56, %v7133_v25  ;;  %7503 = vst [vmem:[%s15326_s7] sm:$0xff] %v7303_v7  ;;  %7511 = vst [vmem:[%s15326_s7 + $0x40] sm:$0xff] %v7311_v22  ;;  %5635 = vmatprep.mubr.bf16.mxu0 %v9266_v50  ;;  %v7383_v53 = vadd.f32 %v15744_v56, %v7141_v3  ;;  %v7391_v61 = vadd.f32 %v15744_v56, %v7149_v23  ;;  %v15747_v7 = vld [vmem:[#allocation8_spill] sm:$0xff] }
 0x3e4   : > { %v7399_v4 = vadd.f32 %v15744_v56, %v7157_v18  ;;  %v7407_v33 = vadd.f32 %v15744_v56, %v7165_v29  ;;  %7519 = vst [vmem:[%s15326_s7 + $0x80] sm:$0xff] %v7319_v44  ;;  %7527 = vst [vmem:[%s15326_s7 + $0xc0] sm:$0xff] %v7327_v1  ;;  %5796 = vmatprep.mubr.bf16.mxu1 %v9267_v46  ;;  %v7415_v25 = vadd.f32 %v15744_v56, %v7173_v51  ;;  %v12036_v29 = vpop.f32.mrf.mxu0  ;;  %v15756_v46 = vld [vmem:[#allocation29_spill] sm:$0xff] }
 0x3e5   : > { %7535 = vst [vmem:[%s15326_s7 + $0x100] sm:$0xff] %v7335_v45  ;;  %7543 = vst [vmem:[%s15326_s7 + $0x140] sm:$0xff] %v7343_v16  ;;  %v7423_v3 = vadd.f32 %v15744_v56, %v7181_v21  ;;  %v7431_v23 = vadd.f32 %v15744_v56, %v7189_v54  ;;  %v7439_v18 = vadd.f32 %v15744_v56, %v7197_v0 }
 0x3e6   : > { %7551 = vst [vmem:[%s15326_s7 + $0x180] sm:$0xff] %v7351_v17  ;;  %7559 = vst [vmem:[%s15326_s7 + $0x1c0] sm:$0xff] %v7359_v13  ;;  %v7447_v51 = vadd.f32 %v15744_v56, %v7205_v38  ;;  %v7455_v21 = vadd.f32 %v15744_v56, %v7213_v31  ;;  %v7463_v54 = vadd.f32 %v15744_v56, %v7221_v42  ;;  %v12054_v38 = vpop.f32.mrf.mxu1 }
 0x3e7   : > { %7567 = vst [vmem:[%s15326_s7 + $0x200] sm:$0xff] %v7367_v36  ;;  %7575 = vst [vmem:[%s15326_s7 + $0x240] sm:$0xff] %v7375_v60  ;;  %v7471_v0 = vadd.f32 %v15744_v56, %v7229_v58  ;;  %v7479_v31 = vadd.f32 %v15744_v56, %v7237_v59  ;;  %v7487_v42 = vadd.f32 %v15744_v56, %v7245_v43  ;;  %v15745_v59 = vld [vmem:[#allocation7_spill] sm:$0xff] }
 0x3e8   : > { %7583 = vst [vmem:[%s15326_s7 + $0x280] sm:$0xff] %v7383_v53  ;;  %7591 = vst [vmem:[%s15326_s7 + $0x2c0] sm:$0xff] %v7391_v61  ;;  %v7495_v58 = vadd.f32 %v15744_v56, %v7253_v15  ;;  %v15746_v43 = vsub.f32 %v15745_v59, %v11727_v30  ;;  %v12075_v15 = vpop.f32.mrf.mxu0  ;;  %v15748_v22 = vsub.f32 %v15747_v7, %v11727_v30  ;;  %v12105_v36 = vpop.f32.mrf.mxu1 }
 0x3e9   : > { %7599 = vst [vmem:[%s15326_s7 + $0x300] sm:$0xff] %v7399_v4  ;;  %7607 = vst [vmem:[%s15326_s7 + $0x340] sm:$0xff] %v7407_v33  ;;  %v15749_v1 = vsub.f32 %v15677_v10, %v11727_v30  ;;  %v15750_v16 = vsub.f32 %v15678_v55, %v11727_v30  ;;  %v15751_v17 = vsub.f32 %v15679_v47, %v11727_v30 }
 0x3ea   : > { %7615 = vst [vmem:[%s15326_s7 + $0x380] sm:$0xff] %v7415_v25  ;;  %7623 = vst [vmem:[%s15326_s7 + $0x3c0] sm:$0xff] %v7423_v3  ;;  %v6820_v56 = vmul.f32 %v11952_v28, %v15746_v43  ;;  %v6828_v44 = vmul.f32 %v11952_v28, %v15748_v22  ;;  %v15752_v10 = vsub.f32 %v15680_v34, %v11727_v30  ;;  %v12132_v33 = vpop.f32.mrf.mxu0  ;;  %v9268_v34 = vld [vmem:[#allocation2 + $0x28] sm:$0xff]   ;;  %v9270_v22 = vld [vmem:[#allocation2 + $0x94] sm:$0xff]  }
 0x3eb   : > { %7631 = vst [vmem:[%s15326_s7 + $0x400] sm:$0xff] %v7431_v23  ;;  %7639 = vst [vmem:[%s15326_s7 + $0x440] sm:$0xff] %v7439_v18  ;;  %v6836_v45 = vmul.f32 %v11952_v28, %v15749_v1  ;;  %v6844_v24 = vmul.f32 %v11952_v28, %v15750_v16  ;;  %v6852_v13 = vmul.f32 %v11952_v28, %v15751_v17  ;;  %5636 = vmatmul.mubr.bf16.gmra.mxu0 %v9268_v34  ;;  %v15766_v1 = vld [vmem:[#allocation22_spill] sm:$0xff] }
 0x3ec   : > { %7647 = vst [vmem:[%s15326_s7 + $0x480] sm:$0xff] %v7447_v51  ;;  %7655 = vst [vmem:[%s15326_s7 + $0x4c0] sm:$0xff] %v7455_v21  ;;  %v6860_v55 = vmul.f32 %v11952_v28, %v15752_v10  ;;  %v15753_v47 = vsub.f32 %v15681_v35, %v11727_v30  ;;  %v15754_v50 = vsub.f32 %v15682_v49, %v11727_v30  ;;  %v12150_v21 = vpop.f32.mrf.mxu1  ;;  %v12168_v7 = vpop.f32.mrf.mxu0  ;;  %5645 = vmatprep.mubr.bf16.mxu0 %v9270_v22  ;;  %v15768_v17 = vld [vmem:[#allocation14_spill] sm:$0xff] }
 0x3ed   : > { %7663 = vst [vmem:[%s15326_s7 + $0x500] sm:$0xff] %v7463_v54  ;;  %7671 = vst [vmem:[%s15326_s7 + $0x540] sm:$0xff] %v7471_v0  ;;  %v15755_v61 = vsub.f32 %v11264_v52, %v11727_v30  ;;  %v15757_v25 = vsub.f32 %v15756_v46, %v11727_v30  ;;  %v15758_v3 = vsub.f32 %v11327_v19, %v11727_v30  ;;  %v9269_v54 = vld [vmem:[#allocation2 + $0xf0] sm:$0xff]   ;;  %v15761_v0 = vld [vmem:[#allocation10_spill] sm:$0xff] }
 0x3ee   : > { %7679 = vst [vmem:[%s15326_s7 + $0x580] sm:$0xff] %v7479_v31  ;;  %7687 = vst [vmem:[%s15326_s7 + $0x5c0] sm:$0xff] %v7487_v42  ;;  %v6868_v60 = vmul.f32 %v11952_v28, %v15753_v47  ;;  %v6876_v53 = vmul.f32 %v11952_v28, %v15754_v50  ;;  %v15759_v23 = vsub.f32 %v11344_v57, %v11727_v30  ;;  %5797 = vmatmul.mubr.bf16.gmra.mxu1 %v9269_v54  ;;  %v15770_v47 = vld [vmem:[#allocation18_spill] sm:$0xff]  ;;  %v12186_v46 = vpop.f32.mrf.mxu1 }
 0x3ef   : > { %7695 = vst [vmem:[%s15326_s7 + $0x600] sm:$0xf] %v7495_v58  ;;  %v6884_v4 = vmul.f32 %v11952_v28, %v15755_v61  ;;  %v6892_v35 = vmul.f32 %v11952_v28, %v15757_v25  ;;  %v6900_v49 = vmul.f32 %v11952_v28, %v15758_v3  ;;  %v15760_v18 = vsub.f32 %v11371_v9, %v11727_v30  ;;  %v9271_v25 = vld [vmem:[#allocation2 + $0x15c] sm:$0xff]   ;;  %v15773_v3 = vld [vmem:[#allocation23_spill] sm:$0xff]  ;;  %v15778_v22 = vld [vmem:[#allocation38_spill] sm:$0xff] }
 0x3f0   : > { %v6908_v52 = vmul.f32 %v11952_v28, %v15759_v23  ;;  %v15762_v31 = vsub.f32 %v15761_v0, %v11727_v30  ;;  %v15763_v42 = vsub.f32 %v15683_v11, %v11727_v30  ;;  %v15764_v58 = vsub.f32 %v11438_v26, %v11727_v30  ;;  %5806 = vmatprep.mubr.bf16.mxu1 %v9271_v25  ;;  %v9272_v25 = vld [vmem:[#allocation2 + $0x30] sm:$0xff]  }
 0x3f1   : > { %v6916_v51 = vmul.f32 %v11952_v28, %v15760_v18  ;;  %v15765_v59 = vsub.f32 %v11469_v63, %v11727_v30  ;;  %v15767_v16 = vsub.f32 %v15766_v1, %v11727_v30  ;;  %v15769_v10 = vsub.f32 %v15768_v17, %v11727_v30 }
 0x3f2   : > { %v6924_v19 = vmul.f32 %v11952_v28, %v15762_v31  ;;  %v6932_v57 = vmul.f32 %v11952_v28, %v15763_v42  ;;  %v6940_v9 = vmul.f32 %v11952_v28, %v15764_v58  ;;  %v15771_v50 = vsub.f32 %v15770_v47, %v11727_v30 }
 0x3f3   : > { %v6948_v43 = vmul.f32 %v11952_v28, %v15765_v59  ;;  %v6956_v11 = vmul.f32 %v11952_v28, %v15767_v16  ;;  %v6964_v26 = vmul.f32 %v11952_v28, %v15769_v10  ;;  %v15772_v61 = vsub.f32 %v11542_v8, %v11727_v30  ;;  %v12204_v59 = vpop.f32.mrf.mxu0  ;;  %v12210_v10 = vpop.f32.mrf.mxu1  ;;  %5646 = vmatmul.mubr.bf16.gmra.mxu0 %v9272_v25 }
 0x3f4   : > { %v6972_v63 = vmul.f32 %v11952_v28, %v15771_v50  ;;  %v15774_v23 = vsub.f32 %v15773_v3, %v11727_v30  ;;  %v15775_v54 = vsub.f32 %v11569_v41, %v11727_v30  ;;  %v15776_v31 = vsub.f32 %v11583_v14, %v11727_v30 }
 0x3f5   : > { %v6980_v34 = vmul.f32 %v11952_v28, %v15772_v61  ;;  %v15777_v42 = vsub.f32 %v15684_v40, %v11727_v30  ;;  %v7062_v1 = vmul.f32 %v15778_v22, %v6820_v56  ;;  %v7070_v16 = vmul.f32 %v15778_v22, %v6828_v44  ;;  %v12222_v50 = vpop.f32.mrf.mxu1 }
 0x3f6   : > { %v6988_v18 = vmul.f32 %v11952_v28, %v15774_v23  ;;  %v6996_v0 = vmul.f32 %v11952_v28, %v15775_v54  ;;  %v7004_v8 = vmul.f32 %v11952_v28, %v15776_v31  ;;  %v7078_v41 = vmul.f32 %v15778_v22, %v6836_v45 }
 0x3f7   : > { %v7012_v58 = vmul.f32 %v11952_v28, %v15777_v42  ;;  %v7086_v17 = vmul.f32 %v15778_v22, %v6844_v24  ;;  %v7094_v14 = vmul.f32 %v15778_v22, %v6852_v13  ;;  %v7102_v47 = vmul.f32 %v15778_v22, %v6860_v55  ;;  %v12216_v28 = vpop.f32.mrf.mxu0  ;;  %v12234_v3 = vpop.f32.mrf.mxu1 }
 0x3f8   : > { %v7110_v30 = vmul.f32 %v15778_v22, %v6868_v60  ;;  %v7118_v40 = vmul.f32 %v15778_v22, %v6876_v53  ;;  %v7126_v56 = vmul.f32 %v15778_v22, %v6884_v4  ;;  %v7134_v44 = vmul.f32 %v15778_v22, %v6892_v35 }
 0x3f9   : > { %v7142_v45 = vmul.f32 %v15778_v22, %v6900_v49  ;;  %v7150_v24 = vmul.f32 %v15778_v22, %v6908_v52  ;;  %v7158_v13 = vmul.f32 %v15778_v22, %v6916_v51  ;;  %v7166_v55 = vmul.f32 %v15778_v22, %v6924_v19  ;;  %v12228_v61 = vpop.f32.mrf.mxu0  ;;  %v9273_v51 = vld [vmem:[#allocation2 + $0xf8] sm:$0xff]   ;;  %v12246_v25 = vpop.f32.mrf.mxu1 }
 0x3fa   : > { %v7174_v60 = vmul.f32 %v15778_v22, %v6932_v57  ;;  %v7182_v53 = vmul.f32 %v15778_v22, %v6940_v9  ;;  %v7190_v4 = vmul.f32 %v15778_v22, %v6948_v43  ;;  %v7198_v35 = vmul.f32 %v15778_v22, %v6956_v11  ;;  %5807 = vmatmul.mubr.bf16.gmra.mxu1 %v9273_v51  ;;  %v9274_v43 = vld [vmem:[#allocation2 + $0x9c] sm:$0xff]  }
 0x3fb   : > { %v7206_v49 = vmul.f32 %v15778_v22, %v6964_v26  ;;  %v7214_v52 = vmul.f32 %v15778_v22, %v6972_v63  ;;  %v7222_v19 = vmul.f32 %v15778_v22, %v6980_v34  ;;  %v7230_v57 = vmul.f32 %v15778_v22, %v6988_v18  ;;  %v12240_v54 = vpop.f32.mrf.mxu0  ;;  %5655 = vmatprep.mubr.bf16.mxu0 %v9274_v43  ;;  %v15779_v26 = vld [vmem:[#allocation39_spill] sm:$0xff]  ;;  %v9275_v34 = vld [vmem:[#allocation2 + $0x164] sm:$0xff]  }
 0x3fc   : > { %v7238_v9 = vmul.f32 %v15778_v22, %v6996_v0  ;;  %v7246_v23 = vmul.f32 %v15778_v22, %v7004_v8  ;;  %v7254_v11 = vmul.f32 %v15778_v22, %v7012_v58  ;;  %v7304_v63 = vadd.f32 %v15779_v26, %v7062_v1  ;;  %5816 = vmatprep.mubr.bf16.mxu1 %v9275_v34  ;;  %v15782_v34 = vld [vmem:[#allocation33_spill] sm:$0xff] }
 0x3fd   : > { %v7312_v31 = vadd.f32 %v15779_v26, %v7070_v16  ;;  %v7320_v42 = vadd.f32 %v15779_v26, %v7078_v41  ;;  %v7328_v18 = vadd.f32 %v15779_v26, %v7086_v17  ;;  %v7336_v0 = vadd.f32 %v15779_v26, %v7094_v14  ;;  %v12252_v43 = vpop.f32.mrf.mxu0  ;;  %v12267_v41 = vpop.f32.mrf.mxu1 }
 0x3fe   : > { %v7344_v8 = vadd.f32 %v15779_v26, %v7102_v47  ;;  %v7352_v51 = vadd.f32 %v15779_v26, %v7110_v30  ;;  %v7360_v58 = vadd.f32 %v15779_v26, %v7118_v40  ;;  %v7368_v22 = vadd.f32 %v15779_v26, %v7126_v56  ;;  %7504 = vst [vmem:[%s15326_s7 + $0x8] sm:$0xff] %v7304_v63 }
 0x3ff   : > { %v7376_v1 = vadd.f32 %v15779_v26, %v7134_v44  ;;  %v7384_v16 = vadd.f32 %v15779_v26, %v7142_v45  ;;  %7512 = vst [vmem:[%s15326_s7 + $0x48] sm:$0xff] %v7312_v31  ;;  %7520 = vst [vmem:[%s15326_s7 + $0x88] sm:$0xff] %v7320_v42  ;;  %v7392_v17 = vadd.f32 %v15779_v26, %v7150_v24  ;;  %v12285_v40 = vpop.f32.mrf.mxu0  ;;  %v9278_v31 = vld [vmem:[#allocation2 + $0xa4] sm:$0xff]  }
 0x400   : > { %v7400_v14 = vadd.f32 %v15779_v26, %v7158_v13  ;;  %v7408_v47 = vadd.f32 %v15779_v26, %v7166_v55  ;;  %v7416_v30 = vadd.f32 %v15779_v26, %v7174_v60  ;;  %7528 = vst [vmem:[%s15326_s7 + $0xc8] sm:$0xff] %v7328_v18  ;;  %7536 = vst [vmem:[%s15326_s7 + $0x108] sm:$0xff] %v7336_v0  ;;  %v12303_v13 = vpop.f32.mrf.mxu1  ;;  %v15783_v0 = vld [vmem:[#allocation5_spill] sm:$0xff] }
 0x401   : > { %7544 = vst [vmem:[%s15326_s7 + $0x148] sm:$0xff] %v7344_v8  ;;  %7552 = vst [vmem:[%s15326_s7 + $0x188] sm:$0xff] %v7352_v51  ;;  %v7424_v56 = vadd.f32 %v15779_v26, %v7182_v53  ;;  %v7432_v44 = vadd.f32 %v15779_v26, %v7190_v4  ;;  %v7440_v45 = vadd.f32 %v15779_v26, %v7198_v35  ;;  %v12321_v35 = vpop.f32.mrf.mxu0  ;;  %v15784_v8 = vld [vmem:[#allocation6_spill] sm:$0xff] }
 0x402   : > { %v7448_v24 = vadd.f32 %v15779_v26, %v7206_v49  ;;  %7560 = vst [vmem:[%s15326_s7 + $0x1c8] sm:$0xff] %v7360_v58  ;;  %7568 = vst [vmem:[%s15326_s7 + $0x208] sm:$0xff] %v7368_v22  ;;  %v7456_v55 = vadd.f32 %v15779_v26, %v7214_v52  ;;  %v7464_v60 = vadd.f32 %v15779_v26, %v7222_v19  ;;  %v9276_v49 = vld [vmem:[#allocation2 + $0x38] sm:$0xff]   ;;  %v15785_v58 = vld [vmem:[#allocation9_spill] sm:$0xff] }
 0x403   : > { %7576 = vst [vmem:[%s15326_s7 + $0x248] sm:$0xff] %v7376_v1  ;;  %7584 = vst [vmem:[%s15326_s7 + $0x288] sm:$0xff] %v7384_v16  ;;  %v7472_v53 = vadd.f32 %v15779_v26, %v7230_v57  ;;  %v7480_v4 = vadd.f32 %v15779_v26, %v7238_v9  ;;  %5656 = vmatmul.mubr.bf16.gmra.mxu0 %v9276_v49  ;;  %v7488_v52 = vadd.f32 %v15779_v26, %v7246_v23  ;;  %v12341_v23 = vpop.f32.mrf.mxu1  ;;  %v12363_v63 = vpop.f32.mrf.mxu0  ;;  %v15786_v22 = vld [vmem:[#allocation44_spill] sm:$0xff]  ;;  %v15790_v49 = vld [vmem:[#allocation13_spill] sm:$0xff] }
 0x404   : > { %7592 = vst [vmem:[%s15326_s7 + $0x2c8] sm:$0xff] %v7392_v17  ;;  %7600 = vst [vmem:[%s15326_s7 + $0x308] sm:$0xff] %v7400_v14  ;;  %v7496_v19 = vadd.f32 %v15779_v26, %v7254_v11  ;;  %v6397_v57 = vadd.f32 %v11832_v20, %v11824_v39  ;;  %v6428_v9 = vadd.f32 %v11843_v37, %v11828_v6  ;;  %v9277_v11 = vld [vmem:[#allocation2 + $0x100] sm:$0xff]   ;;  %v15780_v6 = vld [vmem:[#allocation27_spill] sm:$0xff]  ;;  %5665 = vmatprep.mubr.bf16.mxu0 %v9278_v31 }
 0x405   : > { %7608 = vst [vmem:[%s15326_s7 + $0x348] sm:$0xff] %v7408_v47  ;;  %7616 = vst [vmem:[%s15326_s7 + $0x388] sm:$0xff] %v7416_v30  ;;  %5817 = vmatmul.mubr.bf16.gmra.mxu1 %v9277_v11  ;;  %v5942_v37 = vadd.f32 %v11835_v48, %v11837_v2  ;;  %v6181_v39 = vmul.f32 %v11837_v2, %v11837_v2  ;;  %v5973_v20 = vadd.f32 %v15780_v6, %v11839_v62  ;;  %v15781_v48 = vld [vmem:[#allocation12_spill] sm:$0xff]  ;;  %v12383_v16 = vpop.f32.mrf.mxu1  ;;  %v9279_v17 = vld [vmem:[#allocation2 + $0x16c] sm:$0xff]  }
 0x406   : > { %7624 = vst [vmem:[%s15326_s7 + $0x3c8] sm:$0xff] %v7424_v56  ;;  %7632 = vst [vmem:[%s15326_s7 + $0x408] sm:$0xff] %v7432_v44  ;;  %v6182_v26 = vmul.f32 %v11839_v62, %v11839_v62  ;;  %v6189_v42 = vmul.f32 %v15781_v48, %v15781_v48  ;;  %v6190_v18 = vmul.f32 %v15782_v34, %v15782_v34  ;;  %5826 = vmatprep.mubr.bf16.mxu1 %v9279_v17  ;;  %v12387_v44 = vpop.f32.mrf.mxu0  ;;  %v15793_v31 = vld [vmem:[#allocation19_spill] sm:$0xff] }
 0x407   : > { %7640 = vst [vmem:[%s15326_s7 + $0x448] sm:$0xff] %v7440_v45  ;;  %7648 = vst [vmem:[%s15326_s7 + $0x488] sm:$0xff] %v7448_v24  ;;  %v12377_v51 = vadd.f32 %v15784_v8, %v15783_v0  ;;  %v12381_v1 = vadd.f32 %v15786_v22, %v15785_v58  ;;  %v6398_v14 = vadd.f32 %v6397_v57, %v6181_v39  ;;  %v15794_v8 = vld [vmem:[#allocation26_spill] sm:$0xff]  ;;  %v15795_v58 = vld [vmem:[#allocation15_spill] sm:$0xff] }
 0x408   : > { %7656 = vst [vmem:[%s15326_s7 + $0x4c8] sm:$0xff] %v7456_v55  ;;  %7664 = vst [vmem:[%s15326_s7 + $0x508] sm:$0xff] %v7464_v60  ;;  %v6429_v47 = vadd.f32 %v6428_v9, %v6182_v26  ;;  %v5943_v30 = vadd.f32 %v5942_v37, %v15781_v48  ;;  %v5974_v56 = vadd.f32 %v5973_v20, %v15782_v34  ;;  %v15787_v55 = vld [vmem:[#allocation45_spill] sm:$0xff]  ;;  %v15788_v60 = vld [vmem:[#allocation46_spill] sm:$0xff]  ;;  %v12405_v39 = vpop.f32.mrf.mxu0 }
 0x409   : > { %7672 = vst [vmem:[%s15326_s7 + $0x548] sm:$0xff] %v7472_v53  ;;  %7680 = vst [vmem:[%s15326_s7 + $0x588] sm:$0xff] %v7480_v4  ;;  %v6197_v45 = vmul.f32 %v12377_v51, %v12377_v51  ;;  %v6198_v24 = vmul.f32 %v12381_v1, %v12381_v1  ;;  %v12395_v53 = vadd.f32 %v15788_v60, %v15787_v55  ;;  %v15789_v4 = vld [vmem:[#allocation47_spill] sm:$0xff]  ;;  %v15792_v26 = vld [vmem:[#allocation17_spill] sm:$0xff] }
 0x40a   : > { %7688 = vst [vmem:[%s15326_s7 + $0x5c8] sm:$0xff] %v7488_v52  ;;  %7696 = vst [vmem:[%s15326_s7 + $0x608] sm:$0xf] %v7496_v19  ;;  %v12399_v52 = vadd.f32 %v15790_v49, %v15789_v4  ;;  %v12401_v19 = vpop.f32.mrf.mxu1  ;;  %v6399_v57 = vadd.f32 %v6398_v14, %v6189_v42  ;;  %v6430_v9 = vadd.f32 %v6429_v47, %v6190_v18  ;;  %v15796_v4 = vld [vmem:[#allocation20_spill] sm:$0xff]  ;;  %v15797_v49 = vld [vmem:[#allocation21_spill] sm:$0xff] }
 0x40b   : > { %v5944_v11 = vadd.f32 %v5943_v30, %v12377_v51  ;;  %v5975_v37 = vadd.f32 %v5974_v56, %v12381_v1  ;;  %v6205_v6 = vmul.f32 %v12395_v53, %v12395_v53  ;;  %v12413_v0 = vadd.f32 %v15793_v31, %v15792_v26  ;;  %v12423_v30 = vpop.f32.mrf.mxu0  ;;  %v9280_v56 = vld [vmem:[#allocation2 + $0x40] sm:$0xff]  }
 0x40c   : > { %15791 = vst [vmem:[#allocation31_spill] sm:$0xff] %v12399_v52  ;;  %v6206_v20 = vmul.f32 %v12399_v52, %v12399_v52  ;;  %v12417_v42 = vadd.f32 %v15795_v58, %v15794_v8  ;;  %v12419_v18 = vpop.f32.mrf.mxu1  ;;  %v6400_v22 = vadd.f32 %v6399_v57, %v6197_v45  ;;  %v6431_v17 = vadd.f32 %v6430_v9, %v6198_v24  ;;  %v15798_v45 = vld [vmem:[#allocation24_spill] sm:$0xff]  ;;  %v15799_v24 = vld [vmem:[#allocation30_spill] sm:$0xff] }
 0x40d   : > { %v5945_v14 = vadd.f32 %v5944_v11, %v12395_v53  ;;  %v5976_v47 = vadd.f32 %v5975_v37, %v12399_v52  ;;  %5666 = vmatmul.mubr.bf16.gmra.mxu0 %v9280_v56  ;;  %v6213_v55 = vmul.f32 %v12413_v0, %v12413_v0  ;;  %v12431_v26 = vadd.f32 %v15797_v49, %v15796_v4  ;;  %v9281_v11 = vld [vmem:[#allocation2 + $0x108] sm:$0xff]   ;;  %v12441_v56 = vpop.f32.mrf.mxu0 }
 0x40e   : > { %v6214_v60 = vmul.f32 %v12417_v42, %v12417_v42  ;;  %v12435_v57 = vadd.f32 %v15799_v24, %v15798_v45  ;;  %v12437_v9 = vpop.f32.mrf.mxu1  ;;  %5827 = vmatmul.mubr.bf16.gmra.mxu1 %v9281_v11  ;;  %v6401_v37 = vadd.f32 %v6400_v22, %v6205_v6  ;;  %v6432_v31 = vadd.f32 %v6431_v17, %v6206_v20  ;;  %v9282_v52 = vld [vmem:[#allocation2 + $0xac] sm:$0xff]   ;;  %v9283_v22 = vld [vmem:[#allocation2 + $0x174] sm:$0xff]  }
 0x40f   : > { %v5946_v8 = vadd.f32 %v5945_v14, %v12413_v0  ;;  %v5977_v58 = vadd.f32 %v5976_v47, %v12417_v42  ;;  %5675 = vmatprep.mubr.bf16.mxu0 %v9282_v52  ;;  %v6221_v4 = vmul.f32 %v12431_v26, %v12431_v26  ;;  %v12449_v45 = vadd.f32 %v11988_v5, %v11982_v12  ;;  %v12459_v24 = vpop.f32.mrf.mxu0 }
 0x410   : > { %v6222_v49 = vmul.f32 %v12435_v57, %v12435_v57  ;;  %v12453_v6 = vadd.f32 %v12018_v27, %v12000_v32  ;;  %v12455_v20 = vpop.f32.mrf.mxu1  ;;  %5836 = vmatprep.mubr.bf16.mxu1 %v9283_v22  ;;  %v6402_v17 = vadd.f32 %v6401_v37, %v6213_v55  ;;  %v6433_v52 = vadd.f32 %v6432_v31, %v6214_v60 }
 0x411   : > { %v5947_v14 = vadd.f32 %v5946_v8, %v12431_v26  ;;  %v5978_v47 = vadd.f32 %v5977_v58, %v12435_v57  ;;  %v6229_v12 = vmul.f32 %v12449_v45, %v12449_v45  ;;  %v12467_v32 = vadd.f32 %v12054_v38, %v12036_v29  ;;  %v12477_v8 = vpop.f32.mrf.mxu0 }
 0x412   : > { %v6230_v5 = vmul.f32 %v12453_v6, %v12453_v6  ;;  %v12471_v27 = vadd.f32 %v12105_v36, %v12075_v15  ;;  %v12473_v55 = vpop.f32.mrf.mxu1  ;;  %v6403_v60 = vadd.f32 %v6402_v17, %v6221_v4  ;;  %v6434_v11 = vadd.f32 %v6433_v52, %v6222_v49 }
 0x413   : > { %v5948_v37 = vadd.f32 %v5947_v14, %v12449_v45  ;;  %v5979_v31 = vadd.f32 %v5978_v47, %v12453_v6  ;;  %v6237_v58 = vmul.f32 %v12467_v32, %v12467_v32  ;;  %v12485_v38 = vadd.f32 %v12150_v21, %v12132_v33  ;;  %v12495_v52 = vpop.f32.mrf.mxu0  ;;  %v9284_v14 = vld [vmem:[#allocation2 + $0x48] sm:$0xff]  }
 0x414   : > { %v6238_v29 = vmul.f32 %v12471_v27, %v12471_v27  ;;  %v12489_v15 = vadd.f32 %v12186_v46, %v12168_v7  ;;  %v12491_v36 = vpop.f32.mrf.mxu1  ;;  %v6404_v4 = vadd.f32 %v6403_v60, %v6229_v12  ;;  %v6435_v49 = vadd.f32 %v6434_v11, %v6230_v5  ;;  %v9285_v12 = vld [vmem:[#allocation2 + $0x110] sm:$0xff]  }
 0x415   : > { %15800 = vst [vmem:[#allocation35_spill] sm:$0xff] %v12485_v38  ;;  %v5949_v22 = vadd.f32 %v5948_v37, %v12467_v32  ;;  %v5980_v17 = vadd.f32 %v5979_v31, %v12471_v27  ;;  %5676 = vmatmul.mubr.bf16.gmra.mxu0 %v9284_v14  ;;  %v6245_v33 = vmul.f32 %v12485_v38, %v12485_v38  ;;  %v12513_v31 = vpop.f32.mrf.mxu0  ;;  %v9286_v14 = vld [vmem:[#allocation2 + $0xb4] sm:$0xff]  }
 0x416   : > { %15801 = vst [vmem:[#allocation36_spill] sm:$0xff] %v12489_v15  ;;  %v6246_v21 = vmul.f32 %v12489_v15, %v12489_v15  ;;  %v12503_v7 = vadd.f32 %v12210_v10, %v12204_v59  ;;  %v12507_v46 = vadd.f32 %v12222_v50, %v12216_v28  ;;  %v12509_v47 = vpop.f32.mrf.mxu1  ;;  %5837 = vmatmul.mubr.bf16.gmra.mxu1 %v9285_v12 }
 0x417   : > { %v6405_v5 = vadd.f32 %v6404_v4, %v6237_v58  ;;  %v6436_v60 = vadd.f32 %v6435_v49, %v6238_v29  ;;  %v5950_v11 = vadd.f32 %v5949_v22, %v12485_v38  ;;  %v5981_v37 = vadd.f32 %v5980_v17, %v12489_v15  ;;  %5685 = vmatprep.mubr.bf16.mxu0 %v9286_v14  ;;  %v9287_v29 = vld [vmem:[#allocation2 + $0x17c] sm:$0xff]   ;;  %v12531_v12 = vpop.f32.mrf.mxu0 }
 0x418   : > { %15802 = vst [vmem:[#allocation7_spill] sm:$0xff] %v12507_v46  ;;  %v6253_v59 = vmul.f32 %v12503_v7, %v12503_v7  ;;  %v6254_v10 = vmul.f32 %v12507_v46, %v12507_v46  ;;  %v12521_v28 = vadd.f32 %v12234_v3, %v12228_v61  ;;  %v12525_v50 = vadd.f32 %v12246_v25, %v12240_v54  ;;  %v12527_v58 = vpop.f32.mrf.mxu1 }
 0x419   : > { %5846 = vmatprep.mubr.bf16.mxu1 %v9287_v29  ;;  %v6406_v4 = vadd.f32 %v6405_v5, %v6245_v33  ;;  %v6437_v49 = vadd.f32 %v6436_v60, %v6246_v21  ;;  %v5951_v22 = vadd.f32 %v5950_v11, %v12503_v7  ;;  %v5982_v17 = vadd.f32 %v5981_v37, %v12507_v46  ;;  %v12549_v37 = vpop.f32.mrf.mxu0 }
 0x41a   : > { %15803 = vst [vmem:[#allocation8_spill] sm:$0xff] %v12521_v28  ;;  %15804 = vst [vmem:[#allocation29_spill] sm:$0xff] %v12525_v50  ;;  %v6261_v61 = vmul.f32 %v12521_v28, %v12521_v28  ;;  %v6262_v3 = vmul.f32 %v12525_v50, %v12525_v50  ;;  %v12539_v54 = vadd.f32 %v12267_v41, %v12252_v43  ;;  %v12545_v33 = vpop.f32.mrf.mxu1 }
 0x41b   : > { %v12543_v25 = vadd.f32 %v12303_v13, %v12285_v40  ;;  %v6407_v21 = vadd.f32 %v6406_v4, %v6253_v59  ;;  %v6438_v5 = vadd.f32 %v6437_v49, %v6254_v10  ;;  %v5952_v60 = vadd.f32 %v5951_v22, %v12521_v28  ;;  %v12565_v49 = vpop.f32.mrf.mxu0  ;;  %v9288_v22 = vld [vmem:[#allocation2 + $0x50] sm:$0xff]  }
 0x41c   : > { %15805 = vst [vmem:[#allocation10_spill] sm:$0xff] %v12539_v54  ;;  %v5983_v11 = vadd.f32 %v5982_v17, %v12525_v50  ;;  %v6269_v14 = vmul.f32 %v12539_v54, %v12539_v54  ;;  %v12557_v41 = vadd.f32 %v12341_v23, %v12321_v35  ;;  %v12561_v40 = vadd.f32 %v12383_v16, %v12363_v63  ;;  %v5220_v13 = vpop.f32.mrf.mxu1 }
 0x41d   : > { %15806 = vst [vmem:[#allocation22_spill] sm:$0xff] %v12543_v25  ;;  %v6270_v43 = vmul.f32 %v12543_v25, %v12543_v25  ;;  %v6408_v59 = vadd.f32 %v6407_v21, %v6261_v61  ;;  %v6439_v10 = vadd.f32 %v6438_v5, %v6262_v3  ;;  %v5953_v29 = vadd.f32 %v5952_v60, %v12539_v54  ;;  %v9289_v61 = vld [vmem:[#allocation2 + $0x118] sm:$0xff]  }
 0x41e   : > { %15807 = vst [vmem:[#allocation14_spill] sm:$0xff] %v12557_v41  ;;  %15808 = vst [vmem:[#allocation18_spill] sm:$0xff] %v12561_v40  ;;  %v5984_v4 = vadd.f32 %v5983_v11, %v12543_v25  ;;  %5686 = vmatmul.mubr.bf16.gmra.mxu0 %v9288_v22  ;;  %v6277_v17 = vmul.f32 %v12557_v41, %v12557_v41  ;;  %v6278_v35 = vmul.f32 %v12561_v40, %v12561_v40  ;;  %v5224_v16 = vpop.f32.mrf.mxu1  ;;  %v12581_v11 = vpop.f32.mrf.mxu0  ;;  %v9290_v22 = vld [vmem:[#allocation2 + $0xbc] sm:$0xff]  }
 0x41f   : > { %v12573_v23 = vadd.f32 %v12401_v19, %v12387_v44  ;;  %v12577_v63 = vadd.f32 %v12419_v18, %v12405_v39  ;;  %5847 = vmatmul.mubr.bf16.gmra.mxu1 %v9289_v61  ;;  %v6409_v3 = vadd.f32 %v6408_v59, %v6269_v14  ;;  %v6440_v21 = vadd.f32 %v6439_v10, %v6270_v43  ;;  %v9291_v43 = vld [vmem:[#allocation2 + $0x184] sm:$0xff]  }
 0x420   : > { %v5954_v5 = vadd.f32 %v5953_v29, %v12557_v41  ;;  %v5985_v60 = vadd.f32 %v5984_v4, %v12561_v40  ;;  %5695 = vmatprep.mubr.bf16.mxu0 %v9290_v22  ;;  %v12589_v39 = vadd.f32 %v12437_v9, %v12423_v30  ;;  %v12593_v18 = vadd.f32 %v12455_v20, %v12441_v56  ;;  %v12595_v14 = vpop.f32.mrf.mxu1  ;;  %v5067_v61 = vpop.f32.mrf.mxu0 }
 0x421   : > { %15809 = vst [vmem:[#allocation23_spill] sm:$0xff] %v12573_v23  ;;  %v6285_v44 = vmul.f32 %v12573_v23, %v12573_v23  ;;  %v6286_v19 = vmul.f32 %v12577_v63, %v12577_v63  ;;  %5856 = vmatprep.mubr.bf16.mxu1 %v9291_v43  ;;  %v6410_v59 = vadd.f32 %v6409_v3, %v6277_v17  ;;  %v9293_v61 = vld [vmem:[#allocation2 + $0x120] sm:$0xff]  }
 0x422   : > { %15810 = vst [vmem:[#allocation38_spill] sm:$0xff] %v12589_v39  ;;  %15811 = vst [vmem:[#allocation39_spill] sm:$0xff] %v12593_v18  ;;  %v6441_v10 = vadd.f32 %v6440_v21, %v6278_v35  ;;  %v5955_v29 = vadd.f32 %v5954_v5, %v12573_v23  ;;  %v5986_v4 = vadd.f32 %v5985_v60, %v12577_v63  ;;  %v5228_v20 = vpop.f32.mrf.mxu1  ;;  %v5068_v5 = vpop.f32.mrf.mxu0 }
 0x423   : > { %v6293_v22 = vmul.f32 %v12589_v39, %v12589_v39  ;;  %v6294_v30 = vmul.f32 %v12593_v18, %v12593_v18  ;;  %v12605_v9 = vadd.f32 %v12473_v55, %v12459_v24  ;;  %v12609_v56 = vadd.f32 %v12491_v36, %v12477_v8 }
 0x424   : > { %v6411_v17 = vadd.f32 %v6410_v59, %v6285_v44  ;;  %v6442_v35 = vadd.f32 %v6441_v10, %v6286_v19  ;;  %v5956_v3 = vadd.f32 %v5955_v29, %v12589_v39  ;;  %v5987_v21 = vadd.f32 %v5986_v4, %v12593_v18  ;;  %v5229_v8 = vpop.f32.mrf.mxu1  ;;  %v5265_v10 = vpop.f32.mrf.mxu0  ;;  %v9292_v29 = vld [vmem:[#allocation2 + $0x58] sm:$0xff]  }
 0x425   : > { %15812 = vst [vmem:[#allocation27_spill] sm:$0xff] %v12609_v56  ;;  %v6301_v60 = vmul.f32 %v12605_v9, %v12605_v9  ;;  %v6302_v43 = vmul.f32 %v12609_v56, %v12609_v56  ;;  %v12619_v24 = vadd.f32 %v12509_v47, %v12495_v52  ;;  %v12623_v55 = vadd.f32 %v12527_v58, %v12513_v31 }
 0x426   : > { %v6412_v36 = vadd.f32 %v6411_v17, %v6293_v22  ;;  %v6443_v44 = vadd.f32 %v6442_v35, %v6294_v30  ;;  %v5957_v19 = vadd.f32 %v5956_v3, %v12605_v9  ;;  %v5988_v59 = vadd.f32 %v5987_v21, %v12609_v56  ;;  %5696 = vmatmul.mubr.bf16.gmra.mxu0 %v9292_v29  ;;  %v5426_v58 = vpop.f32.mrf.mxu1  ;;  %v5267_v35 = vpop.f32.mrf.mxu0  ;;  %v9294_v3 = vld [vmem:[#allocation2 + $0xc4] ss:$0 sps:$4 sm:$0x33]  }
 0x427   : > { %15813 = vst [vmem:[#allocation12_spill] sm:$0xff] %v12619_v24  ;;  %15814 = vst [vmem:[#allocation33_spill] sm:$0xff] %v12623_v55  ;;  %v6309_v4 = vmul.f32 %v12619_v24, %v12619_v24  ;;  %v6310_v52 = vmul.f32 %v12623_v55, %v12623_v55  ;;  %v12633_v47 = vadd.f32 %v12545_v33, %v12531_v12  ;;  %5857 = vmatmul.mubr.bf16.gmra.mxu1 %v9293_v61 }
 0x428   : > { %v12636_v31 = vadd.f32 %v5220_v13, %v12549_v37  ;;  %v6413_v22 = vadd.f32 %v6412_v36, %v6301_v60  ;;  %v6444_v30 = vadd.f32 %v6443_v44, %v6302_v43  ;;  %v5958_v20 = vadd.f32 %v5957_v19, %v12619_v24  ;;  %5705 = vmatprep.mubr.bf16.mxu0 %v9294_v3  ;;  %v15816_v37 = vld [vmem:[#allocation32_spill] sm:$0xff]  ;;  %v5428_v5 = vpop.f32.mrf.mxu1  ;;  %v9295_v60 = vld [vmem:[#allocation2 + $0x18c] ss:$0 sps:$4 sm:$0x33]   ;;  %v5269_v19 = vpop.f32.mrf.mxu0 }
 0x429   : > { %v5989_v17 = vadd.f32 %v5988_v59, %v12623_v55  ;;  %v6317_v21 = vmul.f32 %v12633_v47, %v12633_v47  ;;  %v12645_v33 = vadd.f32 %v5224_v16, %v12565_v49  ;;  %v7031_v13 = vsub.s32 2, %v15816_v37  ;;  %5866 = vmatprep.mubr.bf16.mxu1 %v9295_v60  ;;  %v9296_v49 = vld [vmem:[%s15324_s5] sm:$0xff] }
 0x42a   : > { %15815 = vst [vmem:[#allocation5_spill] sm:$0xff] %v12636_v31  ;;  %v6318_v12 = vmul.f32 %v12636_v31, %v12636_v31  ;;  %v6414_v43 = vadd.f32 %v6413_v22, %v6309_v4  ;;  %v6445_v8 = vadd.f32 %v6444_v30, %v6310_v52  ;;  %v5959_v36 = vadd.f32 %v5958_v20, %v12633_v47  ;;  %v9297_v4 = vld [vmem:[%s15325_s6] sm:$0xff]  ;;  %v5430_v61 = vpop.f32.mrf.mxu1  ;;  %v5271_v3 = vpop.f32.mrf.mxu0 }
 0x42b   : > { %v5990_v44 = vadd.f32 %v5989_v17, %v12636_v31  ;;  %v5960_v59 = vsel %vm2301_vm1, %v12645_v33, 0.0  ;;  %v6325_v29 = vmul.f32 %v12645_v33, %v12645_v33  ;;  %v12657_v16 = vrot.slane %v9296_v49, %v7031_v13 }
 0x42c   : > { %v12662_v52 = vrot.slane %v9297_v4, %v7031_v13  ;;  %v6415_v22 = vadd.f32 %v6414_v43, %v6317_v21  ;;  %v6446_v30 = vadd.f32 %v6445_v8, %v6318_v12  ;;  %v5961_v20 = vadd.f32 %v5960_v59, %v5959_v36  ;;  %v5432_v56 = vpop.f32.mrf.mxu1 }
 0x42d   : > { %15817 = vst [vmem:[#allocation6_spill] sm:$0xff] %v12657_v16  ;;  %v12666_v17 = vadd.f32 %v12595_v14, %v12581_v11  ;;  %v6416_v60 = vsel %vm2301_vm1, %v6325_v29, 0.0  ;;  %v7035_v31 = vsub.s32 3, %v15816_v37  ;;  %v12670_v16 = vadd.f32 %v5426_v58, %v5265_v10  ;;  %v5275_v11 = vpop.f32.mrf.mxu0  ;;  %v9298_v14 = vld [vmem:[#allocation2 + $0x60] ss:$0 sps:$4 sm:$0x33]  }
 0x42e   : > { %15818 = vst [vmem:[#allocation9_spill] sm:$0xff] %v12662_v52  ;;  %v12672_v55 = vadd.f32 %v5428_v5, %v5267_v35  ;;  %v5962_v13 = vrot.slane %v5961_v20, 4  ;;  %v6417_v52 = vadd.f32 %v6416_v60, %v6415_v22  ;;  %5706 = vmatmul.mubr.bf16.gmra.mxu0 %v9298_v14  ;;  %v5436_v58 = vpop.f32.mrf.mxu1  ;;  %v9299_v35 = vld [vmem:[#allocation2 + $0x128] ss:$0 sps:$4 sm:$0x33]   ;;  %v15851_v46 = vld [vmem:[#allocation33_spill] sm:$0xff] }
 0x42f   : > { %15819 = vst [vmem:[#allocation44_spill] sm:$0xff] %v12666_v17  ;;  %15820 = vst [vmem:[#allocation45_spill] sm:$0xff] %v12670_v16  ;;  %v5991_v21 = vsel %vm2301_vm1, %v12666_v17, 0.0  ;;  %v6326_v12 = vmul.f32 %v12666_v17, %v12666_v17  ;;  %v12678_v8 = vrot.slane %v9296_v49, %v7035_v31  ;;  %v12680_v36 = vrot.slane %v9297_v4, %v7035_v31  ;;  %v5277_v60 = vpop.f32.mrf.mxu0 }
 0x430   : > { %15821 = vst [vmem:[#allocation46_spill] sm:$0xff] %v12672_v55  ;;  %v5992_v43 = vadd.f32 %v5991_v21, %v5990_v44  ;;  %v6135_v10 = vmul.f32 %v12670_v16, %v12670_v16  ;;  %5867 = vmatmul.mubr.bf16.gmra.mxu1 %v9299_v35  ;;  %v5963_v5 = vadd.f32 %v5962_v13, %v5961_v20  ;;  %v6418_v59 = vrot.slane %v6417_v52, 4  ;;  %v5438_v4 = vpop.f32.mrf.mxu1 }
 0x431   : > { %15822 = vst [vmem:[#allocation47_spill] sm:$0xff] %v12678_v8  ;;  %15823 = vst [vmem:[#allocation13_spill] sm:$0xff] %v12680_v36  ;;  %v6447_v29 = vsel %vm2301_vm1, %v6326_v12, 0.0  ;;  %v6136_v22 = vmul.f32 %v12672_v55, %v12672_v55  ;;  %v12687_v49 = vadd.f32 %v5430_v61, %v5269_v19  ;;  %v12689_v31 = vadd.f32 %v5432_v56, %v5271_v3  ;;  %v5279_v20 = vpop.f32.mrf.mxu0  ;;  %v15852_v50 = vld [vmem:[#allocation5_spill] sm:$0xff] }
 0x432   : > { %v5993_v14 = vrot.slane %v5992_v43, 4  ;;  %v6448_v44 = vadd.f32 %v6447_v29, %v6446_v30  ;;  %v5964_v21 = vrot.slane %v5963_v5, 2  ;;  %v6419_v37 = vadd.f32 %v6418_v59, %v6417_v52  ;;  %v5440_v19 = vpop.f32.mrf.mxu1 }
 0x433   : > { %15824 = vst [vmem:[#allocation17_spill] sm:$0xff] %v12687_v49  ;;  %15825 = vst [vmem:[#allocation19_spill] sm:$0xff] %v12689_v31  ;;  %v12691_v36 = vadd.f32 %v5436_v58, %v5275_v11  ;;  %v12693_v35 = vadd.f32 %v5438_v4, %v5277_v60  ;;  %v5999_v8 = vadd.f32 %v12687_v49, %v12670_v16  ;;  %v5281_v11 = vpop.f32.mrf.mxu0 }
 0x434   : > { %v5994_v13 = vadd.f32 %v5993_v14, %v5992_v43  ;;  %v6449_v12 = vrot.slane %v6448_v44, 4  ;;  %v6143_v30 = vmul.f32 %v12687_v49, %v12687_v49  ;;  %v5965_v61 = vadd.f32 %v5964_v21, %v5963_v5  ;;  %v5442_v60 = vpop.f32.mrf.mxu1 }
 0x435   : > { %15826 = vst [vmem:[#allocation26_spill] sm:$0xff] %v12691_v36  ;;  %15827 = vst [vmem:[#allocation15_spill] sm:$0xff] %v12693_v35  ;;  %v6420_v56 = vrot.slane %v6419_v37, 2  ;;  %v6030_v3 = vadd.f32 %v12689_v31, %v12672_v55  ;;  %v6144_v52 = vmul.f32 %v12689_v31, %v12689_v31  ;;  %v6000_v29 = vadd.f32 %v5999_v8, %v12691_v36  ;;  %v12706_v21 = vpop.f32.mrf.mxu0 }
 0x436   : > { %v5995_v58 = vrot.slane %v5994_v13, 2  ;;  %v6450_v59 = vadd.f32 %v6449_v12, %v6448_v44  ;;  %v6455_v43 = vadd.f32 %v6143_v30, %v6135_v10  ;;  %v5966_v14 = vrot.slane %v5965_v61, 1  ;;  %v5446_v44 = vpop.f32.mrf.mxu1 }
 0x437   : > { %v6421_v4 = vadd.f32 %v6420_v56, %v6419_v37  ;;  %v6486_v16 = vadd.f32 %v6144_v52, %v6136_v22  ;;  %v6151_v5 = vmul.f32 %v12691_v36, %v12691_v36  ;;  %v6031_v17 = vadd.f32 %v6030_v3, %v12693_v35  ;;  %v5287_v37 = vpop.f32.mrf.mxu0 }
 0x438   : > { %v5996_v49 = vadd.f32 %v5995_v58, %v5994_v13  ;;  %v6451_v55 = vrot.slane %v6450_v59, 2  ;;  %v6152_v31 = vmul.f32 %v12693_v35, %v12693_v35  ;;  %v5967_v10 = vadd.f32 %v5966_v14, %v5965_v61  ;;  %v5448_v18 = vpop.f32.mrf.mxu1 }
 0x439   : > { %v6422_v12 = vrot.slane %v6421_v4, 1  ;;  %v6456_v8 = vadd.f32 %v6455_v43, %v6151_v5  ;;  %v12711_v30 = vadd.f32 %v5440_v19, %v5279_v20  ;;  %v12713_v36 = vadd.f32 %v5442_v60, %v5281_v11  ;;  %v5289_v14 = vpop.f32.mrf.mxu0 }
 0x43a   : > { %v5997_v22 = vrot.slane %v5996_v49, 1  ;;  %v6452_v56 = vadd.f32 %v6451_v55, %v6450_v59  ;;  %v6487_v52 = vadd.f32 %v6486_v16, %v6152_v31  ;;  %v12715_v13 = vmul.f32 0.0051020407, %v5967_v10  ;;  %v5450_v16 = vpop.f32.mrf.mxu1  ;;  %v15830_v59 = vld [vmem:[#allocation34_spill] sm:$0xff]  ;;  %v15833_v10 = vld [vmem:[#allocation11_spill] sm:$0xff] }
 0x43b   : > { %15828 = vst [vmem:[#allocation20_spill] sm:$0xff] %v12711_v30  ;;  %15829 = vst [vmem:[#allocation21_spill] sm:$0xff] %v12713_v36  ;;  %v6423_v58 = vadd.f32 %v6422_v12, %v6421_v4  ;;  %v12718_v3 = vadd.f32 %v6000_v29, %v12711_v30  ;;  %v6159_v61 = vmul.f32 %v12711_v30, %v12711_v30  ;;  %v12733_v5 = vpop.f32.mrf.mxu0 }
 0x43c   : > { %v5998_v43 = vadd.f32 %v5997_v22, %v5996_v49  ;;  %v6453_v20 = vrot.slane %v6452_v56, 1  ;;  %v12723_v19 = vadd.f32 %v6031_v17, %v12713_v36  ;;  %v6160_v55 = vmul.f32 %v12713_v36, %v12713_v36  ;;  %v15834_v22 = vld [vmem:[#allocation25_spill] sm:$0xff]  ;;  %v15835_v36 = vld [vmem:[#allocation3_spill] sm:$0xff]  ;;  %v12743_v30 = vpop.f32.mrf.mxu1 }
 0x43d   : > { %v6581_v31 = vmul.f32 0.0051020407, %v6423_v58  ;;  %v6589_v11 = vmul.f32 %v12715_v13, %v12715_v13  ;;  %v12751_v49 = vpop.f32.mrf.mxu0  ;;  %v6457_v39 = vadd.f32 %v6456_v8, %v6159_v61  ;;  %v12798_v58 = vadd.f32 %v5446_v44, %v12706_v21  ;;  %v15841_v21 = vld [vmem:[#allocation43_spill] sm:$0xff] }
 0x43e   : > { %v12761_v4 = vpop.f32.mrf.mxu1  ;;  %v12793_v23 = vmul.f32 0.0051020407, %v5998_v43  ;;  %v6454_v17 = vadd.f32 %v6453_v20, %v6452_v56  ;;  %v6488_v28 = vadd.f32 %v6487_v52, %v6160_v55  ;;  %v12800_v35 = vadd.f32 %v5448_v18, %v5287_v37  ;;  %v15839_v56 = vld [vmem:[#allocation37_spill] sm:$0xff]  ;;  %v15845_v37 = vld [vmem:[#allocation31_spill] sm:$0xff] }
 0x43f   : > { %v6597_v29 = vsub.f32 %v6581_v31, %v6589_v11  ;;  %v12771_v12 = vpop.f32.mrf.mxu0  ;;  %15836 = vst [vmem:[#allocation24_spill] sm:$0xff] %v12798_v58  ;;  %v12802_v24 = vadd.f32 %v5450_v16, %v5289_v14  ;;  %v15843_v14 = vld [vmem:[#allocation28_spill] sm:$0xff]  ;;  %v15850_v44 = vld [vmem:[#allocation27_spill] sm:$0xff]  ;;  %v6167_v15 = vmul.f32 %v12798_v58, %v12798_v58 }
 0x440   : > { %v12781_v38 = vpop.f32.mrf.mxu1  ;;  %15837 = vst [vmem:[#allocation30_spill] sm:$0xff] %v12800_v35  ;;  %v6582_v11 = vmul.f32 0.0051020407, %v6454_v17  ;;  %v6590_v43 = vmul.f32 %v12793_v23, %v12793_v23  ;;  %v6033_v55 = vadd.f32 %v12723_v19, %v12800_v35 }
 0x441   : > { %v12791_v41 = vpop.f32.mrf.mxu0  ;;  %v6805_v60 = vadd.f32 1e-05, %v6597_v29  ;;  %15838 = vst [vmem:[#allocation34_spill] sm:$0xff] %v12802_v24 }
 0x442   : > { %v12795_v54 = vpop.f32.mrf.mxu1  ;;  %v6598_v29 = vsub.f32 %v6582_v11, %v6590_v43  ;;  %v6168_v11 = vmul.f32 %v12800_v35, %v12800_v35 }
 0x443   : > { %v12804_v31 = vpop.f32.mrf.mxu0  ;;  %9182 = vrsqrt.f32 %v6805_v60  ;;  %v15844_v60 = vld [vmem:[#allocation4_spill] sm:$0xff] }
 0x444   : > { %v5462_v61 = vpop.f32.mrf.mxu1  ;;  %v6806_v20 = vadd.f32 1e-05, %v6598_v29  ;;  %v12880_v29 = vadd.f32 %v12743_v30, %v12733_v5  ;;  %v6489_v35 = vadd.f32 %v6488_v28, %v6168_v11  ;;  %v12896_v30 = vadd.f32 %v12781_v38, %v12771_v12 }
 0x445   : > { %v5305_v16 = vpop.f32.mrf.mxu0  ;;  %v12905_v28 = vadd.f32 %v12795_v54, %v12791_v41  ;;  %v12919_v12 = vadd.f32 %v5462_v61, %v12804_v31  ;;  %v15866_v31 = vsub.f32 %v15830_v59, %v12715_v13  ;;  %v15867_v61 = vld [vmem:[#allocation40_spill] sm:$0xff]  ;;  %v15874_v59 = vsub.f32 %v15835_v36, %v12715_v13 }
 0x446   : > { %v5466_v52 = vpop.f32.mrf.mxu1  ;;  %15856 = vst [vmem:[#allocation28_spill] sm:$0xff] %v12880_v29  ;;  %9184 = vrsqrt.f32 %v6806_v20  ;;  %v6176_v8 = vmul.f32 %v12880_v29, %v12880_v29  ;;  %15860 = vst [vmem:[#allocation33_spill] sm:$0xff] %v12896_v30  ;;  %v12916_v38 = vmul.f32 %v12896_v30, %v12896_v30  ;;  %v15880_v36 = vsub.f32 %v12413_v0, %v12715_v13 }
 0x447   : > { %v12832_v43 = vpop.f32.mrf.mxu0  ;;  %15862 = vst [vmem:[#allocation48_spill] sm:$0xff] %v12905_v28  ;;  %v12930_v41 = vmul.f32 %v12905_v28, %v12905_v28  ;;  %v15887_v0 = vsub.f32 %v12503_v7, %v12715_v13 }
 0x448   : > { %15846 = vst [vmem:[#allocation11_spill] sm:$0xff] %v12832_v43  ;;  %v12842_v17 = vpop.f32.mrf.mxu1  ;;  %v12909_v20 = vadd.f32 %v6489_v35, %v6176_v8 }
 0x449   : > { %15847 = vst [vmem:[#allocation25_spill] sm:$0xff] %v12842_v17  ;;  %v12852_v43 = vpop.f32.mrf.mxu0  ;;  %v6175_v17 = vmul.f32 %v12802_v24, %v12802_v24 }
 0x44a   : > { %15848 = vst [vmem:[#allocation3_spill] sm:$0xff] %v12852_v43  ;;  %v12862_v25 = vpop.f32.mrf.mxu1  ;;  %v6002_v43 = vadd.f32 %v12718_v3, %v12798_v58  ;;  %v6458_v3 = vadd.f32 %v6457_v39, %v6167_v15 }
 0x44b   : > { %15853 = vst [vmem:[#allocation37_spill] sm:$0xff] %v12862_v25  ;;  %v12870_v18 = vpop.f32.mrf.mxu0  ;;  %v6034_v25 = vadd.f32 %v6033_v55, %v12880_v29 }
 0x44c   : > { %15855 = vst [vmem:[#allocation43_spill] sm:$0xff] %v12870_v18  ;;  %v12882_v40 = vpop.f32.mrf.mxu1  ;;  %v6003_v58 = vadd.f32 %v6002_v43, %v12802_v24  ;;  %v12887_v18 = vadd.f32 %v12761_v4, %v12751_v49  ;;  %v6459_v15 = vadd.f32 %v6458_v3, %v6175_v17  ;;  %v15868_v43 = vsub.f32 %v15867_v61, %v12715_v13 }
 0x44d   : > { %15857 = vst [vmem:[#allocation4_spill] sm:$0xff] %v12882_v40  ;;  %v12889_v19 = vpop.f32.mrf.mxu0  ;;  %v12912_v55 = vadd.f32 %v6034_v25, %v12896_v30  ;;  %v12932_v25 = vadd.f32 %v5466_v52, %v5305_v16  ;;  %v15871_v30 = vsub.f32 %v15833_v10, %v12715_v13  ;;  %v15873_v16 = vsub.f32 %v15834_v22, %v12715_v13 }
 0x44e   : > { %15858 = vst [vmem:[#allocation31_spill] sm:$0xff] %v12887_v18  ;;  %15859 = vst [vmem:[#allocation27_spill] sm:$0xff] %v12889_v19  ;;  %v12898_v5 = vpop.f32.mrf.mxu1  ;;  %v6004_v39 = vadd.f32 %v6003_v58, %v12887_v18  ;;  %v6183_v4 = vmul.f32 %v12887_v18, %v12887_v18  ;;  %v15875_v61 = vsub.f32 %v11837_v2, %v12715_v13 }
 0x44f   : > { %15861 = vst [vmem:[#allocation5_spill] sm:$0xff] %v12898_v5  ;;  %v12907_v49 = vpop.f32.mrf.mxu0  ;;  %v15879_v22 = vsub.f32 %v12395_v53, %v12715_v13  ;;  %v15881_v2 = vsub.f32 %v12431_v26, %v12715_v13  ;;  %v15885_v53 = vld [vmem:[#allocation35_spill] sm:$0xff] }
 0x450   : > { %15863 = vst [vmem:[#allocation49_spill] sm:$0xff] %v12907_v49  ;;  %v12921_v58 = vpop.f32.mrf.mxu1  ;;  %v9183_v17 = vpop.eup %9182  ;;  %v12923_v11 = vadd.f32 %v6459_v15, %v6183_v4  ;;  %v12926_v54 = vadd.f32 %v6004_v39, %v12905_v28  ;;  %v15869_v15 = vld [vmem:[#allocation42_spill] sm:$0xff] }
 0x451   : > { %15864 = vst [vmem:[#allocation50_spill] sm:$0xff] %v12921_v58  ;;  %v12934_v35 = vpop.f32.mrf.mxu0  ;;  %v6821_v8 = vmul.f32 %v9183_v17, %v15866_v31  ;;  %v6829_v3 = vmul.f32 %v9183_v17, %v15868_v43  ;;  %v15870_v39 = vsub.f32 %v15869_v15, %v12715_v13  ;;  %v6845_v29 = vmul.f32 %v9183_v17, %v15871_v30 }
 0x452   : > { %15865 = vst [vmem:[#allocation51_spill] sm:$0xff] %v12934_v35  ;;  %v12948_v52 = vpop.f32.mrf.mxu1  ;;  %v6853_v28 = vmul.f32 %v9183_v17, %v15873_v16  ;;  %v6861_v31 = vmul.f32 %v9183_v17, %v15874_v59  ;;  %v6869_v43 = vmul.f32 %v9183_v17, %v15875_v61  ;;  %v15876_v15 = vsub.f32 %v15781_v48, %v12715_v13 }
 0x453   : > { %v6837_v4 = vmul.f32 %v9183_v17, %v15870_v39  ;;  %15872 = vst [vmem:[#allocation40_spill] sm:$0xff] %v12948_v52  ;;  %v12962_v10 = vpop.f32.mrf.mxu0  ;;  %v15878_v30 = vsub.f32 %v12377_v51, %v12715_v13  ;;  %v6893_v16 = vmul.f32 %v9183_v17, %v15879_v22  ;;  %v6901_v59 = vmul.f32 %v9183_v17, %v15880_v36 }
 0x454   : > { %v6877_v39 = vmul.f32 %v9183_v17, %v15876_v15  ;;  %15877 = vst [vmem:[#allocation42_spill] sm:$0xff] %v12962_v10  ;;  %v6909_v61 = vmul.f32 %v9183_v17, %v15881_v2  ;;  %v12976_v48 = vpop.f32.mrf.mxu1  ;;  %v15883_v15 = vsub.f32 %v12449_v45, %v12715_v13  ;;  %v15884_v51 = vsub.f32 %v12467_v32, %v12715_v13  ;;  %v15889_v2 = vld [vmem:[#allocation8_spill] sm:$0xff]  ;;  %v15891_v45 = vld [vmem:[#allocation10_spill] sm:$0xff] }
 0x455   : > { %v6885_v18 = vmul.f32 %v9183_v17, %v15878_v30  ;;  %15882 = vst [vmem:[#allocation52_spill] sm:$0xff] %v12976_v48  ;;  %v15886_v22 = vsub.f32 %v15885_v53, %v12715_v13  ;;  %v6941_v36 = vmul.f32 %v9183_v17, %v15887_v0  ;;  %v12990_v26 = vpop.f32.mrf.mxu0  ;;  %v15890_v48 = vsub.f32 %v15889_v2, %v12715_v13  ;;  %v15893_v32 = vld [vmem:[#allocation14_spill] sm:$0xff]  ;;  %v15895_v53 = vld [vmem:[#allocation23_spill] sm:$0xff] }
 0x456   : > { %v6917_v24 = vmul.f32 %v9183_v17, %v15883_v15  ;;  %v6925_v30 = vmul.f32 %v9183_v17, %v15884_v51  ;;  %15888 = vst [vmem:[#allocation35_spill] sm:$0xff] %v12990_v26  ;;  %v15892_v15 = vsub.f32 %v15891_v45, %v12715_v13  ;;  %v15894_v51 = vsub.f32 %v15893_v32, %v12715_v13  ;;  %v13004_v7 = vpop.f32.mrf.mxu1  ;;  %v15898_v0 = vld [vmem:[#allocation38_spill] sm:$0xff]  ;;  %v15901_v45 = vld [vmem:[#allocation12_spill] sm:$0xff] }
 0x457   : > { %v6933_v10 = vmul.f32 %v9183_v17, %v15886_v22  ;;  %v6949_v52 = vmul.f32 %v9183_v17, %v15890_v48  ;;  %v15896_v22 = vsub.f32 %v15895_v53, %v12715_v13  ;;  %15897 = vst [vmem:[#allocation8_spill] sm:$0xff] %v13004_v7  ;;  %v15899_v26 = vsub.f32 %v15898_v0, %v12715_v13  ;;  %v13018_v53 = vpop.f32.mrf.mxu0  ;;  %v15906_v0 = vld [vmem:[#allocation6_spill] sm:$0xff] }
 0x458   : > { %v6957_v35 = vmul.f32 %v9183_v17, %v15892_v15  ;;  %v6965_v58 = vmul.f32 %v9183_v17, %v15894_v51  ;;  %v15900_v48 = vsub.f32 %v12605_v9, %v12715_v13  ;;  %v15902_v15 = vsub.f32 %v15901_v45, %v12715_v13  ;;  %15904 = vst [vmem:[#allocation10_spill] sm:$0xff] %v13018_v53 }
 0x459   : > { %v6973_v49 = vmul.f32 %v9183_v17, %v15896_v22  ;;  %v6981_v5 = vmul.f32 %v9183_v17, %v15899_v26  ;;  %v15903_v32 = vsub.f32 %v12633_v47, %v12715_v13  ;;  %v15905_v22 = vsub.f32 %v12645_v33, %v12715_v13  ;;  %v13032_v53 = vpop.f32.mrf.mxu0  ;;  %v13034_v33 = vpop.eup %9184 }
 0x45a   : > { %v6989_v2 = vmul.f32 %v9183_v17, %v15900_v48  ;;  %v6997_v19 = vmul.f32 %v9183_v17, %v15902_v15  ;;  %v7063_v26 = vmul.f32 %v15906_v0, %v6821_v8  ;;  %v7071_v40 = vmul.f32 %v15906_v0, %v6829_v3  ;;  %v13026_v48 = vpop.f32.mrf.mxu1  ;;  %15908 = vst [vmem:[#allocation23_spill] sm:$0xff] %v13032_v53 }
 0x45b   : > { %v7005_v51 = vmul.f32 %v9183_v17, %v15903_v32  ;;  %v7013_v7 = vmul.f32 %v9183_v17, %v15905_v22  ;;  %v7079_v9 = vmul.f32 %v15906_v0, %v6837_v4  ;;  %15907 = vst [vmem:[#allocation14_spill] sm:$0xff] %v13026_v48  ;;  %v7087_v45 = vmul.f32 %v15906_v0, %v6845_v29  ;;  %v13046_v22 = vpop.f32.mrf.mxu0 }
 0x45c   : > { %v7095_v15 = vmul.f32 %v15906_v0, %v6853_v28  ;;  %v7103_v47 = vmul.f32 %v15906_v0, %v6861_v31  ;;  %v7111_v32 = vmul.f32 %v15906_v0, %v6869_v43  ;;  %v7119_v13 = vmul.f32 %v15906_v0, %v6877_v39  ;;  %v13040_v4 = vpop.f32.mrf.mxu1  ;;  %15910 = vst [vmem:[#allocation12_spill] sm:$0xff] %v13046_v22  ;;  %v15912_v22 = vld [vmem:[#allocation9_spill] sm:$0xff] }
 0x45d   : > { %v7127_v17 = vmul.f32 %v15906_v0, %v6885_v18  ;;  %v7135_v8 = vmul.f32 %v15906_v0, %v6893_v16  ;;  %v7143_v3 = vmul.f32 %v15906_v0, %v6901_v59  ;;  %15909 = vst [vmem:[#allocation38_spill] sm:$0xff] %v13040_v4  ;;  %v7151_v29 = vmul.f32 %v15906_v0, %v6909_v61  ;;  %v13058_v4 = vpop.f32.mrf.mxu0 }
 0x45e   : > { %v7159_v28 = vmul.f32 %v15906_v0, %v6917_v24  ;;  %v7167_v31 = vmul.f32 %v15906_v0, %v6925_v30  ;;  %v7175_v43 = vmul.f32 %v15906_v0, %v6933_v10  ;;  %v7183_v39 = vmul.f32 %v15906_v0, %v6941_v36  ;;  %v13052_v53 = vpop.f32.mrf.mxu1 }
 0x45f   : > { %v7191_v18 = vmul.f32 %v15906_v0, %v6949_v52  ;;  %v7199_v16 = vmul.f32 %v15906_v0, %v6957_v35  ;;  %v7207_v59 = vmul.f32 %v15906_v0, %v6965_v58  ;;  %15911 = vst [vmem:[#allocation6_spill] sm:$0xff] %v13052_v53  ;;  %v7215_v61 = vmul.f32 %v15906_v0, %v6973_v49  ;;  %v13070_v53 = vpop.f32.mrf.mxu0 }
 0x460   : > { %v7223_v24 = vmul.f32 %v15906_v0, %v6981_v5  ;;  %v7231_v30 = vmul.f32 %v15906_v0, %v6989_v2  ;;  %v7239_v10 = vmul.f32 %v15906_v0, %v6997_v19  ;;  %v7247_v36 = vmul.f32 %v15906_v0, %v7005_v51  ;;  %v13064_v48 = vpop.f32.mrf.mxu1 }
 0x461   : > { %v7255_v52 = vmul.f32 %v15906_v0, %v7013_v7  ;;  %v7305_v35 = vadd.f32 %v15912_v22, %v7063_v26  ;;  %v7313_v58 = vadd.f32 %v15912_v22, %v7071_v40  ;;  %v7321_v49 = vadd.f32 %v15912_v22, %v7079_v9 }
 0x462   : > { %v7329_v5 = vadd.f32 %v15912_v22, %v7087_v45  ;;  %v7337_v2 = vadd.f32 %v15912_v22, %v7095_v15  ;;  %v7345_v19 = vadd.f32 %v15912_v22, %v7103_v47  ;;  %v7353_v51 = vadd.f32 %v15912_v22, %v7111_v32  ;;  %v13082_v26 = vpop.f32.mrf.mxu1  ;;  %v13100_v32 = vpop.f32.mrf.mxu0 }
 0x463   : > { %v7361_v7 = vadd.f32 %v15912_v22, %v7119_v13  ;;  %v7369_v0 = vadd.f32 %v15912_v22, %v7127_v17  ;;  %v7377_v40 = vadd.f32 %v15912_v22, %v7135_v8  ;;  %7505 = vst [vmem:[%s15326_s7 + $0x10] sm:$0xff] %v7305_v35  ;;  %7513 = vst [vmem:[%s15326_s7 + $0x50] sm:$0xff] %v7313_v58  ;;  %v15917_v58 = vld [vmem:[#allocation16_spill] sm:$0xff] }
 0x464   : > { %v7385_v9 = vadd.f32 %v15912_v22, %v7143_v3  ;;  %v7393_v45 = vadd.f32 %v15912_v22, %v7151_v29  ;;  %v7401_v15 = vadd.f32 %v15912_v22, %v7159_v28  ;;  %v7409_v47 = vadd.f32 %v15912_v22, %v7167_v31  ;;  %7521 = vst [vmem:[%s15326_s7 + $0x90] sm:$0xff] %v7321_v49  ;;  %v13118_v29 = vpop.f32.mrf.mxu1 }
 0x465   : > { %7529 = vst [vmem:[%s15326_s7 + $0xd0] sm:$0xff] %v7329_v5  ;;  %7537 = vst [vmem:[%s15326_s7 + $0x110] sm:$0xff] %v7337_v2  ;;  %v7417_v13 = vadd.f32 %v15912_v22, %v7175_v43  ;;  %v7425_v17 = vadd.f32 %v15912_v22, %v7183_v39  ;;  %v7433_v8 = vadd.f32 %v15912_v22, %v7191_v18  ;;  %v13136_v18 = vpop.f32.mrf.mxu0 }
 0x466   : > { %7545 = vst [vmem:[%s15326_s7 + $0x150] sm:$0xff] %v7345_v19  ;;  %v7441_v3 = vadd.f32 %v15912_v22, %v7199_v16  ;;  %7553 = vst [vmem:[%s15326_s7 + $0x190] sm:$0xff] %v7353_v51  ;;  %v7449_v28 = vadd.f32 %v15912_v22, %v7207_v59  ;;  %v7457_v31 = vadd.f32 %v15912_v22, %v7215_v61 }
 0x467   : > { %7561 = vst [vmem:[%s15326_s7 + $0x1d0] sm:$0xff] %v7361_v7  ;;  %7569 = vst [vmem:[%s15326_s7 + $0x210] sm:$0xff] %v7369_v0  ;;  %v7465_v43 = vadd.f32 %v15912_v22, %v7223_v24  ;;  %v7473_v39 = vadd.f32 %v15912_v22, %v7231_v30  ;;  %v7481_v16 = vadd.f32 %v15912_v22, %v7239_v10  ;;  %v13157_v30 = vpop.f32.mrf.mxu1  ;;  %v13187_v51 = vpop.f32.mrf.mxu0 }
 0x468   : > { %7577 = vst [vmem:[%s15326_s7 + $0x250] sm:$0xff] %v7377_v40  ;;  %7585 = vst [vmem:[%s15326_s7 + $0x290] sm:$0xff] %v7385_v9  ;;  %v7489_v59 = vadd.f32 %v15912_v22, %v7247_v36  ;;  %v7497_v61 = vadd.f32 %v15912_v22, %v7255_v52  ;;  %v15913_v24 = vsub.f32 %v15839_v56, %v12793_v23  ;;  %v15914_v56 = vld [vmem:[#allocation41_spill] sm:$0xff] }
 0x469   : > { %7593 = vst [vmem:[%s15326_s7 + $0x2d0] sm:$0xff] %v7393_v45  ;;  %7601 = vst [vmem:[%s15326_s7 + $0x310] sm:$0xff] %v7401_v15  ;;  %v15915_v10 = vsub.f32 %v15914_v56, %v12793_v23  ;;  %v15916_v52 = vsub.f32 %v15841_v21, %v12793_v23  ;;  %v15918_v49 = vsub.f32 %v15917_v58, %v12793_v23  ;;  %v15937_v58 = vld [vmem:[#allocation18_spill] sm:$0xff] }
 0x46a   : > { %7609 = vst [vmem:[%s15326_s7 + $0x350] sm:$0xff] %v7409_v47  ;;  %7617 = vst [vmem:[%s15326_s7 + $0x390] sm:$0xff] %v7417_v13  ;;  %v6822_v22 = vmul.f32 %v13034_v33, %v15913_v24  ;;  %v15919_v2 = vsub.f32 %v15843_v14, %v12793_v23  ;;  %v15920_v21 = vsub.f32 %v15844_v60, %v12793_v23  ;;  %v13214_v47 = vpop.f32.mrf.mxu1 }
 0x46b   : > { %7625 = vst [vmem:[%s15326_s7 + $0x3d0] sm:$0xff] %v7425_v17  ;;  %7633 = vst [vmem:[%s15326_s7 + $0x410] sm:$0xff] %v7433_v8  ;;  %v6830_v36 = vmul.f32 %v13034_v33, %v15915_v10  ;;  %v6838_v35 = vmul.f32 %v13034_v33, %v15916_v52  ;;  %v6846_v5 = vmul.f32 %v13034_v33, %v15918_v49 }
 0x46c   : > { %7641 = vst [vmem:[%s15326_s7 + $0x450] sm:$0xff] %v7441_v3  ;;  %7649 = vst [vmem:[%s15326_s7 + $0x490] sm:$0xff] %v7449_v28  ;;  %v6854_v19 = vmul.f32 %v13034_v33, %v15919_v2  ;;  %v6862_v14 = vmul.f32 %v13034_v33, %v15920_v21  ;;  %v15921_v7 = vsub.f32 %v11839_v62, %v12793_v23  ;;  %v13232_v28 = vpop.f32.mrf.mxu0  ;;  %v13250_v56 = vpop.f32.mrf.mxu1 }
 0x46d   : > { %7657 = vst [vmem:[%s15326_s7 + $0x4d0] sm:$0xff] %v7457_v31  ;;  %7665 = vst [vmem:[%s15326_s7 + $0x510] sm:$0xff] %v7465_v43  ;;  %v15922_v40 = vsub.f32 %v15782_v34, %v12793_v23  ;;  %v15923_v45 = vsub.f32 %v12381_v1, %v12793_v23  ;;  %v15924_v60 = vsub.f32 %v15845_v37, %v12793_v23 }
 0x46e   : > { %7673 = vst [vmem:[%s15326_s7 + $0x550] sm:$0xff] %v7473_v39  ;;  %7681 = vst [vmem:[%s15326_s7 + $0x590] sm:$0xff] %v7481_v16  ;;  %v6870_v0 = vmul.f32 %v13034_v33, %v15921_v7  ;;  %v15925_v62 = vsub.f32 %v12417_v42, %v12793_v23  ;;  %v15926_v34 = vsub.f32 %v12435_v57, %v12793_v23  ;;  %v15929_v42 = vld [vmem:[#allocation36_spill] sm:$0xff]  ;;  %v15931_v57 = vld [vmem:[#allocation7_spill] sm:$0xff] }
 0x46f   : > { %7689 = vst [vmem:[%s15326_s7 + $0x5d0] sm:$0xff] %v7489_v59  ;;  %7697 = vst [vmem:[%s15326_s7 + $0x610] sm:$0xf] %v7497_v61  ;;  %v6878_v9 = vmul.f32 %v13034_v33, %v15922_v40  ;;  %v6886_v15 = vmul.f32 %v13034_v33, %v15923_v45  ;;  %v6894_v13 = vmul.f32 %v13034_v33, %v15924_v60  ;;  %v15940_v40 = vld [vmem:[#allocation39_spill] sm:$0xff] }
 0x470   : > { %v6902_v17 = vmul.f32 %v13034_v33, %v15925_v62  ;;  %v6910_v8 = vmul.f32 %v13034_v33, %v15926_v34  ;;  %v15927_v1 = vsub.f32 %v12453_v6, %v12793_v23  ;;  %v15928_v37 = vsub.f32 %v12471_v27, %v12793_v23  ;;  %v15933_v6 = vld [vmem:[#allocation29_spill] sm:$0xff]  ;;  %v15935_v27 = vld [vmem:[#allocation22_spill] sm:$0xff]  ;;  %v13268_v62 = vpop.f32.mrf.mxu0 }
 0x471   : > { %v15930_v43 = vsub.f32 %v15929_v42, %v12793_v23  ;;  %v15932_v16 = vsub.f32 %v15931_v57, %v12793_v23  ;;  %v15934_v61 = vsub.f32 %v15933_v6, %v12793_v23  ;;  %v15936_v10 = vsub.f32 %v15935_v27, %v12793_v23  ;;  %v15945_v57 = vld [vmem:[#allocation44_spill] sm:$0xff] }
 0x472   : > { %v6918_v3 = vmul.f32 %v13034_v33, %v15927_v1  ;;  %v6926_v31 = vmul.f32 %v13034_v33, %v15928_v37  ;;  %v15938_v49 = vsub.f32 %v15937_v58, %v12793_v23  ;;  %v15939_v21 = vsub.f32 %v12577_v63, %v12793_v23 }
 0x473   : > { %v6934_v39 = vmul.f32 %v13034_v33, %v15930_v43  ;;  %v6942_v59 = vmul.f32 %v13034_v33, %v15932_v16  ;;  %v6950_v24 = vmul.f32 %v13034_v33, %v15934_v61  ;;  %v6958_v52 = vmul.f32 %v13034_v33, %v15936_v10  ;;  %v13286_v61 = vpop.f32.mrf.mxu1 }
 0x474   : > { %v6966_v2 = vmul.f32 %v13034_v33, %v15938_v49  ;;  %v6974_v7 = vmul.f32 %v13034_v33, %v15939_v21  ;;  %v15941_v45 = vsub.f32 %v15940_v40, %v12793_v23  ;;  %v15942_v34 = vsub.f32 %v15850_v44, %v12793_v23  ;;  %v15947_v44 = vld [vmem:[#allocation47_spill] sm:$0xff]  ;;  %v13292_v49 = vpop.f32.mrf.mxu0 }
 0x475   : > { %v15943_v37 = vsub.f32 %v15851_v46, %v12793_v23  ;;  %v15944_v63 = vsub.f32 %v15852_v50, %v12793_v23  ;;  %v15946_v16 = vsub.f32 %v15945_v57, %v12793_v23  ;;  %v7064_v27 = vmul.f32 %v15947_v44, %v6822_v22  ;;  %v13298_v40 = vpop.f32.mrf.mxu1  ;;  %v15949_v57 = vld [vmem:[#allocation13_spill] sm:$0xff] }
 0x476   : > { %v6982_v60 = vmul.f32 %v13034_v33, %v15941_v45  ;;  %v6990_v1 = vmul.f32 %v13034_v33, %v15942_v34  ;;  %v7072_v10 = vmul.f32 %v15947_v44, %v6830_v36  ;;  %v7080_v46 = vmul.f32 %v15947_v44, %v6838_v35  ;;  %v13304_v45 = vpop.f32.mrf.mxu0 }
 0x477   : > { %v6998_v42 = vmul.f32 %v13034_v33, %v15943_v37  ;;  %v7006_v43 = vmul.f32 %v13034_v33, %v15944_v63  ;;  %v7014_v6 = vmul.f32 %v13034_v33, %v15946_v16  ;;  %v7088_v58 = vmul.f32 %v15947_v44, %v6846_v5  ;;  %v13310_v34 = vpop.f32.mrf.mxu1 }
 0x478   : > { %v7096_v50 = vmul.f32 %v15947_v44, %v6854_v19  ;;  %v7104_v21 = vmul.f32 %v15947_v44, %v6862_v14  ;;  %v7112_v23 = vmul.f32 %v15947_v44, %v6870_v0  ;;  %v7120_v33 = vmul.f32 %v15947_v44, %v6878_v9  ;;  %v13316_v37 = vpop.f32.mrf.mxu0 }
 0x479   : > { %v7128_v22 = vmul.f32 %v15947_v44, %v6886_v15  ;;  %v7136_v36 = vmul.f32 %v15947_v44, %v6894_v13  ;;  %v7144_v35 = vmul.f32 %v15947_v44, %v6902_v17  ;;  %v7152_v5 = vmul.f32 %v15947_v44, %v6910_v8  ;;  %15948 = vst [vmem:[#allocation9_spill] sm:$0xff] %v13316_v37  ;;  %v13322_v63 = vpop.f32.mrf.mxu1 }
 0x47a   : > { %v7160_v19 = vmul.f32 %v15947_v44, %v6918_v3  ;;  %v7168_v14 = vmul.f32 %v15947_v44, %v6926_v31  ;;  %v7176_v0 = vmul.f32 %v15947_v44, %v6934_v39  ;;  %v7184_v9 = vmul.f32 %v15947_v44, %v6942_v59  ;;  %v13328_v16 = vpop.f32.mrf.mxu0 }
 0x47b   : > { %v7192_v15 = vmul.f32 %v15947_v44, %v6950_v24  ;;  %v7200_v13 = vmul.f32 %v15947_v44, %v6958_v52  ;;  %v7208_v17 = vmul.f32 %v15947_v44, %v6966_v2  ;;  %v7216_v8 = vmul.f32 %v15947_v44, %v6974_v7  ;;  %v13334_v37 = vpop.f32.mrf.mxu1 }
 0x47c   : > { %v7224_v3 = vmul.f32 %v15947_v44, %v6982_v60  ;;  %v7232_v31 = vmul.f32 %v15947_v44, %v6990_v1  ;;  %v7240_v39 = vmul.f32 %v15947_v44, %v6998_v42  ;;  %v7248_v59 = vmul.f32 %v15947_v44, %v7006_v43 }
 0x47d   : > { %v7256_v24 = vmul.f32 %v15947_v44, %v7014_v6  ;;  %v7306_v52 = vadd.f32 %v15949_v57, %v7064_v27  ;;  %v7314_v2 = vadd.f32 %v15949_v57, %v7072_v10  ;;  %v7322_v7 = vadd.f32 %v15949_v57, %v7080_v46  ;;  %v13349_v46 = vpop.f32.mrf.mxu0 }
 0x47e   : > { %v7330_v60 = vadd.f32 %v15949_v57, %v7088_v58  ;;  %v7338_v1 = vadd.f32 %v15949_v57, %v7096_v50  ;;  %v7346_v42 = vadd.f32 %v15949_v57, %v7104_v21  ;;  %v7354_v43 = vadd.f32 %v15949_v57, %v7112_v23 }
 0x47f   : > { %v7362_v6 = vadd.f32 %v15949_v57, %v7120_v33  ;;  %v7370_v44 = vadd.f32 %v15949_v57, %v7128_v22  ;;  %v7378_v27 = vadd.f32 %v15949_v57, %v7136_v36  ;;  %v7386_v10 = vadd.f32 %v15949_v57, %v7144_v35  ;;  %7506 = vst [vmem:[%s15326_s7 + $0x18] sm:$0xff] %v7306_v52  ;;  %v13367_v33 = vpop.f32.mrf.mxu1  ;;  %v15953_v52 = vld [vmem:[#allocation3_spill] sm:$0xff] }
 0x480   : > { %7514 = vst [vmem:[%s15326_s7 + $0x58] sm:$0xff] %v7314_v2  ;;  %7522 = vst [vmem:[%s15326_s7 + $0x98] sm:$0xff] %v7322_v7  ;;  %v7394_v58 = vadd.f32 %v15949_v57, %v7152_v5  ;;  %v7402_v50 = vadd.f32 %v15949_v57, %v7160_v19  ;;  %v7410_v21 = vadd.f32 %v15949_v57, %v7168_v14  ;;  %v13385_v19 = vpop.f32.mrf.mxu0  ;;  %v15954_v2 = vld [vmem:[#allocation37_spill] sm:$0xff]  ;;  %v15955_v7 = vld [vmem:[#allocation43_spill] sm:$0xff] }
 0x481   : > { %v7418_v23 = vadd.f32 %v15949_v57, %v7176_v0  ;;  %7530 = vst [vmem:[%s15326_s7 + $0xd8] sm:$0xff] %v7330_v60  ;;  %7538 = vst [vmem:[%s15326_s7 + $0x118] sm:$0xff] %v7338_v1  ;;  %v7426_v22 = vadd.f32 %v15949_v57, %v7184_v9  ;;  %v7434_v36 = vadd.f32 %v15949_v57, %v7192_v15  ;;  %v15956_v60 = vld [vmem:[#allocation4_spill] sm:$0xff] }
 0x482   : > { %7546 = vst [vmem:[%s15326_s7 + $0x158] sm:$0xff] %v7346_v42  ;;  %7554 = vst [vmem:[%s15326_s7 + $0x198] sm:$0xff] %v7354_v43  ;;  %v7442_v35 = vadd.f32 %v15949_v57, %v7200_v13  ;;  %v7450_v5 = vadd.f32 %v15949_v57, %v7208_v17  ;;  %v7458_v14 = vadd.f32 %v15949_v57, %v7216_v8  ;;  %v13403_v13 = vpop.f32.mrf.mxu1  ;;  %v15958_v42 = vld [vmem:[#allocation27_spill] sm:$0xff]  ;;  %v15959_v43 = vld [vmem:[#allocation5_spill] sm:$0xff] }
 0x483   : > { %7562 = vst [vmem:[%s15326_s7 + $0x1d8] sm:$0xff] %v7362_v6  ;;  %7570 = vst [vmem:[%s15326_s7 + $0x218] sm:$0xff] %v7370_v44  ;;  %v7466_v0 = vadd.f32 %v15949_v57, %v7224_v3  ;;  %v7474_v9 = vadd.f32 %v15949_v57, %v7232_v31  ;;  %v7482_v15 = vadd.f32 %v15949_v57, %v7240_v39  ;;  %v13423_v39 = vpop.f32.mrf.mxu0 }
 0x484   : > { %7578 = vst [vmem:[%s15326_s7 + $0x258] sm:$0xff] %v7378_v27  ;;  %7586 = vst [vmem:[%s15326_s7 + $0x298] sm:$0xff] %v7386_v10  ;;  %v7490_v17 = vadd.f32 %v15949_v57, %v7248_v59  ;;  %v7498_v8 = vadd.f32 %v15949_v57, %v7256_v24  ;;  %v6491_v3 = vadd.f32 %v12909_v20, %v12916_v38  ;;  %v13445_v59 = vpop.f32.mrf.mxu1  ;;  %v15951_v24 = vld [vmem:[#allocation25_spill] sm:$0xff] }
 0x485   : > { %7594 = vst [vmem:[%s15326_s7 + $0x2d8] sm:$0xff] %v7394_v58  ;;  %7602 = vst [vmem:[%s15326_s7 + $0x318] sm:$0xff] %v7402_v50  ;;  %v6461_v31 = vadd.f32 %v12923_v11, %v12930_v41  ;;  %v6036_v20 = vadd.f32 %v12912_v55, %v12919_v12  ;;  %v6192_v38 = vmul.f32 %v12919_v12, %v12919_v12  ;;  %v15950_v55 = vld [vmem:[#allocation11_spill] sm:$0xff]  ;;  %v13469_v44 = vpop.f32.mrf.mxu0  ;;  %v15960_v58 = vld [vmem:[#allocation49_spill] sm:$0xff] }
 0x486   : > { %7610 = vst [vmem:[%s15326_s7 + $0x358] sm:$0xff] %v7410_v21  ;;  %7618 = vst [vmem:[%s15326_s7 + $0x398] sm:$0xff] %v7418_v23  ;;  %v6006_v11 = vadd.f32 %v12926_v54, %v12932_v25  ;;  %v6199_v41 = vmul.f32 %v12932_v25, %v12932_v25  ;;  %v13455_v57 = vadd.f32 %v15951_v24, %v15950_v55  ;;  %v15961_v50 = vld [vmem:[#allocation50_spill] sm:$0xff]  ;;  %v15963_v23 = vld [vmem:[#allocation51_spill] sm:$0xff] }
 0x487   : > { %7626 = vst [vmem:[%s15326_s7 + $0x3d8] sm:$0xff] %v7426_v22  ;;  %7634 = vst [vmem:[%s15326_s7 + $0x418] sm:$0xff] %v7434_v36  ;;  %v13459_v54 = vadd.f32 %v15954_v2, %v15953_v52  ;;  %v13463_v1 = vadd.f32 %v15956_v60, %v15955_v7  ;;  %v13467_v6 = vadd.f32 %v15959_v43, %v15958_v42  ;;  %v15964_v22 = vld [vmem:[#allocation40_spill] sm:$0xff]  ;;  %v15965_v52 = vld [vmem:[#allocation42_spill] sm:$0xff] }
 0x488   : > { %7642 = vst [vmem:[%s15326_s7 + $0x458] sm:$0xff] %v7442_v35  ;;  %7650 = vst [vmem:[%s15326_s7 + $0x498] sm:$0xff] %v7450_v5  ;;  %v6492_v27 = vadd.f32 %v6491_v3, %v6192_v38  ;;  %v6462_v10 = vadd.f32 %v6461_v31, %v6199_v41  ;;  %v13473_v21 = vadd.f32 %v15961_v50, %v15960_v58  ;;  %v13479_v35 = vpop.f32.mrf.mxu1  ;;  %v15966_v2 = vld [vmem:[#allocation52_spill] sm:$0xff]  ;;  %v15967_v60 = vld [vmem:[#allocation35_spill] sm:$0xff] }
 0x489   : > { %7658 = vst [vmem:[%s15326_s7 + $0x4d8] sm:$0xff] %v7458_v14  ;;  %7666 = vst [vmem:[%s15326_s7 + $0x518] sm:$0xff] %v7466_v0  ;;  %v13477_v36 = vadd.f32 %v15964_v22, %v15963_v23  ;;  %v6037_v5 = vadd.f32 %v6036_v20, %v13455_v57  ;;  %v6200_v14 = vmul.f32 %v13455_v57, %v13455_v57  ;;  %v15968_v42 = vld [vmem:[#allocation8_spill] sm:$0xff]  ;;  %v15969_v58 = vld [vmem:[#allocation10_spill] sm:$0xff] }
 0x48a   : > { %7674 = vst [vmem:[%s15326_s7 + $0x558] sm:$0xff] %v7474_v9  ;;  %7682 = vst [vmem:[%s15326_s7 + $0x598] sm:$0xff] %v7482_v15  ;;  %v6007_v0 = vadd.f32 %v6006_v11, %v13459_v54  ;;  %v6207_v9 = vmul.f32 %v13459_v54, %v13459_v54  ;;  %v13487_v15 = vpop.f32.mrf.mxu0  ;;  %v6216_v3 = vmul.f32 %v13473_v21, %v13473_v21  ;;  %v13497_v20 = vpop.f32.mrf.mxu1  ;;  %v15970_v50 = vld [vmem:[#allocation14_spill] sm:$0xff] }
 0x48b   : > { %7690 = vst [vmem:[%s15326_s7 + $0x5d8] sm:$0xff] %v7490_v17  ;;  %7698 = vst [vmem:[%s15326_s7 + $0x618] sm:$0xf] %v7498_v8  ;;  %v6208_v17 = vmul.f32 %v13463_v1, %v13463_v1  ;;  %v6215_v8 = vmul.f32 %v13467_v6, %v13467_v6  ;;  %v6223_v31 = vmul.f32 %v13477_v36, %v13477_v36 }
 0x48c   : > { %15952 = vst [vmem:[#allocation41_spill] sm:$0xff] %v13455_v57  ;;  %15957 = vst [vmem:[#allocation16_spill] sm:$0xff] %v13463_v1  ;;  %v6493_v38 = vadd.f32 %v6492_v27, %v6200_v14  ;;  %v6463_v11 = vadd.f32 %v6462_v10, %v6207_v9  ;;  %v6038_v41 = vadd.f32 %v6037_v5, %v13463_v1  ;;  %v13501_v24 = vpop.f32.mrf.mxu0  ;;  %v15971_v27 = vld [vmem:[#allocation23_spill] sm:$0xff]  ;;  %v15972_v10 = vld [vmem:[#allocation38_spill] sm:$0xff]  ;;  %v13519_v5 = vpop.f32.mrf.mxu1 }
 0x48d   : > { %15962 = vst [vmem:[#allocation36_spill] sm:$0xff] %v13473_v21  ;;  %v6008_v55 = vadd.f32 %v6007_v0, %v13467_v6  ;;  %v13505_v7 = vadd.f32 %v15966_v2, %v15965_v52  ;;  %v13509_v43 = vadd.f32 %v15968_v42, %v15967_v60  ;;  %v13513_v23 = vadd.f32 %v15970_v50, %v15969_v58 }
 0x48e   : > { %v13517_v22 = vadd.f32 %v15972_v10, %v15971_v27  ;;  %v6494_v14 = vadd.f32 %v6493_v38, %v6208_v17  ;;  %v6464_v0 = vadd.f32 %v6463_v11, %v6215_v8  ;;  %v6039_v9 = vadd.f32 %v6038_v41, %v13473_v21  ;;  %v13523_v2 = vpop.f32.mrf.mxu0  ;;  %v13533_v17 = vpop.f32.mrf.mxu1  ;;  %v15973_v27 = vld [vmem:[#allocation12_spill] sm:$0xff]  ;;  %v15974_v10 = vld [vmem:[#allocation6_spill] sm:$0xff] }
 0x48f   : > { %v6009_v52 = vadd.f32 %v6008_v55, %v13477_v36  ;;  %v6224_v60 = vmul.f32 %v13505_v7, %v13505_v7  ;;  %v6231_v42 = vmul.f32 %v13509_v43, %v13509_v43  ;;  %v6232_v58 = vmul.f32 %v13513_v23, %v13513_v23 }
 0x490   : > { %v6239_v50 = vmul.f32 %v13517_v22, %v13517_v22  ;;  %v6495_v8 = vadd.f32 %v6494_v14, %v6216_v3  ;;  %v6465_v38 = vadd.f32 %v6464_v0, %v6223_v31  ;;  %v6040_v11 = vadd.f32 %v6039_v9, %v13505_v7  ;;  %v13537_v55 = vpop.f32.mrf.mxu0  ;;  %v13555_v31 = vpop.f32.mrf.mxu1 }
 0x491   : > { %v6010_v41 = vadd.f32 %v6009_v52, %v13509_v43  ;;  %v13541_v21 = vadd.f32 %v15974_v10, %v15973_v27  ;;  %v13545_v1 = vadd.f32 %v13064_v48, %v13058_v4  ;;  %v13549_v57 = vadd.f32 %v13082_v26, %v13070_v53 }
 0x492   : > { %v13553_v3 = vadd.f32 %v13118_v29, %v13100_v32  ;;  %v6496_v14 = vadd.f32 %v6495_v8, %v6224_v60  ;;  %v6466_v0 = vadd.f32 %v6465_v38, %v6231_v42  ;;  %v6041_v9 = vadd.f32 %v6040_v11, %v13513_v23  ;;  %v13559_v27 = vpop.f32.mrf.mxu0  ;;  %v13569_v32 = vpop.f32.mrf.mxu1 }
 0x493   : > { %15975 = vst [vmem:[#allocation7_spill] sm:$0xff] %v13545_v1  ;;  %15976 = vst [vmem:[#allocation29_spill] sm:$0xff] %v13549_v57  ;;  %v6011_v52 = vadd.f32 %v6010_v41, %v13517_v22  ;;  %v6240_v48 = vmul.f32 %v13541_v21, %v13541_v21  ;;  %v6247_v53 = vmul.f32 %v13545_v1, %v13545_v1 }
 0x494   : > { %v6248_v4 = vmul.f32 %v13549_v57, %v13549_v57  ;;  %v6255_v26 = vmul.f32 %v13553_v3, %v13553_v3  ;;  %v6497_v29 = vadd.f32 %v6496_v14, %v6232_v58  ;;  %v6467_v60 = vadd.f32 %v6466_v0, %v6239_v50  ;;  %v13573_v38 = vpop.f32.mrf.mxu0  ;;  %v13591_v50 = vpop.f32.mrf.mxu1 }
 0x495   : > { %v6042_v42 = vadd.f32 %v6041_v9, %v13541_v21  ;;  %v6012_v8 = vadd.f32 %v6011_v52, %v13545_v1  ;;  %v13577_v11 = vadd.f32 %v13157_v30, %v13136_v18  ;;  %v13581_v41 = vadd.f32 %v13214_v47, %v13187_v51 }
 0x496   : > { %v13585_v10 = vadd.f32 %v13250_v56, %v13232_v28  ;;  %v13589_v58 = vadd.f32 %v13286_v61, %v13268_v62  ;;  %v6498_v14 = vadd.f32 %v6497_v29, %v6240_v48  ;;  %v6468_v0 = vadd.f32 %v6467_v60, %v6247_v53  ;;  %v13595_v30 = vpop.f32.mrf.mxu0  ;;  %v13605_v62 = vpop.f32.mrf.mxu1 }
 0x497   : > { %15977 = vst [vmem:[#allocation22_spill] sm:$0xff] %v13577_v11  ;;  %v6043_v9 = vadd.f32 %v6042_v42, %v13549_v57  ;;  %v6013_v18 = vadd.f32 %v6012_v8, %v13553_v3  ;;  %v6256_v51 = vmul.f32 %v13577_v11, %v13577_v11  ;;  %v6263_v47 = vmul.f32 %v13581_v41, %v13581_v41  ;;  %v15982_v8 = vld [vmem:[#allocation9_spill] sm:$0xff] }
 0x498   : > { %15978 = vst [vmem:[#allocation18_spill] sm:$0xff] %v13585_v10  ;;  %15979 = vst [vmem:[#allocation39_spill] sm:$0xff] %v13589_v58  ;;  %v6264_v28 = vmul.f32 %v13585_v10, %v13585_v10  ;;  %v6271_v56 = vmul.f32 %v13589_v58, %v13589_v58  ;;  %v6499_v61 = vadd.f32 %v6498_v14, %v6248_v4  ;;  %v5389_v29 = vpop.f32.mrf.mxu0 }
 0x499   : > { %v6469_v52 = vadd.f32 %v6468_v0, %v6255_v26  ;;  %v6044_v48 = vadd.f32 %v6043_v9, %v13577_v11  ;;  %v6014_v53 = vadd.f32 %v6013_v18, %v13581_v41  ;;  %v13611_v60 = vadd.f32 %v13298_v40, %v13292_v49  ;;  %v5550_v26 = vpop.f32.mrf.mxu1 }
 0x49a   : > { %v13615_v42 = vadd.f32 %v13310_v34, %v13304_v45  ;;  %v13619_v57 = vadd.f32 %v13322_v63, %v15982_v8  ;;  %v13623_v4 = vadd.f32 %v13334_v37, %v13328_v16  ;;  %v6500_v14 = vadd.f32 %v6499_v61, %v6256_v51  ;;  %v5390_v40 = vpop.f32.mrf.mxu0 }
 0x49b   : > { %15980 = vst [vmem:[#allocation44_spill] sm:$0xff] %v13611_v60  ;;  %v6470_v0 = vadd.f32 %v6469_v52, %v6263_v47  ;;  %v6045_v9 = vadd.f32 %v6044_v48, %v13585_v10  ;;  %v6015_v49 = vadd.f32 %v6014_v53, %v13589_v58  ;;  %v6272_v45 = vmul.f32 %v13611_v60, %v13611_v60  ;;  %v5551_v16 = vpop.f32.mrf.mxu1 }
 0x49c   : > { %15981 = vst [vmem:[#allocation47_spill] sm:$0xff] %v13615_v42  ;;  %15983 = vst [vmem:[#allocation13_spill] sm:$0xff] %v13619_v57  ;;  %v6279_v34 = vmul.f32 %v13615_v42, %v13615_v42  ;;  %v6280_v63 = vmul.f32 %v13619_v57, %v13619_v57  ;;  %v6287_v37 = vmul.f32 %v13623_v4, %v13623_v4  ;;  %v13637_v52 = vpop.f32.mrf.mxu0 }
 0x49d   : > { %15984 = vst [vmem:[#allocation11_spill] sm:$0xff] %v13623_v4  ;;  %v6501_v18 = vadd.f32 %v6500_v14, %v6264_v28  ;;  %v6471_v51 = vadd.f32 %v6470_v0, %v6271_v56  ;;  %v6046_v47 = vadd.f32 %v6045_v9, %v13611_v60  ;;  %v6016_v61 = vadd.f32 %v6015_v49, %v13615_v42  ;;  %v13655_v56 = vpop.f32.mrf.mxu1 }
 0x49e   : > { %v13641_v48 = vadd.f32 %v13367_v33, %v13349_v46  ;;  %v13645_v53 = vadd.f32 %v13403_v13, %v13385_v19  ;;  %v13649_v29 = vadd.f32 %v13445_v59, %v13423_v39  ;;  %v13653_v28 = vadd.f32 %v13479_v35, %v13469_v44  ;;  %v13659_v33 = vpop.f32.mrf.mxu0 }
 0x49f   : > { %v6502_v8 = vadd.f32 %v6501_v18, %v6272_v45  ;;  %v6472_v26 = vadd.f32 %v6471_v51, %v6279_v34  ;;  %v6047_v14 = vadd.f32 %v6046_v47, %v13619_v57  ;;  %v6017_v46 = vadd.f32 %v6016_v61, %v13623_v4  ;;  %v5750_v44 = vpop.f32.mrf.mxu1 }
 0x4a0   : > { %15985 = vst [vmem:[#allocation25_spill] sm:$0xff] %v13645_v53  ;;  %15986 = vst [vmem:[#allocation3_spill] sm:$0xff] %v13649_v29  ;;  %v6288_v19 = vmul.f32 %v13641_v48, %v13641_v48  ;;  %v6295_v13 = vmul.f32 %v13645_v53, %v13645_v53  ;;  %v6296_v39 = vmul.f32 %v13649_v29, %v13649_v29  ;;  %v13671_v40 = vpop.f32.mrf.mxu0 }
 0x4a1   : > { %v6303_v59 = vmul.f32 %v13653_v28, %v13653_v28  ;;  %v6503_v35 = vadd.f32 %v6502_v8, %v6280_v63  ;;  %v6473_v0 = vadd.f32 %v6472_v26, %v6287_v37  ;;  %v6048_v9 = vadd.f32 %v6047_v14, %v13641_v48  ;;  %v13689_v37 = vpop.f32.mrf.mxu1 }
 0x4a2   : > { %v6018_v49 = vadd.f32 %v6017_v46, %v13645_v53  ;;  %v13675_v45 = vadd.f32 %v13497_v20, %v13487_v15  ;;  %v13679_v34 = vadd.f32 %v13519_v5, %v13501_v24  ;;  %v13683_v16 = vadd.f32 %v13533_v17, %v13523_v2  ;;  %v13693_v20 = vpop.f32.mrf.mxu0 }
 0x4a3   : > { %v13687_v63 = vadd.f32 %v13555_v31, %v13537_v55  ;;  %v6504_v18 = vadd.f32 %v6503_v35, %v6288_v19  ;;  %v6474_v51 = vadd.f32 %v6473_v0, %v6295_v13  ;;  %v6049_v47 = vadd.f32 %v6048_v9, %v13649_v29  ;;  %v5754_v55 = vpop.f32.mrf.mxu1  ;;  %v15992_v13 = vld [vmem:[#allocation32_spill] sm:$0xff] }
 0x4a4   : > { %15987 = vst [vmem:[#allocation37_spill] sm:$0xff] %v13675_v45  ;;  %15988 = vst [vmem:[#allocation43_spill] sm:$0xff] %v13683_v16  ;;  %v6019_v15 = vadd.f32 %v6018_v49, %v13653_v28  ;;  %v6304_v24 = vmul.f32 %v13675_v45, %v13675_v45  ;;  %v6311_v5 = vmul.f32 %v13679_v34, %v13679_v34  ;;  %v5597_v14 = vpop.f32.mrf.mxu0  ;;  %v7039_v35 = vsub.s32 4, %v15992_v13 }
 0x4a5   : > { %15989 = vst [vmem:[#allocation4_spill] sm:$0xff] %v13687_v63  ;;  %v6312_v2 = vmul.f32 %v13683_v16, %v13683_v16  ;;  %v6319_v17 = vmul.f32 %v13687_v63, %v13687_v63  ;;  %v6505_v31 = vadd.f32 %v6504_v18, %v6296_v39  ;;  %v6475_v61 = vadd.f32 %v6474_v51, %v6303_v59  ;;  %v5758_v39 = vpop.f32.mrf.mxu1 }
 0x4a6   : > { %v6050_v8 = vadd.f32 %v6049_v47, %v13675_v45  ;;  %v6020_v26 = vadd.f32 %v6019_v15, %v13679_v34  ;;  %v13707_v46 = vadd.f32 %v13569_v32, %v13559_v27  ;;  %v13711_v19 = vadd.f32 %v13591_v50, %v13573_v38  ;;  %v5599_v51 = vpop.f32.mrf.mxu0  ;;  %v9300_v50 = vld [vmem:[%s15324_s5] sm:$0xff] }
 0x4a7   : > { %v13716_v0 = vadd.f32 %v13605_v62, %v13595_v30  ;;  %v6506_v59 = vadd.f32 %v6505_v31, %v6304_v24  ;;  %v6476_v9 = vadd.f32 %v6475_v61, %v6311_v5  ;;  %v13729_v30 = vrot.slane %v9300_v50, %v7039_v35  ;;  %v5760_v62 = vpop.f32.mrf.mxu1 }
 0x4a8   : > { %15990 = vst [vmem:[#allocation27_spill] sm:$0xff] %v13707_v46  ;;  %15991 = vst [vmem:[#allocation5_spill] sm:$0xff] %v13711_v19  ;;  %v6051_v49 = vadd.f32 %v6050_v8, %v13683_v16  ;;  %v6021_v18 = vadd.f32 %v6020_v26, %v13687_v63  ;;  %v6320_v27 = vmul.f32 %v13707_v46, %v13707_v46  ;;  %v6022_v32 = vsel %vm2301_vm1, %v13711_v19, 0.0  ;;  %v13732_v31 = vpop.f32.mrf.mxu0  ;;  %v9301_v8 = vld [vmem:[%s15325_s6] sm:$0xff]  ;;  %v16026_v63 = vld [vmem:[#allocation28_spill] sm:$0xff] }
 0x4a9   : > { %15993 = vst [vmem:[#allocation49_spill] sm:$0xff] %v13716_v0  ;;  %v6327_v38 = vmul.f32 %v13711_v19, %v13711_v19  ;;  %15994 = vst [vmem:[#allocation50_spill] sm:$0xff] %v13729_v30  ;;  %v6507_v47 = vadd.f32 %v6506_v59, %v6312_v2  ;;  %v6477_v15 = vadd.f32 %v6476_v9, %v6319_v17  ;;  %v6053_v16 = vsel %vm2301_vm1, %v13716_v0, 0.0  ;;  %v5762_v17 = vpop.f32.mrf.mxu1 }
 0x4aa   : > { %v6052_v24 = vadd.f32 %v6051_v49, %v13707_v46  ;;  %v6023_v5 = vadd.f32 %v6022_v32, %v6021_v18  ;;  %v13738_v26 = vrot.slane %v9301_v8, %v7039_v35  ;;  %v6328_v2 = vmul.f32 %v13716_v0, %v13716_v0  ;;  %v13744_v32 = vpop.f32.mrf.mxu0 }
 0x4ab   : > { %v6478_v61 = vsel %vm2301_vm1, %v6327_v38, 0.0  ;;  %v6508_v59 = vadd.f32 %v6507_v47, %v6320_v27  ;;  %v7043_v30 = vsub.s32 5, %v15992_v13  ;;  %v13750_v35 = vadd.f32 %v13655_v56, %v13637_v52  ;;  %v5764_v46 = vpop.f32.mrf.mxu1 }
 0x4ac   : > { %15995 = vst [vmem:[#allocation51_spill] sm:$0xff] %v13738_v26  ;;  %v6024_v9 = vrot.slane %v6023_v5, 4  ;;  %v6479_v49 = vadd.f32 %v6478_v61, %v6477_v15  ;;  %v6054_v18 = vadd.f32 %v6053_v16, %v6052_v24  ;;  %v6509_v38 = vsel %vm2301_vm1, %v6328_v2, 0.0  ;;  %v13755_v15 = vpop.f32.mrf.mxu0 }
 0x4ad   : > { %15996 = vst [vmem:[#allocation40_spill] sm:$0xff] %v13750_v35  ;;  %v13753_v26 = vadd.f32 %v5750_v44, %v13659_v33  ;;  %v6510_v47 = vadd.f32 %v6509_v38, %v6508_v59  ;;  %v13757_v16 = vrot.slane %v9300_v50, %v7043_v30  ;;  %v13759_v24 = vrot.slane %v9301_v8, %v7043_v30  ;;  %v13765_v56 = vpop.f32.mrf.mxu1 }
 0x4ae   : > { %v6025_v0 = vadd.f32 %v6024_v9, %v6023_v5  ;;  %v6480_v45 = vrot.slane %v6479_v49, 4  ;;  %v6055_v27 = vrot.slane %v6054_v18, 4  ;;  %v6137_v61 = vmul.f32 %v13750_v35, %v13750_v35  ;;  %v13767_v9 = vpop.f32.mrf.mxu0 }
 0x4af   : > { %15997 = vst [vmem:[#allocation42_spill] sm:$0xff] %v13753_v26  ;;  %15998 = vst [vmem:[#allocation52_spill] sm:$0xff] %v13757_v16  ;;  %v6138_v52 = vmul.f32 %v13753_v26, %v13753_v26  ;;  %v6511_v2 = vrot.slane %v6510_v47, 4  ;;  %v13771_v50 = vadd.f32 %v13689_v37, %v13671_v40  ;;  %v13774_v30 = vadd.f32 %v5754_v55, %v13693_v20  ;;  %v13780_v38 = vpop.f32.mrf.mxu1 }
 0x4b0   : > { %15999 = vst [vmem:[#allocation35_spill] sm:$0xff] %v13759_v24  ;;  %v6026_v33 = vrot.slane %v6025_v0, 2  ;;  %v6481_v44 = vadd.f32 %v6480_v45, %v6479_v49  ;;  %v6056_v5 = vadd.f32 %v6055_v27, %v6054_v18  ;;  %v13776_v8 = vadd.f32 %v5758_v39, %v5597_v14  ;;  %v13782_v18 = vpop.f32.mrf.mxu0 }
 0x4b1   : > { %16000 = vst [vmem:[#allocation8_spill] sm:$0xff] %v13771_v50  ;;  %16001 = vst [vmem:[#allocation10_spill] sm:$0xff] %v13774_v30  ;;  %v13778_v59 = vadd.f32 %v5760_v62, %v5599_v51  ;;  %v6512_v49 = vadd.f32 %v6511_v2, %v6510_v47  ;;  %v6061_v27 = vadd.f32 %v13771_v50, %v13750_v35  ;;  %v13792_v55 = vpop.f32.mrf.mxu1 }
 0x4b2   : > { %16002 = vst [vmem:[#allocation14_spill] sm:$0xff] %v13776_v8  ;;  %v6027_v13 = vadd.f32 %v6026_v33, %v6025_v0  ;;  %v6482_v24 = vrot.slane %v6481_v44, 2  ;;  %v6057_v45 = vrot.slane %v6056_v5, 2  ;;  %16004 = vst [vmem:[#allocation38_spill] sm:$0xff] %v13782_v18  ;;  %v6145_v40 = vmul.f32 %v13771_v50, %v13771_v50  ;;  %v13794_v62 = vpop.f32.mrf.mxu0 }
 0x4b3   : > { %16003 = vst [vmem:[#allocation23_spill] sm:$0xff] %v13778_v59  ;;  %v6092_v37 = vadd.f32 %v13774_v30, %v13753_v26  ;;  %v6146_v20 = vmul.f32 %v13774_v30, %v13774_v30  ;;  %16005 = vst [vmem:[#allocation12_spill] sm:$0xff] %v13792_v55  ;;  %v6513_v51 = vrot.slane %v6512_v49, 2  ;;  %v6062_v2 = vadd.f32 %v6061_v27, %v13776_v8  ;;  %v13799_v35 = vpop.f32.mrf.mxu1 }
 0x4b4   : > { %v6028_v14 = vrot.slane %v6027_v13, 1  ;;  %v6483_v0 = vadd.f32 %v6482_v24, %v6481_v44  ;;  %v6058_v39 = vadd.f32 %v6057_v45, %v6056_v5  ;;  %v6517_v47 = vadd.f32 %v6145_v40, %v6137_v61  ;;  %v13801_v55 = vpop.f32.mrf.mxu0 }
 0x4b5   : > { %v6548_v33 = vadd.f32 %v6146_v20, %v6138_v52  ;;  %v6153_v50 = vmul.f32 %v13776_v8, %v13776_v8  ;;  %v6514_v18 = vadd.f32 %v6513_v51, %v6512_v49  ;;  %v6093_v44 = vadd.f32 %v6092_v37, %v13778_v59  ;;  %v13809_v5 = vpop.f32.mrf.mxu1  ;;  %v16014_v8 = vld [vmem:[#allocation31_spill] sm:$0xff] }
 0x4b6   : > { %v6029_v26 = vadd.f32 %v6028_v14, %v6027_v13  ;;  %v6484_v16 = vrot.slane %v6483_v0, 1  ;;  %v6059_v30 = vrot.slane %v6058_v39, 1  ;;  %v6154_v61 = vmul.f32 %v13778_v59, %v13778_v59  ;;  %v13813_v20 = vpop.f32.mrf.mxu0 }
 0x4b7   : > { %v6518_v24 = vadd.f32 %v6517_v47, %v6153_v50  ;;  %v13807_v52 = vadd.f32 %v5762_v17, %v13732_v31  ;;  %v6515_v40 = vrot.slane %v6514_v18, 1  ;;  %v13823_v31 = vadd.f32 %v5764_v46, %v13744_v32  ;;  %v13825_v17 = vpop.f32.mrf.mxu1  ;;  %v16011_v46 = vld [vmem:[#allocation20_spill] sm:$0xff] }
 0x4b8   : > { %v13811_v45 = vmul.f32 0.0051020407, %v6029_v26  ;;  %v6485_v27 = vadd.f32 %v6484_v16, %v6483_v0  ;;  %v6060_v13 = vadd.f32 %v6059_v30, %v6058_v39  ;;  %v13815_v49 = vadd.f32 %v6548_v33, %v6154_v61  ;;  %v13833_v51 = vpop.f32.mrf.mxu0  ;;  %v16015_v0 = vld [vmem:[#allocation48_spill] sm:$0xff] }
 0x4b9   : > { %16006 = vst [vmem:[#allocation6_spill] sm:$0xff] %v13807_v52  ;;  %v13818_v50 = vadd.f32 %v6062_v2, %v13807_v52  ;;  %v6161_v37 = vmul.f32 %v13807_v52, %v13807_v52  ;;  %16007 = vst [vmem:[#allocation9_spill] sm:$0xff] %v13823_v31  ;;  %v16012_v2 = vld [vmem:[#allocation24_spill] sm:$0xff]  ;;  %v13843_v52 = vpop.f32.mrf.mxu1  ;;  %v6516_v33 = vadd.f32 %v6515_v40, %v6514_v18 }
 0x4ba   : > { %v6583_v26 = vmul.f32 0.0051020407, %v6485_v27  ;;  %v6591_v16 = vmul.f32 %v13811_v45, %v13811_v45  ;;  %v16013_v27 = vld [vmem:[#allocation34_spill] sm:$0xff]  ;;  %v13851_v47 = vpop.f32.mrf.mxu0  ;;  %v13893_v4 = vmul.f32 0.0051020407, %v6060_v13  ;;  %v6094_v61 = vadd.f32 %v6093_v44, %v13823_v31  ;;  %v16040_v44 = vld [vmem:[#allocation49_spill] sm:$0xff] }
 0x4bb   : > { %v13861_v39 = vpop.f32.mrf.mxu1  ;;  %v6519_v53 = vadd.f32 %v6518_v24, %v6161_v37  ;;  %v6162_v59 = vmul.f32 %v13823_v31, %v13823_v31  ;;  %v6584_v18 = vmul.f32 0.0051020407, %v6516_v33  ;;  %v16029_v31 = vld [vmem:[#allocation41_spill] sm:$0xff]  ;;  %v16043_v10 = vld [vmem:[#allocation12_spill] sm:$0xff] }
 0x4bc   : > { %v6599_v14 = vsub.f32 %v6583_v26, %v6591_v16  ;;  %v13871_v32 = vpop.f32.mrf.mxu0  ;;  %v13902_v26 = vadd.f32 %v13765_v56, %v13755_v15  ;;  %v13906_v16 = vadd.f32 %v13780_v38, %v13767_v9  ;;  %v6592_v24 = vmul.f32 %v13893_v4, %v13893_v4  ;;  %v16022_v56 = vld [vmem:[#allocation15_spill] sm:$0xff]  ;;  %v16036_v33 = vld [vmem:[#allocation37_spill] sm:$0xff] }
 0x4bd   : > { %v13881_v1 = vpop.f32.mrf.mxu1 }
 0x4be   : > { %v13891_v42 = vpop.f32.mrf.mxu0  ;;  %v6807_v30 = vadd.f32 1e-05, %v6599_v14  ;;  %16016 = vst [vmem:[#allocation20_spill] sm:$0xff] %v13902_v26  ;;  %16017 = vst [vmem:[#allocation24_spill] sm:$0xff] %v13906_v16  ;;  %v6600_v19 = vsub.f32 %v6584_v18, %v6592_v24  ;;  %v6064_v38 = vadd.f32 %v13818_v50, %v13902_v26  ;;  %v6095_v18 = vadd.f32 %v6094_v61, %v13906_v16 }
 0x4bf   : > { %v13895_v58 = vpop.f32.mrf.mxu1  ;;  %v6170_v24 = vmul.f32 %v13906_v16, %v13906_v16  ;;  %v14002_v50 = vadd.f32 %v13825_v17, %v13813_v20 }
 0x4c0   : > { %v13908_v14 = vpop.f32.mrf.mxu0  ;;  %9186 = vrsqrt.f32 %v6807_v30  ;;  %v16024_v30 = vld [vmem:[#allocation30_spill] sm:$0xff]  ;;  %v6808_v15 = vadd.f32 1e-05, %v6600_v19 }
 0x4c1   : > { %16018 = vst [vmem:[#allocation34_spill] sm:$0xff] %v13908_v14  ;;  %v13914_v40 = vpop.f32.mrf.mxu1  ;;  %16048 = vst [vmem:[#allocation12_spill] sm:$0xff] %v14002_v50 }
 0x4c2   : > { %16020 = vst [vmem:[#allocation31_spill] sm:$0xff] %v13914_v40  ;;  %v13924_v14 = vpop.f32.mrf.mxu0  ;;  %v16027_v40 = vld [vmem:[#allocation33_spill] sm:$0xff]  ;;  %9188 = vrsqrt.f32 %v6808_v15 }
 0x4c3   : > { %16025 = vst [vmem:[#allocation48_spill] sm:$0xff] %v13924_v14  ;;  %v13932_v37 = vpop.f32.mrf.mxu1  ;;  %v16031_v14 = vld [vmem:[#allocation36_spill] sm:$0xff] }
 0x4c4   : > { %16028 = vst [vmem:[#allocation15_spill] sm:$0xff] %v13932_v37  ;;  %v13942_v13 = vpop.f32.mrf.mxu0  ;;  %v16033_v37 = vld [vmem:[#allocation29_spill] sm:$0xff] }
 0x4c5   : > { %16032 = vst [vmem:[#allocation30_spill] sm:$0xff] %v13942_v13  ;;  %v13952_v9 = vpop.f32.mrf.mxu1 }
 0x4c6   : > { %16034 = vst [vmem:[#allocation28_spill] sm:$0xff] %v13952_v9  ;;  %v13962_v13 = vpop.f32.mrf.mxu0  ;;  %v6169_v9 = vmul.f32 %v13902_v26, %v13902_v26 }
 0x4c7   : > { %16035 = vst [vmem:[#allocation33_spill] sm:$0xff] %v13962_v13  ;;  %v13972_v60 = vpop.f32.mrf.mxu1  ;;  %v6550_v13 = vadd.f32 %v13815_v49, %v6162_v59  ;;  %v13994_v59 = vadd.f32 %v13799_v35, %v13794_v62  ;;  %v13998_v49 = vadd.f32 %v13809_v5, %v13801_v55 }
 0x4c8   : > { %16039 = vst [vmem:[#allocation41_spill] sm:$0xff] %v13972_v60  ;;  %v13979_v29 = vpop.f32.mrf.mxu0  ;;  %v16042_v60 = vld [vmem:[#allocation38_spill] sm:$0xff]  ;;  %v6520_v57 = vadd.f32 %v6519_v53, %v6169_v9  ;;  %v14020_v53 = vmul.f32 %v14002_v50, %v14002_v50  ;;  %v14035_v9 = vadd.f32 %v13861_v39, %v13851_v47  ;;  %v16056_v39 = vld [vmem:[#allocation45_spill] sm:$0xff] }
 0x4c9   : > { %16041 = vst [vmem:[#allocation36_spill] sm:$0xff] %v13979_v29  ;;  %v13988_v11 = vadd.f32 %v16043_v10, %v16042_v60  ;;  %v13990_v19 = vpop.f32.mrf.mxu1  ;;  %16046 = vst [vmem:[#allocation49_spill] sm:$0xff] %v13994_v59  ;;  %v6551_v10 = vadd.f32 %v6550_v13, %v6170_v24  ;;  %v6096_v35 = vadd.f32 %v6095_v18, %v13994_v59 }
 0x4ca   : > { %16045 = vst [vmem:[#allocation37_spill] sm:$0xff] %v13990_v19  ;;  %16047 = vst [vmem:[#allocation38_spill] sm:$0xff] %v13998_v49  ;;  %v14004_v61 = vpop.f32.mrf.mxu0  ;;  %v6178_v55 = vmul.f32 %v13994_v59, %v13994_v59  ;;  %v14016_v62 = vmul.f32 %v13998_v49, %v13998_v49  ;;  %v14031_v13 = vadd.f32 %v13843_v52, %v13833_v51 }
 0x4cb   : > { %16044 = vst [vmem:[#allocation29_spill] sm:$0xff] %v13988_v11  ;;  %16049 = vst [vmem:[#allocation53_spill] sm:$0xff] %v14004_v61  ;;  %v6065_v60 = vadd.f32 %v6064_v38, %v13988_v11  ;;  %v6177_v15 = vmul.f32 %v13988_v11, %v13988_v11  ;;  %v14009_v16 = vpop.f32.mrf.mxu1  ;;  %v14042_v59 = vadd.f32 %v6096_v35, %v14002_v50  ;;  %v16060_v35 = vld [vmem:[#allocation26_spill] sm:$0xff] }
 0x4cc   : > { %16050 = vst [vmem:[#allocation54_spill] sm:$0xff] %v14009_v16  ;;  %v14022_v5 = vpop.f32.mrf.mxu0  ;;  %16052 = vst [vmem:[#allocation56_spill] sm:$0xff] %v14035_v9  ;;  %v14039_v24 = vadd.f32 %v6551_v10, %v6178_v55  ;;  %v14050_v52 = vadd.f32 %v13895_v58, %v13891_v42  ;;  %v16057_v47 = vsub.f32 %v16056_v39, %v13811_v45 }
 0x4cd   : > { %16051 = vst [vmem:[#allocation55_spill] sm:$0xff] %v14022_v5  ;;  %v14024_v20 = vadd.f32 %v6520_v57, %v6177_v15  ;;  %v14027_v17 = vadd.f32 %v6065_v60, %v13998_v49  ;;  %v14037_v38 = vpop.f32.mrf.mxu1  ;;  %v9187_v18 = vpop.eup %9186  ;;  %v14046_v57 = vadd.f32 %v13881_v1, %v13871_v32  ;;  %v16058_v15 = vld [vmem:[#allocation17_spill] sm:$0xff]  ;;  %v16061_v50 = vsub.f32 %v16060_v35, %v13811_v45 }
 0x4ce   : > { %16053 = vst [vmem:[#allocation57_spill] sm:$0xff] %v14037_v38  ;;  %16054 = vst [vmem:[#allocation58_spill] sm:$0xff] %v14050_v52  ;;  %v14052_v51 = vpop.f32.mrf.mxu0  ;;  %v6823_v60 = vmul.f32 %v9187_v18, %v16057_v47  ;;  %v16059_v10 = vsub.f32 %v16058_v15, %v13811_v45  ;;  %v16062_v1 = vsub.f32 %v16011_v46, %v13811_v45 }
 0x4cf   : > { %16055 = vst [vmem:[#allocation59_spill] sm:$0xff] %v14052_v51  ;;  %v6839_v49 = vmul.f32 %v9187_v18, %v16061_v50  ;;  %v14066_v58 = vpop.f32.mrf.mxu1  ;;  %v16064_v42 = vsub.f32 %v16012_v2, %v13811_v45  ;;  %v16065_v39 = vsub.f32 %v16013_v27, %v13811_v45  ;;  %v16066_v15 = vsub.f32 %v16014_v8, %v13811_v45 }
 0x4d0   : > { %v6831_v55 = vmul.f32 %v9187_v18, %v16059_v10  ;;  %v6847_v32 = vmul.f32 %v9187_v18, %v16062_v1  ;;  %16063 = vst [vmem:[#allocation45_spill] sm:$0xff] %v14066_v58  ;;  %v16067_v50 = vsub.f32 %v16015_v0, %v13811_v45  ;;  %v14080_v46 = vpop.f32.mrf.mxu0  ;;  %v16069_v1 = vsub.f32 %v12932_v25, %v13811_v45 }
 0x4d1   : > { %v6855_v11 = vmul.f32 %v9187_v18, %v16064_v42  ;;  %v6863_v47 = vmul.f32 %v9187_v18, %v16065_v39  ;;  %v6871_v10 = vmul.f32 %v9187_v18, %v16066_v15  ;;  %16068 = vst [vmem:[#allocation17_spill] sm:$0xff] %v14080_v46  ;;  %v16070_v2 = vsub.f32 %v13459_v54, %v13811_v45  ;;  %v14094_v0 = vpop.f32.mrf.mxu1  ;;  %v16076_v54 = vld [vmem:[#allocation7_spill] sm:$0xff] }
 0x4d2   : > { %v6879_v35 = vmul.f32 %v9187_v18, %v16067_v50  ;;  %v6887_v26 = vmul.f32 %v9187_v18, %v16069_v1  ;;  %v16071_v27 = vsub.f32 %v13467_v6, %v13811_v45  ;;  %v16072_v8 = vsub.f32 %v13477_v36, %v13811_v45  ;;  %16073 = vst [vmem:[#allocation26_spill] sm:$0xff] %v14094_v0  ;;  %v14108_v36 = vpop.f32.mrf.mxu0 }
 0x4d3   : > { %v6895_v42 = vmul.f32 %v9187_v18, %v16070_v2  ;;  %v16074_v50 = vsub.f32 %v13509_v43, %v13811_v45  ;;  %v16075_v25 = vsub.f32 %v13517_v22, %v13811_v45  ;;  %v16077_v2 = vsub.f32 %v16076_v54, %v13811_v45  ;;  %16079 = vst [vmem:[#allocation7_spill] sm:$0xff] %v14108_v36  ;;  %v16081_v43 = vld [vmem:[#allocation39_spill] sm:$0xff] }
 0x4d4   : > { %v6903_v39 = vmul.f32 %v9187_v18, %v16071_v27  ;;  %v6911_v15 = vmul.f32 %v9187_v18, %v16072_v8  ;;  %v16078_v6 = vsub.f32 %v13553_v3, %v13811_v45  ;;  %v16080_v8 = vsub.f32 %v13581_v41, %v13811_v45  ;;  %v16083_v22 = vld [vmem:[#allocation47_spill] sm:$0xff]  ;;  %v14122_v3 = vpop.f32.mrf.mxu1 }
 0x4d5   : > { %v6919_v46 = vmul.f32 %v9187_v18, %v16074_v50  ;;  %v6927_v1 = vmul.f32 %v9187_v18, %v16075_v25  ;;  %v6935_v58 = vmul.f32 %v9187_v18, %v16077_v2  ;;  %v16082_v50 = vsub.f32 %v16081_v43, %v13811_v45  ;;  %v16085_v54 = vld [vmem:[#allocation11_spill] sm:$0xff]  ;;  %16087 = vst [vmem:[#allocation39_spill] sm:$0xff] %v14122_v3 }
 0x4d6   : > { %v6943_v27 = vmul.f32 %v9187_v18, %v16078_v6  ;;  %v6951_v0 = vmul.f32 %v9187_v18, %v16080_v8  ;;  %v16084_v25 = vsub.f32 %v16083_v22, %v13811_v45  ;;  %v16086_v2 = vsub.f32 %v16085_v54, %v13811_v45  ;;  %v16088_v6 = vld [vmem:[#allocation25_spill] sm:$0xff]  ;;  %v16092_v22 = vld [vmem:[#allocation4_spill] sm:$0xff]  ;;  %v14136_v54 = vpop.f32.mrf.mxu0 }
 0x4d7   : > { %v6959_v51 = vmul.f32 %v9187_v18, %v16082_v50  ;;  %v16089_v36 = vsub.f32 %v16088_v6, %v13811_v45  ;;  %v16090_v41 = vsub.f32 %v13653_v28, %v13811_v45  ;;  %v16091_v43 = vsub.f32 %v13679_v34, %v13811_v45  ;;  %16094 = vst [vmem:[#allocation47_spill] sm:$0xff] %v14136_v54  ;;  %v16097_v6 = vld [vmem:[#allocation50_spill] sm:$0xff] }
 0x4d8   : > { %v6967_v38 = vmul.f32 %v9187_v18, %v16084_v25  ;;  %v6975_v5 = vmul.f32 %v9187_v18, %v16086_v2  ;;  %v16093_v25 = vsub.f32 %v16092_v22, %v13811_v45  ;;  %v16095_v2 = vld [vmem:[#allocation5_spill] sm:$0xff]  ;;  %v7073_v29 = vmul.f32 %v16097_v6, %v6831_v55  ;;  %v14150_v54 = vpop.f32.mrf.mxu0 }
 0x4d9   : > { %v6983_v16 = vmul.f32 %v9187_v18, %v16089_v36  ;;  %v6991_v8 = vmul.f32 %v9187_v18, %v16090_v41  ;;  %v6999_v50 = vmul.f32 %v9187_v18, %v16091_v43  ;;  %v16096_v3 = vsub.f32 %v16095_v2, %v13811_v45  ;;  %v14144_v41 = vpop.f32.mrf.mxu1  ;;  %16099 = vst [vmem:[#allocation25_spill] sm:$0xff] %v14150_v54  ;;  %v14152_v45 = vpop.eup %9188 }
 0x4da   : > { %v7007_v61 = vmul.f32 %v9187_v18, %v16093_v25  ;;  %v7065_v36 = vmul.f32 %v16097_v6, %v6823_v60  ;;  %v7081_v28 = vmul.f32 %v16097_v6, %v6839_v49  ;;  %16098 = vst [vmem:[#allocation11_spill] sm:$0xff] %v14144_v41  ;;  %v7089_v34 = vmul.f32 %v16097_v6, %v6847_v32  ;;  %v14164_v2 = vpop.f32.mrf.mxu0 }
 0x4db   : > { %v7015_v19 = vmul.f32 %v9187_v18, %v16096_v3  ;;  %v7097_v43 = vmul.f32 %v16097_v6, %v6855_v11  ;;  %v7105_v22 = vmul.f32 %v16097_v6, %v6863_v47  ;;  %v7113_v25 = vmul.f32 %v16097_v6, %v6871_v10  ;;  %v14158_v3 = vpop.f32.mrf.mxu1  ;;  %16101 = vst [vmem:[#allocation5_spill] sm:$0xff] %v14164_v2  ;;  %v16103_v2 = vld [vmem:[#allocation51_spill] sm:$0xff] }
 0x4dc   : > { %v7121_v18 = vmul.f32 %v16097_v6, %v6879_v35  ;;  %v7129_v60 = vmul.f32 %v16097_v6, %v6887_v26  ;;  %v7137_v49 = vmul.f32 %v16097_v6, %v6895_v42  ;;  %v7145_v55 = vmul.f32 %v16097_v6, %v6903_v39  ;;  %16100 = vst [vmem:[#allocation4_spill] sm:$0xff] %v14158_v3  ;;  %v14176_v3 = vpop.f32.mrf.mxu0 }
 0x4dd   : > { %v7153_v11 = vmul.f32 %v16097_v6, %v6911_v15  ;;  %v7161_v32 = vmul.f32 %v16097_v6, %v6919_v46  ;;  %v7169_v47 = vmul.f32 %v16097_v6, %v6927_v1  ;;  %v7177_v10 = vmul.f32 %v16097_v6, %v6935_v58  ;;  %v14170_v54 = vpop.f32.mrf.mxu1 }
 0x4de   : > { %v7185_v35 = vmul.f32 %v16097_v6, %v6943_v27  ;;  %v7193_v26 = vmul.f32 %v16097_v6, %v6951_v0  ;;  %v7201_v42 = vmul.f32 %v16097_v6, %v6959_v51  ;;  %v7209_v39 = vmul.f32 %v16097_v6, %v6967_v38  ;;  %16102 = vst [vmem:[#allocation50_spill] sm:$0xff] %v14170_v54  ;;  %v14188_v54 = vpop.f32.mrf.mxu0 }
 0x4df   : > { %v7217_v15 = vmul.f32 %v16097_v6, %v6975_v5  ;;  %v7225_v46 = vmul.f32 %v16097_v6, %v6983_v16  ;;  %v7233_v1 = vmul.f32 %v16097_v6, %v6991_v8  ;;  %v7241_v58 = vmul.f32 %v16097_v6, %v6999_v50  ;;  %v14182_v41 = vpop.f32.mrf.mxu1 }
 0x4e0   : > { %v7249_v27 = vmul.f32 %v16097_v6, %v7007_v61  ;;  %v7257_v0 = vmul.f32 %v16097_v6, %v7015_v19  ;;  %v7307_v51 = vadd.f32 %v16103_v2, %v7065_v36  ;;  %v7315_v38 = vadd.f32 %v16103_v2, %v7073_v29 }
 0x4e1   : > { %v7323_v5 = vadd.f32 %v16103_v2, %v7081_v28  ;;  %v7331_v16 = vadd.f32 %v16103_v2, %v7089_v34  ;;  %v7339_v8 = vadd.f32 %v16103_v2, %v7097_v43  ;;  %v7347_v50 = vadd.f32 %v16103_v2, %v7105_v22  ;;  %v14200_v36 = vpop.f32.mrf.mxu1 }
 0x4e2   : > { %v7355_v61 = vadd.f32 %v16103_v2, %v7113_v25  ;;  %v7363_v19 = vadd.f32 %v16103_v2, %v7121_v18  ;;  %v7371_v6 = vadd.f32 %v16103_v2, %v7129_v60  ;;  %v7379_v29 = vadd.f32 %v16103_v2, %v7137_v49  ;;  %7507 = vst [vmem:[%s15326_s7 + $0x20] sm:$0xff] %v7307_v51  ;;  %v14218_v25 = vpop.f32.mrf.mxu0 }
 0x4e3   : > { %7515 = vst [vmem:[%s15326_s7 + $0x60] sm:$0xff] %v7315_v38  ;;  %v7387_v28 = vadd.f32 %v16103_v2, %v7145_v55  ;;  %v7395_v34 = vadd.f32 %v16103_v2, %v7153_v11  ;;  %v7403_v43 = vadd.f32 %v16103_v2, %v7161_v32  ;;  %v7411_v22 = vadd.f32 %v16103_v2, %v7169_v47  ;;  %v14236_v11 = vpop.f32.mrf.mxu1 }
 0x4e4   : > { %7523 = vst [vmem:[%s15326_s7 + $0xa0] sm:$0xff] %v7323_v5  ;;  %7531 = vst [vmem:[%s15326_s7 + $0xe0] sm:$0xff] %v7331_v16  ;;  %v7419_v18 = vadd.f32 %v16103_v2, %v7177_v10  ;;  %v7427_v60 = vadd.f32 %v16103_v2, %v7185_v35  ;;  %v7435_v49 = vadd.f32 %v16103_v2, %v7193_v26  ;;  %v14254_v26 = vpop.f32.mrf.mxu0  ;;  %v16109_v16 = vld [vmem:[#allocation21_spill] sm:$0xff] }
 0x4e5   : > { %7539 = vst [vmem:[%s15326_s7 + $0x120] sm:$0xff] %v7339_v8  ;;  %7547 = vst [vmem:[%s15326_s7 + $0x160] sm:$0xff] %v7347_v50  ;;  %v7443_v55 = vadd.f32 %v16103_v2, %v7201_v42  ;;  %v7451_v32 = vadd.f32 %v16103_v2, %v7209_v39  ;;  %v7459_v47 = vadd.f32 %v16103_v2, %v7217_v15 }
 0x4e6   : > { %7555 = vst [vmem:[%s15326_s7 + $0x1a0] sm:$0xff] %v7355_v61  ;;  %7563 = vst [vmem:[%s15326_s7 + $0x1e0] sm:$0xff] %v7363_v19  ;;  %v7467_v10 = vadd.f32 %v16103_v2, %v7225_v46  ;;  %v7475_v35 = vadd.f32 %v16103_v2, %v7233_v1  ;;  %v7483_v42 = vadd.f32 %v16103_v2, %v7241_v58  ;;  %v16104_v46 = vld [vmem:[#allocation46_spill] sm:$0xff]  ;;  %v14275_v58 = vpop.f32.mrf.mxu1 }
 0x4e7   : > { %7571 = vst [vmem:[%s15326_s7 + $0x220] sm:$0xff] %v7371_v6  ;;  %7579 = vst [vmem:[%s15326_s7 + $0x260] sm:$0xff] %v7379_v29  ;;  %v7491_v39 = vadd.f32 %v16103_v2, %v7249_v27  ;;  %v7499_v15 = vadd.f32 %v16103_v2, %v7257_v0  ;;  %v16105_v1 = vsub.f32 %v16104_v46, %v13893_v4  ;;  %v16106_v27 = vld [vmem:[#allocation19_spill] sm:$0xff]  ;;  %v14305_v6 = vpop.f32.mrf.mxu0 }
 0x4e8   : > { %7587 = vst [vmem:[%s15326_s7 + $0x2a0] sm:$0xff] %v7387_v28  ;;  %7595 = vst [vmem:[%s15326_s7 + $0x2e0] sm:$0xff] %v7395_v34  ;;  %v16107_v0 = vsub.f32 %v16106_v27, %v13893_v4  ;;  %v16108_v38 = vsub.f32 %v16022_v56, %v13893_v4  ;;  %v16110_v8 = vsub.f32 %v16109_v16, %v13893_v4 }
 0x4e9   : > { %7603 = vst [vmem:[%s15326_s7 + $0x320] sm:$0xff] %v7403_v43  ;;  %7611 = vst [vmem:[%s15326_s7 + $0x360] sm:$0xff] %v7411_v22  ;;  %v6824_v2 = vmul.f32 %v14152_v45, %v16105_v1  ;;  %v16111_v61 = vsub.f32 %v16024_v30, %v13893_v4  ;;  %v16112_v56 = vsub.f32 %v16026_v63, %v13893_v4  ;;  %v16116_v63 = vld [vmem:[#allocation16_spill] sm:$0xff] }
 0x4ea   : > { %7619 = vst [vmem:[%s15326_s7 + $0x3a0] sm:$0xff] %v7419_v18  ;;  %7627 = vst [vmem:[%s15326_s7 + $0x3e0] sm:$0xff] %v7427_v60  ;;  %v6832_v51 = vmul.f32 %v14152_v45, %v16107_v0  ;;  %v6840_v5 = vmul.f32 %v14152_v45, %v16108_v38  ;;  %v6848_v50 = vmul.f32 %v14152_v45, %v16110_v8  ;;  %v14332_v60 = vpop.f32.mrf.mxu1 }
 0x4eb   : > { %7635 = vst [vmem:[%s15326_s7 + $0x420] sm:$0xff] %v7435_v49  ;;  %7643 = vst [vmem:[%s15326_s7 + $0x460] sm:$0xff] %v7443_v55  ;;  %v6856_v19 = vmul.f32 %v14152_v45, %v16111_v61  ;;  %v6864_v30 = vmul.f32 %v14152_v45, %v16112_v56  ;;  %v16113_v29 = vsub.f32 %v16027_v40, %v13893_v4 }
 0x4ec   : > { %7651 = vst [vmem:[%s15326_s7 + $0x4a0] sm:$0xff] %v7451_v32  ;;  %7659 = vst [vmem:[%s15326_s7 + $0x4e0] sm:$0xff] %v7459_v47  ;;  %v16114_v34 = vsub.f32 %v12919_v12, %v13893_v4  ;;  %v16115_v22 = vsub.f32 %v16029_v31, %v13893_v4  ;;  %v16117_v49 = vsub.f32 %v16116_v63, %v13893_v4  ;;  %v14368_v38 = vpop.f32.mrf.mxu1 }
 0x4ed   : > { %7667 = vst [vmem:[%s15326_s7 + $0x520] sm:$0xff] %v7467_v10  ;;  %7675 = vst [vmem:[%s15326_s7 + $0x560] sm:$0xff] %v7475_v35  ;;  %v6872_v28 = vmul.f32 %v14152_v45, %v16113_v29  ;;  %v16118_v40 = vsub.f32 %v16031_v14, %v13893_v4  ;;  %v16119_v12 = vsub.f32 %v13505_v7, %v13893_v4  ;;  %v14350_v35 = vpop.f32.mrf.mxu0  ;;  %v16123_v7 = vld [vmem:[#allocation22_spill] sm:$0xff] }
 0x4ee   : > { %7683 = vst [vmem:[%s15326_s7 + $0x5a0] sm:$0xff] %v7483_v42  ;;  %7691 = vst [vmem:[%s15326_s7 + $0x5e0] sm:$0xff] %v7491_v39  ;;  %v6880_v43 = vmul.f32 %v14152_v45, %v16114_v34  ;;  %v6888_v18 = vmul.f32 %v14152_v45, %v16115_v22  ;;  %v6896_v55 = vmul.f32 %v14152_v45, %v16117_v49  ;;  %v16132_v22 = vld [vmem:[#allocation3_spill] sm:$0xff] }
 0x4ef   : > { %7699 = vst [vmem:[%s15326_s7 + $0x620] sm:$0xf] %v7499_v15  ;;  %v6904_v32 = vmul.f32 %v14152_v45, %v16118_v40  ;;  %v6912_v47 = vmul.f32 %v14152_v45, %v16119_v12  ;;  %v16120_v31 = vsub.f32 %v13513_v23, %v13893_v4  ;;  %v16121_v42 = vsub.f32 %v13541_v21, %v13893_v4  ;;  %v16125_v23 = vld [vmem:[#allocation18_spill] sm:$0xff]  ;;  %v16127_v21 = vld [vmem:[#allocation44_spill] sm:$0xff]  ;;  %v14386_v40 = vpop.f32.mrf.mxu0 }
 0x4f0   : > { %v16122_v14 = vsub.f32 %v16033_v37, %v13893_v4  ;;  %v16124_v46 = vsub.f32 %v16123_v7, %v13893_v4  ;;  %v16126_v27 = vsub.f32 %v16125_v23, %v13893_v4  ;;  %v16128_v16 = vsub.f32 %v16127_v21, %v13893_v4  ;;  %v16129_v37 = vld [vmem:[#allocation13_spill] sm:$0xff] }
 0x4f1   : > { %v6920_v10 = vmul.f32 %v14152_v45, %v16120_v31  ;;  %v6928_v39 = vmul.f32 %v14152_v45, %v16121_v42  ;;  %v16130_v61 = vsub.f32 %v16129_v37, %v13893_v4  ;;  %v16131_v29 = vsub.f32 %v13641_v48, %v13893_v4  ;;  %v16135_v42 = vld [vmem:[#allocation43_spill] sm:$0xff] }
 0x4f2   : > { %v6936_v15 = vmul.f32 %v14152_v45, %v16122_v14  ;;  %v6944_v1 = vmul.f32 %v14152_v45, %v16124_v46  ;;  %v6952_v0 = vmul.f32 %v14152_v45, %v16126_v27  ;;  %v6960_v8 = vmul.f32 %v14152_v45, %v16128_v16  ;;  %v16137_v48 = vld [vmem:[#allocation27_spill] sm:$0xff]  ;;  %v14404_v16 = vpop.f32.mrf.mxu1 }
 0x4f3   : > { %v6968_v56 = vmul.f32 %v14152_v45, %v16130_v61  ;;  %v6976_v34 = vmul.f32 %v14152_v45, %v16131_v29  ;;  %v16133_v63 = vsub.f32 %v16132_v22, %v13893_v4  ;;  %v16134_v12 = vsub.f32 %v16036_v33, %v13893_v4  ;;  %v16140_v33 = vld [vmem:[#allocation52_spill] sm:$0xff] }
 0x4f4   : > { %v16136_v14 = vsub.f32 %v16135_v42, %v13893_v4  ;;  %v16138_v46 = vsub.f32 %v16137_v48, %v13893_v4  ;;  %v16139_v27 = vsub.f32 %v16040_v44, %v13893_v4  ;;  %v7066_v37 = vmul.f32 %v16140_v33, %v6824_v2 }
 0x4f5   : > { %v6984_v49 = vmul.f32 %v14152_v45, %v16133_v63  ;;  %v6992_v31 = vmul.f32 %v14152_v45, %v16134_v12  ;;  %v7074_v61 = vmul.f32 %v16140_v33, %v6832_v51  ;;  %v7082_v29 = vmul.f32 %v16140_v33, %v6840_v5  ;;  %v14410_v63 = vpop.f32.mrf.mxu0 }
 0x4f6   : > { %v7000_v7 = vmul.f32 %v14152_v45, %v16136_v14  ;;  %v7008_v23 = vmul.f32 %v14152_v45, %v16138_v46  ;;  %v7016_v21 = vmul.f32 %v14152_v45, %v16139_v27  ;;  %v7090_v22 = vmul.f32 %v16140_v33, %v6848_v50  ;;  %v14416_v45 = vpop.f32.mrf.mxu1 }
 0x4f7   : > { %v7098_v12 = vmul.f32 %v16140_v33, %v6856_v19  ;;  %v7106_v42 = vmul.f32 %v16140_v33, %v6864_v30  ;;  %v7114_v4 = vmul.f32 %v16140_v33, %v6872_v28  ;;  %v7122_v44 = vmul.f32 %v16140_v33, %v6880_v43  ;;  %v14422_v14 = vpop.f32.mrf.mxu0 }
 0x4f8   : > { %v7130_v2 = vmul.f32 %v16140_v33, %v6888_v18  ;;  %v7138_v51 = vmul.f32 %v16140_v33, %v6896_v55  ;;  %v7146_v5 = vmul.f32 %v16140_v33, %v6904_v32  ;;  %v7154_v50 = vmul.f32 %v16140_v33, %v6912_v47  ;;  %16141 = vst [vmem:[#allocation51_spill] sm:$0xff] %v14422_v14  ;;  %v14428_v48 = vpop.f32.mrf.mxu1 }
 0x4f9   : > { %v7162_v19 = vmul.f32 %v16140_v33, %v6920_v10  ;;  %v7170_v30 = vmul.f32 %v16140_v33, %v6928_v39  ;;  %v7178_v28 = vmul.f32 %v16140_v33, %v6936_v15  ;;  %v7186_v43 = vmul.f32 %v16140_v33, %v6944_v1  ;;  %16142 = vst [vmem:[#allocation46_spill] sm:$0xff] %v14428_v48  ;;  %v14434_v46 = vpop.f32.mrf.mxu0  ;;  %v16144_v48 = vld [vmem:[#allocation35_spill] sm:$0xff] }
 0x4fa   : > { %v7194_v18 = vmul.f32 %v16140_v33, %v6952_v0  ;;  %v7202_v55 = vmul.f32 %v16140_v33, %v6960_v8  ;;  %v7210_v32 = vmul.f32 %v16140_v33, %v6968_v56  ;;  %v7218_v47 = vmul.f32 %v16140_v33, %v6976_v34  ;;  %16143 = vst [vmem:[#allocation19_spill] sm:$0xff] %v14434_v46  ;;  %v14440_v27 = vpop.f32.mrf.mxu1 }
 0x4fb   : > { %v7226_v10 = vmul.f32 %v16140_v33, %v6984_v49  ;;  %v7234_v39 = vmul.f32 %v16140_v33, %v6992_v31  ;;  %v7242_v15 = vmul.f32 %v16140_v33, %v7000_v7  ;;  %v7250_v1 = vmul.f32 %v16140_v33, %v7008_v23  ;;  %v14446_v14 = vpop.f32.mrf.mxu0 }
 0x4fc   : > { %v7258_v0 = vmul.f32 %v16140_v33, %v7016_v21  ;;  %v7308_v8 = vadd.f32 %v16144_v48, %v7066_v37  ;;  %v7316_v56 = vadd.f32 %v16144_v48, %v7074_v61  ;;  %v7324_v34 = vadd.f32 %v16144_v48, %v7082_v29  ;;  %v14452_v46 = vpop.f32.mrf.mxu1 }
 0x4fd   : > { %v7332_v49 = vadd.f32 %v16144_v48, %v7090_v22  ;;  %v7340_v31 = vadd.f32 %v16144_v48, %v7098_v12  ;;  %v7348_v7 = vadd.f32 %v16144_v48, %v7106_v42  ;;  %v7356_v23 = vadd.f32 %v16144_v48, %v7114_v4  ;;  %v14467_v29 = vpop.f32.mrf.mxu0 }
 0x4fe   : > { %v7364_v21 = vadd.f32 %v16144_v48, %v7122_v44  ;;  %v7372_v33 = vadd.f32 %v16144_v48, %v7130_v2  ;;  %v7380_v37 = vadd.f32 %v16144_v48, %v7138_v51  ;;  %v7388_v61 = vadd.f32 %v16144_v48, %v7146_v5  ;;  %7508 = vst [vmem:[%s15326_s7 + $0x28] sm:$0xff] %v7308_v8  ;;  %v14485_v44 = vpop.f32.mrf.mxu1 }
 0x4ff   : > { %7516 = vst [vmem:[%s15326_s7 + $0x68] sm:$0xff] %v7316_v56  ;;  %7524 = vst [vmem:[%s15326_s7 + $0xa8] sm:$0xff] %v7324_v34  ;;  %v7396_v22 = vadd.f32 %v16144_v48, %v7154_v50  ;;  %v7404_v12 = vadd.f32 %v16144_v48, %v7162_v19  ;;  %v7412_v42 = vadd.f32 %v16144_v48, %v7170_v30  ;;  %v14503_v19 = vpop.f32.mrf.mxu0  ;;  %v16147_v56 = vld [vmem:[#allocation48_spill] sm:$0xff]  ;;  %v16148_v34 = vld [vmem:[#allocation15_spill] sm:$0xff] }
 0x500   : > { %v7420_v4 = vadd.f32 %v16144_v48, %v7178_v28  ;;  %7532 = vst [vmem:[%s15326_s7 + $0xe8] sm:$0xff] %v7332_v49  ;;  %7540 = vst [vmem:[%s15326_s7 + $0x128] sm:$0xff] %v7340_v31  ;;  %v7428_v2 = vadd.f32 %v16144_v48, %v7186_v43  ;;  %v7436_v51 = vadd.f32 %v16144_v48, %v7194_v18 }
 0x501   : > { %7548 = vst [vmem:[%s15326_s7 + $0x168] sm:$0xff] %v7348_v7  ;;  %7556 = vst [vmem:[%s15326_s7 + $0x1a8] sm:$0xff] %v7356_v23  ;;  %v7444_v5 = vadd.f32 %v16144_v48, %v7202_v55  ;;  %v7452_v50 = vadd.f32 %v16144_v48, %v7210_v32  ;;  %v7460_v30 = vadd.f32 %v16144_v48, %v7218_v47  ;;  %v14521_v55 = vpop.f32.mrf.mxu1 }
 0x502   : > { %7564 = vst [vmem:[%s15326_s7 + $0x1e8] sm:$0xff] %v7364_v21  ;;  %7572 = vst [vmem:[%s15326_s7 + $0x228] sm:$0xff] %v7372_v33  ;;  %v7468_v28 = vadd.f32 %v16144_v48, %v7226_v10  ;;  %v7476_v43 = vadd.f32 %v16144_v48, %v7234_v39  ;;  %v7484_v18 = vadd.f32 %v16144_v48, %v7242_v15  ;;  %v14541_v39 = vpop.f32.mrf.mxu0 }
 0x503   : > { %7580 = vst [vmem:[%s15326_s7 + $0x268] sm:$0xff] %v7380_v37  ;;  %7588 = vst [vmem:[%s15326_s7 + $0x2a8] sm:$0xff] %v7388_v61  ;;  %v7492_v32 = vadd.f32 %v16144_v48, %v7250_v1  ;;  %v7500_v47 = vadd.f32 %v16144_v48, %v7258_v0  ;;  %v6522_v10 = vadd.f32 %v14024_v20, %v14016_v62  ;;  %v14563_v15 = vpop.f32.mrf.mxu1  ;;  %v16146_v0 = vld [vmem:[#allocation31_spill] sm:$0xff] }
 0x504   : > { %7596 = vst [vmem:[%s15326_s7 + $0x2e8] sm:$0xff] %v7396_v22  ;;  %7604 = vst [vmem:[%s15326_s7 + $0x328] sm:$0xff] %v7404_v12  ;;  %v6553_v48 = vadd.f32 %v14039_v24, %v14020_v53  ;;  %v6067_v62 = vadd.f32 %v14027_v17, %v14031_v13  ;;  %v6193_v53 = vmul.f32 %v14031_v13, %v14031_v13  ;;  %v14583_v31 = vpop.f32.mrf.mxu0  ;;  %v16150_v12 = vld [vmem:[#allocation30_spill] sm:$0xff] }
 0x505   : > { %7612 = vst [vmem:[%s15326_s7 + $0x368] sm:$0xff] %v7412_v42  ;;  %7620 = vst [vmem:[%s15326_s7 + $0x3a8] sm:$0xff] %v7420_v4  ;;  %v6098_v20 = vadd.f32 %v14042_v59, %v14035_v9  ;;  %v6194_v24 = vmul.f32 %v14035_v9, %v14035_v9  ;;  %v6201_v17 = vmul.f32 %v14046_v57, %v14046_v57  ;;  %v16145_v59 = vld [vmem:[#allocation34_spill] sm:$0xff]  ;;  %v14587_v37 = vpop.f32.mrf.mxu1  ;;  %v16151_v42 = vld [vmem:[#allocation28_spill] sm:$0xff] }
 0x506   : > { %7628 = vst [vmem:[%s15326_s7 + $0x3e8] sm:$0xff] %v7428_v2  ;;  %7636 = vst [vmem:[%s15326_s7 + $0x428] sm:$0xff] %v7436_v51  ;;  %v6202_v1 = vmul.f32 %v14050_v52, %v14050_v52  ;;  %v14577_v8 = vadd.f32 %v16146_v0, %v16145_v59  ;;  %v14581_v49 = vadd.f32 %v16148_v34, %v16147_v56  ;;  %v16152_v2 = vld [vmem:[#allocation33_spill] sm:$0xff] }
 0x507   : > { %7644 = vst [vmem:[%s15326_s7 + $0x468] sm:$0xff] %v7444_v5  ;;  %7652 = vst [vmem:[%s15326_s7 + $0x4a8] sm:$0xff] %v7452_v50  ;;  %v6523_v7 = vadd.f32 %v6522_v10, %v6193_v53  ;;  %v6554_v23 = vadd.f32 %v6553_v48, %v6194_v24  ;;  %v6068_v21 = vadd.f32 %v6067_v62, %v14046_v57  ;;  %v16153_v51 = vld [vmem:[#allocation41_spill] sm:$0xff]  ;;  %v14601_v50 = vpop.f32.mrf.mxu0  ;;  %v16155_v48 = vld [vmem:[#allocation36_spill] sm:$0xff] }
 0x508   : > { %7660 = vst [vmem:[%s15326_s7 + $0x4e8] sm:$0xff] %v7460_v30  ;;  %7668 = vst [vmem:[%s15326_s7 + $0x528] sm:$0xff] %v7468_v28  ;;  %v6099_v33 = vadd.f32 %v6098_v20, %v14050_v52  ;;  %v6209_v61 = vmul.f32 %v14577_v8, %v14577_v8  ;;  %v6210_v22 = vmul.f32 %v14581_v49, %v14581_v49  ;;  %v16156_v62 = vld [vmem:[#allocation37_spill] sm:$0xff]  ;;  %v16159_v24 = vld [vmem:[#allocation54_spill] sm:$0xff] }
 0x509   : > { %7676 = vst [vmem:[%s15326_s7 + $0x568] sm:$0xff] %v7476_v43  ;;  %7684 = vst [vmem:[%s15326_s7 + $0x5a8] sm:$0xff] %v7484_v18  ;;  %v14595_v4 = vadd.f32 %v16151_v42, %v16150_v12  ;;  %v14599_v5 = vadd.f32 %v16153_v51, %v16152_v2  ;;  %v6524_v30 = vadd.f32 %v6523_v7, %v6201_v17  ;;  %v16158_v20 = vld [vmem:[#allocation53_spill] sm:$0xff]  ;;  %v16164_v2 = vld [vmem:[#allocation59_spill] sm:$0xff] }
 0x50a   : > { %7692 = vst [vmem:[%s15326_s7 + $0x5e8] sm:$0xff] %v7492_v32  ;;  %7700 = vst [vmem:[%s15326_s7 + $0x628] sm:$0xf] %v7500_v47  ;;  %v6555_v28 = vadd.f32 %v6554_v23, %v6202_v1  ;;  %v6069_v43 = vadd.f32 %v6068_v21, %v14577_v8  ;;  %v6100_v18 = vadd.f32 %v6099_v33, %v14581_v49  ;;  %v14605_v32 = vpop.f32.mrf.mxu1  ;;  %v14619_v1 = vpop.f32.mrf.mxu0  ;;  %v16161_v33 = vld [vmem:[#allocation55_spill] sm:$0xff]  ;;  %v16162_v12 = vld [vmem:[#allocation57_spill] sm:$0xff] }
 0x50b   : > { %16149 = vst [vmem:[#allocation21_spill] sm:$0xff] %v14581_v49  ;;  %16154 = vst [vmem:[#allocation16_spill] sm:$0xff] %v14599_v5  ;;  %v6217_v47 = vmul.f32 %v14595_v4, %v14595_v4  ;;  %v6218_v10 = vmul.f32 %v14599_v5, %v14599_v5  ;;  %v14613_v53 = vadd.f32 %v16156_v62, %v16155_v48  ;;  %v16165_v51 = vld [vmem:[#allocation45_spill] sm:$0xff]  ;;  %v16172_v49 = vld [vmem:[#allocation11_spill] sm:$0xff] }
 0x50c   : > { %v14617_v17 = vadd.f32 %v16159_v24, %v16158_v20  ;;  %v6525_v59 = vadd.f32 %v6524_v30, %v6209_v61  ;;  %v6556_v0 = vadd.f32 %v6555_v28, %v6210_v22  ;;  %v6070_v56 = vadd.f32 %v6069_v43, %v14595_v4  ;;  %v14623_v7 = vpop.f32.mrf.mxu1  ;;  %v14637_v22 = vpop.f32.mrf.mxu0  ;;  %v16167_v24 = vld [vmem:[#allocation17_spill] sm:$0xff]  ;;  %v16174_v52 = vld [vmem:[#allocation4_spill] sm:$0xff] }
 0x50d   : > { %16157 = vst [vmem:[#allocation22_spill] sm:$0xff] %v14613_v53  ;;  %v6101_v34 = vadd.f32 %v6100_v18, %v14599_v5  ;;  %v6225_v23 = vmul.f32 %v14613_v53, %v14613_v53  ;;  %v14631_v42 = vadd.f32 %v16162_v12, %v16161_v33  ;;  %v14635_v61 = vadd.f32 %v16165_v51, %v16164_v2  ;;  %v16168_v33 = vld [vmem:[#allocation26_spill] sm:$0xff]  ;;  %v16169_v2 = vld [vmem:[#allocation7_spill] sm:$0xff] }
 0x50e   : > { %16160 = vst [vmem:[#allocation18_spill] sm:$0xff] %v14617_v17  ;;  %v6226_v21 = vmul.f32 %v14617_v17, %v14617_v17  ;;  %v6526_v30 = vadd.f32 %v6525_v59, %v6217_v47  ;;  %v6557_v28 = vadd.f32 %v6556_v0, %v6218_v10  ;;  %v6071_v43 = vadd.f32 %v6070_v56, %v14613_v53  ;;  %v14641_v48 = vpop.f32.mrf.mxu1  ;;  %v16170_v51 = vld [vmem:[#allocation39_spill] sm:$0xff]  ;;  %v14655_v10 = vpop.f32.mrf.mxu0 }
 0x50f   : > { %16163 = vst [vmem:[#allocation44_spill] sm:$0xff] %v14631_v42  ;;  %16166 = vst [vmem:[#allocation13_spill] sm:$0xff] %v14635_v61  ;;  %v6102_v18 = vadd.f32 %v6101_v34, %v14617_v17  ;;  %v6233_v62 = vmul.f32 %v14631_v42, %v14631_v42  ;;  %v6234_v20 = vmul.f32 %v14635_v61, %v14635_v61 }
 0x510   : > { %v14649_v12 = vadd.f32 %v16168_v33, %v16167_v24  ;;  %v14653_v47 = vadd.f32 %v16170_v51, %v16169_v2  ;;  %v6527_v59 = vadd.f32 %v6526_v30, %v6225_v23  ;;  %v6558_v0 = vadd.f32 %v6557_v28, %v6226_v21  ;;  %v14659_v17 = vpop.f32.mrf.mxu1  ;;  %v16171_v33 = vld [vmem:[#allocation47_spill] sm:$0xff]  ;;  %v16173_v51 = vld [vmem:[#allocation25_spill] sm:$0xff]  ;;  %v5711_v21 = vpop.f32.mrf.mxu0 }
 0x511   : > { %v6072_v56 = vadd.f32 %v6071_v43, %v14631_v42  ;;  %v6103_v34 = vadd.f32 %v6102_v18, %v14635_v61  ;;  %v14667_v2 = vadd.f32 %v16172_v49, %v16171_v33  ;;  %v14671_v23 = vadd.f32 %v16174_v52, %v16173_v51  ;;  %v16175_v49 = vld [vmem:[#allocation5_spill] sm:$0xff]  ;;  %v16176_v33 = vld [vmem:[#allocation50_spill] sm:$0xff] }
 0x512   : > { %v6241_v5 = vmul.f32 %v14649_v12, %v14649_v12  ;;  %v6242_v24 = vmul.f32 %v14653_v47, %v14653_v47  ;;  %v6528_v30 = vadd.f32 %v6527_v59, %v6233_v62  ;;  %v6559_v28 = vadd.f32 %v6558_v0, %v6234_v20  ;;  %v5872_v42 = vpop.f32.mrf.mxu1  ;;  %v5712_v62 = vpop.f32.mrf.mxu0 }
 0x513   : > { %v6073_v43 = vadd.f32 %v6072_v56, %v14649_v12  ;;  %v6104_v18 = vadd.f32 %v6103_v34, %v14653_v47  ;;  %v6249_v61 = vmul.f32 %v14667_v2, %v14667_v2  ;;  %v6250_v9 = vmul.f32 %v14671_v23, %v14671_v23 }
 0x514   : > { %v14681_v53 = vadd.f32 %v16176_v33, %v16175_v49  ;;  %v14685_v52 = vadd.f32 %v14182_v41, %v14176_v3  ;;  %v6529_v20 = vadd.f32 %v6528_v30, %v6241_v5  ;;  %v6560_v59 = vadd.f32 %v6559_v28, %v6242_v24  ;;  %v5873_v56 = vpop.f32.mrf.mxu1 }
 0x515   : > { %v6074_v0 = vadd.f32 %v6073_v43, %v14667_v2  ;;  %v6105_v42 = vadd.f32 %v6104_v18, %v14671_v23  ;;  %v14695_v21 = vadd.f32 %v14200_v36, %v14188_v54  ;;  %v14699_v41 = vadd.f32 %v14236_v11, %v14218_v25 }
 0x516   : > { %v6257_v34 = vmul.f32 %v14681_v53, %v14681_v53  ;;  %v6258_v51 = vmul.f32 %v14685_v52, %v14685_v52  ;;  %v6530_v3 = vadd.f32 %v6529_v20, %v6249_v61  ;;  %v6561_v5 = vadd.f32 %v6560_v59, %v6250_v9 }
 0x517   : > { %v6075_v24 = vadd.f32 %v6074_v0, %v14681_v53  ;;  %v6106_v30 = vadd.f32 %v6105_v42, %v14685_v52  ;;  %v6265_v28 = vmul.f32 %v14695_v21, %v14695_v21  ;;  %v6266_v43 = vmul.f32 %v14699_v41, %v14699_v41  ;;  %v16180_v0 = vld [vmem:[#allocation46_spill] sm:$0xff] }
 0x518   : > { %v14709_v54 = vadd.f32 %v14275_v58, %v14254_v26  ;;  %v14713_v36 = vadd.f32 %v14332_v60, %v14305_v6  ;;  %v6531_v25 = vadd.f32 %v6530_v3, %v6257_v34  ;;  %v6562_v9 = vadd.f32 %v6561_v5, %v6258_v51  ;;  %v16182_v3 = vld [vmem:[#allocation19_spill] sm:$0xff] }
 0x519   : > { %v6076_v11 = vadd.f32 %v6075_v24, %v14695_v21  ;;  %v6107_v61 = vadd.f32 %v6106_v30, %v14699_v41  ;;  %v14723_v26 = vadd.f32 %v14368_v38, %v14350_v35  ;;  %v14727_v58 = vadd.f32 %v14404_v16, %v14386_v40  ;;  %v16179_v38 = vld [vmem:[#allocation51_spill] sm:$0xff] }
 0x51a   : > { %16177 = vst [vmem:[#allocation3_spill] sm:$0xff] %v14713_v36  ;;  %v6273_v18 = vmul.f32 %v14709_v54, %v14709_v54  ;;  %v6274_v49 = vmul.f32 %v14713_v36, %v14713_v36  ;;  %v6532_v6 = vadd.f32 %v6531_v25, %v6265_v28  ;;  %v6563_v60 = vadd.f32 %v6562_v9, %v6266_v43 }
 0x51b   : > { %16178 = vst [vmem:[#allocation43_spill] sm:$0xff] %v14727_v58  ;;  %v6077_v33 = vadd.f32 %v6076_v11, %v14709_v54  ;;  %v6108_v62 = vadd.f32 %v6107_v61, %v14713_v36  ;;  %v6281_v20 = vmul.f32 %v14723_v26, %v14723_v26  ;;  %v6282_v59 = vmul.f32 %v14727_v58, %v14727_v58 }
 0x51c   : > { %v14737_v35 = vadd.f32 %v14416_v45, %v14410_v63  ;;  %v14741_v40 = vadd.f32 %v16180_v0, %v16179_v38  ;;  %v6533_v16 = vadd.f32 %v6532_v6, %v6273_v18  ;;  %v6564_v42 = vadd.f32 %v6563_v60, %v6274_v49 }
 0x51d   : > { %v6078_v56 = vadd.f32 %v6077_v33, %v14723_v26  ;;  %v6109_v34 = vadd.f32 %v6108_v62, %v14727_v58  ;;  %v14749_v5 = vadd.f32 %v14440_v27, %v16182_v3  ;;  %v14753_v63 = vadd.f32 %v14452_v46, %v14446_v14 }
 0x51e   : > { %16181 = vst [vmem:[#allocation27_spill] sm:$0xff] %v14741_v40  ;;  %v6289_v51 = vmul.f32 %v14737_v35, %v14737_v35  ;;  %v6534_v45 = vadd.f32 %v6533_v16, %v6281_v20  ;;  %v6565_v24 = vadd.f32 %v6564_v42, %v6282_v59  ;;  %v6290_v28 = vmul.f32 %v14741_v40, %v14741_v40 }
 0x51f   : > { %16183 = vst [vmem:[#allocation52_spill] sm:$0xff] %v14753_v63  ;;  %v6079_v30 = vadd.f32 %v6078_v56, %v14737_v35  ;;  %v6297_v43 = vmul.f32 %v14749_v5, %v14749_v5  ;;  %v14762_v25 = vadd.f32 %v14485_v44, %v14467_v29  ;;  %v14766_v27 = vadd.f32 %v14521_v55, %v14503_v19 }
 0x520   : > { %v6535_v14 = vadd.f32 %v6534_v45, %v6289_v51  ;;  %v6298_v9 = vmul.f32 %v14753_v63, %v14753_v63  ;;  %v6110_v11 = vadd.f32 %v6109_v34, %v14741_v40  ;;  %v14776_v18 = vadd.f32 %v14563_v15, %v14541_v39 }
 0x521   : > { %16184 = vst [vmem:[#allocation35_spill] sm:$0xff] %v14766_v27  ;;  %v6080_v46 = vadd.f32 %v6079_v30, %v14749_v5  ;;  %v6305_v61 = vmul.f32 %v14762_v25, %v14762_v25  ;;  %v14780_v29 = vadd.f32 %v14587_v37, %v14583_v31  ;;  %v6566_v44 = vadd.f32 %v6565_v24, %v6290_v28 }
 0x522   : > { %v6536_v19 = vadd.f32 %v6535_v14, %v6297_v43  ;;  %v6306_v49 = vmul.f32 %v14766_v27, %v14766_v27  ;;  %v6111_v6 = vadd.f32 %v6110_v11, %v14753_v63  ;;  %v6313_v60 = vmul.f32 %v14776_v18, %v14776_v18 }
 0x523   : > { %16185 = vst [vmem:[#allocation34_spill] sm:$0xff] %v14780_v29  ;;  %v6081_v55 = vadd.f32 %v6080_v46, %v14762_v25  ;;  %v14790_v39 = vadd.f32 %v14605_v32, %v14601_v50  ;;  %v14794_v15 = vadd.f32 %v14623_v7, %v14619_v1  ;;  %v6567_v31 = vadd.f32 %v6566_v44, %v6298_v9 }
 0x524   : > { %v6537_v37 = vadd.f32 %v6536_v19, %v6305_v61  ;;  %v6112_v62 = vadd.f32 %v6111_v6, %v14766_v27  ;;  %v6314_v20 = vmul.f32 %v14780_v29, %v14780_v29  ;;  %v14804_v50 = vadd.f32 %v14641_v48, %v14637_v22 }
 0x525   : > { %16186 = vst [vmem:[#allocation31_spill] sm:$0xff] %v14794_v15  ;;  %v6082_v33 = vadd.f32 %v6081_v55, %v14776_v18  ;;  %v6321_v59 = vmul.f32 %v14790_v39, %v14790_v39  ;;  %v6568_v32 = vadd.f32 %v6567_v31, %v6306_v49  ;;  %v6322_v0 = vmul.f32 %v14794_v15, %v14794_v15 }
 0x526   : > { %v6538_v38 = vadd.f32 %v6537_v37, %v6313_v60  ;;  %v6113_v7 = vadd.f32 %v6112_v62, %v14780_v29  ;;  %v6084_v16 = vsel %vm2301_vm1, %v14804_v50, 0.0  ;;  %v6329_v42 = vmul.f32 %v14804_v50, %v14804_v50 }
 0x527   : > { %v6083_v1 = vadd.f32 %v6082_v33, %v14790_v39  ;;  %v14816_v22 = vadd.f32 %v14659_v17, %v14655_v10  ;;  %v6569_v48 = vadd.f32 %v6568_v32, %v6314_v20 }
 0x528   : > { %v6539_v56 = vadd.f32 %v6538_v38, %v6321_v59  ;;  %v6114_v51 = vadd.f32 %v6113_v7, %v14794_v15  ;;  %v6540_v3 = vsel %vm2301_vm1, %v6329_v42, 0.0 }
 0x529   : > { %v6085_v34 = vadd.f32 %v6084_v16, %v6083_v1  ;;  %16187 = vst [vmem:[#allocation48_spill] sm:$0xff] %v14816_v22  ;;  %v6115_v30 = vsel %vm2301_vm1, %v14816_v22, 0.0  ;;  %v6330_v28 = vmul.f32 %v14816_v22, %v14816_v22  ;;  %v6570_v43 = vadd.f32 %v6569_v48, %v6322_v0 }
 0x52a   : > { %v6541_v24 = vadd.f32 %v6540_v3, %v6539_v56  ;;  %v6116_v14 = vadd.f32 %v6115_v30, %v6114_v51 }
 0x52b   : > { %v6086_v45 = vrot.slane %v6085_v34, 4  ;;  %v6571_v17 = vsel %vm2301_vm1, %v6330_v28, 0.0 }
 0x52c   : > { %v6542_v9 = vrot.slane %v6541_v24, 4  ;;  %v6117_v10 = vrot.slane %v6116_v14, 4  ;;  %v6572_v11 = vadd.f32 %v6571_v17, %v6570_v43  ;;  %v16189_v43 = vld [vmem:[#allocation32_spill] sm:$0xff] }
 0x52d   : > { %v6087_v46 = vadd.f32 %v6086_v45, %v6085_v34 }
 0x52e   : > { %v6543_v44 = vadd.f32 %v6542_v9, %v6541_v24  ;;  %v6118_v19 = vadd.f32 %v6117_v10, %v6116_v14  ;;  %v6573_v55 = vrot.slane %v6572_v11, 4  ;;  %v16188_v24 = vld [vmem:[#allocation22_spill] sm:$0xff]  ;;  %v7047_v14 = vsub.s32 6, %v16189_v43 }
 0x52f   : > { %v6088_v61 = vrot.slane %v6087_v46, 2 }
 0x530   : > { %v6544_v6 = vrot.slane %v6543_v44, 2  ;;  %v6119_v60 = vrot.slane %v6118_v19, 2  ;;  %v6574_v31 = vadd.f32 %v6573_v55, %v6572_v11  ;;  %v9303_v55 = vld [vmem:[%s15325_s6] sm:$0xff] }
 0x531   : > { %v6089_v49 = vadd.f32 %v6088_v61, %v6087_v46  ;;  %v7051_v46 = vsub.s32 7, %v16189_v43  ;;  %v16199_v43 = vld [vmem:[#allocation13_spill] sm:$0xff] }
 0x532   : > { %v6545_v33 = vadd.f32 %v6544_v6, %v6543_v44  ;;  %v6120_v62 = vadd.f32 %v6119_v60, %v6118_v19  ;;  %v6575_v20 = vrot.slane %v6574_v31, 2  ;;  %v9302_v44 = vld [vmem:[%s15324_s5] sm:$0xff] }
 0x533   : > { %v6090_v37 = vrot.slane %v6089_v49, 1  ;;  %v14848_v19 = vrot.slane %v9302_v44, %v7047_v14  ;;  %v14855_v6 = vrot.slane %v9302_v44, %v7051_v46  ;;  %v14857_v60 = vrot.slane %v9303_v55, %v7051_v46  ;;  %v16205_v44 = vld [vmem:[#allocation44_spill] sm:$0xff] }
 0x534   : > { %v6546_v32 = vrot.slane %v6545_v33, 1  ;;  %v6121_v7 = vrot.slane %v6120_v62, 1  ;;  %v6576_v0 = vadd.f32 %v6575_v20, %v6574_v31  ;;  %v16192_v31 = vld [vmem:[#allocation40_spill] sm:$0xff] }
 0x535   : > { %v6091_v59 = vadd.f32 %v6090_v37, %v6089_v49  ;;  %v14853_v49 = vrot.slane %v9303_v55, %v7047_v14  ;;  %16190 = vst [vmem:[#allocation15_spill] sm:$0xff] %v14855_v6  ;;  %16191 = vst [vmem:[#allocation30_spill] sm:$0xff] %v14857_v60 }
 0x536   : > { %v6547_v1 = vadd.f32 %v6546_v32, %v6545_v33  ;;  %v6122_v51 = vadd.f32 %v6121_v7, %v6120_v62  ;;  %v6577_v28 = vrot.slane %v6576_v0, 1  ;;  %v16193_v33 = vld [vmem:[#allocation8_spill] sm:$0xff] }
 0x537   : > { %v14825_v38 = vmul.f32 0.0051020407, %v6091_v59  ;;  %v16194_v59 = vld [vmem:[#allocation56_spill] sm:$0xff] }
 0x538   : > { %v6585_v16 = vmul.f32 0.0051020407, %v6547_v1  ;;  %v14841_v17 = vmul.f32 0.0051020407, %v6122_v51  ;;  %v6578_v10 = vadd.f32 %v6577_v28, %v6576_v0  ;;  %v16195_v1 = vld [vmem:[#allocation58_spill] sm:$0xff]  ;;  %v16196_v0 = vld [vmem:[#allocation21_spill] sm:$0xff] }
 0x539   : > { %v6593_v42 = vmul.f32 %v14825_v38, %v14825_v38  ;;  %v6609_v37 = vsub.f32 %v16192_v31, %v14825_v38  ;;  %v6617_v62 = vsub.f32 %v16193_v33, %v14825_v38  ;;  %v16198_v51 = vld [vmem:[#allocation18_spill] sm:$0xff]  ;;  %v6713_v55 = vsub.f32 %v14649_v12, %v14825_v38 }
 0x53a   : > { %v6586_v11 = vmul.f32 0.0051020407, %v6578_v10  ;;  %v6594_v61 = vmul.f32 %v14841_v17, %v14841_v17  ;;  %v16201_v33 = vld [vmem:[#allocation6_spill] sm:$0xff]  ;;  %v16203_v10 = vld [vmem:[#allocation29_spill] sm:$0xff]  ;;  %v6721_v31 = vsub.f32 %v14667_v2, %v14825_v38  ;;  %v6769_v12 = vsub.f32 %v14749_v5, %v14825_v38  ;;  %v16208_v5 = vld [vmem:[#allocation23_spill] sm:$0xff] }
 0x53b   : > { %v6601_v56 = vsub.f32 %v6585_v16, %v6593_v42  ;;  %v16197_v42 = vld [vmem:[#allocation16_spill] sm:$0xff]  ;;  %v6633_v46 = vsub.f32 %v16201_v33, %v14825_v38  ;;  %v6649_v28 = vsub.f32 %v16203_v10, %v14825_v38  ;;  %v6705_v16 = vsub.f32 %v16205_v44, %v14825_v38 }
 0x53c   : > { %v6602_v20 = vsub.f32 %v6586_v11, %v6594_v61  ;;  %v16200_v11 = vld [vmem:[#allocation14_spill] sm:$0xff]  ;;  %v6729_v33 = vsub.f32 %v14681_v53, %v14825_v38  ;;  %v6745_v10 = vsub.f32 %v14709_v54, %v14825_v38  ;;  %v6761_v44 = vsub.f32 %v14737_v35, %v14825_v38 }
 0x53d   : > { %v6809_v9 = vadd.f32 1e-05, %v6601_v56  ;;  %v6625_v61 = vsub.f32 %v16200_v11, %v14825_v38  ;;  %v16204_v11 = vld [vmem:[#allocation38_spill] sm:$0xff]  ;;  %v6777_v2 = vsub.f32 %v14762_v25, %v14825_v38  ;;  %v6785_v53 = vsub.f32 %v14776_v18, %v14825_v38  ;;  %v16209_v25 = vld [vmem:[#allocation9_spill] sm:$0xff]  ;;  %v16210_v18 = vld [vmem:[#allocation24_spill] sm:$0xff] }
 0x53e   : > { %v6657_v56 = vsub.f32 %v16204_v11, %v14825_v38  ;;  %v6753_v11 = vsub.f32 %v14723_v26, %v14825_v38  ;;  %v6810_v7 = vadd.f32 1e-05, %v6602_v20  ;;  %v6801_v54 = vsub.f32 %v14804_v50, %v14825_v38  ;;  %v16206_v26 = vld [vmem:[#allocation42_spill] sm:$0xff]  ;;  %v16212_v50 = vld [vmem:[#allocation12_spill] sm:$0xff] }
 0x53f   : > { %9190 = vrsqrt.f32 %v6809_v9  ;;  %v16202_v9 = vld [vmem:[#allocation20_spill] sm:$0xff]  ;;  %v16207_v35 = vld [vmem:[#allocation10_spill] sm:$0xff]  ;;  %v16213_v45 = vsub.f32 %v14031_v13, %v14825_v38  ;;  %v16214_v3 = vsub.f32 %v14046_v57, %v14825_v38  ;;  %v16215_v20 = vsub.f32 %v14577_v8, %v14825_v38 }
 0x540   : > { %v6641_v14 = vsub.f32 %v16202_v9, %v14825_v38  ;;  %v6737_v9 = vsub.f32 %v14695_v21, %v14825_v38  ;;  %v6793_v21 = vsub.f32 %v14790_v39, %v14825_v38  ;;  %v16211_v39 = vld [vmem:[#allocation49_spill] sm:$0xff]  ;;  %9192 = vrsqrt.f32 %v6810_v7 }
 0x541   : > { %v16217_v7 = vsub.f32 %v16188_v24, %v14825_v38 }
 0x54c   : > { %v9191_v60 = vpop.eup %9190 }
 0x54d   : > { %v6825_v34 = vmul.f32 %v9191_v60, %v6609_v37  ;;  %v6833_v6 = vmul.f32 %v9191_v60, %v6617_v62  ;;  %v6841_v32 = vmul.f32 %v9191_v60, %v6625_v61  ;;  %v6849_v40 = vmul.f32 %v9191_v60, %v6633_v46 }
 0x54e   : > { %v6857_v58 = vmul.f32 %v9191_v60, %v6641_v14  ;;  %v6865_v30 = vmul.f32 %v9191_v60, %v6649_v28  ;;  %v6873_v63 = vmul.f32 %v9191_v60, %v6657_v56  ;;  %v6881_v27 = vmul.f32 %v9191_v60, %v16213_v45 }
 0x54f   : > { %v6889_v29 = vmul.f32 %v9191_v60, %v16214_v3  ;;  %v6897_v48 = vmul.f32 %v9191_v60, %v16215_v20  ;;  %v16216_v37 = vsub.f32 %v14595_v4, %v14825_v38  ;;  %v6913_v56 = vmul.f32 %v9191_v60, %v16217_v7 }
 0x550   : > { %v6921_v28 = vmul.f32 %v9191_v60, %v6705_v16  ;;  %v6929_v14 = vmul.f32 %v9191_v60, %v6713_v55  ;;  %v6937_v13 = vmul.f32 %v9191_v60, %v6721_v31  ;;  %v6945_v45 = vmul.f32 %v9191_v60, %v6729_v33 }
 0x551   : > { %v6905_v62 = vmul.f32 %v9191_v60, %v16216_v37  ;;  %v6953_v46 = vmul.f32 %v9191_v60, %v6737_v9  ;;  %v6961_v61 = vmul.f32 %v9191_v60, %v6745_v10  ;;  %v6969_v57 = vmul.f32 %v9191_v60, %v6753_v11 }
 0x552   : > { %v6977_v3 = vmul.f32 %v9191_v60, %v6761_v44  ;;  %v6985_v22 = vmul.f32 %v9191_v60, %v6769_v12  ;;  %v6993_v15 = vmul.f32 %v9191_v60, %v6777_v2  ;;  %v7001_v8 = vmul.f32 %v9191_v60, %v6785_v53  ;;  %v14987_v12 = vpop.eup %9192 }
 0x553   : > { %v7009_v20 = vmul.f32 %v9191_v60, %v6793_v21  ;;  %v7017_v36 = vmul.f32 %v9191_v60, %v6801_v54  ;;  %v7067_v4 = vmul.f32 %v14848_v19, %v6825_v34  ;;  %v7075_v37 = vmul.f32 %v14848_v19, %v6833_v6 }
 0x554   : > { %v7083_v38 = vmul.f32 %v14848_v19, %v6841_v32  ;;  %v7091_v24 = vmul.f32 %v14848_v19, %v6849_v40  ;;  %v7099_v16 = vmul.f32 %v14848_v19, %v6857_v58  ;;  %v7107_v55 = vmul.f32 %v14848_v19, %v6865_v30 }
 0x555   : > { %v7115_v31 = vmul.f32 %v14848_v19, %v6873_v63  ;;  %v7123_v33 = vmul.f32 %v14848_v19, %v6881_v27  ;;  %v7131_v9 = vmul.f32 %v14848_v19, %v6889_v29  ;;  %v7139_v60 = vmul.f32 %v14848_v19, %v6897_v48 }
 0x556   : > { %v7147_v34 = vmul.f32 %v14848_v19, %v6905_v62  ;;  %v7155_v6 = vmul.f32 %v14848_v19, %v6913_v56  ;;  %v7163_v32 = vmul.f32 %v14848_v19, %v6921_v28  ;;  %v7171_v40 = vmul.f32 %v14848_v19, %v6929_v14 }
 0x557   : > { %v7179_v58 = vmul.f32 %v14848_v19, %v6937_v13  ;;  %v7187_v30 = vmul.f32 %v14848_v19, %v6945_v45  ;;  %v7195_v63 = vmul.f32 %v14848_v19, %v6953_v46  ;;  %v7203_v27 = vmul.f32 %v14848_v19, %v6961_v61 }
 0x558   : > { %v7211_v29 = vmul.f32 %v14848_v19, %v6969_v57  ;;  %v7219_v48 = vmul.f32 %v14848_v19, %v6977_v3  ;;  %v7227_v10 = vmul.f32 %v14848_v19, %v6985_v22  ;;  %v7235_v11 = vmul.f32 %v14848_v19, %v6993_v15 }
 0x559   : > { %v7243_v44 = vmul.f32 %v14848_v19, %v7001_v8  ;;  %v7251_v2 = vmul.f32 %v14848_v19, %v7009_v20  ;;  %v7259_v53 = vmul.f32 %v14848_v19, %v7017_v36  ;;  %v7309_v21 = vadd.f32 %v14853_v49, %v7067_v4 }
 0x55a   : > { %v7317_v54 = vadd.f32 %v14853_v49, %v7075_v37  ;;  %v7325_v62 = vadd.f32 %v14853_v49, %v7083_v38  ;;  %v7333_v7 = vadd.f32 %v14853_v49, %v7091_v24  ;;  %v7341_v22 = vadd.f32 %v14853_v49, %v7099_v16 }
 0x55b   : > { %v7349_v15 = vadd.f32 %v14853_v49, %v7107_v55  ;;  %v7357_v56 = vadd.f32 %v14853_v49, %v7115_v31  ;;  %v7365_v28 = vadd.f32 %v14853_v49, %v7123_v33  ;;  %v7373_v14 = vadd.f32 %v14853_v49, %v7131_v9  ;;  %7509 = vst [vmem:[%s15326_s7 + $0x30] sm:$0xff] %v7309_v21 }
 0x55c   : > { %v7381_v36 = vadd.f32 %v14853_v49, %v7139_v60  ;;  %7517 = vst [vmem:[%s15326_s7 + $0x70] sm:$0xff] %v7317_v54  ;;  %v7389_v19 = vadd.f32 %v14853_v49, %v7147_v34  ;;  %v7397_v13 = vadd.f32 %v14853_v49, %v7155_v6  ;;  %v7405_v45 = vadd.f32 %v14853_v49, %v7163_v32  ;;  %v16235_v54 = vld [vmem:[#allocation3_spill] sm:$0xff] }
 0x55d   : > { %v7413_v46 = vadd.f32 %v14853_v49, %v7171_v40  ;;  %7525 = vst [vmem:[%s15326_s7 + $0xb0] sm:$0xff] %v7325_v62  ;;  %7533 = vst [vmem:[%s15326_s7 + $0xf0] sm:$0xff] %v7333_v7  ;;  %v7421_v61 = vadd.f32 %v14853_v49, %v7179_v58  ;;  %v7429_v57 = vadd.f32 %v14853_v49, %v7187_v30  ;;  %v16237_v7 = vld [vmem:[#allocation43_spill] sm:$0xff] }
 0x55e   : > { %7541 = vst [vmem:[%s15326_s7 + $0x130] sm:$0xff] %v7341_v22  ;;  %7549 = vst [vmem:[%s15326_s7 + $0x170] sm:$0xff] %v7349_v15  ;;  %v7437_v3 = vadd.f32 %v14853_v49, %v7195_v63  ;;  %v7445_v8 = vadd.f32 %v14853_v49, %v7203_v27  ;;  %v7453_v20 = vadd.f32 %v14853_v49, %v7211_v29  ;;  %v16239_v15 = vld [vmem:[#allocation27_spill] sm:$0xff] }
 0x55f   : > { %7557 = vst [vmem:[%s15326_s7 + $0x1b0] sm:$0xff] %v7357_v56  ;;  %7565 = vst [vmem:[%s15326_s7 + $0x1f0] sm:$0xff] %v7365_v28  ;;  %v7461_v4 = vadd.f32 %v14853_v49, %v7219_v48  ;;  %v7469_v37 = vadd.f32 %v14853_v49, %v7227_v10  ;;  %v7477_v38 = vadd.f32 %v14853_v49, %v7235_v11  ;;  %v16241_v28 = vld [vmem:[#allocation52_spill] sm:$0xff] }
 0x560   : > { %7573 = vst [vmem:[%s15326_s7 + $0x230] sm:$0xff] %v7373_v14  ;;  %7581 = vst [vmem:[%s15326_s7 + $0x270] sm:$0xff] %v7381_v36  ;;  %v7485_v24 = vadd.f32 %v14853_v49, %v7243_v44  ;;  %v7493_v16 = vadd.f32 %v14853_v49, %v7251_v2  ;;  %v7501_v55 = vadd.f32 %v14853_v49, %v7259_v53  ;;  %v16243_v36 = vld [vmem:[#allocation35_spill] sm:$0xff] }
 0x561   : > { %7589 = vst [vmem:[%s15326_s7 + $0x2b0] sm:$0xff] %v7389_v19  ;;  %7597 = vst [vmem:[%s15326_s7 + $0x2f0] sm:$0xff] %v7397_v13  ;;  %v16218_v31 = vsub.f32 %v16206_v26, %v14841_v17  ;;  %v16219_v26 = vsub.f32 %v16207_v35, %v14841_v17  ;;  %v16220_v9 = vsub.f32 %v16208_v5, %v14841_v17 }
 0x562   : > { %7605 = vst [vmem:[%s15326_s7 + $0x330] sm:$0xff] %v7405_v45  ;;  %7613 = vst [vmem:[%s15326_s7 + $0x370] sm:$0xff] %v7413_v46  ;;  %v16221_v34 = vsub.f32 %v16209_v25, %v14841_v17  ;;  %v16222_v32 = vsub.f32 %v16210_v18, %v14841_v17  ;;  %v16223_v35 = vsub.f32 %v16211_v39, %v14841_v17  ;;  %v16245_v45 = vld [vmem:[#allocation34_spill] sm:$0xff] }
 0x563   : > { %7621 = vst [vmem:[%s15326_s7 + $0x3b0] sm:$0xff] %v7421_v61  ;;  %7629 = vst [vmem:[%s15326_s7 + $0x3f0] sm:$0xff] %v7429_v57  ;;  %v6826_v49 = vmul.f32 %v14987_v12, %v16218_v31  ;;  %v6834_v33 = vmul.f32 %v14987_v12, %v16219_v26  ;;  %v6842_v60 = vmul.f32 %v14987_v12, %v16220_v9  ;;  %v16247_v57 = vld [vmem:[#allocation31_spill] sm:$0xff] }
 0x564   : > { %7637 = vst [vmem:[%s15326_s7 + $0x430] sm:$0xff] %v7437_v3  ;;  %7645 = vst [vmem:[%s15326_s7 + $0x470] sm:$0xff] %v7445_v8  ;;  %v6850_v6 = vmul.f32 %v14987_v12, %v16221_v34  ;;  %v6858_v40 = vmul.f32 %v14987_v12, %v16222_v32  ;;  %v6866_v5 = vmul.f32 %v14987_v12, %v16223_v35 }
 0x565   : > { %7653 = vst [vmem:[%s15326_s7 + $0x4b0] sm:$0xff] %v7453_v20  ;;  %7661 = vst [vmem:[%s15326_s7 + $0x4f0] sm:$0xff] %v7461_v4  ;;  %v16224_v25 = vsub.f32 %v16212_v50, %v14841_v17  ;;  %v16225_v58 = vsub.f32 %v16194_v59, %v14841_v17  ;;  %v16226_v63 = vsub.f32 %v16195_v1, %v14841_v17  ;;  %v16249_v20 = vld [vmem:[#allocation48_spill] sm:$0xff] }
 0x566   : > { %7669 = vst [vmem:[%s15326_s7 + $0x530] sm:$0xff] %v7469_v37  ;;  %7677 = vst [vmem:[%s15326_s7 + $0x570] sm:$0xff] %v7477_v38  ;;  %v16227_v39 = vsub.f32 %v16196_v0, %v14841_v17  ;;  %v16228_v50 = vsub.f32 %v16197_v42, %v14841_v17  ;;  %v16229_v59 = vsub.f32 %v16198_v51, %v14841_v17  ;;  %v16251_v38 = vld [vmem:[#allocation15_spill] sm:$0xff] }
 0x567   : > { %7685 = vst [vmem:[%s15326_s7 + $0x5b0] sm:$0xff] %v7485_v24  ;;  %7693 = vst [vmem:[%s15326_s7 + $0x5f0] sm:$0xff] %v7493_v16  ;;  %v6874_v18 = vmul.f32 %v14987_v12, %v16224_v25  ;;  %v6882_v30 = vmul.f32 %v14987_v12, %v16225_v58  ;;  %v6890_v27 = vmul.f32 %v14987_v12, %v16226_v63 }
 0x568   : > { %7701 = vst [vmem:[%s15326_s7 + $0x630] sm:$0xf] %v7501_v55  ;;  %v6898_v29 = vmul.f32 %v14987_v12, %v16227_v39  ;;  %v6906_v48 = vmul.f32 %v14987_v12, %v16228_v50  ;;  %v6914_v10 = vmul.f32 %v14987_v12, %v16229_v59  ;;  %v16230_v1 = vsub.f32 %v16199_v43, %v14841_v17  ;;  %v16252_v50 = vld [vmem:[#allocation30_spill] sm:$0xff] }
 0x569   : > { %v16231_v0 = vsub.f32 %v14653_v47, %v14841_v17  ;;  %v16232_v42 = vsub.f32 %v14671_v23, %v14841_v17  ;;  %v16233_v51 = vsub.f32 %v14685_v52, %v14841_v17  ;;  %v16234_v43 = vsub.f32 %v14699_v41, %v14841_v17 }
 0x56a   : > { %v6922_v11 = vmul.f32 %v14987_v12, %v16230_v1  ;;  %v16236_v47 = vsub.f32 %v16235_v54, %v14841_v17  ;;  %v16238_v23 = vsub.f32 %v16237_v7, %v14841_v17  ;;  %v16240_v52 = vsub.f32 %v16239_v15, %v14841_v17 }
 0x56b   : > { %v6930_v44 = vmul.f32 %v14987_v12, %v16231_v0  ;;  %v6938_v2 = vmul.f32 %v14987_v12, %v16232_v42  ;;  %v6946_v53 = vmul.f32 %v14987_v12, %v16233_v51  ;;  %v6954_v21 = vmul.f32 %v14987_v12, %v16234_v43 }
 0x56c   : > { %v6962_v62 = vmul.f32 %v14987_v12, %v16236_v47  ;;  %v6970_v22 = vmul.f32 %v14987_v12, %v16238_v23  ;;  %v6978_v56 = vmul.f32 %v14987_v12, %v16240_v52  ;;  %v16242_v41 = vsub.f32 %v16241_v28, %v14841_v17 }
 0x56d   : > { %v16244_v19 = vsub.f32 %v16243_v36, %v14841_v17  ;;  %v16246_v46 = vsub.f32 %v16245_v45, %v14841_v17  ;;  %v16248_v3 = vsub.f32 %v16247_v57, %v14841_v17  ;;  %v16250_v4 = vsub.f32 %v16249_v20, %v14841_v17 }
 0x56e   : > { %v6986_v14 = vmul.f32 %v14987_v12, %v16242_v41  ;;  %v7068_v24 = vmul.f32 %v16251_v38, %v6826_v49  ;;  %v7076_v16 = vmul.f32 %v16251_v38, %v6834_v33  ;;  %v7084_v55 = vmul.f32 %v16251_v38, %v6842_v60 }
 0x56f   : > { %v6994_v13 = vmul.f32 %v14987_v12, %v16244_v19  ;;  %v7002_v61 = vmul.f32 %v14987_v12, %v16246_v46  ;;  %v7010_v8 = vmul.f32 %v14987_v12, %v16248_v3  ;;  %v7018_v37 = vmul.f32 %v14987_v12, %v16250_v4 }
 0x570   : > { %v7092_v31 = vmul.f32 %v16251_v38, %v6850_v6  ;;  %v7100_v26 = vmul.f32 %v16251_v38, %v6858_v40  ;;  %v7108_v9 = vmul.f32 %v16251_v38, %v6866_v5  ;;  %v7116_v34 = vmul.f32 %v16251_v38, %v6874_v18 }
 0x571   : > { %v7124_v32 = vmul.f32 %v16251_v38, %v6882_v30  ;;  %v7132_v17 = vmul.f32 %v16251_v38, %v6890_v27  ;;  %v7140_v12 = vmul.f32 %v16251_v38, %v6898_v29  ;;  %v7148_v49 = vmul.f32 %v16251_v38, %v6906_v48 }
 0x572   : > { %v7156_v33 = vmul.f32 %v16251_v38, %v6914_v10  ;;  %v7164_v60 = vmul.f32 %v16251_v38, %v6922_v11  ;;  %v7172_v6 = vmul.f32 %v16251_v38, %v6930_v44  ;;  %v7180_v40 = vmul.f32 %v16251_v38, %v6938_v2 }
 0x573   : > { %v7188_v35 = vmul.f32 %v16251_v38, %v6946_v53  ;;  %v7196_v5 = vmul.f32 %v16251_v38, %v6954_v21  ;;  %v7204_v25 = vmul.f32 %v16251_v38, %v6962_v62  ;;  %v7212_v18 = vmul.f32 %v16251_v38, %v6970_v22 }
 0x574   : > { %v7220_v58 = vmul.f32 %v16251_v38, %v6978_v56  ;;  %v7228_v30 = vmul.f32 %v16251_v38, %v6986_v14  ;;  %v7236_v63 = vmul.f32 %v16251_v38, %v6994_v13  ;;  %v7244_v27 = vmul.f32 %v16251_v38, %v7002_v61 }
 0x575   : > { %v7252_v39 = vmul.f32 %v16251_v38, %v7010_v8  ;;  %v7260_v29 = vmul.f32 %v16251_v38, %v7018_v37  ;;  %v7310_v48 = vadd.f32 %v16252_v50, %v7068_v24  ;;  %v7318_v59 = vadd.f32 %v16252_v50, %v7076_v16 }
 0x576   : > { %v7326_v10 = vadd.f32 %v16252_v50, %v7084_v55  ;;  %v7334_v1 = vadd.f32 %v16252_v50, %v7092_v31  ;;  %v7342_v11 = vadd.f32 %v16252_v50, %v7100_v26  ;;  %v7350_v0 = vadd.f32 %v16252_v50, %v7108_v9 }
 0x577   : > { %v7358_v44 = vadd.f32 %v16252_v50, %v7116_v34  ;;  %v7366_v42 = vadd.f32 %v16252_v50, %v7124_v32  ;;  %v7374_v2 = vadd.f32 %v16252_v50, %v7132_v17  ;;  %v7382_v51 = vadd.f32 %v16252_v50, %v7140_v12  ;;  %7510 = vst [vmem:[%s15326_s7 + $0x38] sm:$0xff] %v7310_v48 }
 0x578   : > { %v7390_v53 = vadd.f32 %v16252_v50, %v7148_v49  ;;  %7518 = vst [vmem:[%s15326_s7 + $0x78] sm:$0xff] %v7318_v59  ;;  %7526 = vst [vmem:[%s15326_s7 + $0xb8] sm:$0xff] %v7326_v10  ;;  %v7398_v43 = vadd.f32 %v16252_v50, %v7156_v33  ;;  %v7406_v21 = vadd.f32 %v16252_v50, %v7164_v60 }
 0x579   : > { %v7414_v54 = vadd.f32 %v16252_v50, %v7172_v6  ;;  %v7422_v47 = vadd.f32 %v16252_v50, %v7180_v40  ;;  %7534 = vst [vmem:[%s15326_s7 + $0xf8] sm:$0xff] %v7334_v1  ;;  %7542 = vst [vmem:[%s15326_s7 + $0x138] sm:$0xff] %v7342_v11  ;;  %v7430_v62 = vadd.f32 %v16252_v50, %v7188_v35 }
 0x57a   : > { %7550 = vst [vmem:[%s15326_s7 + $0x178] sm:$0xff] %v7350_v0  ;;  %7558 = vst [vmem:[%s15326_s7 + $0x1b8] sm:$0xff] %v7358_v44  ;;  %v7438_v7 = vadd.f32 %v16252_v50, %v7196_v5  ;;  %v7446_v23 = vadd.f32 %v16252_v50, %v7204_v25  ;;  %v7454_v22 = vadd.f32 %v16252_v50, %v7212_v18 }
 0x57b   : > { %7566 = vst [vmem:[%s15326_s7 + $0x1f8] sm:$0xff] %v7366_v42  ;;  %7574 = vst [vmem:[%s15326_s7 + $0x238] sm:$0xff] %v7374_v2  ;;  %v7462_v15 = vadd.f32 %v16252_v50, %v7220_v58  ;;  %v7470_v52 = vadd.f32 %v16252_v50, %v7228_v30  ;;  %v7478_v56 = vadd.f32 %v16252_v50, %v7236_v63 }
 0x57c   : > { %7582 = vst [vmem:[%s15326_s7 + $0x278] sm:$0xff] %v7382_v51  ;;  %7590 = vst [vmem:[%s15326_s7 + $0x2b8] sm:$0xff] %v7390_v53  ;;  %v7486_v28 = vadd.f32 %v16252_v50, %v7244_v27  ;;  %v7494_v41 = vadd.f32 %v16252_v50, %v7252_v39  ;;  %v7502_v14 = vadd.f32 %v16252_v50, %v7260_v29 }
 0x57d   : > { %7598 = vst [vmem:[%s15326_s7 + $0x2f8] sm:$0xff] %v7398_v43  ;;  %7606 = vst [vmem:[%s15326_s7 + $0x338] sm:$0xff] %v7406_v21 }
 0x57e   : > { %7614 = vst [vmem:[%s15326_s7 + $0x378] sm:$0xff] %v7414_v54  ;;  %7622 = vst [vmem:[%s15326_s7 + $0x3b8] sm:$0xff] %v7422_v47 }
 0x57f   : > { %7630 = vst [vmem:[%s15326_s7 + $0x3f8] sm:$0xff] %v7430_v62  ;;  %7638 = vst [vmem:[%s15326_s7 + $0x438] sm:$0xff] %v7438_v7 }
 0x580   : > { %7646 = vst [vmem:[%s15326_s7 + $0x478] sm:$0xff] %v7446_v23  ;;  %7654 = vst [vmem:[%s15326_s7 + $0x4b8] sm:$0xff] %v7454_v22 }
 0x581   : > { %7662 = vst [vmem:[%s15326_s7 + $0x4f8] sm:$0xff] %v7462_v15  ;;  %7670 = vst [vmem:[%s15326_s7 + $0x538] sm:$0xff] %v7470_v52 }
 0x582   : > { %7678 = vst [vmem:[%s15326_s7 + $0x578] sm:$0xff] %v7478_v56  ;;  %7686 = vst [vmem:[%s15326_s7 + $0x5b8] sm:$0xff] %v7486_v28 }
 0x583   : > { %7694 = vst [vmem:[%s15326_s7 + $0x5f8] sm:$0xff] %v7494_v41  ;;  %7702 = vst [vmem:[%s15326_s7 + $0x638] sm:$0xf] %v7502_v14 }
 0x584 PF: > { %s17_s24 = sadd.s32 1, %s9310_s24  }
 0x585   : > { %p14_p5 = scmp.ge.s32.totalorder %s17_s24, 6  }
 0x587   :  { %16 = sbr.rel (!%p14_p5) target bundleno = 1 (0x1), region = 91 }

</bundles_post_ra>
